<compile_context>
chip_gen: v7x
topology: tpu7x:2x2x1
jax: 0.10.0
libtpu: 0.0.40
codegen_flags: <defaults>
</compile_context>

<pallas_src>
import functools
import math

import jax
import jax.numpy as jnp
from jax import lax
from jax.experimental import pallas as pl
from jax.experimental.pallas import tpu as pltpu


# ---------------------------------------------------------------------------
# Small helpers
# ---------------------------------------------------------------------------

def _choose_nb(B, HW, min_steps=1, m_target=256):
    """Images per grid step: grow (by powers of 2 dividing B) while the MXU M
    dimension (nb*H*W) is below the target and the grid keeps >= min_steps."""
    nb = 1
    while (B % (nb * 2) == 0) and (nb * HW < m_target) and (B // (nb * 2) >= min_steps):
        nb *= 2
    return nb


def _vmem_budget(est_bytes):
    """Advisory scoped-VMEM limit: 4x the rough per-step footprint, clamped to
    [8 MiB, 32 MiB] (never assume more than ~32 MiB scoped on v7x)."""
    return int(min(max(4 * est_bytes, 8 << 20), 32 << 20))


def _dual_tap_matrix(src, nb, H, W, C):
    """src: Ref (or array) of shape (nb, H+4, W+4, C) with a zero border of width 2.

    Returns the (nb*H*W, 18*C) im2col matrix for [3x3 dil=1 | 3x3 dil=2], built from
    static slices of the halo'd block (taps laid along the contraction axis so the
    whole pair of dilated convs is a single MXU matmul)."""
    taps = []
    for d in (1, 2):
        o = 2 - d
        for kh in range(3):
            for kw in range(3):
                taps.append(src[:, o + kh * d:o + kh * d + H,
                                o + kw * d:o + kw * d + W, :])
    return jnp.concatenate(taps, axis=-1).reshape(nb * H * W, 18 * C)


# ---------------------------------------------------------------------------
# Kernel 1: conv1 -> (conv2 + conv3 -> conv4, folded) -> SE
# grid = (branch, image-chunk); conv weights shared, SE weights branch-selected.
# ---------------------------------------------------------------------------

def _denoise_se_kernel(x_ref, w1_ref, b1_ref, wd_ref, bd_ref, sw1_ref, sw2_ref,
                       o_ref, pad_ref, *, nb, H, W, C):
    f32 = jnp.float32
    x = x_ref[0].reshape(nb * H * W, C)                               # bf16, interior only

    # conv1 (1x1) on interior pixels only.
    x1 = jnp.dot(x, w1_ref[...], preferred_element_type=f32) + b1_ref[...]

    # Assemble the 2-pixel halo in VMEM (zero border, interior = conv1 output).
    pad_ref[...] = jnp.zeros_like(pad_ref)
    pad_ref[:, 2:H + 2, 2:W + 2, :] = x1.reshape(nb, H, W, C).astype(pad_ref.dtype)

    # conv2(d=1) + conv3(d=2) + conv4(1x1, folded) as one K = 18*C contraction.
    xcat = _dual_tap_matrix(pad_ref, nb, H, W, C)                     # (nb*H*W, 18C) bf16
    x4 = jnp.dot(xcat, wd_ref[...], preferred_element_type=f32) + bd_ref[...]
    x4 = x4.reshape(nb, H * W, C)

    # SE gate: tiny, done on the VPU (broadcast-multiply + reduce), per image.
    pooled = jnp.mean(x4, axis=1)                                     # (nb, C)
    se1 = sw1_ref[0]                                                  # (Cr, C) torch layout
    se2 = sw2_ref[0]                                                  # (Cr, C) = fc2.T
    h = jnp.maximum(jnp.sum(pooled[:, None, :] * se1[None, :, :], axis=-1), 0.0)
    gate = jax.nn.sigmoid(jnp.sum(h[:, :, None] * se2[None, :, :], axis=1))   # (nb, C)

    o_ref[0] = (x4 * gate[:, None, :]).reshape(nb, H, W, C).astype(o_ref.dtype)


def _denoise_se_call(x_both, w1, b1, wd, bd, se_w1, se_w2, *, B, H, W, C, nb):
    Cr = se_w1.shape[1]
    n_chunks = B // nb
    kernel = functools.partial(_denoise_se_kernel, nb=nb, H=H, W=W, C=C)
    w2d = lambda br, c: (0, 0)
    est = (nb * H * W * C * 16                      # in/out blocks (dbl-buffered) + f32 temps
           + nb * (H + 4) * (W + 4) * C * 2         # halo scratch
           + 3 * nb * H * W * 18 * C * 2            # im2col taps + copies
           + 24 * C * C * 4)                        # weights
    return pl.pallas_call(
        kernel,
        out_shape=jax.ShapeDtypeStruct((2, B, H, W, C), jnp.bfloat16),
        grid_spec=pltpu.PrefetchScalarGridSpec(
            num_scalar_prefetch=0,
            grid=(2, n_chunks),
            in_specs=[
                pl.BlockSpec((1, nb, H, W, C), lambda br, c: (br, c, 0, 0, 0)),
                pl.BlockSpec((C, C), w2d),
                pl.BlockSpec((1, C), w2d),
                pl.BlockSpec((18 * C, C), w2d),
                pl.BlockSpec((1, C), w2d),
                pl.BlockSpec((1, Cr, C), lambda br, c: (br, 0, 0)),   # branch-select SE
                pl.BlockSpec((1, Cr, C), lambda br, c: (br, 0, 0)),
            ],
            out_specs=pl.BlockSpec((1, nb, H, W, C), lambda br, c: (br, c, 0, 0, 0)),
            scratch_shapes=[pltpu.VMEM((nb, H + 4, W + 4, C), jnp.bfloat16)],
        ),
        compiler_params=pltpu.CompilerParams(
            dimension_semantics=("parallel", "parallel"),
            vmem_limit_bytes=_vmem_budget(est)),
    )(x_both, w1, b1, wd, bd, se_w1, se_w2)


# ---------------------------------------------------------------------------
# Kernel 2 (fused stages 2+3): cosine similarity -> thermal update -> global
# pools -> channel MLP -> regulation -> init 1x1 conv -> dual dilated conv +
# final 1x1 conv (folded) -> final residual combination.
# ---------------------------------------------------------------------------

def _fuse_kernel(se_ref, t_ref, rgb_ref,
                 wm1_ref, bm1_ref, wm2_ref, bm2_ref,
                 wi_ref, bi_ref, wrf_ref, brf_ref,
                 orgb_ref, oth_ref, pad_ref, *, nb, H, W, C):
    f32 = jnp.float32
    r = se_ref[0].astype(f32)                                         # rgb_se   (nb,H,W,C)
    s = se_ref[1].astype(f32)                                         # thermal_se
    t0 = t_ref[...]                                                   # original thermal, f32

    # --- centered-cosine similarity from 5 fused moments (per image) ----------
    ax = (1, 2, 3)
    inv_n = 1.0 / float(H * W * C)
    S_r = jnp.sum(r, axis=ax, keepdims=True)
    S_s = jnp.sum(s, axis=ax, keepdims=True)
    S_rr = jnp.sum(r * r, axis=ax, keepdims=True)
    S_ss = jnp.sum(s * s, axis=ax, keepdims=True)
    S_rs = jnp.sum(r * s, axis=ax, keepdims=True)
    Nr2 = jnp.maximum(S_rr, 1e-24)                                    # clamped ||r||^2
    Ns2 = jnp.maximum(S_ss, 1e-24)
    num = (S_rs - S_r * S_s * inv_n) * lax.rsqrt(Nr2 * Ns2)
    cr = jnp.sqrt(jnp.maximum(S_rr / Nr2 - S_r * S_r * inv_n / Nr2, 0.0))
    ct = jnp.sqrt(jnp.maximum(S_ss / Ns2 - S_s * S_s * inv_n / Ns2, 0.0))
    sim = 1.0 - num / (cr * ct + 1e-6)                                # (nb,1,1,1)

    tmod = t0 * (1.0 + sim)                                           # thermal += thermal*sim

    # --- global avg/max pools -> channel-weight MLP ---------------------------
    pooled = jnp.concatenate(
        [jnp.mean(r, axis=(1, 2)), jnp.mean(tmod, axis=(1, 2)),
         jnp.max(r, axis=(1, 2)), jnp.max(tmod, axis=(1, 2))], axis=-1)  # (nb, 4C) f32
    h = jnp.maximum(
        jnp.dot(pooled, wm1_ref[...], preferred_element_type=f32) + bm1_ref[...], 0.0)
    cw = jnp.dot(h, wm2_ref[...], preferred_element_type=f32) + bm2_ref[...]   # (nb, 2C)

    # --- channel regulation + initial 1x1 conv (interior pixels only) ---------
    comb = jnp.concatenate([r, tmod], axis=-1)                        # (nb,H,W,2C)
    reg = comb * cw.reshape(nb, 1, 1, 2 * C)                          # regulated, f32
    x0 = jnp.dot(reg.astype(jnp.bfloat16).reshape(nb * H * W, 2 * C), wi_ref[...],
                 preferred_element_type=f32) + bi_ref[...]            # (nb*H*W, C)

    # Halo in VMEM (zero border) for the dilated convs.
    pad_ref[...] = jnp.zeros_like(pad_ref)
    pad_ref[:, 2:H + 2, 2:W + 2, :] = x0.reshape(nb, H, W, C).astype(pad_ref.dtype)

    # conv1_rect(d=1) + conv2_rect(d=2) + final 1x1 conv folded -> one K=18C matmul.
    # brf has +1 folded in, so xf == weight_map + 1.
    xcat = _dual_tap_matrix(pad_ref, nb, H, W, C)
    xf = jnp.dot(xcat, wrf_ref[...], preferred_element_type=f32) + brf_ref[...]
    xf = xf.reshape(nb, H, W, 2 * C)

    # Final residual combination (dropout == identity in eval):
    #   out_rgb = rgb_in      + (th_wmap  + 1) * regulated_thermal
    #   out_th  = thermal_mod + (rgb_wmap + 1) * regulated_rgb
    orgb_ref[...] = rgb_ref[...] + xf[..., C:] * reg[..., C:]
    oth_ref[...] = tmod + xf[..., :C] * reg[..., :C]


def _fuse_call(se_out, t_orig, rgb_in, wm1, bm1, wm2, bm2, wi, bi, wrf, brf,
               *, B, H, W, C, nb):
    n_chunks = B // nb
    kernel = functools.partial(_fuse_kernel, nb=nb, H=H, W=W, C=C)
    wspec = lambda a: pl.BlockSpec(tuple(a.shape), lambda c, _nd=a.ndim: (0,) * _nd)
    img = pl.BlockSpec((nb, H, W, C), lambda c: (c, 0, 0, 0))
    est = (nb * H * W * C * 40                      # se/t/rgb blocks + f32 temps + outputs
           + nb * (H + 4) * (W + 4) * C * 2         # halo scratch
           + 3 * nb * H * W * 18 * C * 2            # im2col taps + copies
           + 48 * C * C * 4)                        # weights
    return pl.pallas_call(
        kernel,
        out_shape=(jax.ShapeDtypeStruct((B, H, W, C), jnp.float32),
                   jax.ShapeDtypeStruct((B, H, W, C), jnp.float32)),
        grid_spec=pltpu.PrefetchScalarGridSpec(
            num_scalar_prefetch=0,
            grid=(n_chunks,),
            in_specs=[
                pl.BlockSpec((2, nb, H, W, C), lambda c: (0, c, 0, 0, 0)),
                img, img,
                wspec(wm1), wspec(bm1), wspec(wm2), wspec(bm2),
                wspec(wi), wspec(bi), wspec(wrf), wspec(brf),
            ],
            out_specs=(img, img),
            scratch_shapes=[pltpu.VMEM((nb, H + 4, W + 4, C), jnp.bfloat16)],
        ),
        compiler_params=pltpu.CompilerParams(
            dimension_semantics=("parallel",),
            vmem_limit_bytes=_vmem_budget(est)),
    )(se_out, t_orig, rgb_in, wm1, bm1, wm2, bm2, wi, bi, wrf, brf)


# ---------------------------------------------------------------------------
# Parameters (deterministic synthetic init matching the module's __init__ shapes)
# ---------------------------------------------------------------------------

def init_params(key, C, reduction=16):
    Cr = max(C // reduction, 1)
    ks = jax.random.split(key, 16)

    def conv1x1_w(k, cin, cout):
        return math.sqrt(2.0 / cout) * jax.random.normal(k, (cin, cout), jnp.float32)

    def conv3x3_w(k, cin, cout):
        return math.sqrt(2.0 / (9 * cout)) * jax.random.normal(k, (9, cin, cout),
                                                               jnp.float32)

    def lin_w(k, cin, cout):   # trunc_normal(std=0.02) approximated by a plain normal
        return 0.02 * jax.random.normal(k, (cin, cout), jnp.float32)

    z = lambda n: jnp.zeros((1, n), jnp.float32)
    return {
        "conv1_w": conv1x1_w(ks[0], C, C), "conv1_b": z(C),
        "conv2_w": conv3x3_w(ks[1], C, C), "conv2_b": z(C),
        "conv3_w": conv3x3_w(ks[2], C, C), "conv3_b": z(C),
        "conv4_w": conv1x1_w(ks[3], C, C), "conv4_b": z(C),
        # SE weights in torch (out_features, in_features) layout (w2t = fc2 transposed).
        "se_rgb_w1t": 0.02 * jax.random.normal(ks[4], (Cr, C), jnp.float32),
        "se_rgb_w2t": 0.02 * jax.random.normal(ks[5], (Cr, C), jnp.float32),
        "se_th_w1t": 0.02 * jax.random.normal(ks[6], (Cr, C), jnp.float32),
        "se_th_w2t": 0.02 * jax.random.normal(ks[7], (Cr, C), jnp.float32),
        "mlp_w1": lin_w(ks[8], 4 * C, C), "mlp_b1": z(C),
        "mlp_w2": lin_w(ks[9], C, 2 * C), "mlp_b2": z(2 * C),
        "init_w": conv1x1_w(ks[10], 2 * C, C), "init_b": z(C),
        "c1r_w": conv3x3_w(ks[11], C, C), "c1r_b": z(C),
        "c2r_w": conv3x3_w(ks[12], C, C), "c2r_b": z(C),
        "final_w": conv1x1_w(ks[13], C, 2 * C), "final_b": z(2 * C),
    }


# ---------------------------------------------------------------------------
# Forward pass
# ---------------------------------------------------------------------------

def fea_learning_forward(params, rgb_nchw, thermal_nchw):
    p = params
    bf16 = jnp.bfloat16
    r = jnp.transpose(rgb_nchw, (0, 2, 3, 1)).astype(jnp.float32)     # NCHW -> NHWC
    t = jnp.transpose(thermal_nchw, (0, 2, 3, 1)).astype(jnp.float32)
    B, H, W, C = r.shape

    # --- host-side weight folding (constant-folded under jit) --------------------
    # conv2 + conv3 followed (linearly) by conv4 (1x1): fold conv4 into the 18C weight.
    wd = jnp.concatenate([p["conv2_w"].reshape(9 * C, C),
                          p["conv3_w"].reshape(9 * C, C)], axis=0)
    bd = p["conv2_b"] + p["conv3_b"]
    wd_f = (wd @ p["conv4_w"]).astype(bf16)                           # (18C, C)
    bd_f = bd @ p["conv4_w"] + p["conv4_b"]                           # (1, C)
    se_w1 = jnp.stack([p["se_rgb_w1t"], p["se_th_w1t"]], axis=0)      # (2, Cr, C)
    se_w2 = jnp.stack([p["se_rgb_w2t"], p["se_th_w2t"]], axis=0)

    # conv1_rect + conv2_rect followed (linearly) by final_conv: fold; fold the
    # "+ regulated" residual as +1 into its bias (eval-mode dropout).
    wr = jnp.concatenate([p["c1r_w"].reshape(9 * C, C),
                          p["c2r_w"].reshape(9 * C, C)], axis=0)
    br = p["c1r_b"] + p["c2r_b"]
    wrf = (wr @ p["final_w"]).astype(bf16)                            # (18C, 2C)
    brf = br @ p["final_w"] + p["final_b"] + 1.0                      # (1, 2C)

    # --- stage 1: cosine_denoising conv stack + SE (rgb & thermal batched) --------
    nb_a = _choose_nb(B, H * W, min_steps=1)        # branch axis already gives >=2 steps
    x_both = jnp.stack([r, t], axis=0).astype(bf16)                   # (2, B, H, W, C)
    se_out = _denoise_se_call(
        x_both, p["conv1_w"].astype(bf16), p["conv1_b"], wd_f, bd_f, se_w1, se_w2,
        B=B, H=H, W=W, C=C, nb=nb_a)

    # --- stages 2+3 fused: similarity, pools, MLP, regulation, rectification, fuse -
    nb_b = _choose_nb(B, H * W, min_steps=2)        # keep >=2 grid steps (v7x megacore)
    out_rgb, out_th = _fuse_call(
        se_out, t, r,
        p["mlp_w1"], p["mlp_b1"], p["mlp_w2"], p["mlp_b2"],
        p["init_w"].astype(bf16), p["init_b"], wrf, brf,
        B=B, H=H, W=W, C=C, nb=nb_b)

    return (jnp.transpose(out_rgb, (0, 3, 1, 2)),                     # back to NCHW
            jnp.transpose(out_th, (0, 3, 1, 2)))


# ---------------------------------------------------------------------------

if __name__ == "__main__":
    B, C, H, W = 2, 32, 8, 8
    key = jax.random.PRNGKey(0)
    pkey, rkey, tkey = jax.random.split(key, 3)
    params = init_params(pkey, C)
    rgb = jax.random.normal(rkey, (B, C, H, W), jnp.float32)
    thermal = jax.random.normal(tkey, (B, C, H, W), jnp.float32)

    fwd = jax.jit(functools.partial(fea_learning_forward, params))
    out_rgb, out_thermal = fwd(rgb, thermal)
    jax.block_until_ready((out_rgb, out_thermal))

    assert out_rgb.shape == (B, C, H, W) and out_thermal.shape == (B, C, H, W)
    assert bool(jnp.isfinite(out_rgb).all()) and bool(jnp.isfinite(out_thermal).all())
    print("KERNEL_OK")
</pallas_src>

<mosaic_0001>
module attributes {stable_mosaic.version = 11 : i64} {
  func.func @_denoise_se_kernel(%arg0: i32, %arg1: i32, %arg2: memref<1x2x8x8x32xbf16, #tpu.memory_space<vmem>>, %arg3: memref<32x32xbf16, #tpu.memory_space<vmem>>, %arg4: memref<1x32xf32, #tpu.memory_space<vmem>>, %arg5: memref<576x32xbf16, #tpu.memory_space<vmem>>, %arg6: memref<1x32xf32, #tpu.memory_space<vmem>>, %arg7: memref<1x2x32xf32, #tpu.memory_space<vmem>>, %arg8: memref<1x2x32xf32, #tpu.memory_space<vmem>>, %arg9: memref<1x2x8x8x32xbf16, #tpu.memory_space<vmem>>, %arg10: memref<2x12x12x32xbf16, #tpu.memory_space<vmem>>) attributes {dimension_semantics = [#tpu.dimension_semantics<parallel>, #tpu.dimension_semantics<parallel>], iteration_bounds = array<i64: 2, 1>, scalar_prefetch = 0 : i64, scratch_operands = 1 : i64, tpu.core_type = #tpu.core_type<tc>, window_params = [{transform_indices = @transform_0, window_bounds = array<i64: 1, 2, 8, 8, 32>}, {pipeline_mode = #tpu.pipeline_mode<synchronous>, transform_indices = @transform_1, window_bounds = array<i64: 32, 32>}, {pipeline_mode = #tpu.pipeline_mode<synchronous>, transform_indices = @transform_2, window_bounds = array<i64: 1, 32>}, {pipeline_mode = #tpu.pipeline_mode<synchronous>, transform_indices = @transform_3, window_bounds = array<i64: 576, 32>}, {pipeline_mode = #tpu.pipeline_mode<synchronous>, transform_indices = @transform_4, window_bounds = array<i64: 1, 32>}, {transform_indices = @transform_5, window_bounds = array<i64: 1, 2, 32>}, {transform_indices = @transform_6, window_bounds = array<i64: 1, 2, 32>}, {transform_indices = @transform_7, window_bounds = array<i64: 1, 2, 8, 8, 32>}]} {
    %c0 = arith.constant 0 : index
    %c0_0 = arith.constant 0 : index
    %c0_1 = arith.constant 0 : index
    %c0_2 = arith.constant 0 : index
    %c0_3 = arith.constant 0 : index
    %0 = vector.load %arg2[%c0, %c0_0, %c0_1, %c0_2, %c0_3] : memref<1x2x8x8x32xbf16, #tpu.memory_space<vmem>>, vector<1x2x8x8x32xbf16>
    %1 = vector.shape_cast %0 : vector<1x2x8x8x32xbf16> to vector<2x8x8x32xbf16>
    %2 = vector.shape_cast %1 : vector<2x8x8x32xbf16> to vector<128x32xbf16>
    %c0_4 = arith.constant 0 : index
    %c0_5 = arith.constant 0 : index
    %3 = vector.load %arg3[%c0_4, %c0_5] : memref<32x32xbf16, #tpu.memory_space<vmem>>, vector<32x32xbf16>
    %cst = arith.constant dense<0.000000e+00> : vector<128x32xf32>
    %4 = tpu.matmul %2, %3, %cst {dimension_numbers = #tpu.dot_dimension_numbers<[1], [0], [0], [1], [0, 0, 1, 1], [], []>} : vector<128x32xbf16>, vector<32x32xbf16>, vector<128x32xf32> -> vector<128x32xf32>
    %c0_6 = arith.constant 0 : index
    %c0_7 = arith.constant 0 : index
    %5 = vector.load %arg4[%c0_6, %c0_7] : memref<1x32xf32, #tpu.memory_space<vmem>>, vector<1x32xf32>
    %6 = vector.broadcast %5 : vector<1x32xf32> to vector<128x32xf32>
    %7 = arith.addf %4, %6 : vector<128x32xf32>
    %cst_8 = arith.constant 0.000000e+00 : bf16
    %8 = vector.broadcast %cst_8 : bf16 to vector<2x12x12x32xbf16>
    %c0_9 = arith.constant 0 : index
    %c0_10 = arith.constant 0 : index
    %c0_11 = arith.constant 0 : index
    %c0_12 = arith.constant 0 : index
    %9 = vector.load %arg10[%c0_9, %c0_10, %c0_11, %c0_12] : memref<2x12x12x32xbf16, #tpu.memory_space<vmem>>, vector<2x12x12x32xbf16>
    tpu.vector_store %arg10[%c0_9, %c0_10, %c0_11, %c0_12], %8 {strides = array<i32>} : memref<2x12x12x32xbf16, #tpu.memory_space<vmem>>, vector<2x12x12x32xbf16>,
    %10 = vector.shape_cast %7 : vector<128x32xf32> to vector<2x8x8x32xf32>
    %11 = arith.truncf %10 : vector<2x8x8x32xf32> to vector<2x8x8x32xbf16>
    %c0_13 = arith.constant 0 : index
    %c2 = arith.constant 2 : index
    %c2_14 = arith.constant 2 : index
    %c0_15 = arith.constant 0 : index
    %12 = vector.load %arg10[%c0_13, %c2, %c2_14, %c0_15] : memref<2x12x12x32xbf16, #tpu.memory_space<vmem>>, vector<2x8x8x32xbf16>
    tpu.vector_store %arg10[%c0_13, %c2, %c2_14, %c0_15], %11 {strides = array<i32>} : memref<2x12x12x32xbf16, #tpu.memory_space<vmem>>, vector<2x8x8x32xbf16>,
    %c0_16 = arith.constant 0 : index
    %c1 = arith.constant 1 : index
    %c1_17 = arith.constant 1 : index
    %c0_18 = arith.constant 0 : index
    %13 = vector.load %arg10[%c0_16, %c1, %c1_17, %c0_18] : memref<2x12x12x32xbf16, #tpu.memory_space<vmem>>, vector<2x8x8x32xbf16>
    %c0_19 = arith.constant 0 : index
    %c1_20 = arith.constant 1 : index
    %c2_21 = arith.constant 2 : index
    %c0_22 = arith.constant 0 : index
    %14 = vector.load %arg10[%c0_19, %c1_20, %c2_21, %c0_22] : memref<2x12x12x32xbf16, #tpu.memory_space<vmem>>, vector<2x8x8x32xbf16>
    %c0_23 = arith.constant 0 : index
    %c1_24 = arith.constant 1 : index
    %c3 = arith.constant 3 : index
    %c0_25 = arith.constant 0 : index
    %15 = vector.load %arg10[%c0_23, %c1_24, %c3, %c0_25] : memref<2x12x12x32xbf16, #tpu.memory_space<vmem>>, vector<2x8x8x32xbf16>
    %c0_26 = arith.constant 0 : index
    %c2_27 = arith.constant 2 : index
    %c1_28 = arith.constant 1 : index
    %c0_29 = arith.constant 0 : index
    %16 = vector.load %arg10[%c0_26, %c2_27, %c1_28, %c0_29] : memref<2x12x12x32xbf16, #tpu.memory_space<vmem>>, vector<2x8x8x32xbf16>
    %c0_30 = arith.constant 0 : index
    %c2_31 = arith.constant 2 : index
    %c2_32 = arith.constant 2 : index
    %c0_33 = arith.constant 0 : index
    %17 = vector.load %arg10[%c0_30, %c2_31, %c2_32, %c0_33] : memref<2x12x12x32xbf16, #tpu.memory_space<vmem>>, vector<2x8x8x32xbf16>
    %c0_34 = arith.constant 0 : index
    %c2_35 = arith.constant 2 : index
    %c3_36 = arith.constant 3 : index
    %c0_37 = arith.constant 0 : index
    %18 = vector.load %arg10[%c0_34, %c2_35, %c3_36, %c0_37] : memref<2x12x12x32xbf16, #tpu.memory_space<vmem>>, vector<2x8x8x32xbf16>
    %c0_38 = arith.constant 0 : index
    %c3_39 = arith.constant 3 : index
    %c1_40 = arith.constant 1 : index
    %c0_41 = arith.constant 0 : index
    %19 = vector.load %arg10[%c0_38, %c3_39, %c1_40, %c0_41] : memref<2x12x12x32xbf16, #tpu.memory_space<vmem>>, vector<2x8x8x32xbf16>
    %c0_42 = arith.constant 0 : index
    %c3_43 = arith.constant 3 : index
    %c2_44 = arith.constant 2 : index
    %c0_45 = arith.constant 0 : index
    %20 = vector.load %arg10[%c0_42, %c3_43, %c2_44, %c0_45] : memref<2x12x12x32xbf16, #tpu.memory_space<vmem>>, vector<2x8x8x32xbf16>
    %c0_46 = arith.constant 0 : index
    %c3_47 = arith.constant 3 : index
    %c3_48 = arith.constant 3 : index
    %c0_49 = arith.constant 0 : index
    %21 = vector.load %arg10[%c0_46, %c3_47, %c3_48, %c0_49] : memref<2x12x12x32xbf16, #tpu.memory_space<vmem>>, vector<2x8x8x32xbf16>
    %c0_50 = arith.constant 0 : index
    %c0_51 = arith.constant 0 : index
    %c0_52 = arith.constant 0 : index
    %c0_53 = arith.constant 0 : index
    %22 = vector.load %arg10[%c0_50, %c0_51, %c0_52, %c0_53] : memref<2x12x12x32xbf16, #tpu.memory_space<vmem>>, vector<2x8x8x32xbf16>
    %c0_54 = arith.constant 0 : index
    %c0_55 = arith.constant 0 : index
    %c2_56 = arith.constant 2 : index
    %c0_57 = arith.constant 0 : index
    %23 = vector.load %arg10[%c0_54, %c0_55, %c2_56, %c0_57] : memref<2x12x12x32xbf16, #tpu.memory_space<vmem>>, vector<2x8x8x32xbf16>
    %c0_58 = arith.constant 0 : index
    %c0_59 = arith.constant 0 : index
    %c4 = arith.constant 4 : index
    %c0_60 = arith.constant 0 : index
    %24 = vector.load %arg10[%c0_58, %c0_59, %c4, %c0_60] : memref<2x12x12x32xbf16, #tpu.memory_space<vmem>>, vector<2x8x8x32xbf16>
    %c0_61 = arith.constant 0 : index
    %c2_62 = arith.constant 2 : index
    %c0_63 = arith.constant 0 : index
    %c0_64 = arith.constant 0 : index
    %25 = vector.load %arg10[%c0_61, %c2_62, %c0_63, %c0_64] : memref<2x12x12x32xbf16, #tpu.memory_space<vmem>>, vector<2x8x8x32xbf16>
    %c0_65 = arith.constant 0 : index
    %c2_66 = arith.constant 2 : index
    %c2_67 = arith.constant 2 : index
    %c0_68 = arith.constant 0 : index
    %26 = vector.load %arg10[%c0_65, %c2_66, %c2_67, %c0_68] : memref<2x12x12x32xbf16, #tpu.memory_space<vmem>>, vector<2x8x8x32xbf16>
    %c0_69 = arith.constant 0 : index
    %c2_70 = arith.constant 2 : index
    %c4_71 = arith.constant 4 : index
    %c0_72 = arith.constant 0 : index
    %27 = vector.load %arg10[%c0_69, %c2_70, %c4_71, %c0_72] : memref<2x12x12x32xbf16, #tpu.memory_space<vmem>>, vector<2x8x8x32xbf16>
    %c0_73 = arith.constant 0 : index
    %c4_74 = arith.constant 4 : index
    %c0_75 = arith.constant 0 : index
    %c0_76 = arith.constant 0 : index
    %28 = vector.load %arg10[%c0_73, %c4_74, %c0_75, %c0_76] : memref<2x12x12x32xbf16, #tpu.memory_space<vmem>>, vector<2x8x8x32xbf16>
    %c0_77 = arith.constant 0 : index
    %c4_78 = arith.constant 4 : index
    %c2_79 = arith.constant 2 : index
    %c0_80 = arith.constant 0 : index
    %29 = vector.load %arg10[%c0_77, %c4_78, %c2_79, %c0_80] : memref<2x12x12x32xbf16, #tpu.memory_space<vmem>>, vector<2x8x8x32xbf16>
    %c0_81 = arith.constant 0 : index
    %c4_82 = arith.constant 4 : index
    %c4_83 = arith.constant 4 : index
    %c0_84 = arith.constant 0 : index
    %30 = vector.load %arg10[%c0_81, %c4_82, %c4_83, %c0_84] : memref<2x12x12x32xbf16, #tpu.memory_space<vmem>>, vector<2x8x8x32xbf16>
    %31 = tpu.concatenate %13, %14, %15, %16, %17, %18, %19, %20, %21, %22, %23, %24, %25, %26, %27, %28 in 3 : vector<2x8x8x32xbf16>, vector<2x8x8x32xbf16>, vector<2x8x8x32xbf16>, vector<2x8x8x32xbf16>, vector<2x8x8x32xbf16>, vector<2x8x8x32xbf16>, vector<2x8x8x32xbf16>, vector<2x8x8x32xbf16>, vector<2x8x8x32xbf16>, vector<2x8x8x32xbf16>, vector<2x8x8x32xbf16>, vector<2x8x8x32xbf16>, vector<2x8x8x32xbf16>, vector<2x8x8x32xbf16>, vector<2x8x8x32xbf16>, vector<2x8x8x32xbf16> -> vector<2x8x8x512xbf16>
    %32 = tpu.concatenate %29, %30 in 3 : vector<2x8x8x32xbf16>, vector<2x8x8x32xbf16> -> vector<2x8x8x64xbf16>
    %33 = tpu.concatenate %31, %32 in 3 : vector<2x8x8x512xbf16>, vector<2x8x8x64xbf16> -> vector<2x8x8x576xbf16>
    %34 = vector.shape_cast %33 : vector<2x8x8x576xbf16> to vector<128x576xbf16>
    %c0_85 = arith.constant 0 : index
    %c0_86 = arith.constant 0 : index
    %35 = vector.load %arg5[%c0_85, %c0_86] : memref<576x32xbf16, #tpu.memory_space<vmem>>, vector<576x32xbf16>
    %cst_87 = arith.constant dense<0.000000e+00> : vector<128x32xf32>
    %36 = tpu.matmul %34, %35, %cst_87 {dimension_numbers = #tpu.dot_dimension_numbers<[1], [0], [0], [1], [0, 0, 1, 1], [], []>} : vector<128x576xbf16>, vector<576x32xbf16>, vector<128x32xf32> -> vector<128x32xf32>
    %c0_88 = arith.constant 0 : index
    %c0_89 = arith.constant 0 : index
    %37 = vector.load %arg6[%c0_88, %c0_89] : memref<1x32xf32, #tpu.memory_space<vmem>>, vector<1x32xf32>
    %38 = vector.broadcast %37 : vector<1x32xf32> to vector<128x32xf32>
    %39 = arith.addf %36, %38 : vector<128x32xf32>
    %40 = vector.shape_cast %39 : vector<128x32xf32> to vector<2x64x32xf32>
    %cst_90 = arith.constant dense<0.000000e+00> : vector<2x32xf32>
    %41 = vector.multi_reduction <add>, %40, %cst_90 [1] : vector<2x64x32xf32> to vector<2x32xf32>
    %cst_91 = arith.constant 6.400000e+01 : f32
    %42 = vector.broadcast %cst_91 : f32 to vector<2x32xf32>
    %43 = arith.divf %41, %42 : vector<2x32xf32>
    %c0_92 = arith.constant 0 : index
    %c0_93 = arith.constant 0 : index
    %c0_94 = arith.constant 0 : index
    %44 = vector.load %arg7[%c0_92, %c0_93, %c0_94] : memref<1x2x32xf32, #tpu.memory_space<vmem>>, vector<1x2x32xf32>
    %45 = vector.shape_cast %44 : vector<1x2x32xf32> to vector<2x32xf32>
    %c0_95 = arith.constant 0 : index
    %c0_96 = arith.constant 0 : index
    %c0_97 = arith.constant 0 : index
    %46 = vector.load %arg8[%c0_95, %c0_96, %c0_97] : memref<1x2x32xf32, #tpu.memory_space<vmem>>, vector<1x2x32xf32>
    %47 = vector.shape_cast %46 : vector<1x2x32xf32> to vector<2x32xf32>
    %48 = vector.shape_cast %43 : vector<2x32xf32> to vector<2x1x32xf32>
    %49 = vector.shape_cast %45 : vector<2x32xf32> to vector<1x2x32xf32>
    %50 = vector.broadcast %48 : vector<2x1x32xf32> to vector<2x2x32xf32>
    %51 = vector.broadcast %49 : vector<1x2x32xf32> to vector<2x2x32xf32>
    %52 = arith.mulf %50, %51 : vector<2x2x32xf32>
    %cst_98 = arith.constant dense<0.000000e+00> : vector<2x2xf32>
    %53 = vector.multi_reduction <add>, %52, %cst_98 [2] : vector<2x2x32xf32> to vector<2x2xf32>
    %cst_99 = arith.constant 0.000000e+00 : f32
    %54 = vector.broadcast %cst_99 : f32 to vector<2x2xf32>
    %55 = arith.maximumf %53, %54 : vector<2x2xf32>
    %56 = vector.shape_cast %55 : vector<2x2xf32> to vector<2x2x1xf32>
    %57 = vector.shape_cast %47 : vector<2x32xf32> to vector<1x2x32xf32>
    %58 = vector.broadcast %56 : vector<2x2x1xf32> to vector<2x2x32xf32>
    %59 = vector.broadcast %57 : vector<1x2x32xf32> to vector<2x2x32xf32>
    %60 = arith.mulf %58, %59 : vector<2x2x32xf32>
    %cst_100 = arith.constant dense<0.000000e+00> : vector<2x32xf32>
    %61 = vector.multi_reduction <add>, %60, %cst_100 [1] : vector<2x2x32xf32> to vector<2x32xf32>
    %62 = arith.negf %61 : vector<2x32xf32>
    %63 = math.exp %62 : vector<2x32xf32>
    %cst_101 = arith.constant 1.000000e+00 : f32
    %64 = vector.broadcast %cst_101 : f32 to vector<2x32xf32>
    %65 = arith.addf %64, %63 : vector<2x32xf32>
    %66 = arith.divf %64, %65 : vector<2x32xf32>
    %67 = vector.shape_cast %66 : vector<2x32xf32> to vector<2x1x32xf32>
    %68 = vector.broadcast %67 : vector<2x1x32xf32> to vector<2x64x32xf32>
    %69 = arith.mulf %40, %68 : vector<2x64x32xf32>
    %70 = vector.shape_cast %69 : vector<2x64x32xf32> to vector<2x8x8x32xf32>
    %71 = arith.truncf %70 : vector<2x8x8x32xf32> to vector<2x8x8x32xbf16>
    %c0_102 = arith.constant 0 : index
    %c0_103 = arith.constant 0 : index
    %c0_104 = arith.constant 0 : index
    %c0_105 = arith.constant 0 : index
    %c0_106 = arith.constant 0 : index
    %72 = vector.load %arg9[%c0_102, %c0_103, %c0_104, %c0_105, %c0_106] : memref<1x2x8x8x32xbf16, #tpu.memory_space<vmem>>, vector<1x2x8x8x32xbf16>
    %73 = vector.shape_cast %72 : vector<1x2x8x8x32xbf16> to vector<2x8x8x32xbf16>
    %74 = vector.shape_cast %71 : vector<2x8x8x32xbf16> to vector<1x2x8x8x32xbf16>
    tpu.vector_store %arg9[%c0_102, %c0_103, %c0_104, %c0_105, %c0_106], %74 {strides = array<i32>} : memref<1x2x8x8x32xbf16, #tpu.memory_space<vmem>>, vector<1x2x8x8x32xbf16>,
    return
  }
  func.func @transform_0(%arg0: i32, %arg1: i32) -> (i32, i32, i32, i32, i32) {
    %c0_i32 = arith.constant 0 : i32
    %c0_i32_0 = arith.constant 0 : i32
    %c0_i32_1 = arith.constant 0 : i32
    %c0_i32_2 = arith.constant 0 : i32
    return %arg0, %arg1, %c0_i32, %c0_i32_0, %c0_i32_1 : i32, i32, i32, i32, i32
  }
  func.func @transform_1(%arg0: i32, %arg1: i32) -> (i32, i32) {
    %c0_i32 = arith.constant 0 : i32
    %c0_i32_0 = arith.constant 0 : i32
    %c0_i32_1 = arith.constant 0 : i32
    return %c0_i32, %c0_i32_0 : i32, i32
  }
  func.func @transform_2(%arg0: i32, %arg1: i32) -> (i32, i32) {
    %c0_i32 = arith.constant 0 : i32
    %c0_i32_0 = arith.constant 0 : i32
    %c0_i32_1 = arith.constant 0 : i32
    return %c0_i32, %c0_i32_0 : i32, i32
  }
  func.func @transform_3(%arg0: i32, %arg1: i32) -> (i32, i32) {
    %c0_i32 = arith.constant 0 : i32
    %c0_i32_0 = arith.constant 0 : i32
    %c0_i32_1 = arith.constant 0 : i32
    return %c0_i32, %c0_i32_0 : i32, i32
  }
  func.func @transform_4(%arg0: i32, %arg1: i32) -> (i32, i32) {
    %c0_i32 = arith.constant 0 : i32
    %c0_i32_0 = arith.constant 0 : i32
    %c0_i32_1 = arith.constant 0 : i32
    return %c0_i32, %c0_i32_0 : i32, i32
  }
  func.func @transform_5(%arg0: i32, %arg1: i32) -> (i32, i32, i32) {
    %c0_i32 = arith.constant 0 : i32
    %c0_i32_0 = arith.constant 0 : i32
    %c0_i32_1 = arith.constant 0 : i32
    return %arg0, %c0_i32, %c0_i32_0 : i32, i32, i32
  }
  func.func @transform_6(%arg0: i32, %arg1: i32) -> (i32, i32, i32) {
    %c0_i32 = arith.constant 0 : i32
    %c0_i32_0 = arith.constant 0 : i32
    %c0_i32_1 = arith.constant 0 : i32
    return %arg0, %c0_i32, %c0_i32_0 : i32, i32, i32
  }
  func.func @transform_7(%arg0: i32, %arg1: i32) -> (i32, i32, i32, i32, i32) {
    %c0_i32 = arith.constant 0 : i32
    %c0_i32_0 = arith.constant 0 : i32
    %c0_i32_1 = arith.constant 0 : i32
    %c0_i32_2 = arith.constant 0 : i32
    return %arg0, %arg1, %c0_i32, %c0_i32_0, %c0_i32_1 : i32, i32, i32, i32, i32
  }
}

module attributes {stable_mosaic.version = 11 : i64} {
  func.func @_fuse_kernel(%arg0: i32, %arg1: memref<2x1x8x8x32xbf16, #tpu.memory_space<vmem>>, %arg2: memref<1x8x8x32xf32, #tpu.memory_space<vmem>>, %arg3: memref<1x8x8x32xf32, #tpu.memory_space<vmem>>, %arg4: memref<128x32xf32, #tpu.memory_space<vmem>>, %arg5: memref<1x32xf32, #tpu.memory_space<vmem>>, %arg6: memref<32x64xf32, #tpu.memory_space<vmem>>, %arg7: memref<1x64xf32, #tpu.memory_space<vmem>>, %arg8: memref<64x32xbf16, #tpu.memory_space<vmem>>, %arg9: memref<1x32xf32, #tpu.memory_space<vmem>>, %arg10: memref<576x64xbf16, #tpu.memory_space<vmem>>, %arg11: memref<1x64xf32, #tpu.memory_space<vmem>>, %arg12: memref<1x8x8x32xf32, #tpu.memory_space<vmem>>, %arg13: memref<1x8x8x32xf32, #tpu.memory_space<vmem>>, %arg14: memref<1x12x12x32xbf16, #tpu.memory_space<vmem>>) attributes {dimension_semantics = [#tpu.dimension_semantics<parallel>], iteration_bounds = array<i64: 2>, scalar_prefetch = 0 : i64, scratch_operands = 1 : i64, tpu.core_type = #tpu.core_type<tc>, window_params = [{transform_indices = @transform_0, window_bounds = array<i64: 2, 1, 8, 8, 32>}, {transform_indices = @transform_1, window_bounds = array<i64: 1, 8, 8, 32>}, {transform_indices = @transform_2, window_bounds = array<i64: 1, 8, 8, 32>}, {pipeline_mode = #tpu.pipeline_mode<synchronous>, transform_indices = @transform_3, window_bounds = array<i64: 128, 32>}, {pipeline_mode = #tpu.pipeline_mode<synchronous>, transform_indices = @transform_4, window_bounds = array<i64: 1, 32>}, {pipeline_mode = #tpu.pipeline_mode<synchronous>, transform_indices = @transform_5, window_bounds = array<i64: 32, 64>}, {pipeline_mode = #tpu.pipeline_mode<synchronous>, transform_indices = @transform_6, window_bounds = array<i64: 1, 64>}, {pipeline_mode = #tpu.pipeline_mode<synchronous>, transform_indices = @transform_7, window_bounds = array<i64: 64, 32>}, {pipeline_mode = #tpu.pipeline_mode<synchronous>, transform_indices = @transform_8, window_bounds = array<i64: 1, 32>}, {pipeline_mode = #tpu.pipeline_mode<synchronous>, transform_indices = @transform_9, window_bounds = array<i64: 576, 64>}, {pipeline_mode = #tpu.pipeline_mode<synchronous>, transform_indices = @transform_10, window_bounds = array<i64: 1, 64>}, {transform_indices = @transform_11, window_bounds = array<i64: 1, 8, 8, 32>}, {transform_indices = @transform_12, window_bounds = array<i64: 1, 8, 8, 32>}]} {
    %c0 = arith.constant 0 : index
    %c0_0 = arith.constant 0 : index
    %c0_1 = arith.constant 0 : index
    %c0_2 = arith.constant 0 : index
    %c0_3 = arith.constant 0 : index
    %0 = vector.load %arg1[%c0, %c0_0, %c0_1, %c0_2, %c0_3] : memref<2x1x8x8x32xbf16, #tpu.memory_space<vmem>>, vector<1x1x8x8x32xbf16>
    %1 = vector.shape_cast %0 : vector<1x1x8x8x32xbf16> to vector<1x8x8x32xbf16>
    %2 = arith.extf %1 : vector<1x8x8x32xbf16> to vector<1x8x8x32xf32>
    %c1 = arith.constant 1 : index
    %c0_4 = arith.constant 0 : index
    %c0_5 = arith.constant 0 : index
    %c0_6 = arith.constant 0 : index
    %c0_7 = arith.constant 0 : index
    %3 = vector.load %arg1[%c1, %c0_4, %c0_5, %c0_6, %c0_7] : memref<2x1x8x8x32xbf16, #tpu.memory_space<vmem>>, vector<1x1x8x8x32xbf16>
    %4 = vector.shape_cast %3 : vector<1x1x8x8x32xbf16> to vector<1x8x8x32xbf16>
    %5 = arith.extf %4 : vector<1x8x8x32xbf16> to vector<1x8x8x32xf32>
    %c0_8 = arith.constant 0 : index
    %c0_9 = arith.constant 0 : index
    %c0_10 = arith.constant 0 : index
    %c0_11 = arith.constant 0 : index
    %6 = vector.load %arg2[%c0_8, %c0_9, %c0_10, %c0_11] : memref<1x8x8x32xf32, #tpu.memory_space<vmem>>, vector<1x8x8x32xf32>
    %cst = arith.constant dense<0.000000e+00> : vector<1xf32>
    %7 = vector.multi_reduction <add>, %2, %cst [1, 2, 3] : vector<1x8x8x32xf32> to vector<1xf32>
    %8 = vector.shape_cast %7 : vector<1xf32> to vector<1x1x1x1xf32>
    %cst_12 = arith.constant dense<0.000000e+00> : vector<1xf32>
    %9 = vector.multi_reduction <add>, %5, %cst_12 [1, 2, 3] : vector<1x8x8x32xf32> to vector<1xf32>
    %10 = vector.shape_cast %9 : vector<1xf32> to vector<1x1x1x1xf32>
    %11 = arith.mulf %2, %2 : vector<1x8x8x32xf32>
    %cst_13 = arith.constant dense<0.000000e+00> : vector<1xf32>
    %12 = vector.multi_reduction <add>, %11, %cst_13 [1, 2, 3] : vector<1x8x8x32xf32> to vector<1xf32>
    %13 = vector.shape_cast %12 : vector<1xf32> to vector<1x1x1x1xf32>
    %14 = arith.mulf %5, %5 : vector<1x8x8x32xf32>
    %cst_14 = arith.constant dense<0.000000e+00> : vector<1xf32>
    %15 = vector.multi_reduction <add>, %14, %cst_14 [1, 2, 3] : vector<1x8x8x32xf32> to vector<1xf32>
    %16 = vector.shape_cast %15 : vector<1xf32> to vector<1x1x1x1xf32>
    %17 = arith.mulf %2, %5 : vector<1x8x8x32xf32>
    %cst_15 = arith.constant dense<0.000000e+00> : vector<1xf32>
    %18 = vector.multi_reduction <add>, %17, %cst_15 [1, 2, 3] : vector<1x8x8x32xf32> to vector<1xf32>
    %19 = vector.shape_cast %18 : vector<1xf32> to vector<1x1x1x1xf32>
    %cst_16 = arith.constant 1.000000e-24 : f32
    %20 = vector.broadcast %cst_16 : f32 to vector<1x1x1x1xf32>
    %21 = arith.maximumf %13, %20 : vector<1x1x1x1xf32>
    %cst_17 = arith.constant 1.000000e-24 : f32
    %22 = vector.broadcast %cst_17 : f32 to vector<1x1x1x1xf32>
    %23 = arith.maximumf %16, %22 : vector<1x1x1x1xf32>
    %24 = arith.mulf %8, %10 : vector<1x1x1x1xf32>
    %cst_18 = arith.constant 4.8828125E-4 : f32
    %25 = vector.broadcast %cst_18 : f32 to vector<1x1x1x1xf32>
    %26 = arith.mulf %24, %25 : vector<1x1x1x1xf32>
    %27 = arith.subf %19, %26 : vector<1x1x1x1xf32>
    %28 = arith.mulf %21, %23 : vector<1x1x1x1xf32>
    %29 = math.rsqrt %28 : vector<1x1x1x1xf32>
    %30 = arith.mulf %27, %29 : vector<1x1x1x1xf32>
    %31 = arith.divf %13, %21 : vector<1x1x1x1xf32>
    %32 = arith.mulf %8, %8 : vector<1x1x1x1xf32>
    %cst_19 = arith.constant 4.8828125E-4 : f32
    %33 = vector.broadcast %cst_19 : f32 to vector<1x1x1x1xf32>
    %34 = arith.mulf %32, %33 : vector<1x1x1x1xf32>
    %35 = arith.divf %34, %21 : vector<1x1x1x1xf32>
    %36 = arith.subf %31, %35 : vector<1x1x1x1xf32>
    %cst_20 = arith.constant 0.000000e+00 : f32
    %37 = vector.broadcast %cst_20 : f32 to vector<1x1x1x1xf32>
    %38 = arith.maximumf %36, %37 : vector<1x1x1x1xf32>
    %39 = math.sqrt %38 : vector<1x1x1x1xf32>
    %40 = arith.divf %16, %23 : vector<1x1x1x1xf32>
    %41 = arith.mulf %10, %10 : vector<1x1x1x1xf32>
    %cst_21 = arith.constant 4.8828125E-4 : f32
    %42 = vector.broadcast %cst_21 : f32 to vector<1x1x1x1xf32>
    %43 = arith.mulf %41, %42 : vector<1x1x1x1xf32>
    %44 = arith.divf %43, %23 : vector<1x1x1x1xf32>
    %45 = arith.subf %40, %44 : vector<1x1x1x1xf32>
    %cst_22 = arith.constant 0.000000e+00 : f32
    %46 = vector.broadcast %cst_22 : f32 to vector<1x1x1x1xf32>
    %47 = arith.maximumf %45, %46 : vector<1x1x1x1xf32>
    %48 = math.sqrt %47 : vector<1x1x1x1xf32>
    %49 = arith.mulf %39, %48 : vector<1x1x1x1xf32>
    %cst_23 = arith.constant 9.99999997E-7 : f32
    %50 = vector.broadcast %cst_23 : f32 to vector<1x1x1x1xf32>
    %51 = arith.addf %49, %50 : vector<1x1x1x1xf32>
    %52 = arith.divf %30, %51 : vector<1x1x1x1xf32>
    %cst_24 = arith.constant 1.000000e+00 : f32
    %53 = vector.broadcast %cst_24 : f32 to vector<1x1x1x1xf32>
    %54 = arith.subf %53, %52 : vector<1x1x1x1xf32>
    %cst_25 = arith.constant 1.000000e+00 : f32
    %55 = vector.broadcast %cst_25 : f32 to vector<1x1x1x1xf32>
    %56 = arith.addf %55, %54 : vector<1x1x1x1xf32>
    %57 = vector.broadcast %56 : vector<1x1x1x1xf32> to vector<1x8x8x32xf32>
    %58 = arith.mulf %6, %57 : vector<1x8x8x32xf32>
    %cst_26 = arith.constant dense<0.000000e+00> : vector<1x32xf32>
    %59 = vector.multi_reduction <add>, %2, %cst_26 [1, 2] : vector<1x8x8x32xf32> to vector<1x32xf32>
    %cst_27 = arith.constant 6.400000e+01 : f32
    %60 = vector.broadcast %cst_27 : f32 to vector<1x32xf32>
    %61 = arith.divf %59, %60 : vector<1x32xf32>
    %cst_28 = arith.constant dense<0.000000e+00> : vector<1x32xf32>
    %62 = vector.multi_reduction <add>, %58, %cst_28 [1, 2] : vector<1x8x8x32xf32> to vector<1x32xf32>
    %cst_29 = arith.constant 6.400000e+01 : f32
    %63 = vector.broadcast %cst_29 : f32 to vector<1x32xf32>
    %64 = arith.divf %62, %63 : vector<1x32xf32>
    %cst_30 = arith.constant dense<0xFF800000> : vector<1x32xf32>
    %65 = vector.multi_reduction <maximumf>, %2, %cst_30 [1, 2] : vector<1x8x8x32xf32> to vector<1x32xf32>
    %cst_31 = arith.constant dense<0xFF800000> : vector<1x32xf32>
    %66 = vector.multi_reduction <maximumf>, %58, %cst_31 [1, 2] : vector<1x8x8x32xf32> to vector<1x32xf32>
    %67 = tpu.concatenate %61, %64, %65, %66 in 1 : vector<1x32xf32>, vector<1x32xf32>, vector<1x32xf32>, vector<1x32xf32> -> vector<1x128xf32>
    %c0_32 = arith.constant 0 : index
    %c0_33 = arith.constant 0 : index
    %68 = vector.load %arg4[%c0_32, %c0_33] : memref<128x32xf32, #tpu.memory_space<vmem>>, vector<128x32xf32>
    %cst_34 = arith.constant dense<0.000000e+00> : vector<1x32xf32>
    %69 = tpu.matmul %67, %68, %cst_34 {dimension_numbers = #tpu.dot_dimension_numbers<[1], [0], [0], [1], [0, 0, 1, 1], [], []>} : vector<1x128xf32>, vector<128x32xf32>, vector<1x32xf32> -> vector<1x32xf32>
    %c0_35 = arith.constant 0 : index
    %c0_36 = arith.constant 0 : index
    %70 = vector.load %arg5[%c0_35, %c0_36] : memref<1x32xf32, #tpu.memory_space<vmem>>, vector<1x32xf32>
    %71 = arith.addf %69, %70 : vector<1x32xf32>
    %cst_37 = arith.constant 0.000000e+00 : f32
    %72 = vector.broadcast %cst_37 : f32 to vector<1x32xf32>
    %73 = arith.maximumf %71, %72 : vector<1x32xf32>
    %c0_38 = arith.constant 0 : index
    %c0_39 = arith.constant 0 : index
    %74 = vector.load %arg6[%c0_38, %c0_39] : memref<32x64xf32, #tpu.memory_space<vmem>>, vector<32x64xf32>
    %cst_40 = arith.constant dense<0.000000e+00> : vector<1x64xf32>
    %75 = tpu.matmul %73, %74, %cst_40 {dimension_numbers = #tpu.dot_dimension_numbers<[1], [0], [0], [1], [0, 0, 1, 1], [], []>} : vector<1x32xf32>, vector<32x64xf32>, vector<1x64xf32> -> vector<1x64xf32>
    %c0_41 = arith.constant 0 : index
    %c0_42 = arith.constant 0 : index
    %76 = vector.load %arg7[%c0_41, %c0_42] : memref<1x64xf32, #tpu.memory_space<vmem>>, vector<1x64xf32>
    %77 = arith.addf %75, %76 : vector<1x64xf32>
    %78 = tpu.concatenate %2, %58 in 3 : vector<1x8x8x32xf32>, vector<1x8x8x32xf32> -> vector<1x8x8x64xf32>
    %79 = vector.shape_cast %77 : vector<1x64xf32> to vector<1x1x1x64xf32>
    %80 = vector.broadcast %79 : vector<1x1x1x64xf32> to vector<1x8x8x64xf32>
    %81 = arith.mulf %78, %80 : vector<1x8x8x64xf32>
    %82 = arith.truncf %81 : vector<1x8x8x64xf32> to vector<1x8x8x64xbf16>
    %83 = vector.shape_cast %82 : vector<1x8x8x64xbf16> to vector<64x64xbf16>
    %c0_43 = arith.constant 0 : index
    %c0_44 = arith.constant 0 : index
    %84 = vector.load %arg8[%c0_43, %c0_44] : memref<64x32xbf16, #tpu.memory_space<vmem>>, vector<64x32xbf16>
    %cst_45 = arith.constant dense<0.000000e+00> : vector<64x32xf32>
    %85 = tpu.matmul %83, %84, %cst_45 {dimension_numbers = #tpu.dot_dimension_numbers<[1], [0], [0], [1], [0, 0, 1, 1], [], []>} : vector<64x64xbf16>, vector<64x32xbf16>, vector<64x32xf32> -> vector<64x32xf32>
    %c0_46 = arith.constant 0 : index
    %c0_47 = arith.constant 0 : index
    %86 = vector.load %arg9[%c0_46, %c0_47] : memref<1x32xf32, #tpu.memory_space<vmem>>, vector<1x32xf32>
    %87 = vector.broadcast %86 : vector<1x32xf32> to vector<64x32xf32>
    %88 = arith.addf %85, %87 : vector<64x32xf32>
    %cst_48 = arith.constant 0.000000e+00 : bf16
    %89 = vector.broadcast %cst_48 : bf16 to vector<1x12x12x32xbf16>
    %c0_49 = arith.constant 0 : index
    %c0_50 = arith.constant 0 : index
    %c0_51 = arith.constant 0 : index
    %c0_52 = arith.constant 0 : index
    %90 = vector.load %arg14[%c0_49, %c0_50, %c0_51, %c0_52] : memref<1x12x12x32xbf16, #tpu.memory_space<vmem>>, vector<1x12x12x32xbf16>
    tpu.vector_store %arg14[%c0_49, %c0_50, %c0_51, %c0_52], %89 {strides = array<i32>} : memref<1x12x12x32xbf16, #tpu.memory_space<vmem>>, vector<1x12x12x32xbf16>,
    %91 = vector.shape_cast %88 : vector<64x32xf32> to vector<1x8x8x32xf32>
    %92 = arith.truncf %91 : vector<1x8x8x32xf32> to vector<1x8x8x32xbf16>
    %c0_53 = arith.constant 0 : index
    %c2 = arith.constant 2 : index
    %c2_54 = arith.constant 2 : index
    %c0_55 = arith.constant 0 : index
    %93 = vector.load %arg14[%c0_53, %c2, %c2_54, %c0_55] : memref<1x12x12x32xbf16, #tpu.memory_space<vmem>>, vector<1x8x8x32xbf16>
    tpu.vector_store %arg14[%c0_53, %c2, %c2_54, %c0_55], %92 {strides = array<i32>} : memref<1x12x12x32xbf16, #tpu.memory_space<vmem>>, vector<1x8x8x32xbf16>,
    %c0_56 = arith.constant 0 : index
    %c1_57 = arith.constant 1 : index
    %c1_58 = arith.constant 1 : index
    %c0_59 = arith.constant 0 : index
    %94 = vector.load %arg14[%c0_56, %c1_57, %c1_58, %c0_59] : memref<1x12x12x32xbf16, #tpu.memory_space<vmem>>, vector<1x8x8x32xbf16>
    %c0_60 = arith.constant 0 : index
    %c1_61 = arith.constant 1 : index
    %c2_62 = arith.constant 2 : index
    %c0_63 = arith.constant 0 : index
    %95 = vector.load %arg14[%c0_60, %c1_61, %c2_62, %c0_63] : memref<1x12x12x32xbf16, #tpu.memory_space<vmem>>, vector<1x8x8x32xbf16>
    %c0_64 = arith.constant 0 : index
    %c1_65 = arith.constant 1 : index
    %c3 = arith.constant 3 : index
    %c0_66 = arith.constant 0 : index
    %96 = vector.load %arg14[%c0_64, %c1_65, %c3, %c0_66] : memref<1x12x12x32xbf16, #tpu.memory_space<vmem>>, vector<1x8x8x32xbf16>
    %c0_67 = arith.constant 0 : index
    %c2_68 = arith.constant 2 : index
    %c1_69 = arith.constant 1 : index
    %c0_70 = arith.constant 0 : index
    %97 = vector.load %arg14[%c0_67, %c2_68, %c1_69, %c0_70] : memref<1x12x12x32xbf16, #tpu.memory_space<vmem>>, vector<1x8x8x32xbf16>
    %c0_71 = arith.constant 0 : index
    %c2_72 = arith.constant 2 : index
    %c2_73 = arith.constant 2 : index
    %c0_74 = arith.constant 0 : index
    %98 = vector.load %arg14[%c0_71, %c2_72, %c2_73, %c0_74] : memref<1x12x12x32xbf16, #tpu.memory_space<vmem>>, vector<1x8x8x32xbf16>
    %c0_75 = arith.constant 0 : index
    %c2_76 = arith.constant 2 : index
    %c3_77 = arith.constant 3 : index
    %c0_78 = arith.constant 0 : index
    %99 = vector.load %arg14[%c0_75, %c2_76, %c3_77, %c0_78] : memref<1x12x12x32xbf16, #tpu.memory_space<vmem>>, vector<1x8x8x32xbf16>
    %c0_79 = arith.constant 0 : index
    %c3_80 = arith.constant 3 : index
    %c1_81 = arith.constant 1 : index
    %c0_82 = arith.constant 0 : index
    %100 = vector.load %arg14[%c0_79, %c3_80, %c1_81, %c0_82] : memref<1x12x12x32xbf16, #tpu.memory_space<vmem>>, vector<1x8x8x32xbf16>
    %c0_83 = arith.constant 0 : index
    %c3_84 = arith.constant 3 : index
    %c2_85 = arith.constant 2 : index
    %c0_86 = arith.constant 0 : index
    %101 = vector.load %arg14[%c0_83, %c3_84, %c2_85, %c0_86] : memref<1x12x12x32xbf16, #tpu.memory_space<vmem>>, vector<1x8x8x32xbf16>
    %c0_87 = arith.constant 0 : index
    %c3_88 = arith.constant 3 : index
    %c3_89 = arith.constant 3 : index
    %c0_90 = arith.constant 0 : index
    %102 = vector.load %arg14[%c0_87, %c3_88, %c3_89, %c0_90] : memref<1x12x12x32xbf16, #tpu.memory_space<vmem>>, vector<1x8x8x32xbf16>
    %c0_91 = arith.constant 0 : index
    %c0_92 = arith.constant 0 : index
    %c0_93 = arith.constant 0 : index
    %c0_94 = arith.constant 0 : index
    %103 = vector.load %arg14[%c0_91, %c0_92, %c0_93, %c0_94] : memref<1x12x12x32xbf16, #tpu.memory_space<vmem>>, vector<1x8x8x32xbf16>
    %c0_95 = arith.constant 0 : index
    %c0_96 = arith.constant 0 : index
    %c2_97 = arith.constant 2 : index
    %c0_98 = arith.constant 0 : index
    %104 = vector.load %arg14[%c0_95, %c0_96, %c2_97, %c0_98] : memref<1x12x12x32xbf16, #tpu.memory_space<vmem>>, vector<1x8x8x32xbf16>
    %c0_99 = arith.constant 0 : index
    %c0_100 = arith.constant 0 : index
    %c4 = arith.constant 4 : index
    %c0_101 = arith.constant 0 : index
    %105 = vector.load %arg14[%c0_99, %c0_100, %c4, %c0_101] : memref<1x12x12x32xbf16, #tpu.memory_space<vmem>>, vector<1x8x8x32xbf16>
    %c0_102 = arith.constant 0 : index
    %c2_103 = arith.constant 2 : index
    %c0_104 = arith.constant 0 : index
    %c0_105 = arith.constant 0 : index
    %106 = vector.load %arg14[%c0_102, %c2_103, %c0_104, %c0_105] : memref<1x12x12x32xbf16, #tpu.memory_space<vmem>>, vector<1x8x8x32xbf16>
    %c0_106 = arith.constant 0 : index
    %c2_107 = arith.constant 2 : index
    %c2_108 = arith.constant 2 : index
    %c0_109 = arith.constant 0 : index
    %107 = vector.load %arg14[%c0_106, %c2_107, %c2_108, %c0_109] : memref<1x12x12x32xbf16, #tpu.memory_space<vmem>>, vector<1x8x8x32xbf16>
    %c0_110 = arith.constant 0 : index
    %c2_111 = arith.constant 2 : index
    %c4_112 = arith.constant 4 : index
    %c0_113 = arith.constant 0 : index
    %108 = vector.load %arg14[%c0_110, %c2_111, %c4_112, %c0_113] : memref<1x12x12x32xbf16, #tpu.memory_space<vmem>>, vector<1x8x8x32xbf16>
    %c0_114 = arith.constant 0 : index
    %c4_115 = arith.constant 4 : index
    %c0_116 = arith.constant 0 : index
    %c0_117 = arith.constant 0 : index
    %109 = vector.load %arg14[%c0_114, %c4_115, %c0_116, %c0_117] : memref<1x12x12x32xbf16, #tpu.memory_space<vmem>>, vector<1x8x8x32xbf16>
    %c0_118 = arith.constant 0 : index
    %c4_119 = arith.constant 4 : index
    %c2_120 = arith.constant 2 : index
    %c0_121 = arith.constant 0 : index
    %110 = vector.load %arg14[%c0_118, %c4_119, %c2_120, %c0_121] : memref<1x12x12x32xbf16, #tpu.memory_space<vmem>>, vector<1x8x8x32xbf16>
    %c0_122 = arith.constant 0 : index
    %c4_123 = arith.constant 4 : index
    %c4_124 = arith.constant 4 : index
    %c0_125 = arith.constant 0 : index
    %111 = vector.load %arg14[%c0_122, %c4_123, %c4_124, %c0_125] : memref<1x12x12x32xbf16, #tpu.memory_space<vmem>>, vector<1x8x8x32xbf16>
    %112 = tpu.concatenate %94, %95, %96, %97, %98, %99, %100, %101, %102, %103, %104, %105, %106, %107, %108, %109 in 3 : vector<1x8x8x32xbf16>, vector<1x8x8x32xbf16>, vector<1x8x8x32xbf16>, vector<1x8x8x32xbf16>, vector<1x8x8x32xbf16>, vector<1x8x8x32xbf16>, vector<1x8x8x32xbf16>, vector<1x8x8x32xbf16>, vector<1x8x8x32xbf16>, vector<1x8x8x32xbf16>, vector<1x8x8x32xbf16>, vector<1x8x8x32xbf16>, vector<1x8x8x32xbf16>, vector<1x8x8x32xbf16>, vector<1x8x8x32xbf16>, vector<1x8x8x32xbf16> -> vector<1x8x8x512xbf16>
    %113 = tpu.concatenate %110, %111 in 3 : vector<1x8x8x32xbf16>, vector<1x8x8x32xbf16> -> vector<1x8x8x64xbf16>
    %114 = tpu.concatenate %112, %113 in 3 : vector<1x8x8x512xbf16>, vector<1x8x8x64xbf16> -> vector<1x8x8x576xbf16>
    %115 = vector.shape_cast %114 : vector<1x8x8x576xbf16> to vector<64x576xbf16>
    %c0_126 = arith.constant 0 : index
    %c0_127 = arith.constant 0 : index
    %116 = vector.load %arg10[%c0_126, %c0_127] : memref<576x64xbf16, #tpu.memory_space<vmem>>, vector<576x64xbf16>
    %cst_128 = arith.constant dense<0.000000e+00> : vector<64x64xf32>
    %117 = tpu.matmul %115, %116, %cst_128 {dimension_numbers = #tpu.dot_dimension_numbers<[1], [0], [0], [1], [0, 0, 1, 1], [], []>} : vector<64x576xbf16>, vector<576x64xbf16>, vector<64x64xf32> -> vector<64x64xf32>
    %c0_129 = arith.constant 0 : index
    %c0_130 = arith.constant 0 : index
    %118 = vector.load %arg11[%c0_129, %c0_130] : memref<1x64xf32, #tpu.memory_space<vmem>>, vector<1x64xf32>
    %119 = vector.broadcast %118 : vector<1x64xf32> to vector<64x64xf32>
    %120 = arith.addf %117, %119 : vector<64x64xf32>
    %121 = vector.shape_cast %120 : vector<64x64xf32> to vector<1x8x8x64xf32>
    %c0_131 = arith.constant 0 : index
    %c0_132 = arith.constant 0 : index
    %c0_133 = arith.constant 0 : index
    %c0_134 = arith.constant 0 : index
    %122 = vector.load %arg3[%c0_131, %c0_132, %c0_133, %c0_134] : memref<1x8x8x32xf32, #tpu.memory_space<vmem>>, vector<1x8x8x32xf32>
    %123 = vector.extract_strided_slice %121 {offsets = [0, 0, 0, 32], sizes = [1, 8, 8, 32], strides = [1, 1, 1, 1]} : vector<1x8x8x64xf32> to vector<1x8x8x32xf32>
    %124 = vector.extract_strided_slice %81 {offsets = [0, 0, 0, 32], sizes = [1, 8, 8, 32], strides = [1, 1, 1, 1]} : vector<1x8x8x64xf32> to vector<1x8x8x32xf32>
    %125 = arith.mulf %123, %124 : vector<1x8x8x32xf32>
    %126 = arith.addf %122, %125 : vector<1x8x8x32xf32>
    %c0_135 = arith.constant 0 : index
    %c0_136 = arith.constant 0 : index
    %c0_137 = arith.constant 0 : index
    %c0_138 = arith.constant 0 : index
    %127 = vector.load %arg12[%c0_135, %c0_136, %c0_137, %c0_138] : memref<1x8x8x32xf32, #tpu.memory_space<vmem>>, vector<1x8x8x32xf32>
    tpu.vector_store %arg12[%c0_135, %c0_136, %c0_137, %c0_138], %126 {strides = array<i32>} : memref<1x8x8x32xf32, #tpu.memory_space<vmem>>, vector<1x8x8x32xf32>,
    %128 = vector.extract_strided_slice %121 {offsets = [0, 0, 0, 0], sizes = [1, 8, 8, 32], strides = [1, 1, 1, 1]} : vector<1x8x8x64xf32> to vector<1x8x8x32xf32>
    %129 = vector.extract_strided_slice %81 {offsets = [0, 0, 0, 0], sizes = [1, 8, 8, 32], strides = [1, 1, 1, 1]} : vector<1x8x8x64xf32> to vector<1x8x8x32xf32>
    %130 = arith.mulf %128, %129 : vector<1x8x8x32xf32>
    %131 = arith.addf %58, %130 : vector<1x8x8x32xf32>
    %c0_139 = arith.constant 0 : index
    %c0_140 = arith.constant 0 : index
    %c0_141 = arith.constant 0 : index
    %c0_142 = arith.constant 0 : index
    %132 = vector.load %arg13[%c0_139, %c0_140, %c0_141, %c0_142] : memref<1x8x8x32xf32, #tpu.memory_space<vmem>>, vector<1x8x8x32xf32>
    tpu.vector_store %arg13[%c0_139, %c0_140, %c0_141, %c0_142], %131 {strides = array<i32>} : memref<1x8x8x32xf32, #tpu.memory_space<vmem>>, vector<1x8x8x32xf32>,
    return
  }
  func.func @transform_0(%arg0: i32) -> (i32, i32, i32, i32, i32) {
    %c0_i32 = arith.constant 0 : i32
    %c0_i32_0 = arith.constant 0 : i32
    %c0_i32_1 = arith.constant 0 : i32
    %c0_i32_2 = arith.constant 0 : i32
    %c0_i32_3 = arith.constant 0 : i32
    return %c0_i32, %arg0, %c0_i32_0, %c0_i32_1, %c0_i32_2 : i32, i32, i32, i32, i32
  }
  func.func @transform_1(%arg0: i32) -> (i32, i32, i32, i32) {
    %c0_i32 = arith.constant 0 : i32
    %c0_i32_0 = arith.constant 0 : i32
    %c0_i32_1 = arith.constant 0 : i32
    %c0_i32_2 = arith.constant 0 : i32
    return %arg0, %c0_i32, %c0_i32_0, %c0_i32_1 : i32, i32, i32, i32
  }
  func.func @transform_2(%arg0: i32) -> (i32, i32, i32, i32) {
    %c0_i32 = arith.constant 0 : i32
    %c0_i32_0 = arith.constant 0 : i32
    %c0_i32_1 = arith.constant 0 : i32
    %c0_i32_2 = arith.constant 0 : i32
    return %arg0, %c0_i32, %c0_i32_0, %c0_i32_1 : i32, i32, i32, i32
  }
  func.func @transform_3(%arg0: i32) -> (i32, i32) {
    %c0_i32 = arith.constant 0 : i32
    %c0_i32_0 = arith.constant 0 : i32
    %c0_i32_1 = arith.constant 0 : i32
    return %c0_i32, %c0_i32_0 : i32, i32
  }
  func.func @transform_4(%arg0: i32) -> (i32, i32) {
    %c0_i32 = arith.constant 0 : i32
    %c0_i32_0 = arith.constant 0 : i32
    %c0_i32_1 = arith.constant 0 : i32
    return %c0_i32, %c0_i32_0 : i32, i32
  }
  func.func @transform_5(%arg0: i32) -> (i32, i32) {
    %c0_i32 = arith.constant 0 : i32
    %c0_i32_0 = arith.constant 0 : i32
    %c0_i32_1 = arith.constant 0 : i32
    return %c0_i32, %c0_i32_0 : i32, i32
  }
  func.func @transform_6(%arg0: i32) -> (i32, i32) {
    %c0_i32 = arith.constant 0 : i32
    %c0_i32_0 = arith.constant 0 : i32
    %c0_i32_1 = arith.constant 0 : i32
    return %c0_i32, %c0_i32_0 : i32, i32
  }
  func.func @transform_7(%arg0: i32) -> (i32, i32) {
    %c0_i32 = arith.constant 0 : i32
    %c0_i32_0 = arith.constant 0 : i32
    %c0_i32_1 = arith.constant 0 : i32
    return %c0_i32, %c0_i32_0 : i32, i32
  }
  func.func @transform_8(%arg0: i32) -> (i32, i32) {
    %c0_i32 = arith.constant 0 : i32
    %c0_i32_0 = arith.constant 0 : i32
    %c0_i32_1 = arith.constant 0 : i32
    return %c0_i32, %c0_i32_0 : i32, i32
  }
  func.func @transform_9(%arg0: i32) -> (i32, i32) {
    %c0_i32 = arith.constant 0 : i32
    %c0_i32_0 = arith.constant 0 : i32
    %c0_i32_1 = arith.constant 0 : i32
    return %c0_i32, %c0_i32_0 : i32, i32
  }
  func.func @transform_10(%arg0: i32) -> (i32, i32) {
    %c0_i32 = arith.constant 0 : i32
    %c0_i32_0 = arith.constant 0 : i32
    %c0_i32_1 = arith.constant 0 : i32
    return %c0_i32, %c0_i32_0 : i32, i32
  }
  func.func @transform_11(%arg0: i32) -> (i32, i32, i32, i32) {
    %c0_i32 = arith.constant 0 : i32
    %c0_i32_0 = arith.constant 0 : i32
    %c0_i32_1 = arith.constant 0 : i32
    %c0_i32_2 = arith.constant 0 : i32
    return %arg0, %c0_i32, %c0_i32_0, %c0_i32_1 : i32, i32, i32, i32
  }
  func.func @transform_12(%arg0: i32) -> (i32, i32, i32, i32) {
    %c0_i32 = arith.constant 0 : i32
    %c0_i32_0 = arith.constant 0 : i32
    %c0_i32_1 = arith.constant 0 : i32
    %c0_i32_2 = arith.constant 0 : i32
    return %arg0, %c0_i32, %c0_i32_0, %c0_i32_1 : i32, i32, i32, i32
  }
}

</mosaic_0001>

<bundles_post_ra>
// kernel: fea_learning_forward.3
= control target key start
LH: loop header
LB: loop body
LE: loop exit
PB: predicated region body
PF: predicated region fallthrough
CT: control target
= control target key end

     0   :  { %s7044_s0 = inlined_call_operand.vmem [shape: bf16[2,2,8,8,32], index: 0, kind: input, shape index: {}]   ;;  %s7045_s1 = inlined_call_operand.vmem [shape: f32[2,8,8,32], index: 1, kind: input, shape index: {}]   ;;  %s7046_s2 = inlined_call_operand.vmem [shape: f32[2,8,8,32], index: 2, kind: input, shape index: {}]   ;;  %s7047_s3 = inlined_call_operand.vmem [shape: f32[128,32], index: 3, kind: input, shape index: {}]   ;;  %s7048_s4 = inlined_call_operand.vmem [shape: f32[1,32], index: 4, kind: input, shape index: {}, may-alias: {4,8}]   ;;  %s7049_s5 = inlined_call_operand.vmem [shape: f32[32,64], index: 5, kind: input, shape index: {}]   ;;  %s7050_s6 = inlined_call_operand.vmem [shape: f32[1,64], index: 6, kind: input, shape index: {}]   ;;  %s7051_s7 = inlined_call_operand.vmem [shape: bf16[64,32], index: 7, kind: input, shape index: {}]   ;;  %s7052_s8 = inlined_call_operand.vmem [shape: f32[1,32], index: 8, kind: input, shape index: {}, may-alias: {4,8}]   ;;  %s7053_s9 = inlined_call_operand.vmem [shape: bf16[576,64], index: 9, kind: input, shape index: {}]   ;;  %s7054_s10 = inlined_call_operand.vmem [shape: f32[1,64], index: 10, kind: input, shape index: {}]   ;;  %s7055_s11 = inlined_call_operand.hbm [shape: f32[2,8,8,32], index: 11, kind: output, shape index: {0}]   ;;  %s7056_s12 = inlined_call_operand.hbm [shape: f32[2,8,8,32], index: 12, kind: output, shape index: {1}]  }
   0x1   :  { %7084 = sst [smem:[#allocation38_spill]] %s7044_s0 }
   0x2   :  { %7085 = sst [smem:[#allocation39_spill]] %s7045_s1 }
   0x3   :  { %7086 = sst [smem:[#allocation40_spill]] %s7047_s3 }
   0x4   :  { %7087 = sst [smem:[#allocation41_spill]] %s7048_s4 }
   0x5   :  { %7088 = sst [smem:[#allocation42_spill]] %s7049_s5 }
   0x6   :  { %7089 = sst [smem:[#allocation43_spill]] %s7050_s6 }
   0x7   :  { %18 = vsyncpa [#allocation5], 0 }
   0x8   :  { %20 = vsyncpa [#allocation5 + $0x1], 0 }
   0x9   :  { %21 = vsyncpa [#allocation7], 0 }
   0xa   :  { %23 = vsyncpa [#allocation7 + $0x1], 0  ;;  %s5426_s21 = smov 0   ;;  %s5428_s22 = smov 0  }
   0xb   :  { %s5430_s23 = smov 0   ;;  %s5432_s24 = smov 0  }
   0xc LB: > { %s5447_s25 = sadd.s32 4294967295, %s5348_s24   ;;  %s4420_s26 = sadd.s32 4294967294, %s5348_s24   ;;  %s5348_s24 = sphi %s5432_s24, %s7166_s24   ;;  %s5344_s23 = sphi %s5430_s23, %s7165_s23   ;;  %s5340_s22 = sphi %s5428_s22, %s7164_s22   ;;  %s5336_s21 = sphi %s5426_s21, %s7163_s21  }
   0xd   : > { %s5451_s27 = sadd.s32 1, %s5348_s24   ;;  %s36_s28 = sadd.s32 1, %s5344_s23 }
   0xe   : > { %s33_s29 = ssub.s32 %s5348_s24, %s5451_s27  ;;  %p43_p0 = scmp.ne.s32.totalorder %s5344_s23, %s5340_s22 }
   0xf   : > { %p34_p1 = scmp.eq.s32.totalorder %s33_s29, 0  ;;  %p44_p2 = scmp.eq.s32.totalorder %s5348_s24, 0 }
  0x10   : > { %p293_p3 = scmp.eq.s32.totalorder %s5447_s25, 1  ;;  %p298_p4 = scmp.ne.s32.totalorder %s5340_s22, %s5336_s21 }
  0x11   : > { %s5463_s30 = scalar_select %p34_p1, %s5344_s23, %s36_s28  }
  0x12   : > { %p45_p5 = por %p44_p2, %p43_p0  ;;  %p5465_p6 = por %p293_p3, %p43_p0 }
  0x13   : > { %7090 = sst [smem:[#allocation10_spill]] %s5463_s30  ;;  %p299_p7 = scmp.eq.s32.totalorder %s4420_s26, 1 }
  0x14   : > { %p4422_p9 = scmp.ge.s32.totalorder %s5348_s24, 2 }
  0x15   : > { %p5469_p8 = por %p299_p7, %p298_p4 }
  0x16   : > { %365 = sbr.rel (%p4422_p9) target bundleno = 43 (0x2b), region = 48 }
  0x1d   : > { %368 = sbr.rel (!%p45_p5) target bundleno = 43 (0x2b), region = 52  ;;  %s370_s15 = sand.u32 (%p45_p5), 1, %s5344_s23  }
  0x1e   : > { %s4717_s16 = sshll.u32 (%p45_p5), %s5348_s24, 5  ;;  %s4423_s17 = sshll.u32 (%p45_p5), %s370_s15, 6 }
  0x1f   : > { %s7093_s0 = sld [smem:[#allocation38_spill]] (%p45_p5)  ;;  %s372_s26 = scalar_lea.vmem (%p45_p5), [#allocation3], %s4423_s17 }
  0x25   : > { %s375_s20 = scalar_lea.vmem %s7093_s0, %s4717_s16 }
  0x26   : > { %v391_v0 = vld [vmem:[%s375_s20] sm:$0xff]   ;;  %v395_v1 = vld [vmem:[%s375_s20 + $0x8] sm:$0xff]   ;;  %v399_v2 = vld [vmem:[%s375_s20 + $0x10] sm:$0xff]  }
  0x27   : > { %392 = vst [vmem:[%s372_s26] sm:$0xff] %v391_v0   ;;  %396 = vst [vmem:[%s372_s26 + $0x8] sm:$0xff] %v395_v1   ;;  %v403_v3 = vld [vmem:[%s375_s20 + $0x18] sm:$0xff]   ;;  %v407_v4 = vld [vmem:[%s375_s20 + $0x40] sm:$0xff]  }
  0x28   : > { %400 = vst [vmem:[%s372_s26 + $0x10] sm:$0xff] %v399_v2   ;;  %v411_v5 = vld [vmem:[%s375_s20 + $0x48] sm:$0xff]   ;;  %404 = vst [vmem:[%s372_s26 + $0x18] sm:$0xff] %v403_v3   ;;  %v415_v6 = vld [vmem:[%s375_s20 + $0x50] sm:$0xff]  }
  0x29   : > { %408 = vst [vmem:[%s372_s26 + $0x20] sm:$0xff] %v407_v4   ;;  %412 = vst [vmem:[%s372_s26 + $0x28] sm:$0xff] %v411_v5   ;;  %v419_v7 = vld [vmem:[%s375_s20 + $0x58] sm:$0xff]  }
  0x2a   : > { %416 = vst [vmem:[%s372_s26 + $0x30] sm:$0xff] %v415_v6   ;;  %420 = vst [vmem:[%s372_s26 + $0x38] sm:$0xff] %v419_v7  }
  0x2b PF: > { %p4426_p10 = scmp.ge.s32.totalorder %s5348_s24, 1  ;;  %p492_p11 = scmp.lt.s32.totalorder %s5348_s24, 3 }
  0x2d   : > { %p493_p12 = pnand %p4426_p10, %p492_p11 }
  0x2f   : > { %496 = sbr.rel (%p493_p12) target bundleno = 1793 (0x701), region = 101 }
  0x36   : > { %s5484_s28 = sand.u32 1, %s5340_s22   ;;  %vm607_vm0 = vcmask 261120   ;;  %s7057_s16 = smov 64   ;;  %vm5353_vm5 = vmmov 0   ;;  %vm882_vm6 = vcmask 523264   ;;  %vm884_vm7 = vcmask 785408  }
  0x37   : > { %s5487_s29 = sshll.u32 %s5484_s28, 6  ;;  %p555_p13 = scmp.lt.s32.totalorder %s5447_s25, 1  ;;  %vm1248_vm8 = vcmask 257024   ;;  %vm1250_vm9 = vcmask 254976   ;;  %vm1339_vm10 = vcmask 257025   ;;  %vm1341_vm11 = vcmask 253952  }
  0x38   : > { %s5490_s15 = scalar_lea.vmem [#allocation3], %s5487_s29  ;;  %s7094_s3 = sld [smem:[#allocation40_spill]]  ;;  %vm3264_vm12 = vsmask.f32 3328  ;;  %vm3265_vm13 = vsmask.f32 7440 }
  0x39   : > { %v4735_v8 = vld [vmem:[%s5490_s15] sm:$0xff]   ;;  %v4766_v9 = vld [vmem:[%s5490_s15 + $0x8] sm:$0xff]   ;;  %v4767_v10 = vld [vmem:[%s5490_s15 + $0x10] sm:$0xff]   ;;  %s5610_s17 = scalar_select %p555_p13, %s5447_s25, 1 }
  0x3a   : > { %v5495_v11 = vunpack.c.l.bf16 %v4735_v8  ;;  %v5497_v12 = vunpack.c.h.bf16 %v4735_v8  ;;  %v5499_v13 = vunpack.c.l.bf16 %v4766_v9  ;;  %v5501_v14 = vunpack.c.h.bf16 %v4766_v9  ;;  %v4768_v15 = vld [vmem:[%s5490_s15 + $0x18] sm:$0xff]   ;;  %v4769_v32 = vld [vmem:[%s5490_s15 + $0x20] sm:$0xff]   ;;  %v4770_v37 = vld [vmem:[%s5490_s15 + $0x28] sm:$0xff]   ;;  %s7095_s1 = sld [smem:[#allocation39_spill]]  ;;  %s7060_s0 = smov 96  }
  0x3b   : > { %v5504_v16 = vunpack.c.l.bf16 %v4767_v10  ;;  %v5506_v17 = vunpack.c.h.bf16 %v4767_v10  ;;  %v5508_v18 = vunpack.c.l.bf16 %v4768_v15  ;;  %v5510_v19 = vunpack.c.h.bf16 %v4768_v15  ;;  %v4771_v45 = vld [vmem:[%s5490_s15 + $0x30] sm:$0xff]   ;;  %v4772_v50 = vld [vmem:[%s5490_s15 + $0x38] sm:$0xff]   ;;  %s7059_s18 = sshll.u32 %s5610_s17, 6  ;;  %s7104_s5 = sld [smem:[#allocation42_spill]]  ;;  %vm6380_vm14 = vmor %vm3264_vm12, %vm3265_vm13 }
  0x3c   : > { %v608_v20 = vsel %vm607_vm0, %v5495_v11, 0.0  ;;  %v609_v21 = vsel %vm607_vm0, %v5497_v12, 0.0  ;;  %v611_v22 = vsel %vm607_vm0, %v5499_v13, 0.0  ;;  %v613_v23 = vsel %vm607_vm0, %v5501_v14, 0.0  ;;  %s7105_s4 = sld [smem:[#allocation41_spill]]  ;;  %s7106_s20 = smov 64  }
  0x3d   : > { %v610_v24 = vadd.f32 %v609_v21, %v608_v20  ;;  %v615_v25 = vsel %vm607_vm0, %v5504_v16, 0.0  ;;  %v617_v26 = vsel %vm607_vm0, %v5506_v17, 0.0  ;;  %v619_v27 = vsel %vm607_vm0, %v5508_v18, 0.0  ;;  %s7108_s6 = sld [smem:[#allocation43_spill]]  ;;  %s4732_s26 = sshll.u32 %s5447_s25, 10 }
  0x3e   : > { %v621_v28 = vsel %vm607_vm0, %v5510_v19, 0.0  ;;  %v654_v29 = vmul.f32 %v5495_v11, %v5495_v11  ;;  %v655_v30 = vmul.f32 %v5497_v12, %v5497_v12  ;;  %v656_v31 = vmul.f32 %v5499_v13, %v5499_v13  ;;  %s4267_s19 = scalar_lea.sflag [#allocation7], %s5484_s28 }
  0x3f   : > { %v612_v33 = vadd.f32 %v611_v22, %v610_v24  ;;  %v657_v34 = vmul.f32 %v5501_v14, %v5501_v14  ;;  %v658_v35 = vmul.f32 %v5504_v16, %v5504_v16  ;;  %v659_v36 = vmul.f32 %v5506_v17, %v5506_v17 }
  0x40   : > { %v660_v38 = vmul.f32 %v5508_v18, %v5508_v18  ;;  %v662_v39 = vsel %vm607_vm0, %v654_v29, 0.0  ;;  %v663_v40 = vsel %vm607_vm0, %v655_v30, 0.0  ;;  %v661_v42 = vmul.f32 %v5510_v19, %v5510_v19  ;;  %s559_s30 = scalar_lea.vmem %s7095_s1, %s7059_s18  ;;  %s5352_s1 = smov 32  }
  0x41   : > { %v614_v41 = vadd.f32 %v613_v23, %v612_v33  ;;  %v664_v43 = vadd.f32 %v663_v40, %v662_v39  ;;  %v665_v44 = vsel %vm607_vm0, %v656_v31, 0.0  ;;  %v667_v46 = vsel %vm607_vm0, %v657_v34, 0.0  ;;  %s6902_s18 = scalar_lea.vmem [#allocation6], %s5487_s29 }
  0x42   : > { %v669_v47 = vsel %vm607_vm0, %v658_v35, 0.0  ;;  %v671_v48 = vsel %vm607_vm0, %v659_v36, 0.0  ;;  %v673_v49 = vsel %vm607_vm0, %v660_v38, 0.0  ;;  %v4752_v53 = vunpack.c.l.bf16 %v4769_v32  ;;  %s4296_s15 = sshll.u32 %s6902_s18, 4  ;;  %s6944_s15 = int_to_ptr.vmem [resolvable:$true] %s4296_s15 }
  0x43   : > { %v616_v51 = vadd.f32 %v615_v25, %v614_v41  ;;  %v666_v52 = vadd.f32 %v665_v44, %v664_v43  ;;  %v4753_v54 = vunpack.c.h.bf16 %v4769_v32  ;;  %v4756_v55 = vunpack.c.l.bf16 %v4770_v37 }
  0x44   : > { %v4757_v56 = vunpack.c.h.bf16 %v4770_v37  ;;  %v4760_v57 = vunpack.c.l.bf16 %v4771_v45  ;;  %v4761_v58 = vunpack.c.h.bf16 %v4771_v45  ;;  %v675_v61 = vsel %vm607_vm0, %v661_v42, 0.0 }
  0x45   : > { %v618_v59 = vadd.f32 %v617_v26, %v616_v51  ;;  %v668_v60 = vadd.f32 %v667_v46, %v666_v52  ;;  %v631_v62 = vsel %vm607_vm0, %v4752_v53, 0.0  ;;  %v632_v63 = vsel %vm607_vm0, %v4753_v54, 0.0 }
  0x46   : > { %v634_v0 = vsel %vm607_vm0, %v4756_v55, 0.0  ;;  %v4764_v3 = vunpack.c.l.bf16 %v4772_v50  ;;  %v633_v4 = vadd.f32 %v632_v63, %v631_v62  ;;  %v636_v5 = vsel %vm607_vm0, %v4757_v56, 0.0 }
  0x47   : > { %v620_v1 = vadd.f32 %v619_v27, %v618_v59  ;;  %v670_v2 = vadd.f32 %v669_v47, %v668_v60  ;;  %v638_v6 = vsel %vm607_vm0, %v4760_v57, 0.0  ;;  %v640_v7 = vsel %vm607_vm0, %v4761_v58, 0.0 }
  0x48   : > { %v685_v8 = vmul.f32 %v4752_v53, %v4752_v53  ;;  %v635_v15 = vadd.f32 %v634_v0, %v633_v4  ;;  %v686_v20 = vmul.f32 %v4753_v54, %v4753_v54  ;;  %v4765_v21 = vunpack.c.h.bf16 %v4772_v50 }
  0x49   : > { %v5562_v9 = vadd.f32 %v621_v28, %v620_v1  ;;  %v672_v10 = vadd.f32 %v671_v48, %v670_v2  ;;  %v687_v22 = vmul.f32 %v4756_v55, %v4756_v55  ;;  %v688_v23 = vmul.f32 %v4757_v56, %v4757_v56 }
  0x4a   : > { %v637_v25 = vadd.f32 %v636_v5, %v635_v15  ;;  %v689_v26 = vmul.f32 %v4760_v57, %v4760_v57  ;;  %v690_v27 = vmul.f32 %v4761_v58, %v4761_v58  ;;  %v642_v29 = vsel %vm607_vm0, %v4764_v3, 0.0 }
  0x4b   : > { %623 = vadd.xlane.f32.xlu1 %v5562_v9  ;;  %v674_v24 = vadd.f32 %v673_v49, %v672_v10  ;;  %v693_v30 = vsel %vm607_vm0, %v685_v8, 0.0  ;;  %v694_v31 = vsel %vm607_vm0, %v686_v20, 0.0  ;;  %v696_v28 = vsel %vm607_vm0, %v687_v22, 0.0 }
  0x4c   : > { %v639_v33 = vadd.f32 %v638_v6, %v637_v25  ;;  %v695_v34 = vadd.f32 %v694_v31, %v693_v30  ;;  %v644_v35 = vsel %vm607_vm0, %v4765_v21, 0.0  ;;  %v691_v36 = vmul.f32 %v4764_v3, %v4764_v3 }
  0x4d   : > { %v676_v32 = vadd.f32 %v675_v61, %v674_v24  ;;  %v692_v37 = vmul.f32 %v4765_v21, %v4765_v21  ;;  %v698_v38 = vsel %vm607_vm0, %v688_v23, 0.0  ;;  %v700_v41 = vsel %vm607_vm0, %v689_v26, 0.0 }
  0x4e   : > { %v641_v39 = vadd.f32 %v640_v7, %v639_v33  ;;  %v697_v40 = vadd.f32 %v696_v28, %v695_v34  ;;  %v702_v42 = vsel %vm607_vm0, %v690_v27, 0.0  ;;  %v716_v43 = vmul.f32 %v4752_v53, %v5495_v11 }
  0x4f   : > { %677 = vadd.xlane.f32.xlu0 %v676_v32  ;;  %v717_v44 = vmul.f32 %v4753_v54, %v5497_v12  ;;  %v718_v45 = vmul.f32 %v4756_v55, %v5499_v13  ;;  %v719_v46 = vmul.f32 %v4757_v56, %v5501_v14  ;;  %v720_v49 = vmul.f32 %v4760_v57, %v5504_v16 }
  0x50   : > { %v643_v47 = vadd.f32 %v642_v29, %v641_v39  ;;  %v699_v48 = vadd.f32 %v698_v38, %v697_v40  ;;  %v721_v50 = vmul.f32 %v4761_v58, %v5506_v17  ;;  %v722_v51 = vmul.f32 %v4764_v3, %v5508_v18 }
  0x51   : > { %v724_v52 = vsel %vm607_vm0, %v716_v43, 0.0  ;;  %v725_v59 = vsel %vm607_vm0, %v717_v44, 0.0  ;;  %v727_v54 = vsel %vm607_vm0, %v718_v45, 0.0  ;;  %v704_v55 = vsel %vm607_vm0, %v691_v36, 0.0 }
  0x52   : > { %v645_v60 = vadd.f32 %v644_v35, %v643_v47  ;;  %v701_v53 = vadd.f32 %v700_v41, %v699_v48  ;;  %v726_v61 = vadd.f32 %v725_v59, %v724_v52  ;;  %v706_v56 = vsel %vm607_vm0, %v692_v37, 0.0 }
  0x53   : > { %v729_v62 = vsel %vm607_vm0, %v719_v46, 0.0  ;;  %v731_v57 = vsel %vm607_vm0, %v720_v49, 0.0  ;;  %v733_v0 = vsel %vm607_vm0, %v721_v50, 0.0  ;;  %v735_v1 = vsel %vm607_vm0, %v722_v51, 0.0 }
  0x54   : > { %646 = vadd.xlane.f32.xlu1 %v645_v60  ;;  %v703_v58 = vadd.f32 %v702_v42, %v701_v53  ;;  %v728_v63 = vadd.f32 %v727_v54, %v726_v61  ;;  %v723_v4 = vmul.f32 %v4765_v21, %v5510_v19  ;;  %v827_v20 = vsel %vm607_vm0, %v5495_v11, -inf }
  0x55   : > { %v828_v22 = vsel %vm607_vm0, %v5497_v12, -inf  ;;  %v829_v23 = vsel %vm607_vm0, %v5499_v13, -inf  ;;  %v830_v21 = vsel %vm607_vm0, %v5501_v14, -inf  ;;  %v831_v24 = vsel %vm607_vm0, %v5504_v16, -inf }
  0x56   : > { %v705_v2 = vadd.f32 %v704_v55, %v703_v58  ;;  %v730_v3 = vadd.f32 %v729_v62, %v728_v63  ;;  %v737_v8 = vsel %vm607_vm0, %v723_v4, 0.0  ;;  %v833_v25 = vsel %vm607_vm0, %v5506_v17, -inf }
  0x57   : > { %v835_v26 = vsel %vm607_vm0, %v5508_v18, -inf  ;;  %v837_v27 = vsel %vm607_vm0, %v5510_v19, -inf  ;;  %v832_v29 = vmax.f32 %v827_v20, %v831_v24  ;;  %v834_v30 = vmax.f32 %v828_v22, %v833_v25 }
  0x58   : > { %v707_v5 = vadd.f32 %v706_v56, %v705_v2  ;;  %v732_v6 = vadd.f32 %v731_v57, %v730_v3  ;;  %v836_v31 = vmax.f32 %v829_v23, %v835_v26  ;;  %v838_v28 = vmax.f32 %v830_v21, %v837_v27 }
  0x59   : > { %v839_v32 = vmax.f32 %v832_v29, %v834_v30 }
  0x5a   : > { %708 = vadd.xlane.f32.xlu0 %v707_v5  ;;  %v734_v7 = vadd.f32 %v733_v0, %v732_v6  ;;  %v840_v33 = vmax.f32 %v836_v31, %v838_v28 }
  0x5c   : > { %v736_v10 = vadd.f32 %v735_v1, %v734_v7  ;;  %v841_v34 = vmax.f32 %v839_v32, %v840_v33 }
  0x5e   : > { %v738_v15 = vadd.f32 %v737_v8, %v736_v10  ;;  %v842_v35 = vrot.slane %v841_v34, 4 }
  0x60   : > { %739 = vadd.xlane.f32.xlu0 %v738_v15  ;;  %v843_v36 = vmax.f32 %v841_v34, %v842_v35 }
  0x62   : > { %v844_v37 = vrot.slane %v843_v36, 2 }
  0x64   : > { %v845_v38 = vmax.f32 %v843_v36, %v844_v37 }
  0x66   : > { %v846_v39 = vrot.slane %v845_v38, 1 }
  0x68   : > { %v847_v40 = vmax.f32 %v845_v38, %v846_v39 }
  0x76   : > { %874 = vrot.lane.b32.xlu0 %v847_v40, %s7057_s16 }
  0xd8   : > { %v624_v41 = vpop.xlane.xlu1 %623 }
  0xd9   : > { %v625_v42 = vrot.slane %v624_v41, 4 }
  0xdb   : > { %v626_v43 = vadd.f32 %v625_v42, %v624_v41 }
  0xdc   : > { %v678_v44 = vpop.xlane.xlu0 %677 }
  0xdd   : > { %v679_v45 = vrot.slane %v678_v44, 4  ;;  %v627_v47 = vrot.slane %v626_v43, 2 }
  0xdf   : > { %v680_v46 = vadd.f32 %v679_v45, %v678_v44  ;;  %v628_v51 = vadd.f32 %v627_v47, %v626_v43 }
  0xe1   : > { %v681_v48 = vrot.slane %v680_v46, 2  ;;  %v647_v50 = vpop.xlane.xlu1 %646  ;;  %v629_v53 = vrot.slane %v628_v51, 1 }
  0xe2   : > { %v648_v59 = vrot.slane %v647_v50, 4 }
  0xe3   : > { %v682_v49 = vadd.f32 %v681_v48, %v680_v46  ;;  %v630_v57 = vadd.f32 %v629_v53, %v628_v51 }
  0xe4   : > { %v649_v56 = vadd.f32 %v648_v59, %v647_v50  ;;  %v886_v59 = vld [vmem:[%s7094_s3] sm:$0xff] }
  0xe5   : > { %v683_v52 = vrot.slane %v682_v49, 1  ;;  %v757_v1 = vmul.f32 %v630_v57, %v630_v57 }
  0xe6   : > { %v650_v63 = vrot.slane %v649_v56, 2 }
  0xe7   : > { %v684_v60 = vadd.f32 %v683_v52, %v682_v49  ;;  %v709_v61 = vpop.xlane.xlu0 %708  ;;  %v758_v5 = vmul.f32 0.00048828125, %v757_v1 }
  0xe8   : > { %v710_v55 = vrot.slane %v709_v61, 4  ;;  %v651_v3 = vadd.f32 %v650_v63, %v649_v56 }
  0xe9   : > { %v747_v54 = vmax.f32 %v684_v60, 1e-24 }
  0xea   : > { %v711_v62 = vadd.f32 %v710_v55, %v709_v61  ;;  %v652_v15 = vrot.slane %v651_v3, 1  ;;  %v5351_v61 = vmov 0.0|0.0  }
  0xeb   : > { %5225 = vrcp.f32 %v747_v54  ;;  %4969 = vmatprep.subr.bf16.mxu0 %v5351_v61  ;;  %4993 = vmatprep.subr.bf16.mxu1 %v5351_v61 }
  0xec   : > { %v712_v58 = vrot.slane %v711_v62, 2  ;;  %v653_v22 = vadd.f32 %v652_v15, %v651_v3  ;;  %v601_v3 = vld [vmem:[%s559_s30 + $0x10] sm:$0xff]  ;;  %v604_v15 = vld [vmem:[%s559_s30 + $0x28] sm:$0xff] }
  0xed   : > { %v740_v31 = vpop.xlane.xlu0 %739 }
  0xee   : > { %v713_v0 = vadd.f32 %v712_v58, %v711_v62  ;;  %v771_v23 = vmul.f32 %v653_v22, %v653_v22  ;;  %v741_v28 = vrot.slane %v740_v31, 4  ;;  %v749_v48 = vmul.f32 %v653_v22, %v630_v57  ;;  %v888_v62 = vld [vmem:[%s7094_s3 + $0x10] sm:$0xff]  ;;  %v889_v57 = vld [vmem:[%s7094_s3 + $0x18] sm:$0xff] }
  0xef   : > { %v4973_v63 = vpack.c.bf16 %v889_v57, %v888_v62  ;;  %v893_v22 = vld [vmem:[%s7094_s3 + $0x38] sm:$0xff] }
  0xf0   : > { %v714_v2 = vrot.slane %v713_v0, 1  ;;  %v772_v24 = vmul.f32 0.00048828125, %v771_v23  ;;  %v742_v33 = vadd.f32 %v741_v28, %v740_v31  ;;  %v750_v50 = vmul.f32 0.00048828125, %v749_v48  ;;  %v605_v23 = vld [vmem:[%s559_s30 + $0x30] sm:$0xff] }
  0xf1   : > { %v896_v48 = vld [vmem:[%s7094_s3 + $0x50] sm:$0xff] }
  0xf2   : > { %v715_v4 = vadd.f32 %v714_v2, %v713_v0  ;;  %v743_v36 = vrot.slane %v742_v33, 2  ;;  %v599_v0 = vld [vmem:[%s559_s30] sm:$0xff]  ;;  %v600_v2 = vld [vmem:[%s559_s30 + $0x8] sm:$0xff] }
  0xf4   : > { %v748_v7 = vmax.f32 %v715_v4, 1e-24  ;;  %v744_v43 = vadd.f32 %v743_v36, %v742_v33 }
  0xf5   : > { %v5226_v6 = vpop.eup %5225 }
  0xf6   : > { %v756_v8 = vmul.f32 %v5226_v6, %v684_v60  ;;  %v759_v10 = vmul.f32 %v5226_v6, %v758_v5  ;;  %5227 = vrcp.f32 %v748_v7  ;;  %v752_v37 = vmul.f32 %v748_v7, %v747_v54  ;;  %v887_v60 = vld [vmem:[%s7094_s3 + $0x8] sm:$0xff]  ;;  %v890_v5 = vld [vmem:[%s7094_s3 + $0x20] sm:$0xff]  ;;  %v892_v7 = vld [vmem:[%s7094_s3 + $0x30] sm:$0xff] }
  0xf7   : > { %v745_v49 = vrot.slane %v744_v43, 1  ;;  %v4970_v54 = vpack.c.bf16 %v887_v60, %v886_v59  ;;  %v891_v6 = vld [vmem:[%s7094_s3 + $0x28] sm:$0xff] }
  0xf8   : > { %v760_v20 = vsub.f32 %v756_v8, %v759_v10  ;;  %v602_v10 = vld [vmem:[%s559_s30 + $0x18] sm:$0xff] }
  0xf9   : > { %v746_v51 = vadd.f32 %v745_v49, %v744_v43  ;;  %4971 = vmatpush3.bf16.msra.mxu0 %v4970_v54  ;;  %v897_v49 = vld [vmem:[%s7094_s3 + $0x58] sm:$0xff] }
  0xfa   : > { %v761_v21 = vmax.f32 %v760_v20, 0.0  ;;  %4972 = vmatprep.subr.bf16.mxu0 %v5351_v61  ;;  %v4976_v20 = vpack.c.bf16 %v891_v6, %v890_v5  ;;  %v4985_v62 = vpack.c.bf16 %v897_v49, %v896_v48 }
  0xfb   : > { %v751_v53 = vsub.f32 %v746_v51, %v750_v50 }
  0xfc   : > { %5229 = vrsqrt.f32 %v761_v21  ;;  %vm764_vm1 = vcmp.eq.f32.partialorder %v761_v21, inf  ;;  %v767_v40 = vand.u32 2147483648, %v761_v21  ;;  %vm766_vm3 = vcmp.eq.f32.partialorder %v761_v21, 0.0 }
  0xfd   : > { %4974 = vmatpush3.bf16.msra.mxu0 %v4973_v63  ;;  %v898_v63 = vld [vmem:[%s7094_s3 + $0x60] sm:$0xff] }
  0xfe   : > { %4975 = vmatprep.subr.bf16.mxu0 %v5351_v61 }
 0x100   : > { %v5228_v25 = vpop.eup %5227 }
 0x101   : > { %v770_v26 = vmul.f32 %v5228_v25, %v715_v4  ;;  %v773_v27 = vmul.f32 %v5228_v25, %v772_v24  ;;  %v603_v4 = vld [vmem:[%s559_s30 + $0x20] sm:$0xff]  ;;  %4977 = vmatpush3.bf16.msra.mxu0 %v4976_v20 }
 0x102   : > { %4978 = vmatprep.subr.bf16.mxu0 %v5351_v61 }
 0x103   : > { %v774_v29 = vsub.f32 %v770_v26, %v773_v27  ;;  %v4979_v27 = vpack.c.bf16 %v893_v22, %v892_v7  ;;  %v900_v22 = vld [vmem:[%s7094_s3 + $0x70] sm:$0xff] }
 0x105   : > { %v775_v30 = vmax.f32 %v774_v29, 0.0  ;;  %v894_v29 = vld [vmem:[%s7094_s3 + $0x40] sm:$0xff]  ;;  %4980 = vmatpush3.bf16.msra.mxu0 %v4979_v27 }
 0x106   : > { %v5230_v32 = vpop.eup %5229  ;;  %4981 = vmatprep.subr.bf16.mxu0 %v5351_v61 }
 0x107   : > { %5231 = vrsqrt.f32 %v775_v30  ;;  %v763_v34 = vmul.f32 %v5230_v32, %v761_v21  ;;  %vm778_vm2 = vcmp.eq.f32.partialorder %v775_v30, inf  ;;  %v781_v41 = vand.u32 2147483648, %v775_v30 }
 0x108   : > { %vm780_vm4 = vcmp.eq.f32.partialorder %v775_v30, 0.0  ;;  %5233 = vrsqrt.f32 %v752_v37 }
 0x109   : > { %v765_v39 = vsel %vm764_vm1, %v761_v21, %v763_v34  ;;  %v606_v21 = vld [vmem:[%s559_s30 + $0x38] sm:$0xff]  ;;  %s7107_s30 = smov 96  }
 0x10a   : > { %v768_v44 = vsel %vm766_vm3, %v767_v40, %v765_v39 }
 0x111   : > { %v5232_v35 = vpop.eup %5231 }
 0x112   : > { %v777_v38 = vmul.f32 %v5232_v35, %v775_v30  ;;  %v5234_v52 = vpop.eup %5233 }
 0x113   : > { %v754_v55 = vmul.f32 %v5234_v52, %v751_v53 }
 0x114   : > { %v779_v42 = vsel %vm778_vm2, %v775_v30, %v777_v38  ;;  %v895_v30 = vld [vmem:[%s7094_s3 + $0x48] sm:$0xff] }
 0x115   : > { %v782_v45 = vsel %vm780_vm4, %v781_v41, %v779_v42  ;;  %v4982_v39 = vpack.c.bf16 %v895_v30, %v894_v29 }
 0x116   : > { %v783_v46 = vmul.f32 %v782_v45, %v768_v44 }
 0x117   : > { %4983 = vmatpush3.bf16.msra.mxu0 %v4982_v39 }
 0x118   : > { %v784_v47 = vadd.f32 1e-06, %v783_v46  ;;  %4984 = vmatprep.subr.bf16.mxu0 %v5351_v61 }
 0x11a   : > { %5235 = vrcp.f32 %v784_v47 }
 0x11b   : > { %4986 = vmatpush3.bf16.msra.mxu0 %v4985_v62 }
 0x11c   : > { %4987 = vmatprep.subr.bf16.mxu0 %v5351_v61 }
 0x124   : > { %v5236_v56 = vpop.eup %5235 }
 0x125   : > { %v786_v58 = vmul.f32 %v5236_v56, %v754_v55 }
 0x127   : > { %v787_v1 = vsub.f32 1.0, %v786_v58 }
 0x129   : > { %v788_v8 = vadd.f32 1.0, %v787_v1 }
 0x12b   : > { %v5646_v24 = vmul.f32 %v788_v8, %v601_v3  ;;  %v5648_v25 = vmul.f32 %v788_v8, %v599_v0  ;;  %v5650_v26 = vmul.f32 %v788_v8, %v600_v2  ;;  %v5658_v31 = vmul.f32 %v788_v8, %v603_v4  ;;  %v899_v0 = vld [vmem:[%s7094_s3 + $0x68] sm:$0xff] }
 0x12c   : > { %v5660_v28 = vmul.f32 %v788_v8, %v602_v10  ;;  %v5662_v32 = vmul.f32 %v788_v8, %v604_v15  ;;  %v5671_v35 = vmul.f32 %v788_v8, %v605_v23  ;;  %v5673_v36 = vmul.f32 %v788_v8, %v606_v21  ;;  %v901_v23 = vld [vmem:[%s7094_s3 + $0x78] sm:$0xff]  ;;  %s5357_s3 = smov [#allocation6]  }
 0x12d   : > { %7096 = vst [vmem:[#allocation11_spill] sm:$0xff] %v5646_v24  ;;  %7097 = vst [vmem:[#allocation12_spill] sm:$0xff] %v5648_v25  ;;  %1064 = vrot.lane.b32.xlu0 %v5646_v24, %s5352_s1  ;;  %v805_v33 = vsel %vm607_vm0, %v5648_v25, 0.0  ;;  %v806_v34 = vsel %vm607_vm0, %v5650_v26, 0.0  ;;  %v808_v38 = vsel %vm607_vm0, %v5646_v24, 0.0  ;;  %v848_v41 = vsel %vm607_vm0, %v5648_v25, -inf }
 0x12e   : > { %7098 = vst [vmem:[#allocation13_spill] sm:$0xff] %v5650_v26  ;;  %7099 = vst [vmem:[#allocation14_spill] sm:$0xff] %v5658_v31  ;;  %v807_v37 = vadd.f32 %v806_v34, %v805_v33  ;;  %v810_v40 = vsel %vm607_vm0, %v5660_v28, 0.0  ;;  %v849_v42 = vsel %vm607_vm0, %v5650_v26, -inf  ;;  %v850_v43 = vsel %vm607_vm0, %v5646_v24, -inf }
 0x12f   : > { %7100 = vst [vmem:[#allocation15_spill] sm:$0xff] %v5660_v28  ;;  %7101 = vst [vmem:[#allocation16_spill] sm:$0xff] %v5662_v32  ;;  %v851_v45 = vsel %vm607_vm0, %v5660_v28, -inf  ;;  %v852_v46 = vsel %vm607_vm0, %v5658_v31, -inf  ;;  %v854_v47 = vsel %vm607_vm0, %v5662_v32, -inf  ;;  %v856_v52 = vsel %vm607_vm0, %v5671_v35, -inf }
 0x130   : > { %7102 = vst [vmem:[#allocation17_spill] sm:$0xff] %v5671_v35  ;;  %7103 = vst [vmem:[#allocation18_spill] sm:$0xff] %v5673_v36  ;;  %v809_v44 = vadd.f32 %v808_v38, %v807_v37  ;;  %v853_v50 = vmax.f32 %v848_v41, %v852_v46  ;;  %v855_v51 = vmax.f32 %v849_v42, %v854_v47  ;;  %v858_v59 = vsel %vm607_vm0, %v5673_v36, -inf }
 0x131   : > { %1068 = vrot.lane.b32.xlu0 %v5658_v31, %s5352_s1  ;;  %v857_v53 = vmax.f32 %v850_v43, %v856_v52  ;;  %v859_v54 = vmax.f32 %v851_v45, %v858_v59  ;;  %v812_v55 = vsel %vm607_vm0, %v5658_v31, 0.0  ;;  %v814_v1 = vsel %vm607_vm0, %v5662_v32, 0.0  ;;  %v974_v43 = vld [vmem:[%s7104_s5] sm:$0xff] }
 0x132   : > { %v811_v60 = vadd.f32 %v810_v40, %v809_v44  ;;  %v860_v56 = vmax.f32 %v853_v50, %v855_v51  ;;  %v816_v4 = vsel %vm607_vm0, %v5671_v35, 0.0  ;;  %v4988_v5 = vpack.c.bf16 %v899_v0, %v898_v63  ;;  %v975_v44 = vld [vmem:[%s7104_s5 + $0x8] sm:$0xff] }
 0x133   : > { %v861_v58 = vmax.f32 %v857_v53, %v859_v54  ;;  %v818_v8 = vsel %vm607_vm0, %v5673_v36, 0.0  ;;  %v4991_v27 = vpack.c.bf16 %v901_v23, %v900_v22  ;;  %v5354_v33 = vmov 0.0  }
 0x134   : > { %v813_v57 = vadd.f32 %v812_v55, %v811_v60  ;;  %4989 = vmatpush3.bf16.msra.mxu0 %v4988_v5  ;;  %4923 = vmatprep.mubr.msk.f32.mxu0 %vm5353_vm5, %v5354_v33  ;;  %v4994_v45 = vpack.c.bf16 %v975_v44, %v974_v43  ;;  %v797_v46 = vrot.slane %v5562_v9, 4  ;;  %v875_v60 = vpop.permute.xlu0 %874  ;;  %v5055_v5 = vld [vmem:[%s7051_s7 + $0x18] sm:$0xff]  }
 0x135   : > { %1072 = vrot.lane.b32.xlu0 %v5671_v35, %s5352_s1  ;;  %v862_v3 = vmax.f32 %v860_v56, %v861_v58  ;;  %4990 = vmatprep.subr.bf16.mxu0 %v5351_v61  ;;  %v977_v56 = vld [vmem:[%s7104_s5 + $0x18] sm:$0xff]  ;;  %v902_v58 = vld [vmem:[%s7105_s4] sm:$0x1]  ;;  %s5258_s4 = sshll.u32 %s5357_s3, 4  ;;  %s5259_s4 = int_to_ptr.vmem [resolvable:$false] %s5258_s4 }
 0x136   : > { %v815_v2 = vadd.f32 %v814_v1, %v813_v57  ;;  %4934 = vmatprep.mubr.msk.f32.mxu1 %vm5353_vm5, %v5354_v33  ;;  %4995 = vmatpush3.bf16.msra.mxu1 %v4994_v45  ;;  %v798_v47 = vadd.f32 %v797_v46, %v5562_v9  ;;  %v976_v9 = vld [vmem:[%s7104_s5 + $0x10] sm:$0xff]  ;;  %v5052_v57 = vld [vmem:[%s7051_s7] sm:$0xff]   ;;  %s5260_s5 = scalar_lea.vmem %s5259_s4, 2048  ;;  %p5261_p3 = scmp.lt.s32.totalorder %s6944_s15, %s5259_s4 }
 0x137   : > { %v863_v7 = vrot.slane %v862_v3, 4  ;;  %4996 = vmatprep.subr.bf16.mxu1 %v5351_v61  ;;  %v4997_v62 = vpack.c.bf16 %v977_v56, %v976_v9 }
 0x138   : > { %v817_v6 = vadd.f32 %v816_v4, %v815_v2  ;;  %4992 = vmatpush3.bf16.msra.mxu0 %v4991_v27  ;;  %v799_v48 = vrot.slane %v798_v47, 2  ;;  %v5054_v4 = vld [vmem:[%s7051_s7 + $0x10] sm:$0xff]  }
 0x139   : > { %v864_v20 = vmax.f32 %v862_v3, %v863_v7  ;;  %v5053_v3 = vld [vmem:[%s7051_s7 + $0x8] sm:$0xff]  }
 0x13a   : > { %v819_v10 = vadd.f32 %v818_v8, %v817_v6  ;;  %v800_v49 = vadd.f32 %v799_v48, %v798_v47  ;;  %4998 = vmatpush3.bf16.msra.mxu1 %v4997_v62  ;;  %v5356_v6 = vmov 0  }
 0x13b   : > { %v865_v30 = vrot.slane %v864_v20, 2  ;;  %4937 = vmatprep.subr.bf16.mxu1 %v5052_v57  ;;  %1252 = vst.msk [vmem:[#allocation2 + $0x8] sm:$0xf] %vm1248_vm8, %v5356_v6  ;;  %1249 = vst.msk [vmem:[#allocation2] sm:$0xf] %vm1248_vm8, %v5356_v6 }
 0x13c   : > { %v820_v15 = vrot.slane %v819_v10, 4  ;;  %v801_v50 = vrot.slane %v800_v49, 1  ;;  %1253 = vst.msk [vmem:[#allocation2 + $0xc] sm:$0x3] %vm1250_vm9, %v5356_v6  ;;  %1251 = vst.msk [vmem:[#allocation2 + $0x4] sm:$0x3] %vm1250_vm9, %v5356_v6 }
 0x13d   : > { %v866_v38 = vmax.f32 %v864_v20, %v865_v30  ;;  %1254 = vst.msk [vmem:[#allocation2 + $0x10] sm:$0xf] %vm1248_vm8, %v5356_v6  ;;  %1256 = vst.msk [vmem:[#allocation2 + $0x18] sm:$0xf] %vm1248_vm8, %v5356_v6 }
 0x13e   : > { %v821_v21 = vadd.f32 %v820_v15, %v819_v10  ;;  %v802_v51 = vadd.f32 %v801_v50, %v800_v49  ;;  %1255 = vst.msk [vmem:[#allocation2 + $0x14] sm:$0x3] %vm1250_vm9, %v5356_v6  ;;  %1257 = vst.msk [vmem:[#allocation2 + $0x1c] sm:$0x3] %vm1250_vm9, %v5356_v6 }
 0x13f   : > { %v867_v41 = vrot.slane %v866_v38, 1  ;;  %1258 = vst.msk [vmem:[#allocation2 + $0x20] sm:$0xf] %vm1248_vm8, %v5356_v6  ;;  %1260 = vst.msk [vmem:[#allocation2 + $0x28] sm:$0xf] %vm1248_vm8, %v5356_v6 }
 0x140   : > { %v822_v29 = vrot.slane %v821_v21, 2  ;;  %v804_v52 = vmul.f32 0.015625, %v802_v51  ;;  %1259 = vst.msk [vmem:[#allocation2 + $0x24] sm:$0x3] %vm1250_vm9, %v5356_v6  ;;  %1261 = vst.msk [vmem:[#allocation2 + $0x2c] sm:$0x3] %vm1250_vm9, %v5356_v6 }
 0x141   : > { %v868_v42 = vmax.f32 %v866_v38, %v867_v41  ;;  %1262 = vst.msk [vmem:[#allocation2 + $0x30] sm:$0xf] %vm1248_vm8, %v5356_v6  ;;  %1264 = vst.msk [vmem:[#allocation2 + $0x38] sm:$0xf] %vm1248_vm8, %v5356_v6 }
 0x142   : > { %v823_v34 = vadd.f32 %v822_v29, %v821_v21  ;;  %1263 = vst.msk [vmem:[#allocation2 + $0x34] sm:$0x3] %vm1250_vm9, %v5356_v6  ;;  %1265 = vst.msk [vmem:[#allocation2 + $0x3c] sm:$0x3] %vm1250_vm9, %v5356_v6  ;;  %v1374_v8 = vld [vmem:[#allocation2 + $0x8] sm:$0xe] }
 0x143   : > { %1266 = vst.msk [vmem:[#allocation2 + $0x40] sm:$0xf] %vm1248_vm8, %v5356_v6  ;;  %1268 = vst.msk [vmem:[#allocation2 + $0x48] sm:$0xf] %vm1248_vm8, %v5356_v6  ;;  %v1359_v7 = vld [vmem:[#allocation2 + $0xc] sm:$0x1] }
 0x144   : > { %v824_v37 = vrot.slane %v823_v34, 1  ;;  %1267 = vst.msk [vmem:[#allocation2 + $0x44] sm:$0x3] %vm1250_vm9, %v5356_v6  ;;  %1269 = vst.msk [vmem:[#allocation2 + $0x4c] sm:$0x3] %vm1250_vm9, %v5356_v6  ;;  %v4472_v15 = vcombine.low %v1374_v8, %v1359_v7 }
 0x145   : > { %1270 = vst.msk [vmem:[#allocation2 + $0x50] sm:$0xf] %vm1248_vm8, %v5356_v6  ;;  %1272 = vst.msk [vmem:[#allocation2 + $0x58] sm:$0xf] %vm1248_vm8, %v5356_v6  ;;  %v1382_v10 = vld [vmem:[#allocation2 + $0xc] sm:$0x3] }
 0x146   : > { %v825_v39 = vadd.f32 %v824_v37, %v823_v34  ;;  %1271 = vst.msk [vmem:[#allocation2 + $0x54] sm:$0x3] %vm1250_vm9, %v5356_v6  ;;  %1273 = vst.msk [vmem:[#allocation2 + $0x5c] sm:$0x3] %vm1250_vm9, %v5356_v6  ;;  %v5057_v20 = vld [vmem:[#allocation2 + $0x8] ss:$0 sps:$4 sm:$0xff]   ;;  %v4480_v22 = vcombine.low %v1374_v8, %v1382_v10 }
 0x147   : > { %v5058_v23 = vld [vmem:[#allocation2] ss:$0 sps:$4 sm:$0xff]   ;;  %v1609_v21 = vshrl.u32 %v4472_v15, 16  ;;  %v1611_v27 = vshll.u32 %v4472_v15, 16  ;;  %v2128_v29 = vshrl.u32 %v5057_v20, 16  ;;  %v2131_v33 = vshll.u32 %v5057_v20, 16 }
 0x148   : > { %v826_v40 = vmul.f32 0.015625, %v825_v39  ;;  %v5059_v30 = vld [vmem:[#allocation2 + $0x8] sm:$0x1e]   ;;  %v2121_v34 = vshrl.u32 %v5058_v23, 16  ;;  %v1704_v41 = vrot.slane %v4480_v22, 1  ;;  %v2124_v45 = vshll.u32 %v5058_v23, 16 }
 0x149   : > { %v1613_v37 = vrot.slane %v1611_v27, 1  ;;  %v2130_v38 = vrot.slane %v2128_v29, 7  ;;  %v2240_v39 = vshrl.u32 %v5059_v30, 16  ;;  %v5061_v47 = vld [vmem:[#allocation2 + $0x8] sm:$0x3c]  }
 0x14a   : > { %870 = vrot.lane.b32.xlu1 %v826_v40, %s5352_s1  ;;  %v2242_v40 = vshll.u32 %v5059_v30, 16  ;;  %v2123_v48 = vrot.slane %v2121_v34, 7  ;;  %v2353_v51 = vshrl.u32 %v5061_v47, 16  ;;  %v978_v7 = vld [vmem:[%s7108_s6] sm:$0x1] }
 0x14b   : > { %v1614_v43 = vor.u32 %v1613_v37, %v1609_v21  ;;  %v2133_v44 = vor.u32 %v2131_v33, %v2130_v38 }
 0x14c   : > { %v2244_v46 = vrot.slane %v2242_v40, 1 }
 0x14d   : > { %1664 = vrot.lane.b32.xlu0 %v1614_v43, %s5352_s1 }
 0x14e   : > { %878 = vrot.lane.b32.xlu1 %v868_v42, %s7060_s0  ;;  %v5060_v42 = vld [vmem:[#allocation2] sm:$0x1e]   ;;  %v2245_v50 = vor.u32 %v2244_v46, %v2240_v39  ;;  %s5254_s0 = scalar_lea.vmem %s6944_s15, 1024 }
 0x14f   : > { %v2235_v49 = vshll.u32 %v5060_v42, 16  ;;  %p5255_p0 = scmp.ne.s32.totalorder %s6944_s15, %s5254_s0  ;;  %p5262_p4 = scmp.lt.s32.totalorder %s5260_s5, %s5254_s0 }
 0x151   : > { %1712 = vrot.lane.b32.xlu0 %v1704_v41, %s7106_s20  ;;  %p5256_p1 = pnand %p5255_p0, %p5465_p6  ;;  %p5263_p5 = por %p5262_p4, %p5261_p3 }
 0x152   : > { %1060 = vrot.lane.b32.xlu1 %v5648_v25, %s5352_s1  ;;  %v5210_v25 = vld [vmem:[%s7053_s9 + $0x38] sm:$0xff]  }
 0x153   : > { %p5257_p2 = pneg %p5256_p1 }
 0x155   : > { %p5264_p7 = pnand %p5263_p5, %p5257_p2 }
 0x156   : > { %1062 = vrot.lane.b32.xlu1 %v5650_v26, %s5352_s1  ;;  %v6213_v26 = vld [vmem:[#allocation2 + $0x48] ss:$0 sps:$4 sm:$0xff]  }
 0x15a   : > { %1066 = vrot.lane.b32.xlu1 %v5660_v28, %s5352_s1 }
 0x15e   : > { %1070 = vrot.lane.b32.xlu1 %v5662_v32, %s5352_s1 }
 0x162   : > { %1074 = vrot.lane.b32.xlu1 %v5673_v36, %s5352_s1  ;;  %v5153_v36 = vld [vmem:[#allocation2 + $0x40] ss:$0 sps:$4 sm:$0xff]  }
 0x163   : > { %v2661_v31 = vshrl.u32 %v5153_v36, 16 }
 0x166   : > { %2178 = vrot.lane.b32.xlu1 %v2133_v44, %s5352_s1 }
 0x16a   : > { %2290 = vrot.lane.b32.xlu1 %v2245_v50, %s7106_s20 }
 0x1bc   : > { %v871_v59 = vpop.permute.xlu1 %870 }
 0x1bd   : > { %v881_v61 = vsel %vm607_vm0, %v804_v52, %v871_v59  ;;  %v2356_v52 = vshll.u32 %v5061_v47, 16  ;;  %v5062_v59 = vld [vmem:[#allocation2] sm:$0x3c]  }
 0x1be   : > { %v883_v54 = vsel %vm882_vm6, %v881_v61, %v875_v60  ;;  %v2233_v61 = vshrl.u32 %v5060_v42, 16  ;;  %v2237_v60 = vrot.slane %v2235_v49, 1  ;;  %v2345_v56 = vshrl.u32 %v5062_v59, 16  ;;  %v1446_v49 = vld [vmem:[#allocation2 + $0x50] sm:$0xe] }
 0x1bf   : > { %v2348_v62 = vshll.u32 %v5062_v59, 16 }
 0x1c0   : > { %v879_v53 = vpop.permute.xlu1 %878 }
 0x1c1   : > { %v885_v55 = vsel %vm884_vm7, %v883_v54, %v879_v53  ;;  %v2355_v53 = vrot.slane %v2353_v51, 1  ;;  %v2358_v54 = vrot.slane %v2356_v52, 2  ;;  %v1437_v51 = vld [vmem:[#allocation2 + $0x50] sm:$0xf] }
 0x1c2   : > { %4924 = vmatmul.mubr.f32.vlgmr.msra.gmra.mrb[0].mxu0 %v885_v55  ;;  %v2126_v55 = vor.u32 %v2124_v45, %v2123_v48  ;;  %v1438_v48 = vld [vmem:[#allocation2 + $0x54] sm:$0x1] }
 0x1c3   : > { %v2359_v9 = vor.u32 %v2358_v54, %v2355_v53  ;;  %v4527_v50 = vcombine.low %v1446_v49, %v1438_v48  ;;  %v4519_v52 = vcombine.low %v1437_v51, %v1438_v48 }
 0x1c4   : > { %2176 = vrot.lane.b32.xlu0 %v2126_v55, %s5352_s1 }
 0x1c5   : > { %2410 = vrot.lane.b32.xlu1 %v2359_v9, %s7107_s30 }
 0x1c9   : > { %1966 = vrot.lane.b32.xlu1 %v4519_v52, %s7106_s20 }
 0x295   : > { %v969_v63 = vpop.f32.mrb[0].mxu0 }
 0x296   : > { %v970_v0 = vadd.f32 %v969_v63, %v902_v58  ;;  %v4925_v1 = vpop.f32.mrb[1].mxu0  ;;  %v2347_v58 = vrot.slane %v2345_v56, 1  ;;  %v2350_v63 = vrot.slane %v2348_v62, 2 }
 0x297   : > { %v1061_v1 = vpop.permute.xlu1 %1060 }
 0x298   : > { %v973_v2 = vmax.f32 %v970_v0, 0.0  ;;  %v2351_v0 = vor.u32 %v2350_v63, %v2347_v58  ;;  %v1084_v30 = vsel %vm607_vm0, %v5495_v11, %v1061_v1 }
 0x29a   : > { %4935 = vmatmul.mubr.msk.f32.vlgmr.msra.gmra.mrb[0].mxu1 %vm607_vm0, %v973_v2 }
 0x29b   : > { %4938 = vmatpush3.bf16.msra.mxu1 %v5052_v57  ;;  %v2238_v57 = vor.u32 %v2237_v60, %v2233_v61  ;;  %v1063_v2 = vpop.permute.xlu1 %1062  ;;  %v4443_v60 = vld [vmem:[%s7052_s8] ss:$0 sm:$0xff] }
 0x29c   : > { %4939 = vmatprep.subr.bf16.mxu1 %v5053_v3  ;;  %v1085_v33 = vsel %vm607_vm0, %v5497_v12, %v1063_v2 }
 0x29d   : > { %2288 = vrot.lane.b32.xlu0 %v2238_v57, %s7106_s20 }
 0x29f   : > { %4940 = vmatpush3.bf16.msra.mxu1 %v5053_v3  ;;  %v1092_v3 = vlaneseq }
 0x2a0   : > { %4941 = vmatprep.subr.bf16.mxu1 %v5054_v4 }
 0x2a1   : > { %2408 = vrot.lane.b32.xlu0 %v2351_v0, %s7107_s30  ;;  %v1093_v6 = vshrl.u32 %v1092_v3, 7 }
 0x2a3   : > { %4942 = vmatpush3.bf16.msra.mxu1 %v5054_v4  ;;  %v1065_v4 = vpop.permute.xlu0 %1064  ;;  %v1094_v8 = vsub.s32 0, %v1093_v6 }
 0x2a4   : > { %4943 = vmatprep.subr.bf16.mxu1 %v5055_v5  ;;  %v1086_v21 = vsel %vm607_vm0, %v5499_v13, %v1065_v4 }
 0x2a7   : > { %4944 = vmatpush3.bf16.msra.mxu1 %v5055_v5  ;;  %v1067_v5 = vpop.permute.xlu1 %1066  ;;  %v1069_v10 = vpop.permute.xlu0 %1068 }
 0x2a8   : > { %v1088_v27 = vsel %vm607_vm0, %v5504_v16, %v1069_v10  ;;  %v1087_v34 = vsel %vm607_vm0, %v5501_v14, %v1067_v5 }
 0x2ab   : > { %v1071_v20 = vpop.permute.xlu1 %1070  ;;  %v1073_v41 = vpop.permute.xlu0 %1072 }
 0x2ac   : > { %v1089_v37 = vsel %vm607_vm0, %v5506_v17, %v1071_v20  ;;  %v1090_v43 = vsel %vm607_vm0, %v5508_v18, %v1073_v41  ;;  %v2044_v18 = vshll.u32 %v4527_v50, 16 }
 0x2ae   : > { %v2046_v59 = vrot.slane %v2044_v18, 1 }
 0x2af   : > { %v1075_v17 = vpop.permute.xlu1 %1074 }
 0x2b0   : > { %v1091_v44 = vsel %vm607_vm0, %v5510_v19, %v1075_v17  ;;  %v2042_v19 = vshrl.u32 %v4527_v50, 16 }
 0x2b2   : > { %v2047_v61 = vor.u32 %v2046_v59, %v2042_v19 }
 0x2b4   : > { %2062 = vrot.lane.b32.xlu1 %v2047_v61, %s7107_s30 }
 0x36d   : > { %v1048_v15 = vpop.f32.mrb[0].mxu1 }
 0x36e   : > { %v1049_v22 = vadd.f32 %v1048_v15, %v978_v7  ;;  %v4936_v23 = vpop.f32.mrb[1].mxu1 }
 0x370   : > { %v1095_v29 = vrot.slane %v1049_v22, %v1094_v8 }
 0x372   : > { %v5822_v38 = vmul.f32 %v1095_v29, %v1084_v30  ;;  %v5824_v39 = vmul.f32 %v1095_v29, %v1085_v33  ;;  %v5826_v13 = vmul.f32 %v1095_v29, %v1086_v21  ;;  %v5828_v16 = vmul.f32 %v1095_v29, %v1087_v34 }
 0x373   : > { %v5830_v40 = vmul.f32 %v1095_v29, %v1088_v27  ;;  %v5832_v11 = vmul.f32 %v1095_v29, %v1089_v37  ;;  %v5847_v45 = vmul.f32 %v1095_v29, %v1090_v43  ;;  %v5849_v46 = vmul.f32 %v1095_v29, %v1091_v44 }
 0x374   : > { %7109 = vst [vmem:[#allocation19_spill] sm:$0xff] %v5822_v38  ;;  %7110 = vst [vmem:[#allocation20_spill] sm:$0xff] %v5824_v39  ;;  %v4720_v12 = vpack.c.bf16 %v5824_v39, %v5822_v38  ;;  %v4721_v14 = vpack.c.bf16 %v5828_v16, %v5826_v13  ;;  %v6246_v38 = vld [vmem:[#allocation2 + $0x30] ss:$0 sps:$4 sm:$0xff]  }
 0x375   : > { %7111 = vst [vmem:[#allocation21_spill] sm:$0xff] %v5826_v13  ;;  %7112 = vst [vmem:[#allocation22_spill] sm:$0xff] %v5828_v16  ;;  %v4722_v42 = vpack.c.bf16 %v5832_v11, %v5830_v40  ;;  %v4723_v47 = vpack.c.bf16 %v5849_v46, %v5847_v45  ;;  %v2668_v16 = vshrl.u32 %v6213_v26, 16 }
 0x376   : > { %7113 = vst [vmem:[#allocation23_spill] sm:$0xff] %v5830_v40  ;;  %7114 = vst [vmem:[#allocation24_spill] sm:$0xff] %v5832_v11  ;;  %4945 = vmatprep.mubr.msk.bf16.mxu1 %vm882_vm6, %v4720_v12 }
 0x377   : > { %4946 = vmatmul.mubr.msk.bf16.vlgmr.msra.gmra.mrb[4].mxu1 %vm882_vm6, %v4721_v14  ;;  %7115 = vst [vmem:[#allocation25_spill] sm:$0xff] %v5847_v45  ;;  %7116 = vst [vmem:[#allocation26_spill] sm:$0xff] %v5849_v46  ;;  %v6200_v45 = vld [vmem:[#allocation2 + $0x30] ss:$0 sps:$4 sm:$0xff]  }
 0x378   : > { %4949 = vmatprep.mubr.msk.bf16.mxu1 %vm882_vm6, %v4722_v42 }
 0x37f   : > { %4950 = vmatmul.mubr.msk.bf16.gmra.mrb[8].mxu1 %vm882_vm6, %v4723_v47 }
 0x44a   : > { %v4947_v53 = vpop.f32.mrb[4].mxu1 }
 0x44b   : > { %v1226_v54 = vadd.f32 %v4947_v53, %v4443_v60  ;;  %v1217_v55 = vpop.f32.mrb[5].mxu1 }
 0x44c   : > { %v1218_v9 = vadd.f32 %v4443_v60, %v1217_v55  ;;  %v4948_v56 = vpop.f32.mrb[6].mxu1 }
 0x44d   : > { %v4726_v62 = vpack.c.bf16 %v1226_v54, %v1226_v54  ;;  %v1229_v57 = vadd.f32 %v4948_v56, %v4443_v60  ;;  %v1220_v58 = vpop.f32.mrb[7].mxu1 }
 0x44e   : > { %v4724_v63 = vpack.c.bf16 %v1218_v9, %v1218_v9  ;;  %v1221_v0 = vadd.f32 %v4443_v60, %v1220_v58 }
 0x44f   : > { %v1310_v1 = vrot.slane %v4726_v62, 7  ;;  %v4727_v2 = vpack.c.bf16 %v1229_v57, %v1229_v57 }
 0x450   : > { %v1306_v3 = vrot.slane %v4724_v63, 7  ;;  %v4725_v4 = vpack.c.bf16 %v1221_v0, %v1221_v0 }
 0x451   : > { %v1311_v5 = vrot.slane %v1310_v1, 4  ;;  %1345 = vst.msk [vmem:[#allocation2 + $0x20] sm:$0xe] %vm1339_vm10, %v1310_v1  ;;  %v1312_v6 = vrot.slane %v4727_v2, 7 }
 0x452   : > { %v1307_v7 = vrot.slane %v1306_v3, 4  ;;  %1340 = vst.msk [vmem:[#allocation2 + $0x10] sm:$0xe] %vm1339_vm10, %v1306_v3  ;;  %v1308_v8 = vrot.slane %v4725_v4, 7  ;;  %v4951_v10 = vpop.f32.mrb[8].mxu1 }
 0x453   : > { %1346 = vst.msk [vmem:[#allocation2 + $0x24] sm:$0x1] %vm1341_vm11, %v1311_v5  ;;  %v1313_v15 = vrot.slane %v1312_v6, 4  ;;  %v1242_v20 = vadd.f32 %v4951_v10, %v4443_v60  ;;  %v1233_v22 = vpop.f32.mrb[9].mxu1 }
 0x454   : > { %1347 = vst.msk [vmem:[#allocation2 + $0x28] sm:$0xe] %vm1339_vm10, %v1312_v6  ;;  %v1309_v23 = vrot.slane %v1308_v8, 4  ;;  %1343 = vst.msk [vmem:[#allocation2 + $0x18] sm:$0xe] %vm1339_vm10, %v1308_v8  ;;  %v1234_v21 = vadd.f32 %v4443_v60, %v1233_v22  ;;  %v4952_v27 = vpop.f32.mrb[10].mxu1 }
 0x455   : > { %1342 = vst.msk [vmem:[#allocation2 + $0x14] sm:$0x1] %vm1341_vm11, %v1307_v7  ;;  %1348 = vst.msk [vmem:[#allocation2 + $0x2c] sm:$0x1] %vm1341_vm11, %v1313_v15  ;;  %v4730_v29 = vpack.c.bf16 %v1242_v20, %v1242_v20  ;;  %v1245_v30 = vadd.f32 %v4952_v27, %v4443_v60  ;;  %v1236_v33 = vpop.f32.mrb[11].mxu1 }
 0x456   : > { %1344 = vst.msk [vmem:[#allocation2 + $0x1c] sm:$0x1] %vm1341_vm11, %v1309_v23  ;;  %v4728_v34 = vpack.c.bf16 %v1234_v21, %v1234_v21  ;;  %v1237_v37 = vadd.f32 %v4443_v60, %v1236_v33 }
 0x457   : > { %v1318_v12 = vrot.slane %v4730_v29, 7  ;;  %v4731_v14 = vpack.c.bf16 %v1245_v30, %v1245_v30 }
 0x458   : > { %v1314_v41 = vrot.slane %v4728_v34, 7  ;;  %v4729_v17 = vpack.c.bf16 %v1237_v37, %v1237_v37  ;;  %v1425_v48 = vld [vmem:[#allocation2 + $0x20] sm:$0xf] }
 0x459   : > { %v1319_v42 = vrot.slane %v1318_v12, 4  ;;  %1353 = vst.msk [vmem:[#allocation2 + $0x40] sm:$0xe] %vm1339_vm10, %v1318_v12  ;;  %v1320_v43 = vrot.slane %v4731_v14, 7  ;;  %v5871_v52 = vld [vmem:[#allocation2 + $0x20] sm:$0xf] }
 0x45a   : > { %v1315_v44 = vrot.slane %v1314_v41, 4  ;;  %1349 = vst.msk [vmem:[#allocation2 + $0x30] sm:$0xe] %vm1339_vm10, %v1314_v41  ;;  %v1316_v47 = vrot.slane %v4729_v17, 7  ;;  %v1426_v49 = vld [vmem:[#allocation2 + $0x24] sm:$0x1] }
 0x45b   : > { %1354 = vst.msk [vmem:[#allocation2 + $0x44] sm:$0x1] %vm1341_vm11, %v1319_v42  ;;  %v1321_v50 = vrot.slane %v1320_v43, 4  ;;  %v4513_v51 = vcombine.low %v1425_v48, %v1426_v49  ;;  %v5873_v18 = vld [vmem:[#allocation2 + $0x24] sm:$0x1] }
 0x45c   : > { %1355 = vst.msk [vmem:[#allocation2 + $0x48] sm:$0xe] %vm1339_vm10, %v1320_v43  ;;  %v1317_v19 = vrot.slane %v1316_v47, 4  ;;  %1351 = vst.msk [vmem:[#allocation2 + $0x38] sm:$0xe] %vm1339_vm10, %v1316_v47  ;;  %v4490_v59 = vcombine.low %v5871_v52, %v5873_v18 }
 0x45d   : > { %1350 = vst.msk [vmem:[#allocation2 + $0x34] sm:$0x1] %vm1341_vm11, %v1315_v44  ;;  %v1377_v61 = vld [vmem:[#allocation2 + $0x20] sm:$0xe]  ;;  %v1385_v60 = vld [vmem:[#allocation2 + $0x24] sm:$0x3]  ;;  %1954 = vrot.lane.b32.xlu1 %v4513_v51, %s7106_s20 }
 0x45e   : > { %1356 = vst.msk [vmem:[#allocation2 + $0x4c] sm:$0x1] %vm1341_vm11, %v1321_v50  ;;  %v4483_v53 = vcombine.low %v1377_v61, %v1385_v60  ;;  %1352 = vst.msk [vmem:[#allocation2 + $0x3c] sm:$0x1] %vm1341_vm11, %v1317_v19  ;;  %1772 = vrot.lane.b32.xlu0 %v4490_v59, %s7107_s30  ;;  %v5883_v54 = vld [vmem:[#allocation2 + $0x14] sm:$0x1] }
 0x45f   : > { %v1390_v9 = vld [vmem:[#allocation2 + $0x10] sm:$0xf]  ;;  %v5886_v62 = vld [vmem:[#allocation2 + $0x2c] sm:$0x1]  ;;  %v5888_v57 = vld [vmem:[#allocation2 + $0x24] sm:$0x3] }
 0x460   : > { %v1707_v55 = vrot.slane %v4483_v53, 1  ;;  %v4488_v56 = vcombine.low %v1390_v9, %v5883_v54  ;;  %v5891_v58 = vld [vmem:[#allocation2 + $0x20] sm:$0xe]  ;;  %v1396_v63 = vld [vmem:[#allocation2 + $0x28] sm:$0xf] }
 0x461   : > { %v4506_v0 = vcombine.low %v5891_v58, %v5888_v57  ;;  %v4491_v1 = vcombine.low %v1396_v63, %v5886_v62  ;;  %v5897_v2 = vld [vmem:[#allocation2 + $0x10] sm:$0xe]  ;;  %v1383_v3 = vld [vmem:[#allocation2 + $0x14] sm:$0x3]  ;;  %v5901_v6 = vld [vmem:[#allocation2 + $0x2c] sm:$0x1] }
 0x462   : > { %1718 = vrot.lane.b32.xlu1 %v1707_v55, %s7106_s20  ;;  %1768 = vrot.lane.b32.xlu0 %v4488_v56, %s7107_s30  ;;  %v4481_v5 = vcombine.low %v5897_v2, %v1383_v3  ;;  %v1427_v7 = vld [vmem:[#allocation2 + $0x28] sm:$0xf]  ;;  %v5084_v15 = vld [vmem:[#allocation2 + $0x20] sm:$0x3c]   ;;  %v5905_v20 = vld [vmem:[#allocation2 + $0x1c] sm:$0x1] }
 0x463   : > { %v1890_v4 = vrot.slane %v4506_v0, 1  ;;  %v4514_v10 = vcombine.low %v1427_v7, %v5901_v6  ;;  %v5907_v22 = vld [vmem:[#allocation2 + $0x2c] sm:$0x3]  ;;  %v5910_v23 = vld [vmem:[#allocation2 + $0x14] sm:$0x3]  ;;  %v3008_v34 = vrot.slane %v5084_v15, 1 }
 0x464   : > { %v1705_v8 = vrot.slane %v4481_v5, 1  ;;  %v1392_v21 = vld [vmem:[#allocation2 + $0x18] sm:$0xf]  ;;  %v5913_v27 = vld [vmem:[#allocation2 + $0x28] sm:$0xe] }
 0x465   : > { %v4489_v29 = vcombine.low %v1392_v21, %v5905_v20  ;;  %v5916_v30 = vld [vmem:[#allocation2 + $0x10] sm:$0xe]  ;;  %v4507_v33 = vcombine.low %v5913_v27, %v5907_v22  ;;  %v5096_v12 = vld [vmem:[#allocation2 + $0x20] ss:$0 sps:$4 sm:$0xff]   ;;  %v1440_v14 = vld [vmem:[#allocation2 + $0x20] sm:$0xe] }
 0x466   : > { %1774 = vrot.lane.b32.xlu1 %v4491_v1, %s7107_s30  ;;  %1900 = vrot.lane.b32.xlu0 %v1890_v4, %s5352_s1  ;;  %v4504_v37 = vcombine.low %v5916_v30, %v5910_v23  ;;  %v4521_v41 = vcombine.low %v1440_v14, %v1426_v49  ;;  %v5095_v42 = vld [vmem:[#allocation2 + $0x28] sm:$0x3c]   ;;  %v1365_v43 = vld [vmem:[#allocation2 + $0x24] sm:$0x1]  ;;  %v2633_v47 = vshrl.u32 %v5096_v12, 16  ;;  %v2636_v0 = vshll.u32 %v5096_v12, 16 }
 0x467   : > { %v1891_v17 = vrot.slane %v4507_v33, 1  ;;  %v5924_v48 = vld [vmem:[#allocation2 + $0x1c] sm:$0x3]  ;;  %v5930_v51 = vld [vmem:[#allocation2 + $0x18] sm:$0xe]  ;;  %v4475_v59 = vcombine.low %v1377_v61, %v1365_v43  ;;  %v3009_v60 = vrot.slane %v5095_v42, 1 }
 0x468   : > { %v1888_v44 = vrot.slane %v4504_v37, 1  ;;  %v5927_v50 = vld [vmem:[#allocation2 + $0x1c] sm:$0x1]  ;;  %v2002_v19 = vshll.u32 %v4521_v41, 16  ;;  %v1423_v49 = vld [vmem:[#allocation2 + $0x18] sm:$0xf]  ;;  %v4505_v53 = vcombine.low %v5930_v51, %v5924_v48 }
 0x469   : > { %v4512_v55 = vcombine.low %v1423_v49, %v5927_v50  ;;  %v2635_v9 = vrot.slane %v2633_v47, 7  ;;  %v5102_v56 = vld [vmem:[#allocation2 + $0x20] ss:$0 sps:$4 sm:$0xff]   ;;  %v1386_v63 = vld [vmem:[#allocation2 + $0x2c] sm:$0x3]  ;;  %v1632_v61 = vshll.u32 %v4475_v59, 16 }
 0x46a   : > { %1714 = vrot.lane.b32.xlu1 %v1705_v8, %s7106_s20  ;;  %1956 = vrot.lane.b32.xlu0 %v4514_v10, %s7106_s20  ;;  %v5937_v1 = vld [vmem:[#allocation2 + $0x28] sm:$0xe]  ;;  %v2004_v3 = vrot.slane %v2002_v19, 1  ;;  %v1889_v4 = vrot.slane %v4505_v53, 1  ;;  %v5105_v5 = vld [vmem:[#allocation2 + $0x28] ss:$0 sps:$4 sm:$0xff]  }
 0x46b   : > { %v2638_v7 = vor.u32 %v2636_v0, %v2635_v9  ;;  %v4484_v8 = vcombine.low %v5937_v1, %v1386_v63  ;;  %v2149_v10 = vshrl.u32 %v5102_v56, 16  ;;  %v2000_v15 = vshrl.u32 %v4521_v41, 16  ;;  %v1361_v21 = vld [vmem:[#allocation2 + $0x14] sm:$0x1]  ;;  %v5107_v37 = vld [vmem:[#allocation2 + $0x28] ss:$0 sps:$4 sm:$0xff]  }
 0x46c   : > { %v1634_v33 = vrot.slane %v1632_v61, 1  ;;  %v1630_v42 = vshrl.u32 %v4475_v59, 16  ;;  %v1384_v43 = vld [vmem:[#allocation2 + $0x1c] sm:$0x3]  ;;  %v2152_v41 = vshll.u32 %v5102_v56, 16  ;;  %v4473_v47 = vcombine.low %v5897_v2, %v1361_v21 }
 0x46d   : > { %v1708_v12 = vrot.slane %v4484_v8, 1  ;;  %v2151_v14 = vrot.slane %v2149_v10, 7  ;;  %v5947_v49 = vld [vmem:[#allocation2 + $0x18] sm:$0xe]  ;;  %v2156_v53 = vshrl.u32 %v5107_v37, 16  ;;  %v2643_v59 = vshll.u32 %v5105_v5, 16 }
 0x46e   : > { %1770 = vrot.lane.b32.xlu1 %v4489_v29, %s7107_s30  ;;  %3016 = vrot.lane.b32.xlu0 %v3008_v34, %s5352_s1  ;;  %v2005_v29 = vor.u32 %v2004_v3, %v2000_v15  ;;  %v2640_v34 = vshrl.u32 %v5105_v5, 16  ;;  %v1635_v19 = vor.u32 %v1634_v33, %v1630_v42  ;;  %v4482_v9 = vcombine.low %v5947_v49, %v1384_v43  ;;  %v1497_v0 = vld [vmem:[#allocation2 + $0x20] sm:$0xc]  ;;  %v5152_v35 = vld [vmem:[#allocation2 + $0x38] sm:$0x3c]  }
 0x46f   : > { %v2158_v3 = vrot.slane %v2156_v53, 7  ;;  %v1618_v2 = vshll.u32 %v4473_v47, 16  ;;  %v2159_v8 = vshll.u32 %v5107_v37, 16  ;;  %v1616_v42 = vshrl.u32 %v4473_v47, 16 }
 0x470   : > { %v1706_v61 = vrot.slane %v4482_v9, 1  ;;  %v4499_v37 = vcombine.low %v5913_v27, %v5886_v62  ;;  %v1498_v9 = vld [vmem:[#allocation2 + $0x28] sm:$0xc]  ;;  %v4496_v62 = vcombine.low %v5916_v30, %v5883_v54 }
 0x471   : > { %v2161_v15 = vor.u32 %v2159_v8, %v2158_v3  ;;  %v1620_v21 = vrot.slane %v1618_v2, 1  ;;  %v4571_v47 = vcombine.low %v1498_v9, %v5907_v22  ;;  %v1495_v2 = vld [vmem:[#allocation2 + $0x10] sm:$0xc]  ;;  %v5113_v8 = vld [vmem:[#allocation2 + $0x28] sm:$0x1e]  }
 0x472   : > { %1902 = vrot.lane.b32.xlu1 %v1891_v17, %s5352_s1  ;;  %1896 = vrot.lane.b32.xlu0 %v1888_v44, %s5352_s1  ;;  %v5106_v17 = vld [vmem:[#allocation2 + $0x10] ss:$0 sps:$4 sm:$0xff]   ;;  %v4498_v44 = vcombine.low %v5891_v58, %v5873_v18  ;;  %v5108_v58 = vld [vmem:[#allocation2 + $0x18] ss:$0 sps:$4 sm:$0xff]  }
 0x473   : > { %v2135_v63 = vshrl.u32 %v5106_v17, 16  ;;  %v2138_v10 = vshll.u32 %v5106_v17, 16  ;;  %v1621_v43 = vor.u32 %v1620_v21, %v1616_v42  ;;  %v1811_v21 = vshll.u32 %v4496_v62, 16 }
 0x474   : > { %v1825_v18 = vshll.u32 %v4498_v44, 16 }
 0x476   : > { %3018 = vrot.lane.b32.xlu1 %v3009_v60, %s5352_s1  ;;  %1952 = vrot.lane.b32.xlu0 %v4512_v55, %s7106_s20  ;;  %v2642_v60 = vrot.slane %v2640_v34, 7  ;;  %v2154_v55 = vor.u32 %v2152_v41, %v2151_v14  ;;  %v1827_v5 = vrot.slane %v1825_v18, 1  ;;  %v5109_v14 = vld [vmem:[#allocation2 + $0x20] sm:$0x1e]  }
 0x477   : > { %v2263_v53 = vshll.u32 %v5109_v14, 16  ;;  %v5967_v18 = vld [vmem:[#allocation2 + $0x44] sm:$0x1]  ;;  %v2261_v22 = vshrl.u32 %v5109_v14, 16  ;;  %v2270_v14 = vshll.u32 %v5113_v8, 16 }
 0x478   : > { %v2645_v56 = vor.u32 %v2643_v59, %v2642_v60 }
 0x47a   : > { %1898 = vrot.lane.b32.xlu1 %v1889_v4, %s5352_s1  ;;  %2688 = vrot.lane.b32.xlu0 %v2638_v7, %s7107_s30  ;;  %v4570_v4 = vcombine.low %v1497_v0, %v5888_v57  ;;  %v2137_v7 = vrot.slane %v2135_v63, 7  ;;  %v1823_v57 = vshrl.u32 %v4498_v44, 16  ;;  %v2145_v63 = vshll.u32 %v5108_v58, 16 }
 0x47b   : > { %v1832_v44 = vshll.u32 %v4499_v37, 16  ;;  %v2265_v0 = vrot.slane %v2263_v53, 1 }
 0x47c   : > { %v2140_v33 = vor.u32 %v2138_v10, %v2137_v7  ;;  %v2545_v34 = vshrl.u32 %v4570_v4, 16  ;;  %v5959_v17 = vor.u32 %v1827_v5, %v1823_v57  ;;  %v2556_v7 = vshll.u32 %v4571_v47, 16 }
 0x47d   : > { %v1834_v30 = vrot.slane %v1832_v44, 1  ;;  %v2266_v10 = vor.u32 %v2265_v0, %v2261_v22  ;;  %v1813_v57 = vrot.slane %v1811_v21, 1  ;;  %v5116_v0 = vld [vmem:[#allocation2 + $0x10] sm:$0x3c]  }
 0x47e   : > { %2050 = vrot.lane.b32.xlu1 %v2005_v29, %s7107_s30  ;;  %1720 = vrot.lane.b32.xlu0 %v1708_v12, %s7106_s20  ;;  %v2142_v29 = vshrl.u32 %v5108_v58, 16  ;;  %v2548_v12 = vshll.u32 %v4570_v4, 16  ;;  %v1433_v58 = vld [vmem:[#allocation2 + $0x40] sm:$0xf]  ;;  %v2553_v4 = vshrl.u32 %v4571_v47, 16 }
 0x47f   : > { %v4517_v54 = vcombine.low %v1433_v58, %v5967_v18 }
 0x480   : > { %v2144_v41 = vrot.slane %v2142_v29, 7  ;;  %v2550_v60 = vrot.slane %v2548_v12, 2  ;;  %v1830_v29 = vshrl.u32 %v4499_v37, 16  ;;  %v2558_v12 = vrot.slane %v2556_v7, 2  ;;  %v1441_v37 = vld [vmem:[#allocation2 + $0x28] sm:$0xe] }
 0x481   : > { %v1367_v7 = vld [vmem:[#allocation2 + $0x2c] sm:$0x1] }
 0x482   : > { %1670 = vrot.lane.b32.xlu1 %v1635_v19, %s5352_s1  ;;  %2184 = vrot.lane.b32.xlu0 %v2154_v55, %s5352_s1  ;;  %v2547_v19 = vrot.slane %v2545_v34, 1  ;;  %v5112_v55 = vld [vmem:[#allocation2 + $0x20] sm:$0x3c]   ;;  %v2147_v27 = vor.u32 %v2145_v63, %v2144_v41  ;;  %v5975_v34 = vor.u32 %v1834_v30, %v1830_v29  ;;  %v2364_v30 = vshll.u32 %v5116_v0, 16 }
 0x483   : > { %v2380_v3 = vshll.u32 %v5112_v55, 16  ;;  %v4476_v29 = vcombine.low %v5937_v1, %v1367_v7 }
 0x484   : > { %v2551_v59 = vor.u32 %v2550_v60, %v2547_v19  ;;  %v5114_v19 = vld [vmem:[#allocation2 + $0x10] sm:$0x1e]   ;;  %v1809_v60 = vshrl.u32 %v4496_v62, 16  ;;  %v4497_v62 = vcombine.low %v5930_v51, %v5905_v20 }
 0x485   : > { %v2382_v5 = vrot.slane %v2380_v3, 2  ;;  %v4522_v3 = vcombine.low %v1441_v37, %v5901_v6  ;;  %v5175_v6 = vld [vmem:[%s7053_s9 + $0xc0] sm:$0xff]   ;;  %v1639_v37 = vshll.u32 %v4476_v29, 16 }
 0x486   : > { %2690 = vrot.lane.b32.xlu1 %v2645_v56, %s7107_s30  ;;  %1716 = vrot.lane.b32.xlu0 %v1706_v61, %s7106_s20  ;;  %v2377_v56 = vshrl.u32 %v5112_v55, 16  ;;  %v4568_v61 = vcombine.low %v1495_v2, %v5910_v23  ;;  %v5115_v23 = vld [vmem:[#allocation2 + $0x28] sm:$0x3c]   ;;  %v2272_v55 = vrot.slane %v2270_v14, 1  ;;  %v5980_v47 = vor.u32 %v1813_v57, %v1809_v60 }
 0x487   : > { %v2385_v9 = vshrl.u32 %v5115_v23, 16  ;;  %v2388_v63 = vshll.u32 %v5115_v23, 16  ;;  %v1818_v21 = vshll.u32 %v4497_v62, 16  ;;  %4843 = vmatprep.subr.bf16.mxu0 %v5175_v6  ;;  %v2366_v14 = vrot.slane %v2364_v30, 2  ;;  %v1429_v23 = vld [vmem:[#allocation2 + $0x30] sm:$0xf] }
 0x488   : > { %v2532_v41 = vshll.u32 %v4568_v61, 16  ;;  %v1816_v1 = vshrl.u32 %v4497_v62, 16  ;;  %v1637_v62 = vshrl.u32 %v4476_v29, 16 }
 0x489   : > { %v2387_v22 = vrot.slane %v2385_v9, 1  ;;  %v2390_v58 = vrot.slane %v2388_v63, 2  ;;  %v1820_v57 = vrot.slane %v1818_v21, 1  ;;  %v6018_v21 = vpop.permute.xlu0 %1664 }
 0x48a   : > { %2186 = vrot.lane.b32.xlu1 %v2161_v15, %s5352_s1  ;;  %2180 = vrot.lane.b32.xlu0 %v2140_v33, %s5352_s1  ;;  %v2379_v15 = vrot.slane %v2377_v56, 1  ;;  %v2555_v33 = vrot.slane %v2553_v4, 1  ;;  %v2534_v44 = vrot.slane %v2532_v41, 2  ;;  %v2268_v56 = vshrl.u32 %v5113_v8, 16  ;;  %v1496_v8 = vld [vmem:[#allocation2 + $0x18] sm:$0xc] }
 0x48b   : > { %v4569_v20 = vcombine.low %v1496_v8, %v5924_v48  ;;  %v2391_v51 = vor.u32 %v2390_v58, %v2387_v22  ;;  %v5121_v48 = vld [vmem:[#allocation2 + $0x18] sm:$0x1e]   ;;  %v6004_v9 = vor.u32 %v1820_v57, %v1816_v1  ;;  %v1402_v8 = vld [vmem:[#allocation2 + $0x40] sm:$0xf]  ;;  %v6035_v1 = vld [vmem:[#allocation2 + $0x4c] sm:$0x1] }
 0x48c   : > { %v2383_v42 = vor.u32 %v2382_v5, %v2379_v15  ;;  %v2559_v53 = vor.u32 %v2558_v12, %v2555_v33  ;;  %v2273_v2 = vor.u32 %v2272_v55, %v2268_v56  ;;  %v5993_v15 = vld [vmem:[#allocation2 + $0x34] sm:$0x1]  ;;  %v2009_v5 = vshll.u32 %v4522_v3, 16  ;;  %v1363_v22 = vld [vmem:[#allocation2 + $0x1c] sm:$0x1] }
 0x48d   : > { %v2540_v41 = vshll.u32 %v4569_v20, 16  ;;  %v2007_v55 = vshrl.u32 %v4522_v3, 16  ;;  %v2254_v6 = vshrl.u32 %v5121_v48, 16 }
 0x48e   : > { %1666 = vrot.lane.b32.xlu1 %v1621_v43, %s5352_s1  ;;  %2492 = vrot.lane.b32.xlu0 %v5959_v17, %s5352_s1  ;;  %v2529_v43 = vshrl.u32 %v4568_v61, 16  ;;  %v2011_v60 = vrot.slane %v2009_v5, 1 }
 0x490   : > { %v2012_v56 = vor.u32 %v2011_v60, %v2007_v55  ;;  %v6032_v60 = vpop.permute.xlu0 %1712  ;;  %v5179_v55 = vld [vmem:[%s7053_s9 + $0xc8] sm:$0xff]  }
 0x492   : > { %2182 = vrot.lane.b32.xlu1 %v2147_v27, %s5352_s1  ;;  %2596 = vrot.lane.b32.xlu0 %v2551_v59, %s7106_s20  ;;  %v2531_v27 = vrot.slane %v2529_v43, 1  ;;  %v2249_v59 = vshll.u32 %v5114_v19, 16  ;;  %v2537_v43 = vshrl.u32 %v4569_v20, 16 }
 0x494   : > { %v2535_v4 = vor.u32 %v2534_v44, %v2531_v27  ;;  %v2251_v61 = vrot.slane %v2249_v59, 1  ;;  %v2539_v63 = vrot.slane %v2537_v43, 1  ;;  %v2542_v27 = vrot.slane %v2540_v41, 2  ;;  %v5122_v59 = vld [vmem:[#allocation2 + $0x18] sm:$0x3c]  }
 0x495   : > { %v2256_v44 = vshll.u32 %v5121_v48, 16 }
 0x496   : > { %1962 = vrot.lane.b32.xlu1 %v4517_v54, %s7106_s20  ;;  %2296 = vrot.lane.b32.xlu0 %v2266_v10, %s7106_s20  ;;  %v2361_v54 = vshrl.u32 %v5116_v0, 16  ;;  %v2247_v10 = vshrl.u32 %v5114_v19, 16  ;;  %v2543_v58 = vor.u32 %v2542_v27, %v2539_v63  ;;  %v6040_v27 = vld [vmem:[#allocation2 + $0x34] sm:$0x1] }
 0x497   : > { %v2258_v3 = vrot.slane %v2256_v44, 1 }
 0x498   : > { %v2252_v33 = vor.u32 %v2251_v61, %v2247_v10  ;;  %v2363_v12 = vrot.slane %v2361_v54, 1  ;;  %v2372_v61 = vshll.u32 %v5122_v59, 16  ;;  %v4474_v54 = vcombine.low %v5947_v49, %v1363_v22  ;;  %v6016_v10 = vpop.permute.xlu1 %2178  ;;  %v6048_v22 = vld [vmem:[#allocation2 + $0x30] sm:$0xe] }
 0x499   : > { %v2259_v20 = vor.u32 %v2258_v3, %v2254_v6  ;;  %v5183_v3 = vld [vmem:[%s7053_s9 + $0xd0] sm:$0xff]   ;;  %v6069_v6 = vld [vmem:[#allocation2 + $0x40] sm:$0xe] }
 0x49a   : > { %2494 = vrot.lane.b32.xlu1 %v5975_v34, %s5352_s1  ;;  %2416 = vrot.lane.b32.xlu0 %v2383_v42, %s7107_s30  ;;  %v4515_v42 = vcombine.low %v1429_v23, %v5993_v15  ;;  %v2367_v19 = vor.u32 %v2366_v14, %v2363_v12  ;;  %v2374_v5 = vrot.slane %v2372_v61, 2  ;;  %v1389_v12 = vld [vmem:[#allocation2 + $0x44] sm:$0x3]  ;;  %v6023_v23 = vld [vmem:[#allocation2 + $0x40] sm:$0xe]  ;;  %v5185_v61 = vld [vmem:[%s7053_s9 + $0x48] sm:$0xff]  }
 0x49b   : > { %v4487_v43 = vcombine.low %v6023_v23, %v1389_v12  ;;  %v5188_v12 = vld [vmem:[%s7053_s9 + $0x98] sm:$0xff]  }
 0x49d   : > { %v1711_v63 = vrot.slane %v4487_v43, 1 }
 0x49e   : > { %2598 = vrot.lane.b32.xlu1 %v2559_v53, %s7106_s20  ;;  %2488 = vrot.lane.b32.xlu0 %v5980_v47, %s5352_s1  ;;  %v6001_v53 = vld [vmem:[#allocation2 + $0x18] sm:$0xe] }
 0x49f   : > { %v4520_v0 = vcombine.low %v6001_v53, %v5927_v50  ;;  %v6013_v50 = vld [vmem:[#allocation2 + $0x44] sm:$0x1] }
 0x4a0   : > { %v4494_v29 = vcombine.low %v1402_v8, %v6013_v50 }
 0x4a1   : > { %v1995_v7 = vshll.u32 %v4520_v0, 16  ;;  %v1993_v14 = vshrl.u32 %v4520_v0, 16  ;;  %v6042_v0 = vld [vmem:[#allocation2 + $0x44] sm:$0x3] }
 0x4a2   : > { %2298 = vrot.lane.b32.xlu1 %v2273_v2, %s7106_s20  ;;  %2592 = vrot.lane.b32.xlu0 %v2535_v4, %s7106_s20  ;;  %v1641_v2 = vrot.slane %v1639_v37, 1  ;;  %v2369_v4 = vshrl.u32 %v5122_v59, 16  ;;  %v1623_v37 = vshrl.u32 %v4474_v54, 16  ;;  %v1404_v59 = vld [vmem:[#allocation2 + $0x48] sm:$0xf] }
 0x4a3   : > { %v1997_v49 = vrot.slane %v1995_v7, 1  ;;  %v4495_v7 = vcombine.low %v1404_v59, %v6035_v1 }
 0x4a4   : > { %v1642_v30 = vor.u32 %v1641_v2, %v1637_v62  ;;  %v5180_v2 = vld [vmem:[%s7053_s9 + $0x88] sm:$0xff]   ;;  %v5181_v62 = vld [vmem:[%s7053_s9 + $0x40] sm:$0xff]  }
 0x4a5   : > { %v1998_v41 = vor.u32 %v1997_v49, %v1993_v14  ;;  %4803 = vmatprep.subr.bf16.mxu1 %v5181_v62  ;;  %v5186_v49 = vld [vmem:[%s7053_s9 + $0x8] sm:$0xff]   ;;  %v5193_v62 = vld [vmem:[%s7053_s9 + $0xa0] sm:$0xff]  }
 0x4a6   : > { %2418 = vrot.lane.b32.xlu1 %v2391_v51, %s7107_s30  ;;  %2292 = vrot.lane.b32.xlu0 %v2252_v33, %s7106_s20  ;;  %v2371_v51 = vrot.slane %v2369_v4, 1  ;;  %v1625_v33 = vshll.u32 %v4474_v54, 16  ;;  %v5184_v4 = vld [vmem:[%s7053_s9 + $0x90] sm:$0xff]  }
 0x4a8   : > { %v2375_v57 = vor.u32 %v2374_v5, %v2371_v51  ;;  %v1627_v48 = vrot.slane %v1625_v33, 1  ;;  %v6075_v51 = vpop.permute.xlu0 %2176  ;;  %v5189_v33 = vld [vmem:[%s7053_s9 + $0x50] sm:$0xff]  }
 0x4aa   : > { %1958 = vrot.lane.b32.xlu1 %v4515_v42, %s7106_s20  ;;  %2412 = vrot.lane.b32.xlu0 %v2367_v19, %s7107_s30  ;;  %v5176_v42 = vld [vmem:[%s7053_s9 + $0x80] sm:$0xff]   ;;  %v6029_v19 = vpop.permute.xlu1 %2290  ;;  %v1628_v44 = vor.u32 %v1627_v48, %v1623_v37  ;;  %v6098_v48 = vld [vmem:[#allocation2 + $0x4c] sm:$0x3]  ;;  %v5191_v37 = vld [vmem:[%s7053_s9 + $0x10] sm:$0xff]  }
 0x4ab   : > { %4844 = vmatpush3.bf16.msra.mxu0 %v5176_v42 }
 0x4ac   : > { %4845 = vmatprep.subr.bf16.mxu0 %v5179_v55  ;;  %v1435_v55 = vld [vmem:[#allocation2 + $0x48] sm:$0xf]  ;;  %v6109_v59 = vpop.permute.xlu0 %2288 }
 0x4ae   : > { %2490 = vrot.lane.b32.xlu1 %v6004_v9, %s5352_s1  ;;  %2052 = vrot.lane.b32.xlu0 %v2012_v56, %s7107_s30  ;;  %v1387_v56 = vld [vmem:[#allocation2 + $0x34] sm:$0x3]  ;;  %v6066_v54 = vpop.permute.xlu1 %2410 }
 0x4af   : > { %4846 = vmatpush3.bf16.msra.mxu0 %v5180_v2  ;;  %v4485_v8 = vcombine.low %v6048_v22, %v1387_v56  ;;  %v1400_v56 = vld [vmem:[#allocation2 + $0x38] sm:$0xf]  ;;  %v6112_v2 = vld [vmem:[#allocation2 + $0x48] sm:$0xe] }
 0x4b0   : > { %4847 = vmatprep.subr.bf16.mxu0 %v5183_v3  ;;  %v5138_v3 = vld [vmem:[#allocation2 + $0x40] sm:$0x3c]  }
 0x4b1   : > { %v1709_v14 = vrot.slane %v4485_v8, 1  ;;  %v5195_v8 = vld [vmem:[%s7053_s9 + $0x18] sm:$0xff]  }
 0x4b2   : > { %2594 = vrot.lane.b32.xlu1 %v2543_v58, %s7106_s20  ;;  %1672 = vrot.lane.b32.xlu0 %v1642_v30, %s5352_s1  ;;  %v5182_v58 = vld [vmem:[%s7053_s9] sm:$0xff]   ;;  %v1398_v30 = vld [vmem:[#allocation2 + $0x30] sm:$0xf]  ;;  %v6091_v42 = vpop.permute.xlu1 %1966 }
 0x4b3   : > { %v4492_v5 = vcombine.low %v1398_v30, %v6040_v27  ;;  %4804 = vmatpush3.bf16.msra.mxu1 %v5182_v58  ;;  %4848 = vmatpush3.bf16.msra.mxu0 %v5184_v4  ;;  %7117 = vst [vmem:[#allocation27_spill] sm:$0xff] %v6091_v42  ;;  %v4511_v4 = vcombine.low %v6112_v2, %v6098_v48  ;;  %v5196_v30 = vld [vmem:[%s7053_s9 + $0xe8] sm:$0xff]  }
 0x4b4   : > { %4805 = vmatprep.subr.bf16.mxu1 %v5185_v61  ;;  %v6120_v61 = vld [vmem:[#allocation2 + $0x34] sm:$0x3] }
 0x4b6   : > { %2294 = vrot.lane.b32.xlu1 %v2259_v20, %s7106_s20  ;;  %1780 = vrot.lane.b32.xlu0 %v4494_v29, %s7107_s30  ;;  %v5187_v20 = vld [vmem:[%s7053_s9 + $0xd8] sm:$0xff]   ;;  %v4510_v29 = vcombine.low %v6069_v6, %v6042_v0 }
 0x4b7   : > { %4849 = vmatprep.subr.bf16.mxu0 %v5187_v20  ;;  %4806 = vmatpush3.bf16.msra.mxu1 %v5186_v49  ;;  %v6130_v20 = vpop.permute.xlu1 %2062  ;;  %v5198_v49 = vld [vmem:[%s7053_s9 + $0x60] sm:$0xff]  }
 0x4b8   : > { %v1894_v43 = vrot.slane %v4510_v29, 1  ;;  %4807 = vmatprep.subr.bf16.mxu1 %v5189_v33  ;;  %4850 = vmatpush3.bf16.msra.mxu0 %v5188_v12  ;;  %7118 = vst [vmem:[#allocation28_spill] sm:$0xff] %v6130_v20  ;;  %v5145_v29 = vld [vmem:[#allocation2 + $0x48] sm:$0x3c]   ;;  %v1895_v12 = vrot.slane %v4511_v4, 1 }
 0x4b9   : > { %v5197_v33 = vld [vmem:[%s7053_s9 + $0xa8] sm:$0xff]  }
 0x4ba   : > { %2414 = vrot.lane.b32.xlu1 %v2375_v57, %s7107_s30  ;;  %2048 = vrot.lane.b32.xlu0 %v1998_v41, %s7107_s30  ;;  %v5192_v57 = vld [vmem:[%s7053_s9 + $0xe0] sm:$0xff]   ;;  %v6096_v41 = vld [vmem:[#allocation2 + $0x3c] sm:$0x1] }
 0x4bb   : > { %v4493_v58 = vcombine.low %v1400_v56, %v6096_v41  ;;  %4851 = vmatprep.subr.bf16.mxu0 %v5192_v57  ;;  %4808 = vmatpush3.bf16.msra.mxu1 %v5191_v37  ;;  %v6144_v57 = vpop.permute.xlu0 %2408  ;;  %v5202_v56 = vld [vmem:[%s7053_s9 + $0x68] sm:$0xff]  }
 0x4bc   : > { %4852 = vmatpush3.bf16.msra.mxu0 %v5193_v62  ;;  %v6157_v62 = vld [vmem:[#allocation2 + $0x40] sm:$0xe] }
 0x4bd   : > { %4853 = vmatprep.subr.bf16.mxu0 %v5196_v30  ;;  %v6167_v4 = vcombine.low %v6157_v62, %v5967_v18  ;;  %v5204_v18 = vld [vmem:[%s7053_s9 + $0x28] sm:$0xff]  }
 0x4be   : > { %1726 = vrot.lane.b32.xlu1 %v1711_v63, %s7106_s20  ;;  %1668 = vrot.lane.b32.xlu0 %v1628_v44, %s5352_s1  ;;  %v6104_v63 = vld [vmem:[#allocation2 + $0x4c] sm:$0x1]  ;;  %v5194_v44 = vld [vmem:[%s7053_s9 + $0x58] sm:$0xff]  }
 0x4bf   : > { %4809 = vmatprep.subr.bf16.mxu1 %v5194_v44  ;;  %v5199_v44 = vld [vmem:[%s7053_s9 + $0x20] sm:$0xff]  }
 0x4c0   : > { %4810 = vmatpush3.bf16.msra.mxu1 %v5195_v8  ;;  %4854 = vmatpush3.bf16.msra.mxu0 %v5197_v33  ;;  %v1373_v33 = vld [vmem:[#allocation2 + $0x44] sm:$0x1] }
 0x4c1   : > { %4811 = vmatprep.subr.bf16.mxu1 %v5198_v49  ;;  %v5205_v49 = vld [vmem:[%s7053_s9 + $0xf8] sm:$0xff]  }
 0x4c2   : > { %1782 = vrot.lane.b32.xlu1 %v4495_v7, %s7107_s30  ;;  %1776 = vrot.lane.b32.xlu0 %v4492_v5, %s7107_s30  ;;  %v4518_v7 = vcombine.low %v1435_v55, %v6104_v63  ;;  %v6132_v5 = vld [vmem:[#allocation2 + $0x30] sm:$0xe]  ;;  %v6148_v55 = vld [vmem:[#allocation2 + $0x3c] sm:$0x3] }
 0x4c3   : > { %v4508_v37 = vcombine.low %v6132_v5, %v6120_v61 }
 0x4c4   : > { %4812 = vmatpush3.bf16.msra.mxu1 %v5199_v44  ;;  %v6192_v44 = vcombine.low %v6023_v23, %v1373_v33  ;;  %v5208_v23 = vld [vmem:[%s7053_s9 + $0x30] sm:$0xff]  }
 0x4c5   : > { %4813 = vmatprep.subr.bf16.mxu1 %v5202_v56  ;;  %v2030_v56 = vshll.u32 %v6167_v4, 16 }
 0x4c6   : > { %1722 = vrot.lane.b32.xlu1 %v1709_v14, %s7106_s20  ;;  %1908 = vrot.lane.b32.xlu0 %v1894_v43, %s5352_s1  ;;  %v5200_v14 = vld [vmem:[%s7053_s9 + $0xf0] sm:$0xff]   ;;  %v3012_v43 = vrot.slane %v5138_v3, 1 }
 0x4c7   : > { %v5201_v3 = vld [vmem:[%s7053_s9 + $0xb0] sm:$0xff]   ;;  %4855 = vmatprep.subr.bf16.mxu0 %v5200_v14  ;;  %v2032_v40 = vrot.slane %v2030_v56, 1  ;;  %v2028_v56 = vshrl.u32 %v6167_v4, 16 }
 0x4c8   : > { %v5207_v14 = vld [vmem:[%s7053_s9 + $0x70] sm:$0xff]   ;;  %4856 = vmatpush3.bf16.msra.mxu0 %v5201_v3  ;;  %4814 = vmatpush3.bf16.msra.mxu1 %v5204_v18  ;;  %v1660_v18 = vshll.u32 %v6192_v44, 16 }
 0x4c9   : > { %4857 = vmatprep.subr.bf16.mxu0 %v5205_v49  ;;  %v5151_v3 = vld [vmem:[#allocation2 + $0x30] sm:$0x3c]   ;;  %4815 = vmatprep.subr.bf16.mxu1 %v5207_v14  ;;  %v2647_v14 = vshrl.u32 %v6200_v45, 16  ;;  %v2033_v4 = vor.u32 %v2032_v40, %v2028_v56 }
 0x4ca   : > { %1778 = vrot.lane.b32.xlu1 %v4493_v58, %s7107_s30  ;;  %1964 = vrot.lane.b32.xlu0 %v4518_v7, %s7106_s20  ;;  %v6160_v58 = vld [vmem:[#allocation2 + $0x38] sm:$0xe]  ;;  %v3013_v7 = vrot.slane %v5145_v29, 1  ;;  %v6182_v29 = vld [vmem:[#allocation2 + $0x3c] sm:$0x1]  ;;  %v3010_v39 = vrot.slane %v5151_v3, 1 }
 0x4cb   : > { %v4509_v8 = vcombine.low %v6160_v58, %v6148_v55  ;;  %v1369_v49 = vld [vmem:[#allocation2 + $0x34] sm:$0x1]  ;;  %v6234_v3 = vld [vmem:[#allocation2 + $0x48] sm:$0xe]  ;;  %v2649_v24 = vrot.slane %v2647_v14, 7 }
 0x4cc   : > { %4816 = vmatpush3.bf16.msra.mxu1 %v5208_v23  ;;  %7121 = vst [vmem:[#allocation31_spill] sm:$0xff] %v6234_v3  ;;  %v6239_v23 = vcombine.low %v6234_v3, %v6104_v63  ;;  %v1658_v63 = vshrl.u32 %v6192_v44, 16  ;;  %v5154_v14 = vld [vmem:[#allocation2 + $0x20] sm:$0x1e]  }
 0x4cd   : > { %v1893_v46 = vrot.slane %v4509_v8, 1  ;;  %v5209_v8 = vld [vmem:[%s7053_s9 + $0x78] sm:$0xff]  }
 0x4ce   : > { %1910 = vrot.lane.b32.xlu1 %v1895_v12, %s5352_s1  ;;  %3024 = vrot.lane.b32.xlu0 %v3012_v43, %s5352_s1  ;;  %v1892_v43 = vrot.slane %v4508_v37, 1  ;;  %v5206_v37 = vld [vmem:[%s7053_s9 + $0xb8] sm:$0xff]  }
 0x4cf   : > { %v6169_v30 = vpop.permute.xlu1 %1954  ;;  %4858 = vmatpush3.bf16.msra.mxu0 %v5206_v37  ;;  %v6221_v37 = vcombine.low %v5871_v52, %v5871_v52  ;;  %4817 = vmatprep.subr.bf16.mxu1 %v5209_v8  ;;  %v2664_v52 = vshll.u32 %v5153_v36, 16  ;;  %v1662_v8 = vrot.slane %v1660_v18, 1  ;;  %v2163_v36 = vshrl.u32 %v6246_v38, 16 }
 0x4d0   : > { %v6176_v12 = vpop.permute.xlu0 %1772  ;;  %4818 = vmatpush3.bf16.msra.mxu1 %v5210_v25 }
 0x4d1   : > { %7119 = vst [vmem:[#allocation29_spill] sm:$0xff] %v6176_v12  ;;  %v1663_v44 = vor.u32 %v1662_v8, %v1658_v63  ;;  %v2671_v8 = vshll.u32 %v6213_v26, 16  ;;  %v1499_v26 = vld [vmem:[#allocation2 + $0x30] sm:$0xc] }
 0x4d2   : > { %3026 = vrot.lane.b32.xlu1 %v3013_v7, %s5352_s1  ;;  %1904 = vrot.lane.b32.xlu0 %v1892_v43, %s5352_s1  ;;  %v1431_v7 = vld [vmem:[#allocation2 + $0x38] sm:$0xf] }
 0x4d3   : > { %v4516_v43 = vcombine.low %v1431_v7, %v6182_v29  ;;  %v3011_v7 = vrot.slane %v5152_v35, 1  ;;  %v6223_v35 = vld [vmem:[#allocation2 + $0x30] sm:$0xe] }
 0x4d4   : > { %v6194_v32 = vpop.permute.xlu1 %1718  ;;  %v6197_v11 = vpop.permute.xlu0 %1768 }
 0x4d5   : > { %7120 = vst [vmem:[#allocation30_spill] sm:$0xff] %v6197_v11 }
 0x4d6   : > { %1906 = vrot.lane.b32.xlu1 %v1893_v46, %s5352_s1  ;;  %1960 = vrot.lane.b32.xlu0 %v4516_v43, %s7106_s20  ;;  %v2663_v46 = vrot.slane %v2661_v31, 7  ;;  %v6229_v31 = vcombine.low %v6223_v35, %v5993_v15  ;;  %v6232_v43 = vcombine.low %v6048_v22, %v1369_v49 }
 0x4d8   : > { %v6210_v33 = vpop.permute.xlu1 %1774  ;;  %v1901_v28 = vpop.permute.xlu0 %1900  ;;  %v2666_v49 = vor.u32 %v2664_v52, %v2663_v46  ;;  %v2016_v18 = vshll.u32 %v6229_v31, 16  ;;  %v1646_v25 = vshll.u32 %v6232_v43, 16  ;;  %v2650_v46 = vshll.u32 %v6200_v45, 16  ;;  %v6270_v52 = vld [vmem:[#allocation2 + $0x38] sm:$0xe] }
 0x4d9   : > { %v2768_v15 = vsel %vm607_vm0, %v5959_v17, %v1901_v28  ;;  %v1388_v28 = vld [vmem:[#allocation2 + $0x3c] sm:$0x3] }
 0x4da   : > { %3022 = vrot.lane.b32.xlu1 %v3011_v7, %s5352_s1  ;;  %3020 = vrot.lane.b32.xlu0 %v3010_v39, %s5352_s1  ;;  %v6251_v39 = vcombine.low %v6112_v2, %v6035_v1  ;;  %v6265_v1 = vcombine.low %v6069_v6, %v6013_v50  ;;  %v2037_v2 = vshll.u32 %v6239_v23, 16  ;;  %v4486_v45 = vcombine.low %v6270_v52, %v1388_v28 }
 0x4db   : > { %v1648_v63 = vrot.slane %v1646_v25, 1  ;;  %v6286_v28 = vcombine.low %v6132_v5, %v6040_v27  ;;  %v4572_v27 = vcombine.low %v1499_v26, %v6120_v61 }
 0x4dc   : > { %v6241_v7 = vpop.permute.xlu1 %1714  ;;  %v1957_v22 = vpop.permute.xlu0 %1956  ;;  %v1860_v50 = vshll.u32 %v6251_v39, 16  ;;  %v1851_v12 = vshrl.u32 %v6265_v1, 16 }
 0x4dd   : > { %v6254_v40 = vsel %vm882_vm6, %v2768_v15, %v1957_v22  ;;  %v2014_v15 = vshrl.u32 %v6229_v31, 16  ;;  %v1502_v22 = vld [vmem:[#allocation2 + $0x48] sm:$0xc]  ;;  %v1644_v31 = vshrl.u32 %v6232_v43, 16 }
 0x4de   : > { %7122 = vst [vmem:[#allocation32_spill] sm:$0xff] %v6254_v40  ;;  %2058 = vrot.lane.b32.xlu1 %v2033_v4, %s7107_s30  ;;  %2696 = vrot.lane.b32.xlu0 %v2666_v49, %s7107_s30  ;;  %v2670_v4 = vrot.slane %v2668_v16, 7  ;;  %v2652_v49 = vor.u32 %v2650_v46, %v2649_v24  ;;  %v4575_v6 = vcombine.low %v1502_v22, %v6098_v48  ;;  %v2018_v16 = vrot.slane %v2016_v18, 1 }
 0x4df   : > { %v6282_v24 = vrot.slane %v2037_v2, 1  ;;  %v1853_v46 = vshll.u32 %v6265_v1, 16  ;;  %v2165_v22 = vrot.slane %v2163_v36, 7  ;;  %v1837_v36 = vshrl.u32 %v6286_v28, 16  ;;  %v1443_v1 = vld [vmem:[#allocation2 + $0x38] sm:$0xe] }
 0x4e0   : > { %v6268_v56 = vpop.permute.xlu1 %1770  ;;  %v3017_v17 = vpop.permute.xlu0 %3016  ;;  %v2585_v42 = vshrl.u32 %v4575_v6, 16  ;;  %v2588_v5 = vshll.u32 %v4575_v6, 16 }
 0x4e1   : > { %v3034_v13 = vsel %vm607_vm0, %v5154_v14, %v3017_v17  ;;  %v2673_v17 = vor.u32 %v2671_v8, %v2670_v4  ;;  %v6291_v14 = vld [vmem:[#allocation2 + $0x38] ss:$0 sps:$4 sm:$0xff]   ;;  %v5159_v8 = vld [vmem:[#allocation2 + $0x28] sm:$0x1e]   ;;  %v1855_v3 = vrot.slane %v1853_v46, 1 }
 0x4e2   : > { %1678 = vrot.lane.b32.xlu1 %v1663_v44, %s5352_s1  ;;  %v3058_v20 = vshll.u32 %v3034_v13, 16  ;;  %2692 = vrot.lane.b32.xlu0 %v2652_v49, %s7107_s30  ;;  %v3056_v18 = vshrl.u32 %v3034_v13, 16  ;;  %v1710_v44 = vrot.slane %v4486_v45, 1  ;;  %v6294_v49 = vrot.slane %v1860_v50, 1  ;;  %v6302_v45 = vld [vmem:[#allocation2 + $0x38] ss:$0 sps:$4 sm:$0xff]  }
 0x4e3   : > { %v2166_v13 = vshll.u32 %v6246_v38, 16  ;;  %v1839_v50 = vshll.u32 %v6286_v28, 16  ;;  %v2654_v61 = vshrl.u32 %v6291_v14, 16 }
 0x4e4   : > { %v6288_v48 = vpop.permute.xlu1 %1902  ;;  %v3060_v43 = vrot.slane %v3058_v20, 1  ;;  %v1897_v25 = vpop.permute.xlu0 %1896  ;;  %v2019_v20 = vor.u32 %v2018_v16, %v2014_v15  ;;  %v2561_v16 = vshrl.u32 %v4572_v27, 16 }
 0x4e5   : > { %v2168_v15 = vor.u32 %v2166_v13, %v2165_v22  ;;  %v1649_v22 = vor.u32 %v1648_v63, %v1644_v31  ;;  %v6321_v13 = vrot.slane %v2585_v42, 1  ;;  %v2657_v31 = vshll.u32 %v6291_v14, 16 }
 0x4e6   : > { %2698 = vrot.lane.b32.xlu1 %v2673_v17, %s7107_s30  ;;  %v6298_v4 = vor.u32 %v3060_v43, %v3056_v18  ;;  %1724 = vrot.lane.b32.xlu0 %v1710_v44, %s7106_s20  ;;  %v2762_v17 = vsel %vm607_vm0, %v5980_v47, %v1897_v25  ;;  %v2564_v18 = vshll.u32 %v4572_v27, 16  ;;  %v2170_v47 = vshrl.u32 %v6302_v45, 16 }
 0x4e7   : > { %v2656_v27 = vrot.slane %v2654_v61, 7  ;;  %v2563_v63 = vrot.slane %v2561_v16, 1  ;;  %v1364_v16 = vld [vmem:[#allocation2 + $0x20] sm:$0xf] }
 0x4e8   : > { %v3019_v2 = vpop.permute.xlu1 %3018  ;;  %v4602_v6 = vcombine.low %v6298_v4, %v6298_v4  ;;  %v1953_v26 = vpop.permute.xlu0 %1952  ;;  %v2566_v42 = vrot.slane %v2564_v18, 2  ;;  %v2173_v18 = vshll.u32 %v6302_v45, 16  ;;  %v6354_v45 = vld [vmem:[%s7053_s9 + $0x100] sm:$0xff]  }
 0x4e9   : > { %v3037_v38 = vsel %vm607_vm0, %v5159_v8, %v3019_v2  ;;  %v6313_v43 = vsel %vm882_vm6, %v2762_v17, %v1953_v26  ;;  %v1451_v8 = vld [vmem:[#allocation2 + $0x3c] sm:$0x3]  ;;  %v6323_v17 = vrot.slane %v2588_v5, 2  ;;  %4953 = vmatprep.subr.bf16.mxu1 %v6354_v45 }
 0x4ea   : > { %7123 = vst [vmem:[#allocation33_spill] sm:$0xff] %v6313_v43  ;;  %v3064_v28 = vshll.u32 %v3037_v38, 16  ;;  %2054 = vrot.lane.b32.xlu1 %v2019_v20, %s7107_s30  ;;  %v3296_v46 = vshrl.u32 %v4602_v6, 16  ;;  %v3299_v44 = vshll.u32 %v4602_v6, 16  ;;  %2188 = vrot.lane.b32.xlu0 %v2168_v15, %s5352_s1  ;;  %v3062_v25 = vshrl.u32 %v3037_v38, 16 }
 0x4eb   : > { %v1841_v20 = vrot.slane %v1839_v50, 1  ;;  %v6327_v6 = vor.u32 %v1855_v3, %v1851_v12  ;;  %v6329_v15 = vld [vmem:[#allocation2 + $0x30] sm:$0x1e]   ;;  %v4532_v5 = vcombine.low %v1443_v1, %v1451_v8  ;;  %v2172_v50 = vrot.slane %v2170_v47, 7  ;;  %v5237_v8 = vld [vmem:[#allocation2 + $0x24] sm:$0x1] }
 0x4ec   : > { %v3066_v40 = vrot.slane %v3064_v28, 1  ;;  %v6319_v2 = vpop.permute.xlu1 %1898  ;;  %v6325_v26 = vpop.permute.xlu0 %2688  ;;  %v3298_v43 = vrot.slane %v3296_v46, 4  ;;  %v3301_v38 = vrot.slane %v3299_v44, 5  ;;  %v4605_v12 = vcombine.high %v6298_v4, %v6298_v4 }
 0x4ed   : > { %v2659_v46 = vor.u32 %v2657_v31, %v2656_v27  ;;  %v6344_v14 = vor.u32 %v1841_v20, %v1837_v36  ;;  %v2277_v47 = vshll.u32 %v6329_v15, 16  ;;  %v2175_v27 = vor.u32 %v2173_v18, %v2172_v50  ;;  %v1452_v31 = vld [vmem:[#allocation2 + $0x44] sm:$0x3] }
 0x4ee   : > { %v3067_v28 = vor.u32 %v3066_v40, %v3062_v25  ;;  %1674 = vrot.lane.b32.xlu1 %v1649_v22, %s5352_s1  ;;  %2500 = vrot.lane.b32.xlu0 %v6327_v6, %s5352_s1  ;;  %v6340_v40 = vcombine.low %v1443_v1, %v6182_v29  ;;  %v3302_v25 = vor.u32 %v3301_v38, %v3298_v43  ;;  %v2092_v29 = vrot.slane %v4532_v5, 1 }
 0x4ef   : > { %7124 = vst [vmem:[#allocation34_spill] sm:$0xff] %v6344_v14  ;;  %v3305_v36 = vshll.u32 %v4605_v12, 16  ;;  %v7125_v5 = vshrl.u32 %v6251_v39, 16  ;;  %v6373_v39 = vcombine.low %v6160_v58, %v6096_v41 }
 0x4f0   : > { %v4608_v3 = vcombine.low %v3067_v28, %v3067_v28  ;;  %v4611_v61 = vcombine.high %v3067_v28, %v3067_v28  ;;  %v6337_v11 = vpop.permute.xlu1 %2050  ;;  %v6342_v44 = vpop.permute.xlu0 %1720  ;;  %v4467_v28 = vcombine.low %v1364_v16, %v5237_v8  ;;  %v2567_v16 = vor.u32 %v2566_v42, %v2563_v63  ;;  %v1500_v63 = vld [vmem:[#allocation2 + $0x38] sm:$0xc] }
 0x4f1   : > { %v2279_v8 = vrot.slane %v2277_v47, 1  ;;  %v6360_v50 = vor.u32 %v6294_v49, %v7125_v5  ;;  %v3303_v18 = vrot.slane %v3302_v25, 4  ;;  %v2275_v49 = vshrl.u32 %v6329_v15, 16  ;;  %v1501_v15 = vld [vmem:[#allocation2 + $0x40] sm:$0xc] }
 0x4f2   : > { %v3338_v22 = vshrl.u32 %v4608_v3, 16  ;;  %v3341_v4 = vshll.u32 %v4608_v3, 16  ;;  %2694 = vrot.lane.b32.xlu1 %v2659_v46, %s7107_s30  ;;  %2496 = vrot.lane.b32.xlu0 %v6344_v14, %s5352_s1  ;;  %v3347_v1 = vshll.u32 %v4611_v61, 16  ;;  %v6363_v14 = vld [vmem:[#allocation2 + $0x3c] sm:$0x1]  ;;  %v4533_v42 = vcombine.low %v6157_v62, %v1452_v31 }
 0x4f3   : > { %v4573_v25 = vcombine.low %v1500_v63, %v6148_v55  ;;  %v3307_v41 = vrot.slane %v3305_v36, 5  ;;  %v2035_v62 = vshrl.u32 %v6239_v23, 16  ;;  %v6402_v55 = vcombine.low %v1501_v15, %v6042_v0  ;;  %v5169_v36 = vld [vmem:[#allocation2 + $0x58] sm:$0x3c]   ;;  %v1450_v63 = vld [vmem:[#allocation2 + $0x34] sm:$0x3] }
 0x4f4   : > { %v3340_v43 = vrot.slane %v3338_v22, 4  ;;  %v3343_v20 = vrot.slane %v3341_v4, 5  ;;  %v1671_v38 = vpop.permute.xlu1 %1670  ;;  %v2185_v3 = vpop.permute.xlu0 %2184  ;;  %v3349_v4 = vrot.slane %v3347_v1, 5  ;;  %v5239_v1 = vld [vmem:[#allocation2 + $0x10] sm:$0xf] }
 0x4f5   : > { %v2715_v46 = vsel %vm607_vm0, %v4467_v28, %v1671_v38  ;;  %v6366_v61 = vsel %vm607_vm0, %v2092_v29, %v2185_v3  ;;  %v2023_v29 = vshll.u32 %v6340_v40, 16  ;;  %v6408_v23 = vsel %vm6380_vm14, %v3303_v18, %v3307_v41 }
 0x4f6   : > { %v3344_v12 = vor.u32 %v3343_v20, %v3340_v43  ;;  %v2735_v22 = vsel %vm882_vm6, %v2715_v46, %v6194_v32  ;;  %2190 = vrot.lane.b32.xlu1 %v2175_v27, %s5352_s1  ;;  %2600 = vrot.lane.b32.xlu0 %v2567_v16, %s7106_s20  ;;  %v6395_v27 = vcombine.low %v6270_v52, %v6363_v14  ;;  %v5238_v20 = vld [vmem:[#allocation2 + $0x28] sm:$0xf]  ;;  %v2093_v3 = vrot.slane %v4533_v42, 1 }
 0x4f7   : > { %v6386_v32 = vsel %vm884_vm7, %v2735_v22, %v6210_v33  ;;  %v2280_v33 = vor.u32 %v2279_v8, %v2275_v49  ;;  %v6399_v38 = vcombine.low %v5238_v20, %v5238_v20  ;;  %7128 = vst [vmem:[#allocation35_spill] sm:$0xff] %v6408_v23  ;;  %v6414_v31 = vcombine.low %v5239_v1, %v5239_v1 }
 0x4f8   : > { %v3345_v58 = vrot.slane %v3344_v12, 4  ;;  %v6389_v28 = vpop.permute.xlu1 %2690  ;;  %v6397_v43 = vpop.permute.xlu0 %1716  ;;  %v2040_v0 = vor.u32 %v6282_v24, %v2035_v62  ;;  %v1846_v16 = vshll.u32 %v6373_v39, 16  ;;  %v2569_v8 = vshrl.u32 %v4573_v25, 16 }
 0x4f9   : > { %v2591_v18 = vor.u32 %v6323_v17, %v6321_v13  ;;  %v7130_v12 = vshrl.u32 %v6221_v37, 16  ;;  %v2025_v49 = vrot.slane %v2023_v29, 1  ;;  %v2572_v41 = vshll.u32 %v4573_v25, 16  ;;  %v1360_v13 = vld [vmem:[#allocation2 + $0x10] sm:$0xf] }
 0x4fa   : > { %2502 = vrot.lane.b32.xlu1 %v6360_v50, %s5352_s1  ;;  %v6412_v52 = vsel %vm6380_vm14, %v3345_v58, %v3349_v4  ;;  %2300 = vrot.lane.b32.xlu0 %v2280_v33, %s7106_s20  ;;  %v1653_v42 = vshll.u32 %v6395_v27, 16  ;;  %v2454_v4 = vshrl.u32 %v6399_v38, 16  ;;  %v2577_v15 = vshrl.u32 %v6402_v55, 16  ;;  %v5240_v33 = vld [vmem:[#allocation2 + $0x14] sm:$0x1] }
 0x4fb   : > { %7129 = vst [vmem:[#allocation36_spill] sm:$0xff] %v6412_v52  ;;  %v2449_v22 = vrot.slane %v7130_v12, 7  ;;  %v2580_v62 = vshll.u32 %v6402_v55, 16  ;;  %v3015_v17 = vrot.slane %v5169_v36, 1  ;;  %v2021_v29 = vshrl.u32 %v6340_v40, 16 }
 0x4fc   : > { %v2187_v5 = vpop.permute.xlu1 %2186  ;;  %v6426_v58 = vpop.permute.xlu0 %2180  ;;  %v2765_v25 = vsel %vm607_vm0, %v6004_v9, %v6319_v2  ;;  %v4465_v20 = vcombine.low %v1360_v13, %v5240_v33  ;;  %v4531_v1 = vcombine.low %v6223_v35, %v1450_v63  ;;  %v1844_v55 = vshrl.u32 %v6373_v39, 16 }
 0x4fd   : > { %v6429_v24 = vsel %vm607_vm0, %v2093_v3, %v2187_v5  ;;  %v6441_v3 = vld [vmem:[#allocation2 + $0x38] sm:$0x1e]   ;;  %v1848_v5 = vrot.slane %v1846_v16, 1  ;;  %v7131_v36 = vshll.u32 %v6221_v37, 16  ;;  %v2574_v46 = vrot.slane %v2572_v41, 2 }
 0x4fe   : > { %2606 = vrot.lane.b32.xlu1 %v2591_v18, %s7106_s20  ;;  %2060 = vrot.lane.b32.xlu0 %v2040_v0, %s7107_s30  ;;  %v2571_v18 = vrot.slane %v2569_v8, 1  ;;  %v1655_v52 = vrot.slane %v1653_v42, 1  ;;  %v2026_v2 = vor.u32 %v2025_v49, %v2021_v29  ;;  %v1651_v0 = vshrl.u32 %v6395_v27, 16 }
 0x4ff   : > { %v2452_v12 = vor.u32 %v7131_v36, %v2449_v22  ;;  %v2787_v35 = vsel %vm882_vm6, %v2765_v25, %v6169_v30  ;;  %v2091_v8 = vrot.slane %v4531_v1, 1  ;;  %v2284_v27 = vshll.u32 %v6441_v3, 16  ;;  %v5174_v22 = vld [vmem:[#allocation2 + $0x38] sm:$0x3c]   ;;  %v5173_v25 = vld [vmem:[#allocation2 + $0x30] sm:$0x3c]  }
 0x500   : > { %v1667_v40 = vpop.permute.xlu1 %1666  ;;  %v2493_v23 = vpop.permute.xlu0 %2492  ;;  %v2803_v37 = vsel %vm884_vm7, %v2787_v35, %v6337_v11  ;;  %v1447_v30 = vld [vmem:[#allocation2 + $0x1c] sm:$0x3]  ;;  %v6461_v42 = vor.u32 %v1848_v5, %v1844_v55  ;;  %v2579_v13 = vrot.slane %v2577_v15, 1  ;;  %v5178_v36 = vld [vmem:[#allocation2 + $0x58] ss:$0 sps:$4 sm:$0xff]   ;;  %v2575_v15 = vor.u32 %v2574_v46, %v2571_v18 }
 0x501   : > { %v2709_v9 = vsel %vm607_vm0, %v4465_v20, %v1667_v40  ;;  %v2880_v63 = vsel %vm607_vm0, %v2452_v12, %v2493_v23  ;;  %v2457_v23 = vshll.u32 %v6399_v38, 16  ;;  %v2456_v38 = vrot.slane %v2454_v4, 7 }
 0x502   : > { %v2731_v39 = vsel %vm882_vm6, %v2709_v9, %v6241_v7  ;;  %3030 = vrot.lane.b32.xlu1 %v3015_v17, %s5352_s1  ;;  %2056 = vrot.lane.b32.xlu0 %v2026_v2, %s7107_s30  ;;  %v2582_v17 = vrot.slane %v2580_v62, 2  ;;  %v4528_v55 = vcombine.low %v6001_v53, %v1447_v30  ;;  %v5171_v62 = vld [vmem:[#allocation2 + $0x50] sm:$0x3c]   ;;  %v2286_v5 = vrot.slane %v2284_v27, 1 }
 0x503   : > { %v2747_v16 = vsel %vm884_vm7, %v2731_v39, %v6268_v56  ;;  %v1656_v56 = vor.u32 %v1655_v52, %v1651_v0  ;;  %v2401_v12 = vshrl.u32 %v5174_v22, 16  ;;  %v5177_v52 = vld [vmem:[#allocation2 + $0x50] ss:$0 sps:$4 sm:$0xff]   ;;  %v2404_v35 = vshll.u32 %v5174_v22, 16 }
 0x504   : > { %v4606_v49 = vcombine.low %v2747_v16, %v2803_v37  ;;  %v4609_v41 = vcombine.high %v2747_v16, %v2803_v37  ;;  %v2183_v7 = vpop.permute.xlu1 %2182  ;;  %v2597_v11 = vpop.permute.xlu0 %2596  ;;  %v2583_v39 = vor.u32 %v2582_v17, %v2579_v13  ;;  %v2282_v4 = vshrl.u32 %v6441_v3, 16 }
 0x505   : > { %v6464_v29 = vsel %vm607_vm0, %v2091_v8, %v2183_v7  ;;  %v6467_v1 = vsel %vm882_vm6, %v2880_v63, %v2597_v11  ;;  %v2393_v37 = vshrl.u32 %v5173_v25, 16  ;;  %v2396_v16 = vshll.u32 %v5173_v25, 16 }
 0x506   : > { %v3310_v33 = vshrl.u32 %v4606_v49, 16  ;;  %v3313_v20 = vshll.u32 %v4606_v49, 16  ;;  %2498 = vrot.lane.b32.xlu1 %v6461_v42, %s5352_s1  ;;  %1676 = vrot.lane.b32.xlu0 %v1656_v56, %s5352_s1  ;;  %v3319_v2 = vshll.u32 %v4609_v41, 16  ;;  %v2433_v53 = vshrl.u32 %v6414_v31, 16 }
 0x507   : > { %v2682_v18 = vshrl.u32 %v5178_v36, 16  ;;  %v2459_v27 = vor.u32 %v2457_v23, %v2456_v38  ;;  %v3014_v30 = vrot.slane %v5171_v62, 1  ;;  %v2287_v22 = vor.u32 %v2286_v5, %v2282_v4 }
 0x508   : > { %v3312_v40 = vrot.slane %v3310_v33, 4  ;;  %v3315_v9 = vrot.slane %v3313_v20, 5  ;;  %v6473_v0 = vpop.permute.xlu1 %1962  ;;  %v2297_v63 = vpop.permute.xlu0 %2296  ;;  %v2675_v49 = vshrl.u32 %v5177_v52, 16  ;;  %v3321_v41 = vrot.slane %v3319_v2, 5 }
 0x509   : > { %v2849_v46 = vsel %vm882_vm6, %v6366_v61, %v2297_v63  ;;  %v2403_v3 = vrot.slane %v2401_v12, 1  ;;  %v2406_v13 = vrot.slane %v2404_v35, 2  ;;  %v2088_v11 = vrot.slane %v4528_v55, 1  ;;  %v1449_v12 = vld [vmem:[#allocation2 + $0x2c] sm:$0x3] }
 0x50a   : > { %2602 = vrot.lane.b32.xlu1 %v2575_v15, %s7106_s20  ;;  %v3316_v8 = vor.u32 %v3315_v9, %v3312_v40  ;;  %2604 = vrot.lane.b32.xlu0 %v2583_v39, %s7106_s20  ;;  %v2395_v61 = vrot.slane %v2393_v37, 1  ;;  %v2398_v33 = vrot.slane %v2396_v16, 2  ;;  %v2684_v23 = vrot.slane %v2682_v18, 7  ;;  %v5241_v37 = vld [vmem:[#allocation2 + $0x28] sm:$0xe] }
 0x50b   : > { %v2685_v38 = vshll.u32 %v5178_v36, 16  ;;  %v2435_v62 = vrot.slane %v2433_v53, 7  ;;  %v2677_v55 = vrot.slane %v2675_v49, 7  ;;  %v2678_v5 = vshll.u32 %v5177_v52, 16 }
 0x50c   : > { %v2495_v7 = vpop.permute.xlu1 %2494  ;;  %v3317_v17 = vrot.slane %v3316_v8, 4  ;;  %v2417_v56 = vpop.permute.xlu0 %2416  ;;  %v2407_v9 = vor.u32 %v2406_v13, %v2403_v3  ;;  %v2818_v2 = vsel %vm607_vm0, %v2088_v11, %v6075_v51  ;;  %v2436_v35 = vshll.u32 %v6414_v31, 16 }
 0x50d   : > { %v2883_v25 = vsel %vm607_vm0, %v2459_v27, %v2495_v7  ;;  %v6483_v20 = vsel %vm884_vm7, %v2849_v46, %v2417_v56  ;;  %v2399_v39 = vor.u32 %v2398_v33, %v2395_v61  ;;  %v2687_v4 = vor.u32 %v2685_v38, %v2684_v23  ;;  %v1448_v46 = vld [vmem:[#allocation2 + $0x24] sm:$0x3] }
 0x50e   : > { %2302 = vrot.lane.b32.xlu1 %v2287_v22, %s7106_s20  ;;  %v6488_v15 = vsel %vm6380_vm14, %v3317_v17, %v3321_v41  ;;  %3028 = vrot.lane.b32.xlu0 %v3014_v30, %s5352_s1  ;;  %v4530_v16 = vcombine.low %v5241_v37, %v1449_v12  ;;  %v2438_v53 = vor.u32 %v2436_v35, %v2435_v62  ;;  %v5242_v30 = vld [vmem:[#allocation2 + $0x18] sm:$0xf]  ;;  %v5243_v41 = vld [vmem:[#allocation2 + $0x20] sm:$0xe]  ;;  %s6942_s20 = scalar_lea.hbm %s7056_s12, %s4732_s26 }
 0x50f   : > { %v2680_v52 = vor.u32 %v2678_v5, %v2677_v55  ;;  %v2841_v51 = vsel %vm882_vm6, %v2818_v2, %v6109_v59  ;;  %v4561_v22 = vcombine.low %v5242_v30, %v5242_v30  ;;  %v4529_v7 = vcombine.low %v5243_v41, %v1448_v46  ;;  %v1358_v46 = vld [vmem:[#allocation2 + $0x8] sm:$0xf] }
 0x510   : > { %v2599_v40 = vpop.permute.xlu1 %2598  ;;  %v2489_v63 = vpop.permute.xlu0 %2488  ;;  %v2857_v3 = vsel %vm884_vm7, %v2841_v51, %v6144_v57  ;;  %v2090_v13 = vrot.slane %v4530_v16, 1 }
 0x511   : > { %v6495_v36 = vsel %vm882_vm6, %v2883_v25, %v2599_v40  ;;  %v2874_v31 = vsel %vm607_vm0, %v2438_v53, %v2489_v63  ;;  %v2440_v33 = vshrl.u32 %v4561_v22, 16  ;;  %v2089_v62 = vrot.slane %v4529_v7, 1 }
 0x512   : > { %2422 = vrot.lane.b32.xlu1 %v2407_v9, %s7107_s30  ;;  %2420 = vrot.lane.b32.xlu0 %v2399_v39, %s7107_s30  ;;  %v2824_v56 = vsel %vm607_vm0, %v2090_v13, %v6426_v58 }
 0x513   : > { %v2442_v63 = vrot.slane %v2440_v33, 7  ;;  %v2821_v39 = vsel %vm607_vm0, %v2089_v62, %v6016_v10 }
 0x514   : > { %v2299_v18 = vpop.permute.xlu1 %2298  ;;  %v2593_v8 = vpop.permute.xlu0 %2592  ;;  %v2843_v51 = vsel %vm882_vm6, %v2821_v39, %v6029_v19  ;;  %v5246_v39 = vld [vmem:[#allocation2 + $0x1c] sm:$0x1] }
 0x515   : > { %v2851_v27 = vsel %vm882_vm6, %v6429_v24, %v2299_v18  ;;  %v2897_v49 = vsel %vm882_vm6, %v2874_v31, %v2593_v8  ;;  %v1366_v18 = vld [vmem:[#allocation2 + $0x28] sm:$0xf]  ;;  %v5244_v8 = vld [vmem:[#allocation2 + $0x2c] sm:$0x1]  ;;  %v2859_v7 = vsel %vm884_vm7, %v2843_v51, %v6066_v54 }
 0x516   : > { %2702 = vrot.lane.b32.xlu1 %v2687_v4, %s7107_s30  ;;  %v2913_v59 = vsel %vm884_vm7, %v2897_v49, %v6325_v26  ;;  %2700 = vrot.lane.b32.xlu0 %v2680_v52, %s7107_s30  ;;  %v2771_v26 = vsel %vm607_vm0, %v5975_v34, %v6288_v48  ;;  %v2443_v4 = vshll.u32 %v4561_v22, 16  ;;  %v5245_v49 = vld [vmem:[#allocation2 + $0xc] sm:$0x1] }
 0x517   : > { %v4601_v17 = vcombine.low %v2857_v3, %v2913_v59  ;;  %v4604_v11 = vcombine.high %v2857_v3, %v2913_v59  ;;  %v4464_v41 = vcombine.low %v1358_v46, %v5245_v49  ;;  %v7136_v49 = vld [vmem:[#allocation29_spill] sm:$0xff] }
 0x518   : > { %v2419_v24 = vpop.permute.xlu1 %2418  ;;  %v2293_v25 = vpop.permute.xlu0 %2292  ;;  %v2445_v53 = vor.u32 %v2443_v4, %v2442_v63 }
 0x519   : > { %v6514_v61 = vsel %vm884_vm7, %v2851_v27, %v2419_v24  ;;  %v3282_v23 = vshrl.u32 %v4601_v17, 16  ;;  %v3285_v38 = vshll.u32 %v4601_v17, 16  ;;  %v2845_v57 = vsel %vm882_vm6, %v2824_v56, %v2293_v25 }
 0x51a   : > { %7132 = vst [vmem:[#allocation37_spill] sm:$0xff] %v6514_v61  ;;  %v3291_v12 = vshll.u32 %v4604_v11, 16  ;;  %v4468_v27 = vcombine.low %v1366_v18, %v5244_v8  ;;  %v2706_v33 = vsel %vm607_vm0, %v4464_v41, %v6018_v21  ;;  %v1362_v21 = vld [vmem:[#allocation2 + $0x18] sm:$0xf]  ;;  %v6622_v61 = vld [vmem:[#allocation2 + $0x4c] sm:$0x3] }
 0x51b   : > { %v3284_v55 = vrot.slane %v3282_v23, 4  ;;  %v3287_v5 = vrot.slane %v3285_v38, 5  ;;  %v4466_v4 = vcombine.low %v1362_v21, %v5246_v39  ;;  %v5211_v21 = vld [vmem:[#allocation2 + $0x40] sm:$0x1e]  }
 0x51c   : > { %v1959_v40 = vpop.permute.xlu1 %1958  ;;  %v2413_v9 = vpop.permute.xlu0 %2412  ;;  %v3293_v37 = vrot.slane %v3291_v12, 5 }
 0x51d   : > { %v6521_v58 = vsel %vm882_vm6, %v2771_v26, %v1959_v40  ;;  %v3288_v2 = vor.u32 %v3287_v5, %v3284_v55  ;;  %v6524_v35 = vsel %vm884_vm7, %v2845_v57, %v2413_v9  ;;  %v7134_v5 = vld [vmem:[#allocation33_spill] sm:$0xff] }
 0x51f   : > { %v3289_v34 = vrot.slane %v3288_v2, 4 }
 0x520   : > { %v2491_v16 = vpop.permute.xlu1 %2490  ;;  %v2053_v48 = vpop.permute.xlu0 %2052 }
 0x521   : > { %v3294_v52 = vsel %vm6380_vm14, %v3289_v34, %v3293_v37  ;;  %v2877_v31 = vsel %vm607_vm0, %v2445_v53, %v2491_v16 }
 0x524   : > { %v2595_v30 = vpop.permute.xlu1 %2594  ;;  %v1673_v10 = vpop.permute.xlu0 %1672 }
 0x525   : > { %v2899_v22 = vsel %vm882_vm6, %v2877_v31, %v2595_v30  ;;  %v2718_v3 = vsel %vm607_vm0, %v4468_v27, %v1673_v10  ;;  %v7135_v10 = vld [vmem:[#allocation32_spill] sm:$0xff] }
 0x526   : > { %v2915_v13 = vsel %vm884_vm7, %v2899_v22, %v6389_v28  ;;  %v2737_v17 = vsel %vm882_vm6, %v2718_v3, %v6342_v44  ;;  %v2729_v28 = vsel %vm882_vm6, %v2706_v33, %v6032_v60  ;;  %v7133_v44 = vld [vmem:[#allocation30_spill] sm:$0xff]  ;;  %v2805_v22 = vsel %vm884_vm7, %v7135_v10, %v2053_v48 }
 0x527   : > { %v4607_v19 = vcombine.low %v2859_v7, %v2915_v13  ;;  %v4610_v59 = vcombine.high %v2859_v7, %v2915_v13  ;;  %v2745_v55 = vsel %vm884_vm7, %v2729_v28, %v7133_v44 }
 0x528   : > { %v6541_v11 = vpop.permute.xlu1 %2294  ;;  %v6543_v25 = vpop.permute.xlu0 %1780 }
 0x529   : > { %v3324_v24 = vshrl.u32 %v4607_v19, 16  ;;  %v3327_v56 = vshll.u32 %v4607_v19, 16  ;;  %v3333_v38 = vshll.u32 %v4610_v59, 16 }
 0x52b   : > { %v3326_v54 = vrot.slane %v3324_v24, 4  ;;  %v3329_v23 = vrot.slane %v3327_v56, 5  ;;  %v3335_v40 = vrot.slane %v3333_v38, 5 }
 0x52c   : > { %v6547_v57 = vpop.permute.xlu1 %2414  ;;  %v2049_v26 = vpop.permute.xlu0 %2048 }
 0x52d   : > { %v3330_v62 = vor.u32 %v3329_v23, %v3326_v54  ;;  %v2801_v12 = vsel %vm884_vm7, %v7134_v5, %v2049_v26 }
 0x52e   : > { %v4600_v9 = vcombine.low %v2745_v55, %v2801_v12  ;;  %v4603_v2 = vcombine.high %v2745_v55, %v2801_v12  ;;  %v5221_v55 = vld [vmem:[%s7053_s9 + $0x108] sm:$0xff]  }
 0x52f   : > { %v3331_v63 = vrot.slane %v3330_v62, 4 }
 0x530   : > { %v6555_v37 = vpop.permute.xlu1 %1726  ;;  %v3268_v16 = vshrl.u32 %v4600_v9, 16  ;;  %v3271_v34 = vshll.u32 %v4600_v9, 16  ;;  %v1669_v60 = vpop.permute.xlu0 %1668  ;;  %v3277_v27 = vshll.u32 %v4603_v2, 16 }
 0x531   : > { %v3336_v53 = vsel %vm6380_vm14, %v3331_v63, %v3335_v40  ;;  %v2712_v46 = vsel %vm607_vm0, %v4466_v4, %v1669_v60 }
 0x532   : > { %v4651_v51 = vcombine.low %v3294_v52, %v3336_v53  ;;  %v4652_v18 = vcombine.high %v3294_v52, %v3336_v53  ;;  %v3270_v31 = vrot.slane %v3268_v16, 4  ;;  %v3273_v8 = vrot.slane %v3271_v34, 5  ;;  %v5212_v34 = vld [vmem:[#allocation2 + $0x48] sm:$0x1e]  }
 0x533   : > { %v2733_v30 = vsel %vm882_vm6, %v2712_v46, %v6397_v43  ;;  %v3279_v56 = vrot.slane %v3277_v27, 5 }
 0x534   : > { %v2749_v41 = vsel %vm884_vm7, %v2733_v30, %v7136_v49  ;;  %4083 = vmatprep.mubr.bf16.mxu0 %v4652_v18  ;;  %v6566_v7 = vpop.permute.xlu1 %1782  ;;  %v3274_v3 = vor.u32 %v3273_v8, %v3270_v31  ;;  %v1777_v59 = vpop.permute.xlu0 %1776  ;;  %v5247_v30 = vld [vmem:[#allocation2 + $0x40] sm:$0xf] }
 0x535   : > { %v4612_v13 = vcombine.low %v2749_v41, %v2805_v22  ;;  %v4615_v19 = vcombine.high %v2749_v41, %v2805_v22  ;;  %4084 = vmatmul.mubr.bf16.vlgmr.msra.gmra.mrb[4].mxu0 %v4651_v51  ;;  %v6569_v52 = vsel %vm884_vm7, %v2737_v17, %v1777_v59  ;;  %v4566_v10 = vcombine.low %v5247_v30, %v5247_v30  ;;  %v5248_v41 = vld [vmem:[#allocation2 + $0x30] sm:$0xf] }
 0x536   : > { %v3275_v24 = vrot.slane %v3274_v3, 4  ;;  %v4564_v3 = vcombine.low %v5248_v41, %v5248_v41 }
 0x537   : > { %v3352_v43 = vshrl.u32 %v4612_v13, 16  ;;  %v3355_v33 = vshll.u32 %v4612_v13, 16  ;;  %v3361_v38 = vshll.u32 %v4615_v19, 16  ;;  %v5249_v13 = vld [vmem:[#allocation2 + $0x48] sm:$0xf] }
 0x538   : > { %v6571_v54 = vpop.permute.xlu1 %1722  ;;  %v6573_v28 = vpop.permute.xlu0 %1908  ;;  %v3280_v62 = vsel %vm6380_vm14, %v3275_v24, %v3279_v56  ;;  %v4567_v19 = vcombine.low %v5249_v13, %v5249_v13  ;;  %v5250_v56 = vld [vmem:[#allocation2 + $0x38] sm:$0xf] }
 0x539   : > { %v3354_v48 = vrot.slane %v3352_v43, 4  ;;  %v3357_v23 = vrot.slane %v3355_v33, 5  ;;  %v4649_v26 = vcombine.low %v3280_v62, %v6488_v15  ;;  %v4650_v44 = vcombine.high %v3280_v62, %v6488_v15  ;;  %v5223_v15 = vld [vmem:[%s7053_s9 + $0x110] sm:$0xff]  }
 0x53a   : > { %v3363_v12 = vrot.slane %v3361_v38, 5  ;;  %v4565_v43 = vcombine.low %v5250_v56, %v5250_v56  ;;  %v2461_v62 = vshrl.u32 %v4564_v3, 16 }
 0x53b   : > { %v3358_v17 = vor.u32 %v3357_v23, %v3354_v48  ;;  %4018 = vmatprep.mubr.bf16.mxu1 %v4650_v44  ;;  %v2475_v48 = vshrl.u32 %v4566_v10, 16 }
 0x53c   : > { %v6582_v5 = vpop.permute.xlu1 %1778  ;;  %v6584_v40 = vpop.permute.xlu0 %1964  ;;  %4019 = vmatmul.mubr.bf16.vlgmr.msra.gmra.mrb[12].mxu1 %v4649_v26  ;;  %v2482_v26 = vshrl.u32 %v4567_v19, 16 }
 0x53d   : > { %v3359_v9 = vrot.slane %v3358_v17, 4  ;;  %4954 = vmatpush3.bf16.msra.mxu1 %v6354_v45  ;;  %v5224_v45 = vld [vmem:[%s7053_s9 + $0x118] sm:$0xff]   ;;  %v2468_v17 = vshrl.u32 %v4565_v43, 16 }
 0x53e   : > { %4955 = vmatprep.subr.bf16.mxu1 %v5221_v55 }
 0x53f   : > { %v6589_v2 = vsel %vm6380_vm14, %v3359_v9, %v3363_v12 }
 0x540   : > { %v6594_v63 = vpop.permute.xlu1 %1910  ;;  %v3025_v39 = vpop.permute.xlu0 %3024 }
 0x541   : > { %v3046_v4 = vsel %vm607_vm0, %v5211_v21, %v3025_v39  ;;  %4956 = vmatpush3.bf16.msra.mxu1 %v5221_v55  ;;  %v2477_v21 = vrot.slane %v2475_v48, 7  ;;  %v1372_v39 = vld [vmem:[#allocation2 + $0x40] sm:$0xf] }
 0x542   : > { %v3082_v16 = vshll.u32 %v3046_v4, 16  ;;  %4957 = vmatprep.subr.bf16.mxu1 %v5223_v15  ;;  %v3080_v22 = vshrl.u32 %v3046_v4, 16  ;;  %v2463_v4 = vrot.slane %v2461_v62, 7 }
 0x544   : > { %v3027_v60 = vpop.permute.xlu1 %3026  ;;  %v6600_v53 = vpop.permute.xlu0 %1904  ;;  %v3084_v18 = vrot.slane %v3082_v16, 1  ;;  %v2484_v16 = vrot.slane %v2482_v26, 7 }
 0x545   : > { %v3049_v46 = vsel %vm607_vm0, %v5212_v34, %v3027_v60  ;;  %4958 = vmatpush3.bf16.msra.mxu1 %v5223_v15  ;;  %v2478_v34 = vshll.u32 %v4566_v10, 16 }
 0x546   : > { %v3088_v51 = vshll.u32 %v3049_v46, 16  ;;  %4959 = vmatprep.subr.bf16.mxu1 %v5224_v45  ;;  %v3086_v31 = vshrl.u32 %v3049_v46, 16  ;;  %v6609_v24 = vor.u32 %v3084_v18, %v3080_v22  ;;  %v5251_v46 = vld [vmem:[#allocation2 + $0x44] sm:$0x1]  ;;  %v2464_v18 = vshll.u32 %v4564_v3, 16 }
 0x547   : > { %v2470_v22 = vrot.slane %v2468_v17, 7  ;;  %v6624_v48 = vor.u32 %v2478_v34, %v2477_v21 }
 0x548   : > { %v3090_v8 = vrot.slane %v3088_v51, 1  ;;  %v6603_v27 = vpop.permute.xlu1 %1906  ;;  %v6605_v49 = vpop.permute.xlu0 %1960  ;;  %v4626_v44 = vcombine.low %v6609_v24, %v6609_v24  ;;  %v4471_v51 = vcombine.low %v1372_v39, %v5251_v46  ;;  %v6630_v3 = vor.u32 %v2464_v18, %v2463_v4  ;;  %v1368_v4 = vld [vmem:[#allocation2 + $0x30] sm:$0xf]  ;;  %v5252_v46 = vld [vmem:[#allocation2 + $0x34] sm:$0x1] }
 0x549   : > { %4960 = vmatpush3.bf16.msra.mxu1 %v5224_v45  ;;  %v2777_v18 = vsel %vm607_vm0, %v6461_v42, %v6603_v27  ;;  %v2847_v42 = vsel %vm882_vm6, %v6464_v29, %v6541_v11 }
 0x54a   : > { %v6607_v59 = vor.u32 %v3090_v8, %v3086_v31  ;;  %v3464_v45 = vshrl.u32 %v4626_v44, 16  ;;  %v3467_v60 = vshll.u32 %v4626_v44, 16  ;;  %v2485_v31 = vshll.u32 %v4567_v19, 16 }
 0x54b   : > { %v2471_v8 = vshll.u32 %v4565_v43, 16 }
 0x54c   : > { %v6611_v33 = vpop.permute.xlu1 %3022  ;;  %v4632_v23 = vcombine.low %v6607_v59, %v6607_v59  ;;  %v3021_v38 = vpop.permute.xlu0 %3020  ;;  %v6632_v19 = vor.u32 %v2485_v31, %v2484_v16  ;;  %v3466_v43 = vrot.slane %v3464_v45, 4  ;;  %v3469_v26 = vrot.slane %v3467_v60, 5  ;;  %v6644_v16 = vld [vmem:[#allocation2 + $0x38] sm:$0xf] }
 0x54d   : > { %v4635_v44 = vcombine.high %v6607_v59, %v6607_v59  ;;  %v6646_v34 = vor.u32 %v2471_v8, %v2470_v22  ;;  %v5214_v8 = vld [vmem:[#allocation2 + $0x38] sm:$0x1e]  }
 0x54e   : > { %v3506_v12 = vshrl.u32 %v4632_v23, 16  ;;  %v3509_v9 = vshll.u32 %v4632_v23, 16  ;;  %v3470_v22 = vor.u32 %v3469_v26, %v3466_v43 }
 0x550   : > { %v6617_v55 = vpop.permute.xlu1 %2058  ;;  %v6619_v15 = vpop.permute.xlu0 %2696  ;;  %v3508_v41 = vrot.slane %v3506_v12, 4  ;;  %v3511_v13 = vrot.slane %v3509_v9, 5  ;;  %v4629_v12 = vcombine.high %v6609_v24, %v6609_v24  ;;  %v5213_v9 = vld [vmem:[#allocation2 + $0x30] sm:$0x1e]   ;;  %v4470_v24 = vcombine.low %v6644_v16, %v6363_v14 }
 0x551   : > { %v3040_v31 = vsel %vm607_vm0, %v5213_v9, %v3021_v38 }
 0x552   : > { %v3512_v45 = vor.u32 %v3511_v13, %v3508_v41  ;;  %v3515_v41 = vshll.u32 %v4635_v44, 16  ;;  %v3070_v38 = vshll.u32 %v3040_v31, 16  ;;  %v2795_v44 = vsel %vm882_vm6, %v2777_v18, %v6473_v0 }
 0x554   : > { %v1679_v30 = vpop.permute.xlu1 %1678  ;;  %v2693_v56 = vpop.permute.xlu0 %2692  ;;  %v3513_v27 = vrot.slane %v3512_v45, 4  ;;  %v3517_v9 = vrot.slane %v3515_v41, 5  ;;  %v3068_v45 = vshrl.u32 %v3040_v31, 16 }
 0x555   : > { %v2727_v23 = vsel %vm607_vm0, %v4471_v51, %v1679_v30  ;;  %v2917_v10 = vsel %vm884_vm7, %v6467_v1, %v2693_v56  ;;  %v4469_v51 = vcombine.low %v1368_v4, %v5252_v46 }
 0x556   : > { %v2743_v62 = vsel %vm882_vm6, %v2727_v23, %v6555_v37  ;;  %v4613_v17 = vcombine.low %v6524_v35, %v2917_v10  ;;  %v4616_v1 = vcombine.high %v6524_v35, %v2917_v10  ;;  %v7137_v37 = vld [vmem:[#allocation31_spill] sm:$0xff]  ;;  %v2783_v35 = vsel %vm607_vm0, %v6360_v50, %v6594_v63 }
 0x557   : > { %v4534_v39 = vcombine.low %v7137_v37, %v6622_v61  ;;  %v6661_v56 = vsel %vm884_vm7, %v2743_v62, %v6566_v7  ;;  %v3473_v23 = vshll.u32 %v4629_v12, 16  ;;  %v3043_v10 = vsel %vm607_vm0, %v5214_v8, %v6611_v33  ;;  %v7138_v62 = vld [vmem:[#allocation27_spill] sm:$0xff] }
 0x558   : > { %v6640_v21 = vpop.permute.xlu1 %2698  ;;  %v3366_v59 = vshrl.u32 %v4613_v17, 16  ;;  %v6648_v60 = vpop.permute.xlu0 %1724  ;;  %v3369_v30 = vshll.u32 %v4613_v17, 16  ;;  %v3375_v63 = vshll.u32 %v4616_v1, 16  ;;  %v2863_v7 = vsel %vm884_vm7, %v2847_v42, %v6547_v57 }
 0x559   : > { %v2799_v33 = vsel %vm882_vm6, %v2783_v35, %v7138_v62  ;;  %v3471_v12 = vrot.slane %v3470_v22, 4  ;;  %v3076_v29 = vshll.u32 %v3043_v10, 16  ;;  %v3475_v1 = vrot.slane %v3473_v23, 5 }
 0x55a   : > { %v3368_v13 = vrot.slane %v3366_v59, 4  ;;  %v3371_v50 = vrot.slane %v3369_v30, 5  ;;  %v3377_v46 = vrot.slane %v3375_v63, 5  ;;  %v3072_v8 = vrot.slane %v3070_v38, 1 }
 0x55b   : > { %v6684_v0 = vsel %vm6380_vm14, %v3513_v27, %v3517_v9  ;;  %v2811_v35 = vsel %vm884_vm7, %v2795_v44, %v6617_v55  ;;  %v3078_v41 = vrot.slane %v3076_v29, 1  ;;  %v6697_v23 = vsel %vm6380_vm14, %v3471_v12, %v3475_v1  ;;  %v7139_v44 = vld [vmem:[#allocation28_spill] sm:$0xff] }
 0x55c   : > { %v2055_v4 = vpop.permute.xlu1 %2054  ;;  %v6668_v43 = vpop.permute.xlu0 %2188  ;;  %v3372_v17 = vor.u32 %v3371_v50, %v3368_v13  ;;  %v3074_v27 = vshrl.u32 %v3043_v10, 16 }
 0x55d   : > { %v2807_v26 = vsel %vm884_vm7, %v6521_v58, %v2055_v4 }
 0x55e   : > { %v4618_v11 = vcombine.low %v6386_v32, %v2807_v26  ;;  %v3373_v59 = vrot.slane %v3372_v17, 4  ;;  %v4621_v57 = vcombine.high %v6386_v32, %v2807_v26  ;;  %v6707_v17 = vsel %vm884_vm7, %v2799_v33, %v7139_v44 }
 0x560   : > { %v1675_v58 = vpop.permute.xlu1 %1674  ;;  %v3394_v30 = vshrl.u32 %v4618_v11, 16  ;;  %v6680_v4 = vpop.permute.xlu0 %2500  ;;  %v3397_v18 = vshll.u32 %v4618_v11, 16  ;;  %v6691_v31 = vsel %vm6380_vm14, %v3373_v59, %v3377_v46  ;;  %v3403_v63 = vshll.u32 %v4621_v57, 16 }
 0x561   : > { %v2721_v22 = vsel %vm607_vm0, %v4469_v51, %v1675_v58  ;;  %v4663_v51 = vcombine.low %v6697_v23, %v6684_v0  ;;  %v6709_v11 = vor.u32 %v3072_v8, %v3068_v45  ;;  %v6885_v23 = vld [vmem:[%s7054_s10] ss:$0 sm:$0xff] }
 0x562   : > { %v3396_v13 = vrot.slane %v3394_v30, 4  ;;  %v2739_v32 = vsel %vm882_vm6, %v2721_v22, %v6571_v54  ;;  %v3399_v50 = vrot.slane %v3397_v18, 5  ;;  %v3405_v46 = vrot.slane %v3403_v63, 5 }
 0x563   : > { %v2755_v55 = vsel %vm884_vm7, %v2739_v32, %v6582_v5  ;;  %v6711_v5 = vor.u32 %v3078_v41, %v3074_v27 }
 0x564   : > { %v2695_v42 = vpop.permute.xlu1 %2694  ;;  %v4630_v38 = vcombine.low %v2755_v55, %v2811_v35  ;;  %v4633_v26 = vcombine.high %v2755_v55, %v2811_v35  ;;  %v2497_v62 = vpop.permute.xlu0 %2496  ;;  %v3400_v12 = vor.u32 %v3399_v50, %v3396_v13  ;;  %v4614_v13 = vcombine.low %v6709_v11, %v6709_v11 }
 0x565   : > { %v2919_v54 = vsel %vm884_vm7, %v6495_v36, %v2695_v42  ;;  %v2886_v33 = vsel %vm607_vm0, %v6630_v3, %v2497_v62 }
 0x566   : > { %v4619_v9 = vcombine.low %v2863_v7, %v2919_v54  ;;  %v4622_v29 = vcombine.high %v2863_v7, %v2919_v54  ;;  %v3478_v1 = vshrl.u32 %v4630_v38, 16  ;;  %v3481_v59 = vshll.u32 %v4630_v38, 16 }
 0x567   : > { %v3401_v10 = vrot.slane %v3400_v12, 4  ;;  %v3487_v18 = vshll.u32 %v4633_v26, 16  ;;  %v4620_v26 = vcombine.low %v6711_v5, %v6711_v5 }
 0x568   : > { %v3408_v58 = vshrl.u32 %v4619_v9, 16  ;;  %v3411_v57 = vshll.u32 %v4619_v9, 16  ;;  %v6713_v30 = vpop.permute.xlu1 %2190  ;;  %v3480_v36 = vrot.slane %v3478_v1, 4  ;;  %v3483_v35 = vrot.slane %v3481_v59, 5  ;;  %v2601_v22 = vpop.permute.xlu0 %2600 }
 0x569   : > { %v3417_v8 = vshll.u32 %v4622_v29, 16  ;;  %v2905_v41 = vsel %vm882_vm6, %v2886_v33, %v2601_v22  ;;  %v3406_v50 = vsel %vm6380_vm14, %v3401_v10, %v3405_v46  ;;  %v3489_v62 = vrot.slane %v3487_v18, 5 }
 0x56a   : > { %v3410_v7 = vrot.slane %v3408_v58, 4  ;;  %v3413_v45 = vrot.slane %v3411_v57, 5  ;;  %v2921_v32 = vsel %vm884_vm7, %v2905_v41, %v6619_v15  ;;  %v3484_v63 = vor.u32 %v3483_v35, %v3480_v36  ;;  %v1454_v36 = vld [vmem:[#allocation2 + $0x54] sm:$0x3] }
 0x56b   : > { %v4625_v42 = vcombine.low %v6483_v20, %v2921_v32  ;;  %v4628_v3 = vcombine.high %v6483_v20, %v2921_v32  ;;  %v4655_v27 = vcombine.high %v6589_v2, %v3406_v50  ;;  %v4654_v15 = vcombine.low %v6589_v2, %v3406_v50 }
 0x56c   : > { %v3414_v55 = vor.u32 %v3413_v45, %v3410_v7  ;;  %v6727_v38 = vpop.permute.xlu1 %2502  ;;  %v6731_v54 = vpop.permute.xlu0 %2300  ;;  %v3485_v44 = vrot.slane %v3484_v63, 4  ;;  %v3419_v9 = vrot.slane %v3417_v8, 5  ;;  %v4617_v20 = vcombine.high %v6709_v11, %v6709_v11 }
 0x56d   : > { %v3450_v29 = vshrl.u32 %v4625_v42, 16  ;;  %v3453_v1 = vshll.u32 %v4625_v42, 16  ;;  %4026 = vmatprep.mubr.bf16.mxu1 %v4655_v27  ;;  %v4623_v59 = vcombine.high %v6711_v5, %v6711_v5  ;;  %v4642_v10 = vcombine.low %v6661_v56, %v6707_v17  ;;  %v5253_v42 = vld [vmem:[#allocation2 + $0x50] sm:$0xe]  ;;  %v7140_v27 = vld [vmem:[#allocation34_spill] sm:$0xff] }
 0x56e   : > { %v3415_v12 = vrot.slane %v3414_v55, 4  ;;  %4027 = vmatmul.mubr.bf16.gmra.mrb[16].mxu1 %v4654_v15  ;;  %v6742_v46 = vsel %vm6380_vm14, %v3485_v44, %v3489_v62  ;;  %v3459_v57 = vshll.u32 %v4628_v3, 16  ;;  %v3380_v18 = vshrl.u32 %v4614_v13, 16  ;;  %v5219_v3 = vld [vmem:[#allocation2 + $0x58] sm:$0x1e]  }
 0x56f   : > { %v3452_v2 = vrot.slane %v3450_v29, 4  ;;  %v3455_v58 = vrot.slane %v3453_v1, 5  ;;  %v3383_v33 = vshll.u32 %v4614_v13, 16  ;;  %v3422_v45 = vshrl.u32 %v4620_v26, 16 }
 0x570   : > { %v6744_v35 = vpop.permute.xlu1 %2606  ;;  %v3420_v11 = vsel %vm6380_vm14, %v3415_v12, %v3419_v9  ;;  %v2061_v5 = vpop.permute.xlu0 %2060  ;;  %v3425_v8 = vshll.u32 %v4620_v26, 16  ;;  %v2094_v41 = vrot.slane %v4534_v39, 1  ;;  %v2780_v50 = vsel %vm607_vm0, %v6327_v6, %v6573_v28 }
 0x571   : > { %v4657_v22 = vcombine.high %v6691_v31, %v3420_v11  ;;  %v4656_v7 = vcombine.low %v6691_v31, %v3420_v11  ;;  %v3456_v32 = vor.u32 %v3455_v58, %v3452_v2  ;;  %v3562_v63 = vshrl.u32 %v4642_v10, 16 }
 0x572   : > { %v3565_v55 = vshll.u32 %v4642_v10, 16  ;;  %v4535_v13 = vcombine.low %v5253_v42, %v1454_v36  ;;  %v2774_v31 = vsel %vm607_vm0, %v7140_v27, %v6600_v53  ;;  %v6759_v26 = vshll.u32 %v4617_v20, 16 }
 0x573   : > { %4091 = vmatprep.mubr.bf16.mxu0 %v4657_v22  ;;  %v3461_v62 = vrot.slane %v3459_v57, 5  ;;  %v3457_v37 = vrot.slane %v3456_v32, 4  ;;  %v2793_v39 = vsel %vm882_vm6, %v2774_v31, %v6605_v49  ;;  %v3382_v6 = vrot.slane %v3380_v18, 4 }
 0x574   : > { %4092 = vmatmul.mubr.bf16.gmra.mrb[8].mxu0 %v4656_v7  ;;  %v3031_v61 = vpop.permute.xlu1 %3030  ;;  %v3385_v28 = vrot.slane %v3383_v33, 5  ;;  %v6763_v15 = vshll.u32 %v4623_v59, 16  ;;  %v2057_v44 = vpop.permute.xlu0 %2056  ;;  %v6765_v12 = vrot.slane %v3422_v45, 4  ;;  %v6767_v9 = vrot.slane %v3425_v8, 5 }
 0x575   : > { %v2809_v53 = vsel %vm884_vm7, %v2793_v39, %v2057_v44  ;;  %v6772_v29 = vsel %vm6380_vm14, %v3457_v37, %v3461_v62  ;;  %v3564_v1 = vrot.slane %v3562_v63, 4  ;;  %v3567_v20 = vrot.slane %v3565_v55, 5  ;;  %v5222_v39 = vld [vmem:[#allocation2 + $0x50] sm:$0x1e]  }
 0x576   : > { %v4624_v10 = vcombine.low %v6569_v52, %v2809_v53  ;;  %v3055_v49 = vsel %vm607_vm0, %v5219_v3, %v3031_v61  ;;  %v2797_v59 = vsel %vm882_vm6, %v2780_v50, %v6584_v40  ;;  %v3391_v2 = vrot.slane %v6759_v26, 5 }
 0x577   : > { %v4645_v58 = vcombine.high %v6661_v56, %v6707_v17  ;;  %v2095_v57 = vrot.slane %v4535_v13, 1  ;;  %v3386_v11 = vor.u32 %v3385_v28, %v3382_v6  ;;  %v3433_v18 = vrot.slane %v6763_v15, 5 }
 0x578   : > { %v2499_v36 = vpop.permute.xlu1 %2498  ;;  %v3436_v33 = vshrl.u32 %v4624_v10, 16  ;;  %v3439_v22 = vshll.u32 %v4624_v10, 16  ;;  %v1677_v7 = vpop.permute.xlu0 %1676  ;;  %v3428_v45 = vor.u32 %v6767_v9, %v6765_v12  ;;  %v4627_v8 = vcombine.high %v6569_v52, %v2809_v53 }
 0x579   : > { %v3100_v32 = vshll.u32 %v3055_v49, 16  ;;  %v2724_v40 = vsel %vm607_vm0, %v4470_v24, %v1677_v7  ;;  %v3568_v63 = vor.u32 %v3567_v20, %v3564_v1  ;;  %v3571_v55 = vshll.u32 %v4645_v58, 16  ;;  %v7141_v58 = vld [vmem:[#allocation37_spill] sm:$0xff] }
 0x57a   : > { %v3438_v56 = vrot.slane %v3436_v33, 4  ;;  %v3441_v17 = vrot.slane %v3439_v22, 5  ;;  %v2741_v50 = vsel %vm882_vm6, %v2724_v40, %v6648_v60  ;;  %v2813_v42 = vsel %vm884_vm7, %v2797_v59, %v2061_v5 }
 0x57b   : > { %v2757_v13 = vsel %vm884_vm7, %v2741_v50, %v6543_v25  ;;  %v2889_v52 = vsel %vm607_vm0, %v6646_v34, %v2499_v36  ;;  %v6797_v62 = vrot.slane %v3386_v11, 4  ;;  %v3445_v60 = vshll.u32 %v4627_v8, 16 }
 0x57c   : > { %v2603_v3 = vpop.permute.xlu1 %2602  ;;  %v3442_v27 = vor.u32 %v3441_v17, %v3438_v56  ;;  %v4636_v14 = vcombine.low %v2757_v13, %v2813_v42  ;;  %v4639_v16 = vcombine.high %v2757_v13, %v2813_v42  ;;  %v2605_v24 = vpop.permute.xlu0 %2604  ;;  %v3098_v61 = vshrl.u32 %v3055_v49, 16 }
 0x57d   : > { %v2907_v31 = vsel %vm882_vm6, %v2889_v52, %v2603_v3  ;;  %v3102_v37 = vrot.slane %v3100_v32, 1  ;;  %v2836_v5 = vsel %vm607_vm0, %v2094_v41, %v6668_v43  ;;  %v3569_v28 = vrot.slane %v3568_v63, 4 }
 0x57e   : > { %v3520_v25 = vshrl.u32 %v4636_v14, 16  ;;  %v3523_v6 = vshll.u32 %v4636_v14, 16  ;;  %v3573_v34 = vrot.slane %v3571_v55, 5  ;;  %v2892_v44 = vsel %vm607_vm0, %v6624_v48, %v6680_v4 }
 0x57f   : > { %v3443_v53 = vrot.slane %v3442_v27, 4  ;;  %v2923_v1 = vsel %vm884_vm7, %v2907_v31, %v6640_v21  ;;  %v2839_v10 = vsel %vm607_vm0, %v2095_v57, %v6713_v30  ;;  %v3447_v36 = vrot.slane %v3445_v60, 5 }
 0x580   : > { %v2303_v20 = vpop.permute.xlu1 %2302  ;;  %v3522_v49 = vrot.slane %v3520_v25, 4  ;;  %v3525_v59 = vrot.slane %v3523_v6, 5  ;;  %v4631_v43 = vcombine.low %v7141_v58, %v2923_v1  ;;  %v3029_v41 = vpop.permute.xlu0 %3028  ;;  %v6809_v11 = vor.u32 %v3102_v37, %v3098_v61 }
 0x581   : > { %v4634_v33 = vcombine.high %v7141_v58, %v2923_v1  ;;  %v3052_v48 = vsel %vm607_vm0, %v5222_v39, %v3029_v41  ;;  %v3529_v4 = vshll.u32 %v4639_v16, 16  ;;  %v6815_v21 = vsel %vm6380_vm14, %v3569_v28, %v3573_v34 }
 0x582   : > { %v3092_v22 = vshrl.u32 %v3052_v48, 16  ;;  %v3094_v7 = vshll.u32 %v3052_v48, 16  ;;  %v3492_v30 = vshrl.u32 %v4631_v43, 16  ;;  %v3495_v57 = vshll.u32 %v4631_v43, 16 }
 0x583   : > { %v3448_v8 = vsel %vm6380_vm14, %v3443_v53, %v3447_v36  ;;  %v3526_v40 = vor.u32 %v3525_v59, %v3522_v49  ;;  %v2853_v56 = vsel %vm882_vm6, %v2836_v5, %v6731_v54  ;;  %v2895_v17 = vsel %vm607_vm0, %v6632_v19, %v6727_v38 }
 0x584   : > { %v2423_v32 = vpop.permute.xlu1 %2422  ;;  %v3096_v50 = vrot.slane %v3094_v7, 1  ;;  %v4660_v63 = vcombine.high %v3448_v8, %v6742_v46  ;;  %v2421_v55 = vpop.permute.xlu0 %2420  ;;  %v2911_v42 = vsel %vm882_vm6, %v2895_v17, %v6744_v35  ;;  %v4644_v13 = vcombine.low %v6809_v11, %v6809_v11 }
 0x585   : > { %v2909_v52 = vsel %vm882_vm6, %v2892_v44, %v2605_v24  ;;  %v4659_v3 = vcombine.low %v3448_v8, %v6742_v46  ;;  %v3531_v27 = vrot.slane %v3529_v4, 5  ;;  %v2855_v14 = vsel %vm882_vm6, %v2839_v10, %v2303_v20 }
 0x586   : > { %v6831_v54 = vor.u32 %v3096_v50, %v3092_v22  ;;  %4034 = vmatprep.mubr.bf16.mxu1 %v4660_v63  ;;  %v3527_v19 = vrot.slane %v3526_v40, 4  ;;  %v3494_v38 = vrot.slane %v3492_v30, 4  ;;  %v3497_v16 = vrot.slane %v3495_v57, 5 }
 0x587   : > { %v3501_v31 = vshll.u32 %v4634_v33, 16  ;;  %v2869_v60 = vsel %vm884_vm7, %v2853_v56, %v2421_v55  ;;  %4035 = vmatmul.mubr.bf16.gmra.mrb[20].mxu1 %v4659_v3  ;;  %v2871_v24 = vsel %vm884_vm7, %v2855_v14, %v2423_v32  ;;  %v3429_v34 = vrot.slane %v3428_v45, 4 }
 0x588   : > { %v2703_v35 = vpop.permute.xlu1 %2702  ;;  %v4638_v61 = vcombine.low %v6831_v54, %v6831_v54  ;;  %v2701_v46 = vpop.permute.xlu0 %2700  ;;  %v3532_v39 = vsel %vm6380_vm14, %v3527_v19, %v3531_v27  ;;  %v3498_v20 = vor.u32 %v3497_v16, %v3494_v38  ;;  %v3590_v58 = vshrl.u32 %v4644_v13, 16 }
 0x589   : > { %v2927_v37 = vsel %vm884_vm7, %v2911_v42, %v2703_v35  ;;  %v2925_v5 = vsel %vm884_vm7, %v2909_v52, %v2701_v46  ;;  %v4665_v28 = vcombine.high %v3532_v39, %v6815_v21  ;;  %v3593_v43 = vshll.u32 %v4644_v13, 16  ;;  %v7142_v13 = vld [vmem:[#allocation35_spill] sm:$0xff]  ;;  %v7143_v52 = vld [vmem:[#allocation36_spill] sm:$0xff] }
 0x58a   : > { %v4643_v25 = vcombine.low %v2871_v24, %v2927_v37  ;;  %v4646_v6 = vcombine.high %v2871_v24, %v2927_v37  ;;  %v3548_v44 = vshrl.u32 %v4638_v61, 16  ;;  %v3551_v53 = vshll.u32 %v4638_v61, 16 }
 0x58b   : > { %v4637_v1 = vcombine.low %v2869_v60, %v2925_v5  ;;  %v4640_v10 = vcombine.high %v2869_v60, %v2925_v5  ;;  %4042 = vmatprep.mubr.bf16.mxu1 %v4665_v28  ;;  %v3503_v41 = vrot.slane %v3501_v31, 5  ;;  %v4664_v9 = vcombine.low %v3532_v39, %v6815_v21 }
 0x58c   : > { %v3576_v49 = vshrl.u32 %v4643_v25, 16  ;;  %v3579_v59 = vshll.u32 %v4643_v25, 16  ;;  %v3585_v22 = vshll.u32 %v4646_v6, 16  ;;  %v3550_v7 = vrot.slane %v3548_v44, 4 }
 0x58d   : > { %v3534_v36 = vshrl.u32 %v4637_v1, 16  ;;  %v3537_v33 = vshll.u32 %v4637_v1, 16  ;;  %v3553_v30 = vrot.slane %v3551_v53, 5  ;;  %v3543_v57 = vshll.u32 %v4640_v10, 16 }
 0x58e   : > { %v3578_v48 = vrot.slane %v3576_v49, 4  ;;  %v3581_v4 = vrot.slane %v3579_v59, 5  ;;  %v3499_v32 = vrot.slane %v3498_v20, 4  ;;  %v3392_v40 = vsel %vm6380_vm14, %v6797_v62, %v3391_v2 }
 0x58f   : > { %v3536_v12 = vrot.slane %v3534_v36, 4  ;;  %v3539_v45 = vrot.slane %v3537_v33, 5  ;;  %v3592_v56 = vrot.slane %v3590_v58, 4  ;;  %v3595_v17 = vrot.slane %v3593_v43, 5  ;;  %4043 = vmatmul.mubr.bf16.gmra.mrb[24].mxu1 %v4664_v9 }
 0x590   : > { %v3582_v8 = vor.u32 %v3581_v4, %v3578_v48  ;;  %v4641_v50 = vcombine.high %v6831_v54, %v6831_v54  ;;  %v3587_v42 = vrot.slane %v3585_v22, 5  ;;  %v3504_v21 = vsel %vm6380_vm14, %v3499_v32, %v3503_v41 }
 0x591   : > { %v3540_v63 = vor.u32 %v3539_v45, %v3536_v12  ;;  %v7144_v3 = vcombine.low %v7142_v13, %v7143_v52  ;;  %v3434_v26 = vsel %vm6380_vm14, %v3429_v34, %v3433_v18  ;;  %v4647_v2 = vcombine.high %v6809_v11, %v6809_v11 }
 0x592   : > { %v3583_v55 = vrot.slane %v3582_v8, 4  ;;  %v4662_v62 = vcombine.high %v6772_v29, %v3504_v21  ;;  %v4661_v27 = vcombine.low %v6772_v29, %v3504_v21  ;;  %v3554_v54 = vor.u32 %v3553_v30, %v3550_v7 }
 0x593   : > { %4961 = vmatprep.mubr.msk.bf16.mxu1 %vm882_vm6, %v7144_v3  ;;  %v3541_v14 = vrot.slane %v3540_v63, 4  ;;  %v3545_v19 = vrot.slane %v3543_v57, 5  ;;  %v3596_v16 = vor.u32 %v3595_v17, %v3592_v56  ;;  %v3557_v31 = vshll.u32 %v4641_v50, 16 }
 0x594   : > { %v3588_v38 = vsel %vm6380_vm14, %v3583_v55, %v3587_v42  ;;  %4099 = vmatprep.mubr.bf16.mxu0 %v4662_v62  ;;  %v4658_v18 = vcombine.low %v3392_v40, %v3434_v26  ;;  %v3599_v35 = vshll.u32 %v4647_v2, 16  ;;  %v3555_v61 = vrot.slane %v3554_v54, 4 }
 0x595   : > { %4100 = vmatmul.mubr.bf16.gmra.mrb[12].mxu0 %v4661_v27  ;;  %v3546_v15 = vsel %vm6380_vm14, %v3541_v14, %v3545_v19  ;;  %v3597_v29 = vrot.slane %v3596_v16, 4  ;;  %v3559_v24 = vrot.slane %v3557_v31, 5 }
 0x596   : > { %v4667_v60 = vcombine.high %v3546_v15, %v3588_v38  ;;  %v4666_v11 = vcombine.low %v3546_v15, %v3588_v38  ;;  %v3601_v46 = vrot.slane %v3599_v35, 5 }
 0x597   : > { %4962 = vmatmul.mubr.msk.bf16.vlgmr.msra.gmra.mrb[28].mxu1 %vm882_vm6, %v4658_v18  ;;  %v3560_v37 = vsel %vm6380_vm14, %v3555_v61, %v3559_v24  ;;  %v7145_v24 = vld [vmem:[#allocation21_spill] sm:$0xff] }
 0x598   : > { %4107 = vmatprep.mubr.bf16.mxu0 %v4667_v60  ;;  %4965 = vmatprep.mubr.msk.bf16.mxu1 %vm882_vm6, %v4663_v51  ;;  %v3602_v39 = vsel %vm6380_vm14, %v3597_v29, %v3601_v46 }
 0x599   : > { %v4668_v5 = vcombine.low %v3560_v37, %v3602_v39 }
 0x59d   : > { %4108 = vmatmul.mubr.bf16.gmra.mrb[16].mxu0 %v4666_v11 }
 0x59f   : > { %4966 = vmatmul.mubr.msk.bf16.gmra.mrb[32].mxu1 %vm882_vm6, %v4668_v5 }
 0x608   : > { %v4859_v25 = vpop.f32.mrb[4].mxu0 }
 0x609   : > { %v4860_v6 = vpop.f32.mrb[5].mxu0 }
 0x60a   : > { %v4861_v28 = vadd.f32 %v4860_v6, %v4859_v25  ;;  %v4862_v34 = vpop.f32.mrb[6].mxu0  ;;  %v7146_v25 = vld [vmem:[#allocation19_spill] sm:$0xff] }
 0x60b   : > { %v4863_v44 = vpop.f32.mrb[7].mxu0 }
 0x60c   : > { %v4864_v53 = vadd.f32 %v4863_v44, %v4862_v34  ;;  %v7147_v34 = vld [vmem:[#allocation11_spill] sm:$0xff] }
 0x60f   : > { %v4819_v0 = vpop.f32.mrb[12].mxu1 }
 0x610   : > { %v4820_v51 = vpop.f32.mrb[13].mxu1 }
 0x611   : > { %v4821_v1 = vadd.f32 %v4820_v51, %v4819_v0  ;;  %v4822_v20 = vpop.f32.mrb[14].mxu1 }
 0x612   : > { %v4823_v47 = vpop.f32.mrb[15].mxu1 }
 0x613   : > { %v4021_v10 = vadd.f32 %v4821_v1, %v6885_v23  ;;  %v4824_v49 = vadd.f32 %v4823_v47, %v4822_v20  ;;  %v7149_v1 = vld [vmem:[#allocation12_spill] sm:$0xff] }
 0x614   : > { %v7150_v47 = vld [vmem:[#allocation20_spill] sm:$0xff] }
 0x615   : > { %v4024_v59 = vadd.f32 %v4824_v49, %v6885_v23  ;;  %v4086_v58 = vadd.f32 %v4861_v28, %v4021_v10 }
 0x617   : > { %v4089_v43 = vadd.f32 %v4864_v53, %v4024_v59  ;;  %v7148_v53 = vld [vmem:[#allocation22_spill] sm:$0xff] }
 0x641   : > { %v4825_v41 = vpop.f32.mrb[16].mxu1 }
 0x642   : > { %v4826_v36 = vpop.f32.mrb[17].mxu1 }
 0x643   : > { %v4827_v33 = vadd.f32 %v4826_v36, %v4825_v41  ;;  %v4828_v48 = vpop.f32.mrb[18].mxu1 }
 0x644   : > { %v4829_v4 = vpop.f32.mrb[19].mxu1 }
 0x645   : > { %v4830_v22 = vadd.f32 %v4829_v4, %v4828_v48  ;;  %v4029_v12 = vadd.f32 %v4827_v33, %v6885_v23  ;;  %v7152_v33 = vld [vmem:[#allocation13_spill] sm:$0xff] }
 0x647   : > { %v4865_v7 = vpop.f32.mrb[8].mxu0  ;;  %v4032_v8 = vadd.f32 %v4830_v22, %v6885_v23 }
 0x648   : > { %v4866_v30 = vpop.f32.mrb[9].mxu0 }
 0x649   : > { %v4867_v9 = vadd.f32 %v4866_v30, %v4865_v7  ;;  %v4868_v45 = vpop.f32.mrb[10].mxu0 }
 0x64a   : > { %v4869_v57 = vpop.f32.mrb[11].mxu0 }
 0x64b   : > { %v4870_v32 = vadd.f32 %v4869_v57, %v4868_v45  ;;  %v4094_v40 = vadd.f32 %v4867_v9, %v4029_v12 }
 0x64d   : > { %v4097_v56 = vadd.f32 %v4870_v32, %v4032_v8 }
 0x65a   : > { %v4831_v17 = vpop.f32.mrb[20].mxu1 }
 0x65b   : > { %v4832_v50 = vpop.f32.mrb[21].mxu1 }
 0x65c   : > { %v4833_v63 = vadd.f32 %v4832_v50, %v4831_v17  ;;  %v4834_v55 = vpop.f32.mrb[22].mxu1  ;;  %v7154_v50 = vld [vmem:[#allocation25_spill] sm:$0xff] }
 0x65d   : > { %v4835_v42 = vpop.f32.mrb[23].mxu1 }
 0x65e   : > { %v4836_v21 = vadd.f32 %v4835_v42, %v4834_v55  ;;  %v4037_v14 = vadd.f32 %v4833_v63, %v6885_v23  ;;  %v7155_v42 = vld [vmem:[#allocation14_spill] sm:$0xff] }
 0x660   : > { %v4040_v15 = vadd.f32 %v4836_v21, %v6885_v23 }
 0x662   : > { %v4837_v13 = vpop.f32.mrb[24].mxu1 }
 0x663   : > { %v4838_v52 = vpop.f32.mrb[25].mxu1 }
 0x664   : > { %v4839_v3 = vadd.f32 %v4838_v52, %v4837_v13  ;;  %v4840_v26 = vpop.f32.mrb[26].mxu1  ;;  %v7156_v13 = vld [vmem:[#allocation24_spill] sm:$0xff] }
 0x665   : > { %v4841_v2 = vpop.f32.mrb[27].mxu1 }
 0x666   : > { %v4842_v62 = vadd.f32 %v4841_v2, %v4840_v26  ;;  %v4045_v59 = vadd.f32 %v4839_v3, %v6885_v23  ;;  %v7157_v3 = vld [vmem:[#allocation17_spill] sm:$0xff]  ;;  %v7158_v2 = vld [vmem:[#allocation26_spill] sm:$0xff] }
 0x668   : > { %v4871_v27 = vpop.f32.mrb[12].mxu0  ;;  %v4048_v7 = vadd.f32 %v4842_v62, %v6885_v23  ;;  %v7153_v23 = vld [vmem:[#allocation23_spill] sm:$0xff] }
 0x669   : > { %v4872_v54 = vpop.f32.mrb[13].mxu0 }
 0x66a   : > { %v4873_v19 = vadd.f32 %v4872_v54, %v4871_v27  ;;  %v4874_v38 = vpop.f32.mrb[14].mxu0  ;;  %v4963_v31 = vpop.f32.mrb[28].mxu1  ;;  %v7159_v27 = vld [vmem:[#allocation16_spill] sm:$0xff] }
 0x66b   : > { %v4875_v16 = vpop.f32.mrb[15].mxu0  ;;  %v4159_v60 = vadd.f32 %v4963_v31, %v4094_v40  ;;  %v4150_v11 = vpop.f32.mrb[29].mxu1 }
 0x66c   : > { %v4876_v18 = vadd.f32 %v4875_v16, %v4874_v38  ;;  %v4102_v35 = vadd.f32 %v4873_v19, %v4037_v14  ;;  %v4151_v61 = vadd.f32 %v4150_v11, %v4086_v58  ;;  %v4964_v29 = vpop.f32.mrb[30].mxu1  ;;  %v7151_v58 = vld [vmem:[#allocation15_spill] sm:$0xff]  ;;  %v7160_v14 = vld [vmem:[#allocation18_spill] sm:$0xff] }
 0x66d   : > { %v4191_v46 = vmul.f32 %v4159_v60, %v7145_v24  ;;  %v4162_v37 = vadd.f32 %v4964_v29, %v4097_v56  ;;  %v4153_v39 = vpop.f32.mrb[31].mxu1 }
 0x66e   : > { %v4105_v5 = vadd.f32 %v4876_v18, %v4040_v15  ;;  %v4189_v6 = vmul.f32 %v4151_v61, %v7146_v25  ;;  %v4154_v28 = vadd.f32 %v4153_v39, %v4089_v43 }
 0x66f   : > { %v4247_v44 = vadd.f32 %v4191_v46, %v7147_v34  ;;  %v4192_v0 = vmul.f32 %v4162_v37, %v7148_v53  ;;  %4209 = vrot.lane.b32.xlu0 %v4191_v46, %s7107_s30 }
 0x670   : > { %v4877_v51 = vpop.f32.mrb[16].mxu0  ;;  %v4245_v20 = vadd.f32 %v4189_v6, %v7149_v1  ;;  %v4190_v10 = vmul.f32 %v4154_v28, %v7150_v47 }
 0x671   : > { %v4878_v49 = vpop.f32.mrb[17].mxu0  ;;  %4255 = vst.msk [vmem:[%s6902_s18 + $0x10] sm:$0xff] %vm607_vm0, %v4247_v44  ;;  %v4248_v43 = vadd.f32 %v4192_v0, %v7151_v58  ;;  %4211 = vrot.lane.b32.xlu1 %v4192_v0, %s7107_s30 }
 0x672   : > { %v4879_v41 = vadd.f32 %v4878_v49, %v4877_v51  ;;  %v4880_v36 = vpop.f32.mrb[18].mxu0  ;;  %4253 = vst.msk [vmem:[%s6902_s18] sm:$0xff] %vm607_vm0, %v4245_v20  ;;  %v4246_v48 = vadd.f32 %v4190_v10, %v7152_v33  ;;  %v4967_v22 = vpop.f32.mrb[32].mxu1 }
 0x673   : > { %v4881_v4 = vpop.f32.mrb[19].mxu0  ;;  %4256 = vst.msk [vmem:[%s6902_s18 + $0x18] sm:$0xff] %vm607_vm0, %v4248_v43  ;;  %v4166_v9 = vpop.f32.mrb[33].mxu1  ;;  %4205 = vrot.lane.b32.xlu0 %v4189_v6, %s7107_s30 }
 0x674   : > { %v4882_v30 = vadd.f32 %v4881_v4, %v4880_v36  ;;  %v4110_v12 = vadd.f32 %v4879_v41, %v4045_v59  ;;  %4254 = vst.msk [vmem:[%s6902_s18 + $0x8] sm:$0xff] %vm607_vm0, %v4246_v48  ;;  %v4167_v45 = vadd.f32 %v4166_v9, %v4102_v35  ;;  %v4968_v57 = vpop.f32.mrb[34].mxu1 }
 0x675   : > { %v4169_v40 = vpop.f32.mrb[35].mxu1  ;;  %4207 = vrot.lane.b32.xlu1 %v4190_v10, %s7107_s30 }
 0x676   : > { %v4175_v8 = vadd.f32 %v4967_v22, %v4110_v12  ;;  %v4113_v32 = vadd.f32 %v4882_v30, %v4048_v7  ;;  %v4193_v56 = vmul.f32 %v4167_v45, %v7153_v23  ;;  %v4170_v17 = vadd.f32 %v4169_v40, %v4105_v5 }
 0x678   : > { %v4195_v63 = vmul.f32 %v4175_v8, %v7154_v50  ;;  %v4178_v55 = vadd.f32 %v4968_v57, %v4113_v32  ;;  %v4249_v21 = vadd.f32 %v4193_v56, %v7155_v42  ;;  %v4194_v52 = vmul.f32 %v4170_v17, %v7156_v13  ;;  %4213 = vrot.lane.b32.xlu0 %v4193_v56, %s7107_s30 }
 0x67a   : > { %v4251_v26 = vadd.f32 %v4195_v63, %v7157_v3  ;;  %v4196_v62 = vmul.f32 %v4178_v55, %v7158_v2  ;;  %4257 = vst.msk [vmem:[%s6902_s18 + $0x20] sm:$0xff] %vm607_vm0, %v4249_v21  ;;  %v4250_v54 = vadd.f32 %v4194_v52, %v7159_v27  ;;  %4215 = vrot.lane.b32.xlu1 %v4194_v52, %s7107_s30 }
 0x67c   : > { %4259 = vst.msk [vmem:[%s6902_s18 + $0x30] sm:$0xff] %vm607_vm0, %v4251_v26  ;;  %v4252_v19 = vadd.f32 %v4196_v62, %v7160_v14  ;;  %4258 = vst.msk [vmem:[%s6902_s18 + $0x28] sm:$0xff] %vm607_vm0, %v4250_v54  ;;  %4217 = vrot.lane.b32.xlu0 %v4195_v63, %s7107_s30 }
 0x67e   : > { %4260 = vst.msk [vmem:[%s6902_s18 + $0x38] sm:$0xff] %vm607_vm0, %v4252_v19  ;;  %4219 = vrot.lane.b32.xlu1 %v4196_v62, %s7107_s30 }
 0x67f   : > { %5267 = shalt.err (!%p5264_p7)
}
 0x680   : > { %s5268_s30 = scalar_lea.hbm %s6942_s20, 1024  ;;  %s5272_s16 = scalar_lea.hbm %s7056_s12, 2048 }
 0x681   : > { %p5269_p10 = scmp.ne.s32.totalorder %s6942_s20, %s5268_s30  ;;  %p5273_p13 = scmp.lt.u32.totalorder %s6942_s20, %s7056_s12 }
 0x682   : > { %p5274_p0 = scmp.lt.u32.totalorder %s5272_s16, %s5268_s30  ;;  %p5276_p2 = scmp.lt.u32.totalorder %s5268_s30, %s6942_s20 }
 0x683   : > { %p5270_p11 = pnand %p5269_p10, %p5465_p6 }
 0x684   : > { %p5275_p1 = por %p5274_p0, %p5273_p13 }
 0x685   : > { %p5271_p12 = pneg %p5270_p11 }
 0x686   : > { %p5277_p3 = por %p5276_p2, %p5275_p1 }
 0x688   : > { %p5278_p4 = pnand %p5277_p3, %p5271_p12 }
 0x68a   : > { %5281 = shalt.err (!%p5278_p4)
}
 0x68b   : > { %s5358_s0 = smov 128   ;;  %s5359_s4 = smov 8  }
 0x68c   : > { %5000 = dma.vmem_to_hbm [thread:$0]  (%p5465_p6), %s6944_s15, 1024, %s6942_s20, %s4267_s19, %s5358_s0, %s5358_s0, %s5359_s4  }
 0x68d   : > { %s7161_s5 = sshll.u32 %s5610_s17, 6  ;;  %s547_s16 = scalar_lea.vmem [#allocation4], %s5487_s29 }
 0x68e   : > { %s564_s18 = scalar_lea.vmem %s7046_s2, %s7161_s5  ;;  %s4280_s29 = sshll.u32 %s547_s16, 4  ;;  %s6996_s29 = int_to_ptr.vmem [resolvable:$true] %s4280_s29 }
 0x68f   : > { %v4183_v38 = vld [vmem:[%s564_s18 + $0x10] sm:$0xff]  ;;  %v4184_v31 = vld [vmem:[%s564_s18 + $0x18] sm:$0xff]  ;;  %v4181_v60 = vld [vmem:[%s564_s18] sm:$0xff]  ;;  %s6994_s20 = scalar_lea.hbm %s7055_s11, %s4732_s26  ;;  %s4262_s19 = scalar_lea.sflag [#allocation5], %s5484_s28 }
 0x690   : > { %v4182_v61 = vld [vmem:[%s564_s18 + $0x8] sm:$0xff]  ;;  %v4185_v37 = vld [vmem:[%s564_s18 + $0x20] sm:$0xff]  ;;  %v4187_v28 = vld [vmem:[%s564_s18 + $0x30] sm:$0xff]  ;;  %s5282_s1 = scalar_lea.vmem %s6996_s29, 1024  ;;  %s5360_s3 = smov [#allocation4]  }
 0x691   : > { %v4186_v5 = vld [vmem:[%s564_s18 + $0x28] sm:$0xff]  ;;  %v4188_v53 = vld [vmem:[%s564_s18 + $0x38] sm:$0xff]  ;;  %p5283_p5 = scmp.ne.s32.totalorder %s6996_s29, %s5282_s1  ;;  %s5286_s25 = sshll.u32 %s5360_s3, 4  ;;  %s5287_s25 = int_to_ptr.vmem [resolvable:$false] %s5286_s25 }
 0x692   : > { %s5288_s5 = scalar_lea.vmem %s5287_s25, 2048  ;;  %p5289_p11 = scmp.lt.s32.totalorder %s6996_s29, %s5287_s25 }
 0x693   : > { %p5284_p7 = pnand %p5283_p5, %p5465_p6  ;;  %p5290_p12 = scmp.lt.s32.totalorder %s5288_s5, %s5282_s1 }
 0x695   : > { %p5285_p10 = pneg %p5284_p7  ;;  %p5291_p13 = por %p5290_p12, %p5289_p11 }
 0x697   : > { %p5292_p0 = pnand %p5291_p13, %p5285_p10 }
 0x6e1   : > { %v4210_v16 = vpop.permute.xlu0 %4209 }
 0x6e2   : > { %v4231_v15 = vadd.f32 %v4210_v16, %v4183_v38 }
 0x6e3   : > { %v4212_v18 = vpop.permute.xlu1 %4211 }
 0x6e4   : > { %4239 = vst.msk [vmem:[%s547_s16 + $0x10] sm:$0xff] %vm607_vm0, %v4231_v15  ;;  %v4232_v11 = vadd.f32 %v4212_v18, %v4184_v31 }
 0x6e5   : > { %v4206_v35 = vpop.permute.xlu0 %4205 }
 0x6e6   : > { %4240 = vst.msk [vmem:[%s547_s16 + $0x18] sm:$0xff] %vm607_vm0, %v4232_v11  ;;  %v4229_v29 = vadd.f32 %v4206_v35, %v4181_v60 }
 0x6e7   : > { %v4208_v24 = vpop.permute.xlu1 %4207 }
 0x6e8   : > { %4237 = vst.msk [vmem:[%s547_s16] sm:$0xff] %vm607_vm0, %v4229_v29  ;;  %v4230_v46 = vadd.f32 %v4208_v24, %v4182_v61 }
 0x6ea   : > { %4238 = vst.msk [vmem:[%s547_s16 + $0x8] sm:$0xff] %vm607_vm0, %v4230_v46  ;;  %v4214_v39 = vpop.permute.xlu0 %4213 }
 0x6eb   : > { %v4233_v25 = vadd.f32 %v4214_v39, %v4185_v37 }
 0x6ec   : > { %v4216_v6 = vpop.permute.xlu1 %4215 }
 0x6ed   : > { %4241 = vst.msk [vmem:[%s547_s16 + $0x20] sm:$0xff] %vm607_vm0, %v4233_v25  ;;  %v4234_v34 = vadd.f32 %v4216_v6, %v4186_v5 }
 0x6ee   : > { %v4218_v44 = vpop.permute.xlu0 %4217 }
 0x6ef   : > { %4242 = vst.msk [vmem:[%s547_s16 + $0x28] sm:$0xff] %vm607_vm0, %v4234_v34  ;;  %v4235_v0 = vadd.f32 %v4218_v44, %v4187_v28 }
 0x6f0   : > { %v4220_v51 = vpop.permute.xlu1 %4219 }
 0x6f1   : > { %4243 = vst.msk [vmem:[%s547_s16 + $0x30] sm:$0xff] %vm607_vm0, %v4235_v0  ;;  %v4236_v1 = vadd.f32 %v4220_v51, %v4188_v53 }
 0x6f3   : > { %4244 = vst.msk [vmem:[%s547_s16 + $0x38] sm:$0xff] %vm607_vm0, %v4236_v1 }
 0x6f4   : > { %5295 = shalt.err (!%p5292_p0)
}
 0x6f5   : > { %s5296_s26 = scalar_lea.hbm %s6994_s20, 1024  ;;  %s5300_s18 = scalar_lea.hbm %s7055_s11, 2048 }
 0x6f6   : > { %p5297_p1 = scmp.ne.s32.totalorder %s6994_s20, %s5296_s26  ;;  %p5301_p4 = scmp.lt.u32.totalorder %s6994_s20, %s7055_s11 }
 0x6f7   : > { %p5302_p5 = scmp.lt.u32.totalorder %s5300_s18, %s5296_s26  ;;  %p5304_p10 = scmp.lt.u32.totalorder %s5296_s26, %s6994_s20 }
 0x6f8   : > { %p5298_p2 = pnand %p5297_p1, %p5465_p6 }
 0x6f9   : > { %p5303_p7 = por %p5302_p5, %p5301_p4 }
 0x6fa   : > { %p5299_p3 = pneg %p5298_p2 }
 0x6fb   : > { %p5305_p11 = por %p5304_p10, %p5303_p7 }
 0x6fd   : > { %p5306_p12 = pnand %p5305_p11, %p5299_p3 }
 0x6ff   : > { %5309 = shalt.err (!%p5306_p12)
}
 0x700   : > { %4999 = dma.vmem_to_hbm [thread:$0]  (%p5465_p6), %s6996_s29, 1024, %s6994_s20, %s4262_s19, %s5358_s0, %s5358_s0, %s5359_s4  }
 0x701 PF: > { %s4311_s15 = sand.u32 1, %s5336_s21   ;;  %p5004_p13 = pnand %p4422_p9, %p5469_p8 }
 0x702   : > { %s4312_s1 = scalar_lea.sflag [#allocation5], %s4311_s15 }
 0x703   : > { %5327 = dma.done.wait (!%p5004_p13), %s4312_s1, 1024  }
 0x704   : > { %5329 = vsyncadd (!%p5004_p13), %s4312_s1, 4294966272  ;;  %s4321_s13 = scalar_lea.sflag [#allocation7], %s4311_s15 }
 0x705   : > { %5331 = dma.done.wait (!%p5004_p13), %s4321_s13, 1024  }
 0x706   : > { %5333 = vsyncadd (!%p5004_p13), %s4321_s13, 4294966272  ;;  %s7162_s28 = sld [smem:[#allocation10_spill]]  ;;  %p26_p6 = scmp.ge.s32.totalorder %s5451_s27, 4  }
 0x707   : > { %s7163_s21 = smov %s5340_s22  ;;  %s7164_s22 = smov %s5344_s23 }
 0x708   : > { %s7166_s24 = smov %s5451_s27  ;;  %28 = sbr.rel (!%p26_p6) target bundleno = 12 (0xc), region = 173 }
 0x70c   : > { %s7165_s23 = smov %s7162_s28 }
 0x70f   :  { %4326 = vsyncpa [#allocation5], 1 }
 0x710   :  { %4328 = vsyncpa [#allocation5 + $0x1], 1 }
 0x711   :  { %4329 = vsyncpa [#allocation7], 1 }
 0x712   :  { %4331 = vsyncpa [#allocation7 + $0x1], 1 }

// kernel: fea_learning_forward.2
= control target key start
LH: loop header
LB: loop body
LE: loop exit
PB: predicated region body
PF: predicated region fallthrough
CT: control target
= control target key end

     0   :  { %s7439_s24 = smov 0   ;;  %s7441_s25 = smov 0   ;;  %s10290_s0 = inlined_call_operand.vmem [shape: bf16[2,2,8,8,32], index: 0, kind: input, shape index: {}]   ;;  %s10291_s1 = inlined_call_operand.vmem [shape: bf16[32,32], index: 1, kind: input, shape index: {}]   ;;  %s10292_s2 = inlined_call_operand.vmem [shape: f32[1,32], index: 2, kind: input, shape index: {}, may-alias: {2,4}]   ;;  %s10293_s3 = inlined_call_operand.vmem [shape: bf16[576,32], index: 3, kind: input, shape index: {}]   ;;  %s10294_s4 = inlined_call_operand.vmem [shape: f32[1,32], index: 4, kind: input, shape index: {}, may-alias: {2,4}]   ;;  %s10295_s5 = inlined_call_operand.vmem [shape: f32[2,2,32], index: 5, kind: input, shape index: {}]   ;;  %s10296_s6 = inlined_call_operand.vmem [shape: f32[2,2,32], index: 6, kind: input, shape index: {}]   ;;  %s10297_s7 = inlined_call_operand.vmem [shape: bf16[2,2,8,8,32], index: 7, kind: output, shape index: {}]  }
   0x1   :  { %s7443_s26 = smov 0  }
   0x2 LB: > { %s29_s27 = sadd.s32 1, %s7389_s25  ;;  %p6279_p0 = scmp.ge.s32.totalorder %s7393_s26, 1  ;;  %s7393_s26 = sphi %s7443_s26, %s17_s26   ;;  %s7389_s25 = sphi %s7441_s25, %s10608_s25   ;;  %s7385_s24 = sphi %s7439_s24, %s10607_s24  }
   0x3   : > { %p31_p1 = scmp.ge.s32.totalorder %s29_s27, 2  ;;  %p277_p2 = scmp.lt.s32.totalorder %s7393_s26, 3 }
   0x5   : > { %s10610_s27 = smov (%p31_p1, %s29_s27), 0  ;;  %p278_p3 = pnand %p6279_p0, %p277_p2 }
   0x7   : > { %281 = sbr.rel (%p278_p3) target bundleno = 1222 (0x4c6), region = 48 }
   0xe   : > { %v7026_v0 = vld [vmem:[%s10291_s1] sm:$0xff]   ;;  %p328_p4 = scmp.lt.s32.totalorder %s7385_s24, 1  ;;  %v7027_v1 = vld [vmem:[%s10291_s1 + $0x8] sm:$0xff]   ;;  %vm559_vm0 = vcmask 257024   ;;  %vm561_vm1 = vcmask 254976   ;;  %v7395_v2 = vmov 0  }
   0xf   : > { %6946 = vmatprep.subr.bf16.mxu0 %v7026_v0  ;;  %563 = vst.msk [vmem:[#allocation2 + $0x8] sm:$0xf] %vm559_vm0, %v7395_v2  ;;  %560 = vst.msk [vmem:[#allocation2] sm:$0xf] %vm559_vm0, %v7395_v2  ;;  %vm437_vm2 = vcmask 261120   ;;  %s7396_s13 = smov 64  }
  0x10   : > { %s10612_s24 = smov (!%p328_p4, %s7385_s24), 1  ;;  %6947 = vmatpush3.bf16.msra.mxu0 %v7026_v0  ;;  %564 = vst.msk [vmem:[#allocation2 + $0xc] sm:$0x3] %vm561_vm1, %v7395_v2  ;;  %562 = vst.msk [vmem:[#allocation2 + $0x4] sm:$0x3] %vm561_vm1, %v7395_v2  ;;  %s7397_s14 = smov 32  }
  0x11   : > { %565 = vst.msk [vmem:[#allocation2 + $0x10] sm:$0xf] %vm559_vm0, %v7395_v2  ;;  %567 = vst.msk [vmem:[#allocation2 + $0x18] sm:$0xf] %vm559_vm0, %v7395_v2  ;;  %6948 = vmatprep.subr.bf16.mxu0 %v7027_v1  ;;  %s6778_s9 = sshll.u32 %s10612_s24, 6  ;;  %s7398_s15 = smov 96  }
  0x12   : > { %566 = vst.msk [vmem:[#allocation2 + $0x14] sm:$0x3] %vm561_vm1, %v7395_v2  ;;  %568 = vst.msk [vmem:[#allocation2 + $0x1c] sm:$0x3] %vm561_vm1, %v7395_v2  ;;  %s7519_s12 = scalar_lea.vmem %s10290_s0, %s6778_s9  ;;  %vm738_vm3 = vcmask 257025   ;;  %vm740_vm4 = vcmask 253952   ;;  %s10235_s29 = scalar_lea.vmem %s10297_s7, %s6778_s9 }
  0x13   : > { %569 = vst.msk [vmem:[#allocation2 + $0x20] sm:$0xf] %vm559_vm0, %v7395_v2  ;;  %571 = vst.msk [vmem:[#allocation2 + $0x28] sm:$0xf] %vm559_vm0, %v7395_v2  ;;  %v7028_v3 = vld [vmem:[%s7519_s12] sm:$0xff]   ;;  %v7029_v4 = vld [vmem:[%s7519_s12 + $0x8] sm:$0xff]  }
  0x14   : > { %570 = vst.msk [vmem:[#allocation2 + $0x24] sm:$0x3] %vm561_vm1, %v7395_v2  ;;  %572 = vst.msk [vmem:[#allocation2 + $0x2c] sm:$0x3] %vm561_vm1, %v7395_v2  ;;  %6949 = vmatpush3.bf16.msra.mxu0 %v7027_v1  ;;  %6950 = vmatprep.mubr.msk.bf16.mxu0 %vm437_vm2, %v7028_v3  ;;  %v7030_v5 = vld [vmem:[%s7519_s12 + $0x10] sm:$0xff]   ;;  %v7031_v9 = vld [vmem:[%s7519_s12 + $0x18] sm:$0xff]  }
  0x15   : > { %573 = vst.msk [vmem:[#allocation2 + $0x30] sm:$0xf] %vm559_vm0, %v7395_v2  ;;  %575 = vst.msk [vmem:[#allocation2 + $0x38] sm:$0xf] %vm559_vm0, %v7395_v2  ;;  %v7032_v14 = vld [vmem:[%s7519_s12 + $0x20] sm:$0xff]   ;;  %v7033_v31 = vld [vmem:[%s7519_s12 + $0x28] sm:$0xff]  }
  0x16   : > { %574 = vst.msk [vmem:[#allocation2 + $0x34] sm:$0x3] %vm561_vm1, %v7395_v2  ;;  %576 = vst.msk [vmem:[#allocation2 + $0x3c] sm:$0x3] %vm561_vm1, %v7395_v2  ;;  %v805_v7 = vld [vmem:[#allocation2 + $0x8] sm:$0xe] }
  0x17   : > { %577 = vst.msk [vmem:[#allocation2 + $0x40] sm:$0xf] %vm559_vm0, %v7395_v2  ;;  %579 = vst.msk [vmem:[#allocation2 + $0x48] sm:$0xf] %vm559_vm0, %v7395_v2  ;;  %6951 = vmatmul.mubr.msk.bf16.vlgmr.msra.gmra.mrb[0].mxu0 %vm437_vm2, %v7029_v4  ;;  %v774_v6 = vld [vmem:[#allocation2 + $0xc] sm:$0x1] }
  0x18   : > { %578 = vst.msk [vmem:[#allocation2 + $0x44] sm:$0x3] %vm561_vm1, %v7395_v2  ;;  %580 = vst.msk [vmem:[#allocation2 + $0x4c] sm:$0x3] %vm561_vm1, %v7395_v2  ;;  %6954 = vmatprep.mubr.msk.bf16.mxu0 %vm437_vm2, %v7030_v5  ;;  %v821_v8 = vld [vmem:[#allocation2 + $0xc] sm:$0x3]  ;;  %v6337_v11 = vcombine.low %v805_v7, %v774_v6 }
  0x19   : > { %581 = vst.msk [vmem:[#allocation2 + $0x50] sm:$0xf] %vm559_vm0, %v7395_v2  ;;  %583 = vst.msk [vmem:[#allocation2 + $0x58] sm:$0xf] %vm559_vm0, %v7395_v2  ;;  %v6353_v10 = vcombine.low %v805_v7, %v821_v8  ;;  %v7040_v19 = vld [vmem:[#allocation2 + $0x8] ss:$0 sps:$4 sm:$0xff]  }
  0x1a   : > { %582 = vst.msk [vmem:[#allocation2 + $0x54] sm:$0x3] %vm561_vm1, %v7395_v2  ;;  %584 = vst.msk [vmem:[#allocation2 + $0x5c] sm:$0x3] %vm561_vm1, %v7395_v2  ;;  %v1274_v18 = vshll.u32 %v6337_v11, 16  ;;  %v1272_v20 = vshrl.u32 %v6337_v11, 16 }
  0x1b   : > { %585 = vst.msk [vmem:[#allocation2 + $0x60] sm:$0xf] %vm559_vm0, %v7395_v2  ;;  %587 = vst.msk [vmem:[#allocation2 + $0x68] sm:$0xf] %vm559_vm0, %v7395_v2  ;;  %v1463_v17 = vrot.slane %v6353_v10, 1  ;;  %v2303_v23 = vshrl.u32 %v7040_v19, 16 }
  0x1c   : > { %586 = vst.msk [vmem:[#allocation2 + $0x64] sm:$0x3] %vm561_vm1, %v7395_v2  ;;  %588 = vst.msk [vmem:[#allocation2 + $0x6c] sm:$0x3] %vm561_vm1, %v7395_v2  ;;  %v7041_v21 = vld [vmem:[#allocation2] ss:$0 sps:$4 sm:$0xff]  }
  0x1d   : > { %589 = vst.msk [vmem:[#allocation2 + $0x70] sm:$0xf] %vm559_vm0, %v7395_v2  ;;  %591 = vst.msk [vmem:[#allocation2 + $0x78] sm:$0xf] %vm559_vm0, %v7395_v2  ;;  %1479 = vrot.lane.b32.xlu0 %v1463_v17, %s7396_s13  ;;  %v1276_v22 = vrot.slane %v1274_v18, 1  ;;  %v2306_v24 = vshll.u32 %v7040_v19, 16 }
  0x1e   : > { %590 = vst.msk [vmem:[#allocation2 + $0x74] sm:$0x3] %vm561_vm1, %v7395_v2  ;;  %592 = vst.msk [vmem:[#allocation2 + $0x7c] sm:$0x3] %vm561_vm1, %v7395_v2  ;;  %v2296_v25 = vshrl.u32 %v7041_v21, 16  ;;  %v2299_v26 = vshll.u32 %v7041_v21, 16 }
  0x1f   : > { %593 = vst.msk [vmem:[#allocation2 + $0x80] sm:$0xf] %vm559_vm0, %v7395_v2  ;;  %595 = vst.msk [vmem:[#allocation2 + $0x88] sm:$0xf] %vm559_vm0, %v7395_v2  ;;  %6955 = vmatmul.mubr.msk.bf16.gmra.mrb[4].mxu0 %vm437_vm2, %v7031_v9  ;;  %v7042_v27 = vld [vmem:[#allocation2 + $0x8] sm:$0x1e]   ;;  %v1277_v29 = vor.u32 %v1276_v22, %v1272_v20 }
  0x20   : > { %594 = vst.msk [vmem:[#allocation2 + $0x84] sm:$0x3] %vm561_vm1, %v7395_v2  ;;  %596 = vst.msk [vmem:[#allocation2 + $0x8c] sm:$0x3] %vm561_vm1, %v7395_v2  ;;  %v916_v12 = vld [vmem:[#allocation2 + $0x50] sm:$0xf]  ;;  %6958 = vmatprep.mubr.msk.bf16.mxu0 %vm437_vm2, %v7032_v14 }
  0x21   : > { %597 = vst.msk [vmem:[#allocation2 + $0x90] sm:$0xf] %vm559_vm0, %v7395_v2  ;;  %599 = vst.msk [vmem:[#allocation2 + $0x98] sm:$0xf] %vm559_vm0, %v7395_v2  ;;  %v917_v13 = vld [vmem:[#allocation2 + $0x54] sm:$0x1]  ;;  %1383 = vrot.lane.b32.xlu0 %v1277_v29, %s7397_s14 }
  0x22   : > { %598 = vst.msk [vmem:[#allocation2 + $0x94] sm:$0x3] %vm561_vm1, %v7395_v2  ;;  %600 = vst.msk [vmem:[#allocation2 + $0x9c] sm:$0x3] %vm561_vm1, %v7395_v2  ;;  %v941_v15 = vld [vmem:[#allocation2 + $0x50] sm:$0xe]  ;;  %v6424_v16 = vcombine.low %v916_v12, %v917_v13 }
  0x23   : > { %601 = vst.msk [vmem:[#allocation2 + $0xa0] sm:$0xf] %vm559_vm0, %v7395_v2  ;;  %603 = vst.msk [vmem:[#allocation2 + $0xa8] sm:$0xf] %vm559_vm0, %v7395_v2  ;;  %v6440_v28 = vcombine.low %v941_v15, %v917_v13  ;;  %v7043_v30 = vld [vmem:[#allocation2] sm:$0x1e]  }
  0x24   : > { %602 = vst.msk [vmem:[#allocation2 + $0xa4] sm:$0x3] %vm561_vm1, %v7395_v2  ;;  %604 = vst.msk [vmem:[#allocation2 + $0xac] sm:$0x3] %vm561_vm1, %v7395_v2  ;;  %1973 = vrot.lane.b32.xlu1 %v6424_v16, %s7396_s13  ;;  %v2305_v32 = vrot.slane %v2303_v23, 7  ;;  %v2298_v33 = vrot.slane %v2296_v25, 7 }
  0x25   : > { %605 = vst.msk [vmem:[#allocation2 + $0xb0] sm:$0xf] %vm559_vm0, %v7395_v2  ;;  %607 = vst.msk [vmem:[#allocation2 + $0xb8] sm:$0xf] %vm559_vm0, %v7395_v2  ;;  %v2527_v34 = vshrl.u32 %v7042_v27, 16  ;;  %v2529_v35 = vshll.u32 %v7042_v27, 16 }
  0x26   : > { %606 = vst.msk [vmem:[#allocation2 + $0xb4] sm:$0x3] %vm561_vm1, %v7395_v2  ;;  %608 = vst.msk [vmem:[#allocation2 + $0xbc] sm:$0x3] %vm561_vm1, %v7395_v2  ;;  %v2520_v36 = vshrl.u32 %v7043_v30, 16  ;;  %v2522_v37 = vshll.u32 %v7043_v30, 16  ;;  %v2308_v39 = vor.u32 %v2306_v24, %v2305_v32  ;;  %v2301_v40 = vor.u32 %v2299_v26, %v2298_v33 }
  0x27   : > { %v7044_v38 = vld [vmem:[#allocation2 + $0x8] sm:$0x3c]   ;;  %v2531_v41 = vrot.slane %v2529_v35, 1  ;;  %v7047_v42 = vld [vmem:[%s7519_s12 + $0x30] sm:$0xff]   ;;  %v2091_v43 = vshll.u32 %v6440_v28, 16  ;;  %6959 = vmatmul.mubr.msk.bf16.gmra.mrb[8].mxu0 %vm437_vm2, %v7033_v31  ;;  %v2089_v55 = vshrl.u32 %v6440_v28, 16 }
  0x28   : > { %v2524_v44 = vrot.slane %v2522_v37, 1  ;;  %v2752_v45 = vshrl.u32 %v7044_v38, 16  ;;  %v2755_v46 = vshll.u32 %v7044_v38, 16  ;;  %v7045_v47 = vld [vmem:[#allocation2] sm:$0x3c]   ;;  %2409 = vrot.lane.b32.xlu1 %v2308_v39, %s7397_s14  ;;  %2407 = vrot.lane.b32.xlu0 %v2301_v40, %s7397_s14  ;;  %v7049_v3 = vld [vmem:[%s7519_s12 + $0x38] sm:$0xff]  }
  0x29   : > { %v2532_v48 = vor.u32 %v2531_v41, %v2527_v34  ;;  %v790_v49 = vld [vmem:[#allocation2 + $0x6c] sm:$0x1]  ;;  %v813_v50 = vld [vmem:[#allocation2 + $0x68] sm:$0xe]  ;;  %v2744_v54 = vshrl.u32 %v7045_v47, 16  ;;  %v2747_v56 = vshll.u32 %v7045_v47, 16  ;;  %6962 = vmatprep.mubr.msk.bf16.mxu0 %vm437_vm2, %v7047_v42 }
  0x2a   : > { %v2525_v51 = vor.u32 %v2524_v44, %v2520_v36  ;;  %v2754_v52 = vrot.slane %v2752_v45, 1  ;;  %v2757_v53 = vrot.slane %v2755_v46, 2  ;;  %v6345_v57 = vcombine.low %v813_v50, %v790_v49  ;;  %v7048_v58 = vld [vmem:[#allocation2 + $0x58] ss:$0 sps:$4 sm:$0xff]   ;;  %v829_v1 = vld [vmem:[#allocation2 + $0x6c] sm:$0x3] }
  0x2b   : > { %v2746_v59 = vrot.slane %v2744_v54, 1  ;;  %v2093_v60 = vrot.slane %v2091_v43, 1  ;;  %v2749_v62 = vrot.slane %v2747_v56, 2  ;;  %v3369_v0 = vshrl.u32 %v7048_v58, 16  ;;  %v7051_v13 = vld [vmem:[#allocation2 + $0x68] ss:$0 sps:$4 sm:$0xff]  }
  0x2c   : > { %2633 = vrot.lane.b32.xlu1 %v2532_v48, %s7396_s13  ;;  %v2758_v61 = vor.u32 %v2757_v53, %v2754_v52  ;;  %v1330_v63 = vshll.u32 %v6345_v57, 16  ;;  %2631 = vrot.lane.b32.xlu0 %v2525_v51, %s7396_s13  ;;  %v1328_v2 = vshrl.u32 %v6345_v57, 16  ;;  %v6361_v4 = vcombine.low %v813_v50, %v829_v1  ;;  %v7052_v15 = vld [vmem:[#allocation2 + $0x50] ss:$0 sps:$4 sm:$0xff]   ;;  %v7053_v19 = vld [vmem:[#allocation2 + $0x68] sm:$0x1e]  }
  0x2d   : > { %v2750_v5 = vor.u32 %v2749_v62, %v2746_v59  ;;  %v3372_v7 = vshll.u32 %v7048_v58, 16  ;;  %v3371_v8 = vrot.slane %v3369_v0, 7  ;;  %v2094_v10 = vor.u32 %v2093_v60, %v2089_v55  ;;  %v7054_v24 = vld [vmem:[#allocation2 + $0x60] ss:$0 sps:$4 sm:$0xff]   ;;  %v7055_v29 = vld [vmem:[#allocation2 + $0x68] sm:$0x3c]  }
  0x2e   : > { %v1332_v6 = vrot.slane %v1330_v63, 1  ;;  %v1471_v9 = vrot.slane %v6361_v4, 1  ;;  %v2359_v14 = vshrl.u32 %v7051_v13, 16  ;;  %v2362_v17 = vshll.u32 %v7051_v13, 16  ;;  %v7056_v34 = vld [vmem:[#allocation2 + $0x60] sm:$0x1e]  }
  0x2f   : > { %6963 = vmatmul.mubr.msk.bf16.gmra.mrb[12].mxu0 %vm437_vm2, %v7049_v3  ;;  %v3374_v12 = vor.u32 %v3372_v7, %v3371_v8  ;;  %v3362_v18 = vshrl.u32 %v7052_v15, 16  ;;  %v3365_v22 = vshll.u32 %v7052_v15, 16  ;;  %v2585_v23 = vshll.u32 %v7053_v19, 16  ;;  %v7058_v42 = vld [vmem:[#allocation2 + $0x60] sm:$0x3c]  }
  0x30   : > { %2873 = vrot.lane.b32.xlu1 %v2758_v61, %s7398_s15  ;;  %2871 = vrot.lane.b32.xlu0 %v2750_v5, %s7398_s15  ;;  %v1333_v11 = vor.u32 %v1332_v6, %v1328_v2  ;;  %v2361_v16 = vrot.slane %v2359_v14, 7  ;;  %v2583_v26 = vshrl.u32 %v7053_v19, 16  ;;  %v2352_v28 = vshrl.u32 %v7054_v24, 16  ;;  %v7560_v50 = vld [vmem:[%s10292_s2] ss:$0 sm:$0xff] }
  0x31   : > { %v3364_v21 = vrot.slane %v3362_v18, 7  ;;  %v2587_v27 = vrot.slane %v2585_v23, 1  ;;  %v2355_v32 = vshll.u32 %v7054_v24, 16  ;;  %v2816_v33 = vshrl.u32 %v7055_v29, 16 }
  0x32   : > { %v2364_v20 = vor.u32 %v2362_v17, %v2361_v16  ;;  %v2354_v31 = vrot.slane %v2352_v28, 7  ;;  %v2819_v35 = vshll.u32 %v7055_v29, 16  ;;  %v2578_v38 = vshll.u32 %v7056_v34, 16 }
  0x33   : > { %v3367_v25 = vor.u32 %v3365_v22, %v3364_v21  ;;  %v2588_v30 = vor.u32 %v2587_v27, %v2583_v26  ;;  %v2818_v37 = vrot.slane %v2816_v33, 1  ;;  %v2576_v40 = vshrl.u32 %v7056_v34, 16 }
  0x34   : > { %2165 = vrot.lane.b32.xlu1 %v2094_v10, %s7398_s15  ;;  %1399 = vrot.lane.b32.xlu0 %v1333_v11, %s7397_s14  ;;  %v2357_v36 = vor.u32 %v2355_v32, %v2354_v31  ;;  %v2821_v39 = vrot.slane %v2819_v35, 2  ;;  %v2580_v41 = vrot.slane %v2578_v38, 1  ;;  %v2808_v45 = vshrl.u32 %v7058_v42, 16 }
  0x35   : > { %v2811_v46 = vshll.u32 %v7058_v42, 16  ;;  %vm3511_vm5 = vcmask 523264   ;;  %vm3544_vm6 = vcmask 785408   ;;  %vm4585_vm7 = vsmask.f32 3328 }
  0x36   : > { %v2822_v43 = vor.u32 %v2821_v39, %v2818_v37  ;;  %v2581_v44 = vor.u32 %v2580_v41, %v2576_v40  ;;  %v2810_v47 = vrot.slane %v2808_v45, 1  ;;  %vm4586_vm8 = vsmask.f32 7440 }
  0x37   : > { %v2813_v48 = vrot.slane %v2811_v46, 2  ;;  %vm8537_vm9 = vmor %vm4585_vm7, %vm4586_vm8 }
  0x38   : > { %3445 = vrot.lane.b32.xlu1 %v3374_v12, %s7398_s15  ;;  %1495 = vrot.lane.b32.xlu0 %v1471_v9, %s7396_s13 }
  0x39   : > { %v2814_v49 = vor.u32 %v2813_v48, %v2810_v47 }
  0x3c   : > { %2425 = vrot.lane.b32.xlu1 %v2364_v20, %s7397_s14  ;;  %3443 = vrot.lane.b32.xlu0 %v3367_v25, %s7398_s15 }
  0x40   : > { %2649 = vrot.lane.b32.xlu1 %v2588_v30, %s7396_s13  ;;  %2423 = vrot.lane.b32.xlu0 %v2357_v36, %s7397_s14 }
  0x44   : > { %2889 = vrot.lane.b32.xlu1 %v2822_v43, %s7398_s15  ;;  %2647 = vrot.lane.b32.xlu0 %v2581_v44, %s7396_s13  ;;  %v7082_v43 = vld [vmem:[#allocation2 + $0x20] ss:$0 sps:$4 sm:$0xff]  }
  0x48   : > { %2887 = vrot.lane.b32.xlu0 %v2814_v49, %s7398_s15 }
  0xea   : > { %v6952_v51 = vpop.f32.mrb[0].mxu0 }
  0xeb   : > { %v505_v52 = vadd.f32 %v6952_v51, %v7560_v50  ;;  %v496_v53 = vpop.f32.mrb[1].mxu0 }
  0xec   : > { %v497_v54 = vadd.f32 %v7560_v50, %v496_v53  ;;  %v6953_v55 = vpop.f32.mrb[2].mxu0  ;;  %v3320_v53 = vshrl.u32 %v7082_v43, 16 }
  0xed   : > { %v6782_v56 = vpack.c.bf16 %v505_v52, %v505_v52  ;;  %v508_v57 = vadd.f32 %v6953_v55, %v7560_v50  ;;  %v499_v58 = vpop.f32.mrb[3].mxu0 }
  0xee   : > { %v6780_v59 = vpack.c.bf16 %v497_v54, %v497_v54  ;;  %v500_v60 = vadd.f32 %v7560_v50, %v499_v58 }
  0xef   : > { %v677_v61 = vrot.slane %v6782_v56, 7  ;;  %v6783_v62 = vpack.c.bf16 %v508_v57, %v508_v57 }
  0xf0   : > { %v673_v63 = vrot.slane %v6780_v59, 7  ;;  %v6781_v0 = vpack.c.bf16 %v500_v60, %v500_v60 }
  0xf1   : > { %v678_v1 = vrot.slane %v677_v61, 4  ;;  %744 = vst.msk [vmem:[#allocation2 + $0x20] sm:$0xe] %vm738_vm3, %v677_v61  ;;  %v679_v2 = vrot.slane %v6783_v62, 7 }
  0xf2   : > { %v674_v3 = vrot.slane %v673_v63, 4  ;;  %739 = vst.msk [vmem:[#allocation2 + $0x10] sm:$0xe] %vm738_vm3, %v673_v63  ;;  %v675_v4 = vrot.slane %v6781_v0, 7  ;;  %v6956_v5 = vpop.f32.mrb[4].mxu0  ;;  %v3322_v63 = vrot.slane %v3320_v53, 7 }
  0xf3   : > { %745 = vst.msk [vmem:[#allocation2 + $0x24] sm:$0x1] %vm740_vm4, %v678_v1  ;;  %v680_v6 = vrot.slane %v679_v2, 4  ;;  %v521_v7 = vadd.f32 %v6956_v5, %v7560_v50  ;;  %v512_v8 = vpop.f32.mrb[5].mxu0  ;;  %v7090_v1 = vld [vmem:[#allocation2 + $0x20] ss:$0 sps:$4 sm:$0xff]  }
  0xf4   : > { %746 = vst.msk [vmem:[#allocation2 + $0x28] sm:$0xe] %vm738_vm3, %v679_v2  ;;  %v676_v9 = vrot.slane %v675_v4, 4  ;;  %742 = vst.msk [vmem:[#allocation2 + $0x18] sm:$0xe] %vm738_vm3, %v675_v4  ;;  %v6957_v10 = vpop.f32.mrb[6].mxu0  ;;  %v513_v44 = vadd.f32 %v7560_v50, %v512_v8 }
  0xf5   : > { %741 = vst.msk [vmem:[#allocation2 + $0x14] sm:$0x1] %vm740_vm4, %v674_v3  ;;  %747 = vst.msk [vmem:[#allocation2 + $0x2c] sm:$0x1] %vm740_vm4, %v680_v6  ;;  %v6786_v11 = vpack.c.bf16 %v521_v7, %v521_v7  ;;  %v515_v12 = vpop.f32.mrb[7].mxu0  ;;  %v524_v45 = vadd.f32 %v6957_v10, %v7560_v50  ;;  %v3323_v8 = vshll.u32 %v7082_v43, 16 }
  0xf6   : > { %743 = vst.msk [vmem:[#allocation2 + $0x1c] sm:$0x1] %vm740_vm4, %v676_v9  ;;  %v516_v48 = vadd.f32 %v7560_v50, %v515_v12  ;;  %v6784_v55 = vpack.c.bf16 %v513_v44, %v513_v44  ;;  %v7096_v43 = vld [vmem:[#allocation2 + $0x10] ss:$0 sps:$4 sm:$0xff]   ;;  %v2327_v44 = vshll.u32 %v7090_v1, 16 }
  0xf7   : > { %v7575_v13 = vrot.slane %v6786_v11, 7  ;;  %v6787_v56 = vpack.c.bf16 %v524_v45, %v524_v45  ;;  %v2310_v53 = vshrl.u32 %v7096_v43, 16 }
  0xf8   : > { %v904_v14 = vld [vmem:[#allocation2 + $0x20] sm:$0xf]  ;;  %v6785_v60 = vpack.c.bf16 %v516_v48, %v516_v48  ;;  %v681_v5 = vrot.slane %v6784_v55, 7  ;;  %v7097_v55 = vld [vmem:[#allocation2 + $0x28] ss:$0 sps:$4 sm:$0xff]  }
  0xf9   : > { %752 = vst.msk [vmem:[#allocation2 + $0x40] sm:$0xe] %vm738_vm3, %v7575_v13  ;;  %v841_v16 = vld [vmem:[#allocation2 + $0x20] sm:$0xf]  ;;  %v837_v24 = vld [vmem:[#allocation2 + $0x10] sm:$0xf] }
  0xfa   : > { %v7579_v15 = vld [vmem:[#allocation2 + $0x24] sm:$0x1]  ;;  %v7585_v20 = vld [vmem:[#allocation2 + $0x20] sm:$0xe]  ;;  %v7592_v25 = vpop.f32.mrb[8].mxu0  ;;  %v686_v4 = vrot.slane %v7575_v13, 4 }
  0xfb   : > { %v7581_v17 = vld [vmem:[#allocation2 + $0x24] sm:$0x1]  ;;  %v6418_v18 = vcombine.low %v904_v14, %v7579_v15  ;;  %v7594_v26 = vld [vmem:[#allocation2 + $0x20] sm:$0xe]  ;;  %v7598_v28 = vpop.f32.mrb[9].mxu0  ;;  %v687_v6 = vrot.slane %v6787_v56, 7 }
  0xfc   : > { %v6371_v19 = vcombine.low %v841_v16, %v7581_v17  ;;  %v824_v21 = vld [vmem:[#allocation2 + $0x24] sm:$0x3]  ;;  %v7588_v23 = vld [vmem:[#allocation2 + $0x14] sm:$0x1]  ;;  %v7603_v32 = vld [vmem:[#allocation2 + $0x2c] sm:$0x1] }
  0xfd   : > { %v6356_v22 = vcombine.low %v7585_v20, %v824_v21  ;;  %1961 = vrot.lane.b32.xlu1 %v6418_v18, %s7396_s13  ;;  %v7596_v27 = vld [vmem:[#allocation2 + $0x24] sm:$0x3]  ;;  %v6369_v30 = vcombine.low %v837_v24, %v7588_v23  ;;  %v7605_v33 = vld [vmem:[#allocation2 + $0x14] sm:$0x3]  ;;  %v7607_v34 = vpop.f32.mrb[10].mxu0  ;;  %v682_v14 = vrot.slane %v681_v5, 4 }
  0xfe   : > { %1595 = vrot.lane.b32.xlu0 %v6371_v19, %s7398_s15  ;;  %v6403_v31 = vcombine.low %v7594_v26, %v7596_v27  ;;  %v7611_v35 = vpop.f32.mrb[11].mxu0  ;;  %v843_v36 = vld [vmem:[#allocation2 + $0x28] sm:$0xf]  ;;  %v7613_v37 = vld [vmem:[#allocation2 + $0x10] sm:$0xe]  ;;  %v688_v13 = vrot.slane %v687_v6, 4  ;;  %v3325_v19 = vor.u32 %v3323_v8, %v3322_v63 }
  0xff   : > { %v1466_v29 = vrot.slane %v6356_v22, 1  ;;  %v6372_v38 = vcombine.low %v843_v36, %v7603_v32  ;;  %v6401_v40 = vcombine.low %v7613_v37, %v7605_v33  ;;  %v7618_v41 = vld [vmem:[#allocation2 + $0x2c] sm:$0x1]  ;;  %v822_v42 = vld [vmem:[#allocation2 + $0x14] sm:$0x3]  ;;  %v683_v16 = vrot.slane %v6785_v60, 7 }
 0x100   : > { %v1833_v39 = vrot.slane %v6403_v31, 1  ;;  %v906_v46 = vld [vmem:[#allocation2 + $0x28] sm:$0xf]  ;;  %v7624_v47 = vld [vmem:[#allocation2 + $0x10] sm:$0xe]  ;;  %v2324_v22 = vshrl.u32 %v7090_v1, 16 }
 0x101   : > { %1485 = vrot.lane.b32.xlu1 %v1466_v29, %s7396_s13  ;;  %v1831_v49 = vrot.slane %v6401_v40, 1  ;;  %v6419_v51 = vcombine.low %v906_v46, %v7618_v41  ;;  %v6354_v52 = vcombine.low %v7624_v47, %v822_v42  ;;  %v7629_v54 = vld [vmem:[#allocation2 + $0x1c] sm:$0x1]  ;;  %v902_v57 = vld [vmem:[#allocation2 + $0x18] sm:$0xf]  ;;  %v684_v29 = vrot.slane %v683_v16, 4 }
 0x102   : > { %1591 = vrot.lane.b32.xlu0 %v6369_v30, %s7398_s15  ;;  %v7633_v58 = vld [vmem:[#allocation2 + $0x1c] sm:$0x1]  ;;  %v825_v59 = vld [vmem:[#allocation2 + $0x2c] sm:$0x3]  ;;  %v6417_v61 = vcombine.low %v902_v57, %v7629_v54  ;;  %v935_v2 = vld [vmem:[#allocation2 + $0x20] sm:$0xe] }
 0x103   : > { %v1464_v62 = vrot.slane %v6354_v52, 1  ;;  %v7636_v0 = vld [vmem:[#allocation2 + $0x2c] sm:$0x3]  ;;  %v7638_v3 = vld [vmem:[#allocation2 + $0x28] sm:$0xe]  ;;  %v6434_v18 = vcombine.low %v935_v2, %v7579_v15  ;;  %v2326_v40 = vrot.slane %v2324_v22, 7  ;;  %v537_v22 = vadd.f32 %v7592_v25, %v7560_v50 }
 0x104   : > { %v780_v7 = vld [vmem:[#allocation2 + $0x24] sm:$0x1]  ;;  %v6357_v9 = vcombine.low %v7638_v3, %v825_v59  ;;  %v7644_v10 = vld [vmem:[#allocation2 + $0x28] sm:$0xe]  ;;  %v839_v11 = vld [vmem:[#allocation2 + $0x18] sm:$0xf] }
 0x105   : > { %1597 = vrot.lane.b32.xlu1 %v6372_v38, %s7398_s15  ;;  %v6404_v12 = vcombine.low %v7644_v10, %v7636_v0  ;;  %753 = vst.msk [vmem:[#allocation2 + $0x44] sm:$0x1] %vm740_vm4, %v686_v4  ;;  %v6370_v21 = vcombine.low %v839_v11, %v7633_v58  ;;  %v7653_v24 = vld [vmem:[#allocation2 + $0x1c] sm:$0x3]  ;;  %749 = vst.msk [vmem:[#allocation2 + $0x34] sm:$0x1] %vm740_vm4, %v682_v14  ;;  %v6340_v15 = vcombine.low %v7585_v20, %v780_v7 }
 0x106   : > { %1851 = vrot.lane.b32.xlu0 %v1833_v39, %s7397_s14  ;;  %748 = vst.msk [vmem:[#allocation2 + $0x30] sm:$0xe] %vm738_vm3, %v681_v5  ;;  %754 = vst.msk [vmem:[#allocation2 + $0x48] sm:$0xe] %vm738_vm3, %v687_v6  ;;  %v7660_v30 = vld [vmem:[#allocation2 + $0x18] sm:$0xe]  ;;  %v6387_v20 = vcombine.low %v7594_v26, %v7581_v17 }
 0x107   : > { %755 = vst.msk [vmem:[#allocation2 + $0x4c] sm:$0x1] %vm740_vm4, %v688_v13  ;;  %v1467_v31 = vrot.slane %v6357_v9, 1  ;;  %v1834_v36 = vrot.slane %v6404_v12, 1  ;;  %v6402_v38 = vcombine.low %v7660_v30, %v7653_v24  ;;  %v823_v39 = vld [vmem:[#allocation2 + $0x1c] sm:$0x3] }
 0x108   : > { %750 = vst.msk [vmem:[#allocation2 + $0x38] sm:$0xe] %vm738_vm3, %v683_v16  ;;  %v2049_v42 = vshll.u32 %v6434_v18, 16  ;;  %v7668_v45 = vld [vmem:[#allocation2 + $0x18] sm:$0xe]  ;;  %v2047_v59 = vshrl.u32 %v6434_v18, 16 }
 0x109   : > { %1847 = vrot.lane.b32.xlu1 %v1831_v49, %s7397_s14  ;;  %751 = vst.msk [vmem:[#allocation2 + $0x3c] sm:$0x1] %vm740_vm4, %v684_v29  ;;  %v1832_v46 = vrot.slane %v6402_v38, 1  ;;  %v6355_v48 = vcombine.low %v7668_v45, %v823_v39  ;;  %v1295_v49 = vshll.u32 %v6340_v15, 16  ;;  %v1048_v56 = vld [vmem:[#allocation2 + $0x20] sm:$0xc]  ;;  %v6388_v29 = vcombine.low %v7644_v10, %v7603_v32 }
 0x10a   : > { %1963 = vrot.lane.b32.xlu0 %v6419_v51, %s7396_s13  ;;  %v2329_v51 = vor.u32 %v2327_v44, %v2326_v40  ;;  %v2051_v52 = vrot.slane %v2049_v42, 1  ;;  %v6531_v57 = vcombine.low %v1048_v56, %v7596_v27  ;;  %v2312_v26 = vrot.slane %v2310_v53, 7  ;;  %v7098_v1 = vld [vmem:[#allocation2 + $0x28] ss:$0 sps:$4 sm:$0xff]   ;;  %v7099_v27 = vld [vmem:[#allocation2 + $0x20] sm:$0x1e]  }
 0x10b   : > { %v1465_v60 = vrot.slane %v6355_v48, 1  ;;  %v3327_v63 = vshrl.u32 %v7097_v55, 16  ;;  %v1293_v2 = vshrl.u32 %v6340_v15, 16  ;;  %v2313_v4 = vshll.u32 %v7096_v43, 16  ;;  %v7100_v14 = vld [vmem:[#allocation2 + $0x18] ss:$0 sps:$4 sm:$0xff]  }
 0x10c   : > { %v2052_v17 = vor.u32 %v2051_v52, %v2047_v59  ;;  %v3128_v5 = vshrl.u32 %v6531_v57, 16  ;;  %v3131_v7 = vshll.u32 %v6531_v57, 16  ;;  %v2331_v12 = vshrl.u32 %v7098_v1, 16  ;;  %v776_v16 = vld [vmem:[#allocation2 + $0x14] sm:$0x1] }
 0x10d   : > { %1481 = vrot.lane.b32.xlu1 %v1464_v62, %s7396_s13  ;;  %v1688_v62 = vshll.u32 %v6387_v20, 16  ;;  %v2315_v8 = vor.u32 %v2313_v4, %v2312_v26  ;;  %v3329_v11 = vrot.slane %v3327_v63, 7  ;;  %v1686_v13 = vshrl.u32 %v6387_v20, 16  ;;  %v1049_v53 = vld [vmem:[#allocation2 + $0x28] sm:$0xc] }
 0x10e   : > { %1959 = vrot.lane.b32.xlu0 %v6417_v61, %s7396_s13  ;;  %v1297_v61 = vrot.slane %v1295_v49, 1  ;;  %v3330_v18 = vshll.u32 %v7097_v55, 16  ;;  %v3133_v39 = vrot.slane %v3131_v7, 2  ;;  %v2333_v40 = vrot.slane %v2331_v12, 7 }
 0x10f   : > { %v1690_v6 = vrot.slane %v1688_v62, 1  ;;  %v2317_v42 = vshrl.u32 %v7100_v14, 16  ;;  %v540_v43 = vadd.f32 %v7607_v34, %v7560_v50  ;;  %v7691_v44 = vcombine.low %v7624_v47, %v776_v16 }
 0x110   : > { %v1298_v9 = vor.u32 %v1297_v61, %v1293_v2  ;;  %v3332_v38 = vor.u32 %v3330_v18, %v3329_v11  ;;  %v2334_v25 = vshll.u32 %v7098_v1, 16  ;;  %v6790_v32 = vpack.c.bf16 %v537_v22, %v537_v22  ;;  %v1046_v2 = vld [vmem:[#allocation2 + $0x10] sm:$0xc]  ;;  %v7714_v11 = vpop.permute.xlu0 %1479 }
 0x111   : > { %1593 = vrot.lane.b32.xlu1 %v6370_v21, %s7398_s15  ;;  %v2550_v21 = vshll.u32 %v7099_v27, 16  ;;  %v7684_v15 = vor.u32 %v1690_v6, %v1686_v13  ;;  %v2319_v34 = vrot.slane %v2317_v42, 7  ;;  %v7700_v47 = vcombine.low %v7613_v37, %v7588_v23 }
 0x112   : > { %3431 = vrot.lane.b32.xlu0 %v3325_v19, %s7398_s15  ;;  %v3130_v19 = vrot.slane %v3128_v5, 1  ;;  %v2548_v55 = vshrl.u32 %v7099_v27, 16  ;;  %v6791_v56 = vpack.c.bf16 %v540_v43, %v540_v43  ;;  %v6532_v57 = vcombine.low %v1049_v53, %v7636_v0 }
 0x113   : > { %v2552_v10 = vrot.slane %v2550_v21, 1  ;;  %v693_v59 = vrot.slane %v6790_v32, 7  ;;  %v1281_v26 = vshll.u32 %v7691_v44, 16  ;;  %v1693_v0 = vshrl.u32 %v6388_v29, 16  ;;  %v7106_v32 = vld [vmem:[#allocation2 + $0x10] sm:$0x1e]  }
 0x114   : > { %v3134_v49 = vor.u32 %v3133_v39, %v3130_v19  ;;  %v6529_v4 = vcombine.low %v1046_v2, %v7605_v33  ;;  %v3136_v6 = vshrl.u32 %v6532_v57, 16  ;;  %v3139_v7 = vshll.u32 %v6532_v57, 16  ;;  %v7722_v19 = vld [vmem:[#allocation2 + $0x44] sm:$0x1]  ;;  %v7105_v39 = vld [vmem:[#allocation2 + $0x28] sm:$0x3c]  }
 0x115   : > { %1853 = vrot.lane.b32.xlu1 %v1834_v36, %s7397_s14  ;;  %v529_v36 = vadd.f32 %v7560_v50, %v7598_v28  ;;  %v532_v28 = vadd.f32 %v7560_v50, %v7611_v35  ;;  %v2320_v35 = vshll.u32 %v7100_v14, 16  ;;  %v2553_v61 = vor.u32 %v2552_v10, %v2548_v55  ;;  %760 = vst.msk [vmem:[#allocation2 + $0x80] sm:$0xe] %vm738_vm3, %v693_v59  ;;  %v912_v14 = vld [vmem:[#allocation2 + $0x40] sm:$0xf] }
 0x116   : > { %1487 = vrot.lane.b32.xlu0 %v1467_v31, %s7396_s13  ;;  %v7101_v31 = vld [vmem:[#allocation2 + $0x20] sm:$0x3c]   ;;  %v694_v37 = vrot.slane %v693_v59, 4  ;;  %v1283_v33 = vrot.slane %v1281_v26, 1  ;;  %v1674_v13 = vshll.u32 %v7700_v47, 16  ;;  %v1279_v21 = vshrl.u32 %v7691_v44, 16 }
 0x117   : > { %v2776_v20 = vshrl.u32 %v7101_v31, 16  ;;  %v6788_v48 = vpack.c.bf16 %v529_v36, %v529_v36  ;;  %v2779_v52 = vshll.u32 %v7101_v31, 16  ;;  %v2322_v63 = vor.u32 %v2320_v35, %v2319_v34  ;;  %v7107_v55 = vld [vmem:[#allocation2 + $0x10] sm:$0x3c]  }
 0x118   : > { %761 = vst.msk [vmem:[#allocation2 + $0x84] sm:$0x1] %vm740_vm4, %v694_v37  ;;  %v3138_v31 = vrot.slane %v3136_v6, 1  ;;  %v3141_v36 = vrot.slane %v3139_v7, 2  ;;  %v1676_v42 = vrot.slane %v1674_v13, 1  ;;  %v3112_v43 = vshrl.u32 %v6529_v4, 16  ;;  %v7755_v37 = vpop.permute.xlu1 %1973 }
 0x119   : > { %1849 = vrot.lane.b32.xlu1 %v1832_v46, %s7397_s14  ;;  %v1695_v46 = vshll.u32 %v6388_v29, 16  ;;  %v2778_v62 = vrot.slane %v2776_v20, 1  ;;  %v2781_v23 = vrot.slane %v2779_v52, 2  ;;  %v689_v1 = vrot.slane %v6788_v48, 7  ;;  %10349 = vst [vmem:[#allocation4_spill] sm:$0xff] %v7755_v37  ;;  %v7173_v7 = vld [vmem:[%s10293_s3 + $0xc8] sm:$0xff]  }
 0x11a   : > { %2415 = vrot.lane.b32.xlu0 %v2329_v51, %s7397_s14  ;;  %v2336_v51 = vor.u32 %v2334_v25, %v2333_v40  ;;  %v6422_v29 = vcombine.low %v912_v14, %v7722_v19  ;;  %v1284_v40 = vor.u32 %v1283_v33, %v1279_v21  ;;  %v3115_v25 = vshll.u32 %v6529_v4, 16  ;;  %v7174_v33 = vld [vmem:[%s10293_s3 + $0x88] sm:$0xff]  }
 0x11b   : > { %v690_v5 = vrot.slane %v689_v1, 4  ;;  %756 = vst.msk [vmem:[#allocation2 + $0x70] sm:$0xe] %vm738_vm3, %v689_v1  ;;  %v2782_v12 = vor.u32 %v2781_v23, %v2778_v62  ;;  %v6386_v44 = vcombine.low %v7660_v30, %v7633_v58  ;;  %v1672_v10 = vshrl.u32 %v7700_v47, 16  ;;  %v7167_v30 = vld [vmem:[%s10293_s3 + $0xc0] sm:$0xff]   ;;  %v7212_v37 = vld [vmem:[%s10293_s3 + $0x28] sm:$0xff]  }
 0x11c   : > { %v3142_v20 = vor.u32 %v3141_v36, %v3138_v31  ;;  %v2784_v48 = vshrl.u32 %v7105_v39, 16  ;;  %v3114_v34 = vrot.slane %v3112_v43, 1  ;;  %v3117_v52 = vrot.slane %v3115_v25, 2  ;;  %v782_v62 = vld [vmem:[#allocation2 + $0x2c] sm:$0x1]  ;;  %6870 = vmatprep.subr.bf16.mxu0 %v7167_v30  ;;  %v7168_v23 = vld [vmem:[%s10293_s3 + $0x80] sm:$0xff]   ;;  %v7781_v31 = vpop.permute.xlu1 %2409 }
 0x11d   : > { %2153 = vrot.lane.b32.xlu1 %v2052_v17, %s7398_s15  ;;  %v1697_v17 = vrot.slane %v1695_v46, 1  ;;  %757 = vst.msk [vmem:[#allocation2 + $0x74] sm:$0x1] %vm740_vm4, %v690_v5  ;;  %v2536_v53 = vshll.u32 %v7106_v32, 16  ;;  %v1047_v1 = vld [vmem:[#allocation2 + $0x18] sm:$0xc]  ;;  %6871 = vmatpush3.bf16.msra.mxu0 %v7168_v23 }
 0x11e   : > { %1483 = vrot.lane.b32.xlu0 %v1465_v60, %s7396_s13  ;;  %v6789_v60 = vpack.c.bf16 %v532_v28, %v532_v28  ;;  %v7729_v28 = vpop.permute.xlu0 %1383  ;;  %v2786_v35 = vrot.slane %v2784_v48, 1  ;;  %v2534_v2 = vshrl.u32 %v7106_v32, 16  ;;  %v6530_v4 = vcombine.low %v1047_v1, %v7653_v24  ;;  %6872 = vmatprep.subr.bf16.mxu0 %v7173_v7  ;;  %v908_v43 = vld [vmem:[#allocation2 + $0x30] sm:$0xf]  ;;  %v7790_v25 = vld [vmem:[#allocation2 + $0x34] sm:$0x1] }
 0x11f   : > { %v7712_v27 = vor.u32 %v1697_v17, %v1693_v0  ;;  %v3118_v17 = vor.u32 %v3117_v52, %v3114_v34  ;;  %v2538_v26 = vrot.slane %v2536_v53, 1  ;;  %v6341_v0 = vcombine.low %v7638_v3, %v782_v62  ;;  %v7180_v3 = vld [vmem:[%s10293_s3 + $0x40] sm:$0xff]  }
 0x120   : > { %v691_v16 = vrot.slane %v6789_v60, 7  ;;  %v1681_v60 = vshll.u32 %v6386_v44, 16  ;;  %v1679_v13 = vshrl.u32 %v6386_v44, 16  ;;  %v3123_v21 = vshll.u32 %v6530_v4, 16  ;;  %6806 = vmatprep.subr.bf16.mxu1 %v7180_v3  ;;  %v7801_v30 = vpop.permute.xlu1 %2633  ;;  %v7814_v1 = vld [vmem:[#allocation2 + $0x40] sm:$0xf] }
 0x121   : > { %1389 = vrot.lane.b32.xlu1 %v1298_v9, %s7397_s14  ;;  %10348 = vst [vmem:[#allocation3_spill] sm:$0xff] %v7712_v27  ;;  %v695_v9 = vrot.slane %v6791_v56, 7  ;;  %v7738_v56 = vld [vmem:[#allocation2 + $0x28] sm:$0xe]  ;;  %6873 = vmatpush3.bf16.msra.mxu0 %v7174_v33  ;;  %v6420_v34 = vcombine.low %v908_v43, %v7790_v25  ;;  %v7829_v3 = vld [vmem:[#allocation2 + $0x40] sm:$0xe] }
 0x122   : > { %2411 = vrot.lane.b32.xlu0 %v2315_v8, %s7397_s14  ;;  %v7104_v8 = vld [vmem:[#allocation2 + $0x28] sm:$0x1e]   ;;  %v692_v22 = vrot.slane %v691_v16, 4  ;;  %758 = vst.msk [vmem:[#allocation2 + $0x78] sm:$0xe] %vm738_vm3, %v691_v16  ;;  %v7742_v58 = vcombine.low %v7738_v56, %v7618_v41  ;;  %v2760_v41 = vshrl.u32 %v7107_v55, 16 }
 0x123   : > { %v696_v18 = vrot.slane %v695_v9, 4  ;;  %762 = vst.msk [vmem:[#allocation2 + $0x88] sm:$0xe] %vm738_vm3, %v695_v9  ;;  %v2555_v57 = vshrl.u32 %v7104_v8, 16  ;;  %v1683_v6 = vrot.slane %v1681_v60, 1  ;;  %v7181_v16 = vld [vmem:[%s10293_s3] sm:$0xff]  }
 0x124   : > { %759 = vst.msk [vmem:[#allocation2 + $0x7c] sm:$0x1] %vm740_vm4, %v692_v22  ;;  %v2762_v9 = vrot.slane %v2760_v41, 1  ;;  %v2056_v14 = vshll.u32 %v7742_v58, 16  ;;  %v7110_v22 = vld [vmem:[#allocation2 + $0x18] sm:$0x1e]   ;;  %6807 = vmatpush3.bf16.msra.mxu1 %v7181_v16 }
 0x125   : > { %3433 = vrot.lane.b32.xlu1 %v3332_v38, %s7398_s15  ;;  %v2557_v38 = vshll.u32 %v7104_v8, 16  ;;  %763 = vst.msk [vmem:[#allocation2 + $0x8c] sm:$0x1] %vm740_vm4, %v696_v18  ;;  %v2539_v8 = vor.u32 %v2538_v26, %v2534_v2  ;;  %v3120_v18 = vshrl.u32 %v6530_v4, 16  ;;  %v7783_v36 = vor.u32 %v1683_v6, %v1679_v13  ;;  %v7808_v41 = vpop.f32.mrb[12].mxu0  ;;  %v7189_v4 = vld [vmem:[%s10293_s3 + $0x48] sm:$0xff]  }
 0x126   : > { %3035 = vrot.lane.b32.xlu0 %v7684_v15, %s7397_s14  ;;  %v2054_v32 = vshrl.u32 %v7742_v58, 16  ;;  %v1300_v58 = vshrl.u32 %v6341_v0, 16  ;;  %v7810_v23 = vpop.f32.mrb[13].mxu0  ;;  %6808 = vmatprep.subr.bf16.mxu1 %v7189_v4 }
 0x127   : > { %v2559_v46 = vrot.slane %v2557_v38, 1  ;;  %v3122_v44 = vrot.slane %v3120_v18, 1  ;;  %v7831_v13 = vpop.f32.mrb[14].mxu0 }
 0x129   : > { %2417 = vrot.lane.b32.xlu1 %v2336_v51, %s7397_s14  ;;  %v7736_v51 = vor.u32 %v1676_v42, %v1672_v10  ;;  %v2560_v47 = vor.u32 %v2559_v46, %v2555_v57  ;;  %v7785_v42 = vld [vmem:[#allocation2 + $0x18] sm:$0xe]  ;;  %v3125_v10 = vrot.slane %v3123_v21, 2  ;;  %v7183_v57 = vld [vmem:[%s10293_s3 + $0x90] sm:$0xff]  }
 0x12a   : > { %3243 = vrot.lane.b32.xlu0 %v3134_v49, %s7396_s13  ;;  %v2787_v49 = vshll.u32 %v7105_v39, 16  ;;  %v2058_v39 = vrot.slane %v2056_v14, 1  ;;  %v6433_v48 = vcombine.low %v7785_v42, %v7629_v54 }
 0x12b   : > { %v3126_v54 = vor.u32 %v3125_v10, %v3122_v44  ;;  %v826_v44 = vld [vmem:[#allocation2 + $0x34] sm:$0x3]  ;;  %v7843_v10 = vld [vmem:[#allocation2 + $0x48] sm:$0xf] }
 0x12c   : > { %v2789_v59 = vrot.slane %v2787_v49, 2  ;;  %v778_v49 = vld [vmem:[#allocation2 + $0x1c] sm:$0x1]  ;;  %v2059_v52 = vor.u32 %v2058_v39, %v2054_v32  ;;  %v2040_v14 = vshrl.u32 %v6433_v48, 16  ;;  %v7190_v39 = vld [vmem:[%s10293_s3 + $0x8] sm:$0xff]  }
 0x12d   : > { %2413 = vrot.lane.b32.xlu1 %v2322_v63, %s7397_s14  ;;  %v2763_v63 = vshll.u32 %v7107_v55, 16  ;;  %v7113_v55 = vld [vmem:[#allocation2 + $0x18] sm:$0x3c]   ;;  %6809 = vmatpush3.bf16.msra.mxu1 %v7190_v39 }
 0x12e   : > { %2639 = vrot.lane.b32.xlu0 %v2553_v61, %s7396_s13  ;;  %v7750_v61 = vpop.permute.xlu0 %2407  ;;  %v2790_v5 = vor.u32 %v2789_v59, %v2786_v35  ;;  %v2768_v60 = vshrl.u32 %v7113_v55, 16  ;;  %v2771_v62 = vshll.u32 %v7113_v55, 16  ;;  %v7860_v55 = vpop.f32.mrb[15].mxu0  ;;  %v7911_v39 = vld [vmem:[#allocation2 + $0x3c] sm:$0x1] }
 0x130   : > { %v2770_v6 = vrot.slane %v2768_v60, 1  ;;  %v2773_v7 = vrot.slane %v2771_v62, 2 }
 0x131   : > { %3037 = vrot.lane.b32.xlu1 %v7712_v27, %s7397_s14 }
 0x132   : > { %2879 = vrot.lane.b32.xlu0 %v2782_v12, %s7398_s15  ;;  %v2765_v12 = vrot.slane %v2763_v63, 2  ;;  %v7771_v24 = vpop.permute.xlu0 %2631  ;;  %v2541_v63 = vshrl.u32 %v7110_v22, 16  ;;  %v2774_v18 = vor.u32 %v2773_v7, %v2770_v6  ;;  %v7887_v6 = vld [vmem:[#allocation2 + $0x4c] sm:$0x3]  ;;  %v7889_v7 = vld [vmem:[#allocation2 + $0x34] sm:$0x3] }
 0x134   : > { %v2766_v38 = vor.u32 %v2765_v12, %v2762_v9  ;;  %v828_v12 = vld [vmem:[#allocation2 + $0x44] sm:$0x3] }
 0x135   : > { %1969 = vrot.lane.b32.xlu1 %v6422_v29, %s7396_s13  ;;  %v7182_v29 = vld [vmem:[%s10293_s3 + $0xd0] sm:$0xff]  }
 0x136   : > { %1385 = vrot.lane.b32.xlu0 %v1284_v40, %s7397_s14  ;;  %v1302_v40 = vshll.u32 %v6341_v0, 16  ;;  %6874 = vmatprep.subr.bf16.mxu0 %v7182_v29  ;;  %v7793_v46 = vpop.permute.xlu0 %2871 }
 0x137   : > { %6875 = vmatpush3.bf16.msra.mxu0 %v7183_v57  ;;  %v7862_v57 = vld [vmem:[#allocation2 + $0x34] sm:$0x1] }
 0x138   : > { %v1304_v53 = vrot.slane %v1302_v40, 1 }
 0x139   : > { %3245 = vrot.lane.b32.xlu1 %v3142_v20, %s7396_s13  ;;  %v2543_v20 = vshll.u32 %v7110_v22, 16  ;;  %v6360_v22 = vcombine.low %v7829_v3, %v828_v12  ;;  %v7198_v12 = vld [vmem:[%s10293_s3 + $0xe0] sm:$0xff]  }
 0x13a   : > { %3031 = vrot.lane.b32.xlu0 %v7736_v51, %s7397_s14  ;;  %v1305_v59 = vor.u32 %v1304_v53, %v1300_v58  ;;  %v7806_v26 = vpop.permute.xlu0 %1399  ;;  %v7858_v53 = vld [vmem:[#allocation2 + $0x30] sm:$0xe] }
 0x13b   : > { %v2545_v35 = vrot.slane %v2543_v20, 1  ;;  %10350 = vst [vmem:[#allocation5_spill] sm:$0xff] %v7806_v26  ;;  %v1470_v40 = vrot.slane %v6360_v22, 1  ;;  %v7845_v20 = vld [vmem:[#allocation2 + $0x4c] sm:$0x1]  ;;  %v6358_v58 = vcombine.low %v7858_v53, %v826_v44 }
 0x13c   : > { %v7905_v22 = vld [vmem:[#allocation2 + $0x30] sm:$0xe]  ;;  %v7947_v26 = vld [vmem:[#allocation2 + $0x3c] sm:$0x1] }
 0x13d   : > { %2641 = vrot.lane.b32.xlu1 %v2560_v47, %s7396_s13  ;;  %v6339_v47 = vcombine.low %v7668_v45, %v778_v49  ;;  %v7816_v45 = vld [vmem:[#allocation2 + $0x44] sm:$0x1]  ;;  %v2546_v2 = vor.u32 %v2545_v35, %v2541_v63  ;;  %v7191_v49 = vld [vmem:[%s10293_s3 + $0xd8] sm:$0xff]   ;;  %v6376_v35 = vcombine.low %v7843_v10, %v7845_v20  ;;  %v7883_v63 = vld [vmem:[#allocation2 + $0x40] sm:$0xe] }
 0x13e   : > { %3239 = vrot.lane.b32.xlu0 %v3118_v17, %s7396_s13  ;;  %v2042_v17 = vshll.u32 %v6433_v48, 16  ;;  %v6375_v0 = vcombine.low %v7814_v1, %v7816_v45  ;;  %v7827_v33 = vpop.permute.xlu0 %1495  ;;  %v7847_v48 = vld [vmem:[#allocation2 + $0x44] sm:$0x3]  ;;  %6876 = vmatprep.subr.bf16.mxu0 %v7191_v49 }
 0x13f   : > { %v1288_v9 = vshll.u32 %v6339_v47, 16  ;;  %10351 = vst [vmem:[#allocation6_spill] sm:$0xff] %v7827_v33 }
 0x141   : > { %2881 = vrot.lane.b32.xlu1 %v2790_v5, %s7398_s15  ;;  %v7823_v5 = vpop.permute.xlu1 %2873  ;;  %v1290_v29 = vrot.slane %v1288_v9, 1  ;;  %v914_v9 = vld [vmem:[#allocation2 + $0x48] sm:$0xf] }
 0x142   : > { %2635 = vrot.lane.b32.xlu0 %v2539_v8, %s7396_s13  ;;  %v2044_v8 = vrot.slane %v2042_v17, 1  ;;  %v7841_v32 = vpop.permute.xlu0 %3443  ;;  %v7196_v17 = vld [vmem:[%s10293_s3 + $0x50] sm:$0xff]  }
 0x143   : > { %10353 = vst [vmem:[#allocation8_spill] sm:$0xff] %v7841_v32  ;;  %6810 = vmatprep.subr.bf16.mxu1 %v7196_v17  ;;  %v7202_v17 = vld [vmem:[%s10293_s3 + $0x58] sm:$0xff]   ;;  %v7206_v32 = vld [vmem:[%s10293_s3 + $0x60] sm:$0xff]  }
 0x144   : > { %v2045_v21 = vor.u32 %v2044_v8, %v2040_v14  ;;  %v7197_v8 = vld [vmem:[%s10293_s3 + $0x10] sm:$0xff]   ;;  %v7899_v14 = vcombine.low %v7883_v63, %v7722_v19 }
 0x145   : > { %3033 = vrot.lane.b32.xlu1 %v7783_v36, %s7397_s14  ;;  %v7833_v16 = vpop.permute.xlu1 %2165  ;;  %6811 = vmatpush3.bf16.msra.mxu1 %v7197_v8 }
 0x146   : > { %2875 = vrot.lane.b32.xlu0 %v2766_v38, %s7398_s15  ;;  %10352 = vst [vmem:[#allocation7_spill] sm:$0xff] %v7833_v16  ;;  %v1286_v38 = vshrl.u32 %v6339_v47, 16  ;;  %v7865_v47 = vld [vmem:[#allocation2 + $0x40] sm:$0xe]  ;;  %v7878_v62 = vpop.permute.xlu0 %2423  ;;  %v2077_v8 = vshll.u32 %v7899_v14, 16  ;;  %6812 = vmatprep.subr.bf16.mxu1 %v7202_v17 }
 0x147   : > { %v6407_v60 = vcombine.low %v7865_v47, %v7847_v48  ;;  %10355 = vst [vmem:[#allocation10_spill] sm:$0xff] %v7878_v62  ;;  %v7955_v62 = vld [vmem:[#allocation2 + $0x30] ss:$0 sps:$4 sm:$0xff]  }
 0x148   : > { %v1291_v43 = vor.u32 %v1290_v29, %v1286_v38  ;;  %v7907_v29 = vld [vmem:[#allocation2 + $0x3c] sm:$0x3]  ;;  %v7909_v38 = vld [vmem:[#allocation2 + $0x38] sm:$0xf] }
 0x149   : > { %1965 = vrot.lane.b32.xlu1 %v6420_v34, %s7396_s13  ;;  %v7852_v34 = vpop.permute.xlu1 %3445  ;;  %v1837_v4 = vrot.slane %v6407_v60, 1  ;;  %v6374_v44 = vcombine.low %v7909_v38, %v7911_v39 }
 0x14a   : > { %2155 = vrot.lane.b32.xlu0 %v2059_v52, %s7398_s15  ;;  %10354 = vst [vmem:[#allocation9_spill] sm:$0xff] %v7852_v34  ;;  %v7856_v52 = vld [vmem:[#allocation2 + $0x30] sm:$0xf]  ;;  %v7335_v34 = vld [vmem:[%s10292_s2] ss:$0 sm:$0xff] }
 0x14d   : > { %3241 = vrot.lane.b32.xlu1 %v3126_v54, %s7396_s13  ;;  %v7192_v54 = vld [vmem:[%s10293_s3 + $0x98] sm:$0xff]  }
 0x14e   : > { %1391 = vrot.lane.b32.xlu0 %v1305_v59, %s7397_s14  ;;  %v6373_v59 = vcombine.low %v7856_v52, %v7862_v57  ;;  %6877 = vmatpush3.bf16.msra.mxu0 %v7192_v54  ;;  %v7924_v54 = vld [vmem:[#allocation2 + $0x38] sm:$0xe] }
 0x14f   : > { %6878 = vmatprep.subr.bf16.mxu0 %v7198_v12  ;;  %v6406_v60 = vcombine.low %v7924_v54, %v7907_v29 }
 0x151   : > { %2637 = vrot.lane.b32.xlu1 %v2546_v2, %s7396_s13  ;;  %v1468_v2 = vrot.slane %v6358_v58, 1  ;;  %v7922_v58 = vpop.permute.xlu0 %2647 }
 0x152   : > { %1603 = vrot.lane.b32.xlu0 %v6375_v0, %s7398_s15  ;;  %v7885_v0 = vpop.permute.xlu1 %2425  ;;  %10356 = vst [vmem:[#allocation11_spill] sm:$0xff] %v7922_v58 }
 0x155   : > { %2877 = vrot.lane.b32.xlu1 %v2774_v18, %s7398_s15  ;;  %v788_v18 = vld [vmem:[#allocation2 + $0x44] sm:$0x1] }
 0x156   : > { %2151 = vrot.lane.b32.xlu0 %v2045_v21, %s7398_s15  ;;  %v7903_v21 = vld [vmem:[#allocation2 + $0x48] sm:$0xe]  ;;  %v7945_v12 = vcombine.low %v7829_v3, %v788_v18  ;;  %v545_v3 = vadd.f32 %v7560_v50, %v7810_v23  ;;  %v556_v18 = vadd.f32 %v7831_v13, %v7560_v50  ;;  %v548_v23 = vadd.f32 %v7335_v34, %v7860_v55  ;;  %v7207_v34 = vld [vmem:[%s10293_s3 + $0x20] sm:$0xff]  }
 0x157   : > { %v6408_v19 = vcombine.low %v7903_v21, %v7887_v6  ;;  %v2075_v13 = vshrl.u32 %v7899_v14, 16  ;;  %v7208_v14 = vld [vmem:[%s10293_s3 + $0xf0] sm:$0xff]  }
 0x158   : > { %v1323_v55 = vshll.u32 %v7945_v12, 16 }
 0x159   : > { %1493 = vrot.lane.b32.xlu1 %v1470_v40, %s7396_s13  ;;  %v7913_v40 = vld [vmem:[#allocation2 + $0x4c] sm:$0x1]  ;;  %v1838_v33 = vrot.slane %v6408_v19, 1  ;;  %v7964_v19 = vld [vmem:[#allocation2 + $0x30] sm:$0xe] }
 0x15a   : > { %1387 = vrot.lane.b32.xlu0 %v1291_v43, %s7397_s14  ;;  %v6405_v43 = vcombine.low %v7905_v22, %v7889_v7  ;;  %v6423_v49 = vcombine.low %v914_v9, %v7913_v40  ;;  %v7203_v9 = vld [vmem:[%s10293_s3 + $0x18] sm:$0xff]   ;;  %v8004_v27 = vcombine.low %v7964_v19, %v7790_v25 }
 0x15b   : > { %6813 = vmatpush3.bf16.msra.mxu1 %v7203_v9  ;;  %v2079_v9 = vrot.slane %v2077_v8, 1  ;;  %v7209_v8 = vld [vmem:[%s10293_s3 + $0xb0] sm:$0xff]  }
 0x15c   : > { %v1835_v58 = vrot.slane %v6405_v43, 1  ;;  %v1836_v43 = vrot.slane %v6406_v60, 1  ;;  %v7976_v60 = vld [vmem:[#allocation2 + $0x48] ss:$0 sps:$4 sm:$0xff]   ;;  %6814 = vmatprep.subr.bf16.mxu1 %v7206_v32 }
 0x15d   : > { %1605 = vrot.lane.b32.xlu1 %v6376_v35, %s7398_s15  ;;  %v7926_v35 = vld [vmem:[#allocation2 + $0x40] ss:$0 sps:$4 sm:$0xff]   ;;  %v3355_v25 = vshrl.u32 %v7976_v60, 16 }
 0x15e   : > { %1599 = vrot.lane.b32.xlu0 %v6373_v59, %s7398_s15  ;;  %v7199_v59 = vld [vmem:[%s10293_s3 + $0xa0] sm:$0xff]  }
 0x15f   : > { %6879 = vmatpush3.bf16.msra.mxu0 %v7199_v59  ;;  %6815 = vmatpush3.bf16.msra.mxu1 %v7207_v34  ;;  %v2080_v34 = vor.u32 %v2079_v9, %v2075_v13 }
 0x161   : > { %1489 = vrot.lane.b32.xlu1 %v1468_v2, %s7396_s13  ;;  %v7936_v2 = vpop.permute.xlu1 %2649 }
 0x162   : > { %1859 = vrot.lane.b32.xlu0 %v1837_v4, %s7397_s14  ;;  %10357 = vst [vmem:[#allocation12_spill] sm:$0xff] %v7936_v2  ;;  %v910_v4 = vld [vmem:[#allocation2 + $0x38] sm:$0xf]  ;;  %v553_v2 = vadd.f32 %v7808_v41, %v7560_v50  ;;  %v7205_v41 = vld [vmem:[%s10293_s3 + $0xa8] sm:$0xff]   ;;  %v7973_v50 = vpop.permute.xlu0 %2887 }
 0x163   : > { %v6421_v59 = vcombine.low %v910_v4, %v7947_v26  ;;  %10358 = vst [vmem:[#allocation13_spill] sm:$0xff] %v7973_v50  ;;  %v6792_v4 = vpack.c.bf16 %v545_v3, %v545_v3  ;;  %v7211_v3 = vld [vmem:[%s10293_s3 + $0x68] sm:$0xff]   ;;  %v3334_v50 = vshrl.u32 %v7955_v62, 16 }
 0x164   : > { %v6794_v17 = vpack.c.bf16 %v553_v2, %v553_v2  ;;  %v6795_v2 = vpack.c.bf16 %v556_v18, %v556_v18  ;;  %6816 = vmatprep.subr.bf16.mxu1 %v7211_v3  ;;  %v7216_v3 = vld [vmem:[%s10293_s3 + $0x30] sm:$0xff]  }
 0x165   : > { %1601 = vrot.lane.b32.xlu1 %v6374_v44, %s7398_s15  ;;  %v7204_v44 = vld [vmem:[%s10293_s3 + $0xe8] sm:$0xff]   ;;  %v7995_v18 = vpop.permute.xlu1 %2889  ;;  %6817 = vmatpush3.bf16.msra.mxu1 %v7212_v37  ;;  %v8044_v37 = vld [vmem:[#allocation2 + $0x38] sm:$0xe] }
 0x166   : > { %1971 = vrot.lane.b32.xlu0 %v6423_v49, %s7396_s13  ;;  %v3348_v49 = vshrl.u32 %v7926_v35, 16  ;;  %6880 = vmatprep.subr.bf16.mxu0 %v7204_v44  ;;  %v6793_v44 = vpack.c.bf16 %v548_v23, %v548_v23  ;;  %10359 = vst [vmem:[#allocation14_spill] sm:$0xff] %v7995_v18  ;;  %v703_v23 = vrot.slane %v6795_v2, 7  ;;  %v7213_v2 = vld [vmem:[%s10293_s3 + $0xf8] sm:$0xff]  }
 0x167   : > { %6881 = vmatpush3.bf16.msra.mxu0 %v7205_v41 }
 0x168   : > { %v699_v16 = vrot.slane %v6793_v44, 7  ;;  %6882 = vmatprep.subr.bf16.mxu0 %v7208_v14  ;;  %770 = vst.msk [vmem:[#allocation2 + $0xa8] sm:$0xe] %vm738_vm3, %v703_v23  ;;  %v7215_v44 = vld [vmem:[%s10293_s3 + $0x70] sm:$0xff]   ;;  %v1325_v14 = vrot.slane %v1323_v55, 1  ;;  %v3357_v55 = vrot.slane %v3355_v25, 7 }
 0x169   : > { %1861 = vrot.lane.b32.xlu1 %v1838_v33, %s7397_s14  ;;  %v3351_v33 = vshll.u32 %v7926_v35, 16  ;;  %v3350_v35 = vrot.slane %v3348_v49, 7  ;;  %v784_v49 = vld [vmem:[#allocation2 + $0x34] sm:$0x1]  ;;  %6818 = vmatprep.subr.bf16.mxu1 %v7215_v44  ;;  %v7147_v44 = vld [vmem:[#allocation2 + $0x38] ss:$0 sps:$4 sm:$0xff]  }
 0x16a   : > { %1855 = vrot.lane.b32.xlu0 %v1835_v58, %s7397_s14  ;;  %v701_v58 = vrot.slane %v6794_v17, 7  ;;  %v697_v17 = vrot.slane %v6792_v4, 7  ;;  %v704_v4 = vrot.slane %v703_v23, 4  ;;  %766 = vst.msk [vmem:[#allocation2 + $0x98] sm:$0xe] %vm738_vm3, %v699_v16  ;;  %v3337_v23 = vshll.u32 %v7955_v62, 16  ;;  %6819 = vmatpush3.bf16.msra.mxu1 %v7216_v3 }
 0x16b   : > { %6883 = vmatpush3.bf16.msra.mxu0 %v7209_v8  ;;  %v3353_v9 = vor.u32 %v3351_v33, %v3350_v35  ;;  %v827_v8 = vld [vmem:[#allocation2 + $0x3c] sm:$0x3]  ;;  %v8035_v33 = vcombine.low %v7858_v53, %v784_v49  ;;  %v8041_v62 = vcombine.low %v7865_v47, %v7816_v45  ;;  %v3358_v35 = vshll.u32 %v7976_v60, 16  ;;  %v957_v3 = vld [vmem:[#allocation2 + $0x54] sm:$0x3] }
 0x16c   : > { %v702_v41 = vrot.slane %v701_v58, 4  ;;  %768 = vst.msk [vmem:[#allocation2 + $0xa0] sm:$0xe] %vm738_vm3, %v701_v58  ;;  %v698_v32 = vrot.slane %v697_v17, 4  ;;  %764 = vst.msk [vmem:[#allocation2 + $0x90] sm:$0xe] %vm738_vm3, %v697_v17  ;;  %6884 = vmatprep.subr.bf16.mxu0 %v7213_v2  ;;  %v6359_v47 = vcombine.low %v8044_v37, %v827_v8 }
 0x16d   : > { %1857 = vrot.lane.b32.xlu1 %v1836_v43, %s7397_s14  ;;  %v1321_v58 = vshrl.u32 %v7945_v12, 16  ;;  %v700_v43 = vrot.slane %v699_v16, 4  ;;  %v3336_v17 = vrot.slane %v3334_v50, 7  ;;  %v7146_v16 = vld [vmem:[#allocation2 + $0x30] ss:$0 sps:$4 sm:$0xff]   ;;  %v7218_v53 = vld [vmem:[%s10293_s3 + $0x78] sm:$0xff]   ;;  %v3360_v25 = vor.u32 %v3358_v35, %v3357_v55 }
 0x16e   : > { %1967 = vrot.lane.b32.xlu0 %v6421_v59, %s7396_s13  ;;  %769 = vst.msk [vmem:[#allocation2 + $0xa4] sm:$0x1] %vm740_vm4, %v702_v41  ;;  %v7214_v59 = vld [vmem:[%s10293_s3 + $0xb8] sm:$0xff]   ;;  %765 = vst.msk [vmem:[#allocation2 + $0x94] sm:$0x1] %vm740_vm4, %v698_v32  ;;  %v2063_v41 = vshll.u32 %v8004_v27, 16  ;;  %6820 = vmatprep.subr.bf16.mxu1 %v7218_v53 }
 0x16f   : > { %v8023_v13 = vpop.permute.xlu1 %1961  ;;  %771 = vst.msk [vmem:[#allocation2 + $0xac] sm:$0x1] %vm740_vm4, %v704_v4  ;;  %767 = vst.msk [vmem:[#allocation2 + $0x9c] sm:$0x1] %vm740_vm4, %v700_v43  ;;  %v1052_v50 = vld [vmem:[#allocation2 + $0x40] sm:$0xc]  ;;  %6885 = vmatpush3.bf16.msra.mxu0 %v7214_v59  ;;  %v1326_v4 = vor.u32 %v1325_v14, %v1321_v58  ;;  %v3339_v45 = vor.u32 %v3337_v23, %v3336_v17 }
 0x170   : > { %v8025_v12 = vpop.permute.xlu0 %1595  ;;  %v2338_v2 = vshrl.u32 %v7146_v16, 16  ;;  %v7219_v60 = vld [vmem:[%s10293_s3 + $0x38] sm:$0xff]   ;;  %v2061_v43 = vshrl.u32 %v8004_v27, 16  ;;  %v2065_v59 = vrot.slane %v2063_v41, 1  ;;  %v1309_v58 = vshll.u32 %v8035_v33, 16 }
 0x171   : > { %10360 = vst [vmem:[#allocation15_spill] sm:$0xff] %v8025_v12  ;;  %2161 = vrot.lane.b32.xlu1 %v2080_v34, %s7398_s15  ;;  %v6535_v34 = vcombine.low %v1052_v50, %v7847_v48  ;;  %v1469_v17 = vrot.slane %v6359_v47, 1  ;;  %v2341_v8 = vshll.u32 %v7146_v16, 16  ;;  %v1716_v48 = vshll.u32 %v8041_v62, 16  ;;  %6821 = vmatpush3.bf16.msra.mxu1 %v7219_v60  ;;  %v1050_v50 = vld [vmem:[#allocation2 + $0x30] sm:$0xc] }
 0x172   : > { %3439 = vrot.lane.b32.xlu0 %v3353_v9, %s7398_s15  ;;  %v2340_v23 = vrot.slane %v2338_v2, 7  ;;  %v8070_v27 = vcombine.low %v7905_v22, %v7862_v57  ;;  %v1307_v55 = vshrl.u32 %v8035_v33, 16  ;;  %v2066_v35 = vor.u32 %v2065_v59, %v2061_v43  ;;  %v951_v33 = vld [vmem:[#allocation2 + $0x24] sm:$0x3]  ;;  %v950_v59 = vld [vmem:[#allocation2 + $0x1c] sm:$0x3] }
 0x173   : > { %v8050_v49 = vpop.permute.xlu1 %1485  ;;  %v1311_v41 = vrot.slane %v1309_v58, 1  ;;  %v1714_v53 = vshrl.u32 %v8041_v62, 16  ;;  %v3341_v16 = vshrl.u32 %v7147_v44, 16  ;;  %v1718_v57 = vrot.slane %v1716_v48, 1 }
 0x174   : > { %10361 = vst [vmem:[#allocation16_spill] sm:$0xff] %v8050_v49  ;;  %v8052_v32 = vpop.permute.xlu0 %1591  ;;  %v2343_v2 = vor.u32 %v2341_v8, %v2340_v23  ;;  %v3160_v22 = vshrl.u32 %v6535_v34, 16  ;;  %v3163_v60 = vshll.u32 %v6535_v34, 16  ;;  %v8086_v62 = vcombine.low %v7903_v21, %v7845_v20 }
 0x175   : > { %1397 = vrot.lane.b32.xlu1 %v1326_v4, %s7397_s14  ;;  %v8076_v4 = vld [vmem:[#allocation2 + $0x38] ss:$0 sps:$4 sm:$0xff]   ;;  %v6533_v43 = vcombine.low %v1050_v50, %v7889_v7  ;;  %v1312_v58 = vor.u32 %v1311_v41, %v1307_v55  ;;  %v3343_v23 = vrot.slane %v3341_v16, 7  ;;  %v3344_v34 = vshll.u32 %v7147_v44, 16  ;;  %v7339_v41 = vld [vmem:[#allocation2 + $0x10] sm:$0xf] }
 0x176   : > { %3435 = vrot.lane.b32.xlu0 %v3339_v45, %s7398_s15  ;;  %v2345_v8 = vshrl.u32 %v8076_v4, 16  ;;  %v3162_v20 = vrot.slane %v3160_v22, 1  ;;  %v3165_v21 = vrot.slane %v3163_v60, 2  ;;  %v1702_v7 = vshll.u32 %v8070_v27, 16 }
 0x177   : > { %v8063_v9 = vpop.permute.xlu1 %1597  ;;  %v8102_v44 = vcombine.low %v7339_v41, %v7339_v41  ;;  %v6449_v16 = vcombine.low %v7785_v42, %v950_v59  ;;  %v1700_v22 = vshrl.u32 %v8070_v27, 16  ;;  %v1723_v60 = vshll.u32 %v8086_v62, 16  ;;  %v7341_v27 = vld [vmem:[#allocation2 + $0x18] sm:$0xf] }
 0x178   : > { %10362 = vst [vmem:[#allocation17_spill] sm:$0xff] %v8063_v9  ;;  %v8065_v14 = vpop.permute.xlu0 %1851  ;;  %v3166_v59 = vor.u32 %v3165_v21, %v3162_v20  ;;  %v3147_v55 = vshll.u32 %v6533_v43, 16  ;;  %v8130_v20 = vcombine.low %v7814_v1, %v7814_v1  ;;  %v940_v21 = vld [vmem:[#allocation2 + $0x48] sm:$0xe] }
 0x179   : > { %3441 = vrot.lane.b32.xlu1 %v3360_v25, %s7398_s15  ;;  %v7336_v25 = vld [vmem:[#allocation2 + $0x50] sm:$0xe] }
 0x17a   : > { %1491 = vrot.lane.b32.xlu0 %v1469_v17, %s7396_s13  ;;  %v6456_v18 = vcombine.low %v7336_v25, %v957_v3  ;;  %v7337_v17 = vld [vmem:[#allocation2 + $0x20] sm:$0xf]  ;;  %v8096_v25 = vor.u32 %v1718_v57, %v1714_v53  ;;  %v2348_v53 = vshll.u32 %v8076_v4, 16  ;;  %v2347_v57 = vrot.slane %v2345_v8, 7  ;;  %10367 = vst [vmem:[#allocation22_spill] sm:$0xff] %v8130_v20 }
 0x17b   : > { %v8078_v45 = vpop.permute.xlu1 %1847  ;;  %v8082_v9 = vcombine.low %v7337_v17, %v7337_v17  ;;  %v3144_v17 = vshrl.u32 %v6533_v43, 16  ;;  %v8123_v8 = vcombine.low %v7341_v27, %v7341_v27  ;;  %v3149_v49 = vrot.slane %v3147_v55, 2  ;;  %v8211_v20 = vld [vmem:[#allocation2 + $0x38] sm:$0x1e]  }
 0x17c   : > { %v8080_v47 = vpop.permute.xlu0 %1963  ;;  %10365 = vst [vmem:[#allocation20_spill] sm:$0xff] %v8096_v25  ;;  %v8099_v50 = vrot.slane %v6456_v18, 1  ;;  %v3346_v18 = vor.u32 %v3344_v34, %v3343_v23  ;;  %v7340_v23 = vld [vmem:[#allocation2 + $0x28] sm:$0xf]  ;;  %v2350_v12 = vor.u32 %v2348_v53, %v2347_v57  ;;  %v1051_v53 = vld [vmem:[#allocation2 + $0x38] sm:$0xc] }
 0x17d   : > { %10363 = vst [vmem:[#allocation18_spill] sm:$0xff] %v8080_v47  ;;  %2157 = vrot.lane.b32.xlu1 %v2066_v35, %s7398_s15  ;;  %v7338_v35 = vld [vmem:[#allocation2 + $0x20] sm:$0xe]  ;;  %v8121_v34 = vcombine.low %v7340_v23, %v7340_v23  ;;  %v3146_v1 = vrot.slane %v3144_v17, 1  ;;  %v8159_v17 = vcombine.low %v7924_v54, %v7911_v39  ;;  %v8170_v39 = vcombine.low %v7843_v10, %v7843_v10 }
 0x17e   : > { %2419 = vrot.lane.b32.xlu0 %v2343_v2, %s7397_s14  ;;  %10366 = vst [vmem:[#allocation21_spill] sm:$0xff] %v8099_v50  ;;  %v6450_v2 = vcombine.low %v7338_v35, %v951_v33  ;;  %v8112_v33 = vld [vmem:[#allocation2 + $0x30] sm:$0x1e]   ;;  %v1053_v35 = vld [vmem:[#allocation2 + $0x48] sm:$0xc]  ;;  %v8174_v54 = vcombine.low %v7856_v52, %v7856_v52 }
 0x17f   : > { %v8094_v3 = vpop.permute.xlu1 %1481  ;;  %v6536_v43 = vcombine.low %v1053_v35, %v7887_v6  ;;  %v2564_v23 = vshll.u32 %v8112_v33, 16  ;;  %v2562_v55 = vshrl.u32 %v8112_v33, 16  ;;  %v943_v35 = vld [vmem:[#allocation2 + $0x80] sm:$0xe]  ;;  %10373 = vst [vmem:[#allocation28_spill] sm:$0xff] %v8170_v39  ;;  %v1707_v39 = vshrl.u32 %v8159_v17, 16 }
 0x180   : > { %v8092_v48 = vpop.permute.xlu0 %1959  ;;  %v8118_v50 = vrot.slane %v6450_v2, 1  ;;  %v1725_v2 = vrot.slane %v1723_v60, 1  ;;  %10374 = vst [vmem:[#allocation29_spill] sm:$0xff] %v8174_v54 }
 0x181   : > { %10364 = vst [vmem:[#allocation19_spill] sm:$0xff] %v8092_v48  ;;  %1393 = vrot.lane.b32.xlu1 %v1312_v58, %s7397_s14  ;;  %v1704_v58 = vrot.slane %v1702_v7, 1  ;;  %v1721_v7 = vshrl.u32 %v8086_v62, 16  ;;  %v7153_v48 = vld [vmem:[#allocation2 + $0x30] sm:$0x3c]   ;;  %v3171_v62 = vshll.u32 %v6536_v43, 16 }
 0x182   : > { %3043 = vrot.lane.b32.xlu0 %v8096_v25, %s7397_s14  ;;  %v8125_v25 = vrot.slane %v6449_v16, 1  ;;  %v2792_v6 = vshrl.u32 %v7153_v48, 16 }
 0x183   : > { %v8116_v42 = vpop.permute.xlu1 %1593  ;;  %v8141_v4 = vor.u32 %v1704_v58, %v1700_v22  ;;  %v8161_v57 = vor.u32 %v1725_v2, %v1721_v7  ;;  %v2566_v22 = vrot.slane %v2564_v23, 1  ;;  %v3168_v58 = vshrl.u32 %v6536_v43, 16  ;;  %v8177_v2 = vld [vmem:[#allocation2 + $0x38] sm:$0xe] }
 0x184   : > { %v8114_v41 = vpop.permute.xlu0 %3431  ;;  %v6534_v7 = vcombine.low %v1051_v53, %v7907_v29  ;;  %v2794_v29 = vrot.slane %v2792_v6, 1  ;;  %v1709_v53 = vshll.u32 %v8159_v17, 16 }
 0x185   : > { %3437 = vrot.lane.b32.xlu1 %v3346_v18, %s7398_s15  ;;  %10370 = vst [vmem:[#allocation25_spill] sm:$0xff] %v8141_v4  ;;  %v8143_v18 = vld [vmem:[#allocation2 + $0x8] sm:$0xf]  ;;  %10371 = vst [vmem:[#allocation26_spill] sm:$0xff] %v8161_v57  ;;  %v2567_v43 = vor.u32 %v2566_v22, %v2562_v55  ;;  %v3170_v10 = vrot.slane %v3168_v58, 1  ;;  %v8195_v55 = vcombine.low %v8177_v2, %v7947_v26 }
 0x186   : > { %3251 = vrot.lane.b32.xlu0 %v3166_v59, %s7396_s13  ;;  %v2795_v59 = vshll.u32 %v7153_v48, 16  ;;  %v3155_v6 = vshll.u32 %v6534_v7, 16  ;;  %v8204_v26 = vld [vmem:[#allocation2 + $0x68] sm:$0xf] }
 0x187   : > { %v8139_v27 = vpop.permute.xlu1 %1853  ;;  %10377 = vst [vmem:[#allocation32_spill] sm:$0xff] %v8204_v26 }
 0x188   : > { %v8137_v16 = vpop.permute.xlu0 %1487  ;;  %10369 = vst [vmem:[#allocation24_spill] sm:$0xff] %v8139_v27  ;;  %v959_v27 = vld [vmem:[#allocation2 + $0x84] sm:$0x3] }
 0x189   : > { %10368 = vst [vmem:[#allocation23_spill] sm:$0xff] %v8137_v16  ;;  %v8151_v16 = vcombine.low %v940_v21, %v7913_v40  ;;  %2421 = vrot.lane.b32.xlu1 %v2350_v12, %s7397_s14  ;;  %v3150_v21 = vor.u32 %v3149_v49, %v3146_v1  ;;  %v920_v12 = vld [vmem:[#allocation2 + $0x80] sm:$0xf]  ;;  %v921_v49 = vld [vmem:[#allocation2 + $0x84] sm:$0x1]  ;;  %v3173_v1 = vrot.slane %v3171_v62, 2 }
 0x18a   : > { %3039 = vrot.lane.b32.xlu0 %v8141_v4, %s7397_s14  ;;  %v7342_v4 = vld [vmem:[#allocation2 + $0xc] sm:$0x1]  ;;  %v3152_v62 = vshrl.u32 %v6534_v7, 16  ;;  %v8222_v17 = vcombine.low %v943_v35, %v921_v49 }
 0x18b   : > { %v8165_v40 = vpop.permute.xlu1 %1849  ;;  %v6321_v33 = vcombine.low %v8143_v18, %v7342_v4  ;;  %v2084_v48 = vshll.u32 %v8151_v16, 16  ;;  %v6426_v4 = vcombine.low %v920_v12, %v921_v49  ;;  %v2797_v18 = vrot.slane %v2795_v59, 2  ;;  %v786_v59 = vld [vmem:[#allocation2 + $0x3c] sm:$0x1] }
 0x18c   : > { %v8163_v60 = vpop.permute.xlu0 %2415  ;;  %v2082_v12 = vshrl.u32 %v8151_v16, 16  ;;  %v3174_v58 = vor.u32 %v3173_v1, %v3170_v10  ;;  %v2070_v16 = vshll.u32 %v8195_v55, 16  ;;  %v3154_v10 = vrot.slane %v3152_v62, 1 }
 0x18d   : > { %10372 = vst [vmem:[#allocation27_spill] sm:$0xff] %v8163_v60  ;;  %3045 = vrot.lane.b32.xlu1 %v8161_v57, %s7397_s14  ;;  %v6458_v60 = vcombine.low %v943_v35, %v959_v27  ;;  %v2086_v57 = vrot.slane %v2084_v48, 1  ;;  %v2798_v7 = vor.u32 %v2797_v18, %v2794_v29  ;;  %v8218_v48 = vcombine.low %v8044_v37, %v786_v59  ;;  %v954_v29 = vld [vmem:[#allocation2 + $0x3c] sm:$0x3]  ;;  %v952_v37 = vld [vmem:[#allocation2 + $0x2c] sm:$0x3] }
 0x18e   : > { %3247 = vrot.lane.b32.xlu0 %v3150_v21, %s7396_s13  ;;  %v8191_v21 = vcombine.low %v7909_v38, %v7909_v38  ;;  %v3465_v27 = vsel %vm437_vm2, %v6321_v33, %v7729_v28  ;;  %v3157_v1 = vrot.slane %v3155_v6, 2  ;;  %v2571_v49 = vshll.u32 %v8211_v20, 16  ;;  %v857_v38 = vld [vmem:[#allocation2 + $0x80] sm:$0xf] }
 0x18f   : > { %v8185_v52 = vpop.permute.xlu1 %2153  ;;  %v2087_v35 = vor.u32 %v2086_v57, %v2082_v12  ;;  %v2068_v6 = vshrl.u32 %v8195_v55, 16  ;;  %v1316_v18 = vshll.u32 %v8218_v48, 16  ;;  %v6453_v59 = vcombine.low %v8177_v2, %v954_v29 }
 0x190   : > { %v8183_v23 = vpop.permute.xlu0 %1483  ;;  %10376 = vst [vmem:[#allocation31_spill] sm:$0xff] %v8191_v21  ;;  %v2105_v57 = vshll.u32 %v8222_v17, 16  ;;  %v6451_v12 = vcombine.low %v7738_v56, %v952_v37  ;;  %v3691_v2 = vsel %vm437_vm2, %v8125_v25, %v7750_v61  ;;  %v2569_v37 = vshrl.u32 %v8211_v20, 16  ;;  %v894_v21 = vld [vmem:[#allocation2 + $0x7c] sm:$0x3] }
 0x191   : > { %10375 = vst [vmem:[#allocation30_spill] sm:$0xff] %v8183_v23  ;;  %1977 = vrot.lane.b32.xlu1 %v6426_v4, %s7396_s13  ;;  %v1711_v4 = vrot.slane %v1709_v53, 1  ;;  %v955_v53 = vld [vmem:[#allocation2 + $0x44] sm:$0x3]  ;;  %v1314_v61 = vshrl.u32 %v8218_v48, 16  ;;  %v8270_v25 = vrot.slane %v6453_v59, 1  ;;  %v3738_v20 = vsel %vm3511_vm5, %v3691_v2, %v7771_v24 }
 0x192   : > { %2643 = vrot.lane.b32.xlu0 %v2567_v43, %s7396_s13  ;;  %v8213_v43 = vrot.slane %v6458_v60, 1  ;;  %v8226_v60 = vld [vmem:[#allocation2 + $0x6c] sm:$0x1]  ;;  %v6454_v55 = vcombine.low %v7883_v63, %v955_v53  ;;  %v1318_v63 = vrot.slane %v1316_v18, 1  ;;  %v8279_v53 = vrot.slane %v6451_v12, 1 }
 0x193   : > { %v8208_v22 = vpop.permute.xlu1 %1389  ;;  %10380 = vst [vmem:[#allocation35_spill] sm:$0xff] %v8226_v60  ;;  %v8235_v62 = vor.u32 %v1711_v4, %v1707_v39  ;;  %v3694_v39 = vsel %vm437_vm2, %v8118_v50, %v7781_v31  ;;  %v2072_v4 = vrot.slane %v2070_v16, 1  ;;  %v953_v50 = vld [vmem:[#allocation2 + $0x34] sm:$0x3]  ;;  %v832_v16 = vld [vmem:[#allocation2 + $0x84] sm:$0x3] }
 0x194   : > { %v8206_v23 = vpop.permute.xlu0 %2411  ;;  %10379 = vst [vmem:[#allocation34_spill] sm:$0xff] %v8208_v22  ;;  %10388 = vst [vmem:[#allocation43_spill] sm:$0xff] %v8270_v25  ;;  %v816_v48 = vld [vmem:[#allocation2 + $0x80] sm:$0xe]  ;;  %v10391_v59 = vshrl.u32 %v8082_v9, 16 }
 0x195   : > { %10378 = vst [vmem:[#allocation33_spill] sm:$0xff] %v8206_v23  ;;  %3253 = vrot.lane.b32.xlu1 %v3174_v58, %s7396_s13  ;;  %10383 = vst [vmem:[#allocation38_spill] sm:$0xff] %v8235_v62  ;;  %v7157_v58 = vld [vmem:[#allocation2 + $0x38] sm:$0x3c]   ;;  %v8283_v18 = vld [vmem:[#allocation2 + $0x20] sm:$0xf]  ;;  %v6364_v24 = vcombine.low %v816_v48, %v832_v16 }
 0x196   : > { %2883 = vrot.lane.b32.xlu0 %v2798_v7, %s7398_s15  ;;  %v8241_v7 = vsel %vm3511_vm5, %v3465_v27, %v7714_v11  ;;  %v8253_v11 = vld [vmem:[#allocation2 + $0x84] sm:$0x1]  ;;  %v3158_v27 = vor.u32 %v3157_v1, %v3154_v10  ;;  %v2800_v60 = vshrl.u32 %v7157_v58, 16  ;;  %v2803_v26 = vshll.u32 %v7157_v58, 16  ;;  %10389 = vst [vmem:[#allocation44_spill] sm:$0xff] %v8279_v53  ;;  %10390 = vst [vmem:[#allocation45_spill] sm:$0xff] %v8283_v18 }
 0x197   : > { %v8233_v33 = vpop.permute.xlu1 %3433  ;;  %v6379_v31 = vcombine.low %v857_v38, %v8253_v11  ;;  %v3740_v10 = vsel %vm3511_vm5, %v3694_v39, %v7801_v30  ;;  %v8277_v1 = vrot.slane %v2105_v57, 1  ;;  %v8287_v58 = vrot.slane %v6454_v55, 1  ;;  %v796_v39 = vld [vmem:[#allocation2 + $0x84] sm:$0x1]  ;;  %v8306_v16 = vld [vmem:[#allocation2 + $0x10] sm:$0xf] }
 0x198   : > { %v8231_v28 = vpop.permute.xlu0 %3035  ;;  %10382 = vst [vmem:[#allocation37_spill] sm:$0xff] %v8233_v33  ;;  %v6452_v30 = vcombine.low %v7964_v19, %v953_v50  ;;  %v2802_v38 = vrot.slane %v2800_v60, 1  ;;  %v8302_v55 = vsel %vm3544_vm6, %v3738_v20, %v7793_v46  ;;  %v10396_v19 = vshrl.u32 %v8121_v34, 16  ;;  %v879_v60 = vld [vmem:[#allocation2 + $0x80] sm:$0xe] }
 0x199   : > { %10381 = vst [vmem:[#allocation36_spill] sm:$0xff] %v8231_v28  ;;  %3041 = vrot.lane.b32.xlu1 %v8235_v62, %s7397_s14  ;;  %v8265_v62 = vld [vmem:[#allocation2 + $0x78] sm:$0xe]  ;;  %v8267_v28 = vld [vmem:[#allocation2 + $0x7c] sm:$0x3]  ;;  %10392 = vst [vmem:[#allocation46_spill] sm:$0xff] %v8287_v58  ;;  %v8378_v25 = vcombine.low %v879_v60, %v8253_v11 }
 0x19a   : > { %2163 = vrot.lane.b32.xlu0 %v2087_v35, %s7398_s15  ;;  %v2573_v35 = vrot.slane %v2571_v49, 1  ;;  %10386 = vst [vmem:[#allocation41_spill] sm:$0xff] %v8265_v62  ;;  %10387 = vst [vmem:[#allocation42_spill] sm:$0xff] %v8267_v28  ;;  %v2936_v49 = vrot.slane %v10391_v59, 7  ;;  %v2943_v50 = vrot.slane %v10396_v19, 7  ;;  %v10400_v19 = vshll.u32 %v8082_v9, 16 }
 0x19b   : > { %v8262_v56 = vpop.permute.xlu1 %2417  ;;  %v830_v20 = vld [vmem:[#allocation2 + $0x74] sm:$0x3]  ;;  %v1056_v46 = vld [vmem:[#allocation2 + $0x80] sm:$0xc]  ;;  %v10405_v53 = vshll.u32 %v8121_v34, 16 }
 0x19c   : > { %v8260_v29 = vpop.permute.xlu0 %3243  ;;  %10385 = vst [vmem:[#allocation40_spill] sm:$0xff] %v8262_v56  ;;  %v2574_v2 = vor.u32 %v2573_v35, %v2569_v37  ;;  %v8294_v56 = vld [vmem:[#allocation2 + $0x84] sm:$0x3]  ;;  %v10397_v37 = vshrl.u32 %v8102_v44, 16  ;;  %v853_v35 = vld [vmem:[#allocation2 + $0x70] sm:$0xf] }
 0x19d   : > { %10384 = vst [vmem:[#allocation39_spill] sm:$0xff] %v8260_v29  ;;  %3249 = vrot.lane.b32.xlu1 %v3158_v27, %s7396_s13  ;;  %v2073_v27 = vor.u32 %v2072_v4, %v2068_v6  ;;  %v8298_v29 = vsel %vm3544_vm6, %v3740_v10, %v7823_v5  ;;  %v8317_v4 = vld [vmem:[#allocation2 + $0x24] sm:$0x1]  ;;  %v854_v10 = vld [vmem:[#allocation2 + $0x74] sm:$0x1]  ;;  %v8350_v23 = vor.u32 %v10405_v53, %v2943_v50 }
 0x19e   : > { %1611 = vrot.lane.b32.xlu0 %v6379_v31, %s7398_s15  ;;  %v2805_v31 = vrot.slane %v2803_v26, 2  ;;  %10395 = vst [vmem:[#allocation49_spill] sm:$0xff] %v8298_v29  ;;  %v2922_v6 = vrot.slane %v10397_v37, 7  ;;  %v8313_v26 = vsel %vm437_vm2, %v8213_v43, %v7885_v0  ;;  %10399 = vst [vmem:[#allocation51_spill] sm:$0xff] %v8317_v4  ;;  %v893_v59 = vld [vmem:[#allocation2 + $0x74] sm:$0x3]  ;;  %v8325_v0 = vor.u32 %v10400_v19, %v2936_v49 }
 0x19f   : > { %v8292_v12 = vpop.permute.xlu1 %2413  ;;  %10398 = vst [vmem:[#allocation50_spill] sm:$0xff] %v8313_v26  ;;  %v8327_v43 = vrot.slane %v6452_v30, 1  ;;  %v1474_v37 = vrot.slane %v6364_v24, 1  ;;  %v8329_v5 = vld [vmem:[#allocation2 + $0x88] sm:$0xf]  ;;  %v1319_v49 = vor.u32 %v1318_v63, %v1314_v61  ;;  %v8344_v19 = vcombine.low %v816_v48, %v796_v39  ;;  %10406 = vst [vmem:[#allocation56_spill] sm:$0xff] %v8350_v23 }
 0x1a0   : > { %v8290_v57 = vpop.permute.xlu0 %2639  ;;  %10394 = vst [vmem:[#allocation48_spill] sm:$0xff] %v8292_v12  ;;  %10401 = vst [vmem:[#allocation52_spill] sm:$0xff] %v8325_v0  ;;  %v8331_v26 = vld [vmem:[#allocation2 + $0x8c] sm:$0x1]  ;;  %v792_v28 = vld [vmem:[#allocation2 + $0x74] sm:$0x1]  ;;  %v2806_v9 = vor.u32 %v2805_v31, %v2802_v38 }
 0x1a1   : > { %10393 = vst [vmem:[#allocation47_spill] sm:$0xff] %v8290_v57  ;;  %2645 = vrot.lane.b32.xlu1 %v2574_v2, %s7396_s13  ;;  %10402 = vst [vmem:[#allocation53_spill] sm:$0xff] %v8327_v43  ;;  %v6411_v2 = vcombine.low %v879_v60, %v8294_v56  ;;  %v8334_v12 = vld [vmem:[#allocation2 + $0x8c] sm:$0x3]  ;;  %v8340_v30 = vld [vmem:[#allocation2 + $0x14] sm:$0x1]  ;;  %v6380_v31 = vcombine.low %v8329_v5, %v8331_v26 }
 0x1a2   : > { %2159 = vrot.lane.b32.xlu0 %v2073_v27, %s7398_s15  ;;  %v814_v27 = vld [vmem:[#allocation2 + $0x70] sm:$0xe]  ;;  %v8346_v43 = vld [vmem:[#allocation2 + $0x88] sm:$0xf]  ;;  %v10407_v48 = vshll.u32 %v8102_v44, 16 }
 0x1a3   : > { %v8338_v58 = vpop.permute.xlu1 %3037  ;;  %v877_v0 = vld [vmem:[#allocation2 + $0x70] sm:$0xe]  ;;  %v6362_v4 = vcombine.low %v814_v27, %v830_v20  ;;  %v944_v61 = vld [vmem:[#allocation2 + $0x88] sm:$0xe]  ;;  %v878_v50 = vld [vmem:[#allocation2 + $0x78] sm:$0xe]  ;;  %v8383_v54 = vcombine.low %v814_v27, %v792_v28 }
 0x1a4   : > { %v8336_v57 = vpop.permute.xlu0 %2879  ;;  %10404 = vst [vmem:[#allocation55_spill] sm:$0xff] %v8338_v58  ;;  %v8352_v58 = vld [vmem:[#allocation2 + $0x8c] sm:$0x1]  ;;  %v6409_v63 = vcombine.low %v877_v0, %v893_v59  ;;  %v880_v38 = vld [vmem:[#allocation2 + $0x88] sm:$0xe]  ;;  %v2925_v39 = vor.u32 %v10407_v48, %v2922_v6  ;;  %v1841_v20 = vrot.slane %v6411_v2, 1  ;;  %v6410_v5 = vcombine.low %v878_v50, %v894_v21 }
 0x1a5   : > { %10403 = vst [vmem:[#allocation54_spill] sm:$0xff] %v8336_v57  ;;  %v6377_v57 = vcombine.low %v853_v35, %v854_v10  ;;  %2885 = vrot.lane.b32.xlu1 %v2806_v9, %s7398_s15  ;;  %v1054_v34 = vld [vmem:[#allocation2 + $0x70] sm:$0xc]  ;;  %v6412_v53 = vcombine.low %v880_v38, %v8334_v12  ;;  %v8361_v35 = vld [vmem:[#allocation2 + $0x80] ss:$0 sps:$4 sm:$0xff]   ;;  %v8367_v9 = vcombine.low %v877_v0, %v854_v10  ;;  %v1472_v29 = vrot.slane %v6362_v4, 1 }
 0x1a6   : > { %1395 = vrot.lane.b32.xlu0 %v1319_v49, %s7397_s14  ;;  %v8363_v24 = vld [vmem:[#allocation2 + $0x78] sm:$0xf]  ;;  %v8365_v23 = vld [vmem:[#allocation2 + $0x7c] sm:$0x1]  ;;  %v10408_v49 = vshrl.u32 %v8123_v8, 16  ;;  %v8381_v2 = vcombine.low %v1056_v46, %v8294_v56  ;;  %v6427_v10 = vcombine.low %v8346_v43, %v8352_v58  ;;  %v8390_v47 = vcombine.low %v944_v61, %v8352_v58 }
 0x1a7   : > { %v1057_v6 = vld [vmem:[#allocation2 + $0x88] sm:$0xc]  ;;  %v8371_v48 = vld [vmem:[#allocation2 + $0x78] sm:$0xf]  ;;  %v8373_v18 = vpop.permute.xlu1 %1969  ;;  %v8387_v0 = vld [vmem:[#allocation2 + $0x7c] sm:$0x1]  ;;  %v6537_v33 = vcombine.low %v1054_v34, %v893_v59  ;;  %v8401_v56 = vcombine.low %v880_v38, %v8331_v26 }
 0x1a8   : > { %v2929_v44 = vrot.slane %v10408_v49, 7  ;;  %10409 = vst [vmem:[#allocation57_spill] sm:$0xff] %v8373_v18  ;;  %v8375_v22 = vpop.permute.xlu0 %1385  ;;  %10410 = vst [vmem:[#allocation58_spill] sm:$0xff] %v8381_v2  ;;  %v831_v49 = vld [vmem:[#allocation2 + $0x7c] sm:$0x3]  ;;  %v8392_v18 = vrot.slane %v6409_v63, 1  ;;  %v8419_v34 = vcombine.low %v1057_v6, %v8334_v12 }
 0x1a9   : > { %v1055_v11 = vld [vmem:[#allocation2 + $0x78] sm:$0xc]  ;;  %v8394_v60 = vld [vmem:[#allocation2 + $0x88] ss:$0 sps:$4 sm:$0xff]   ;;  %1501 = vrot.lane.b32.xlu1 %v1474_v37, %s7396_s13  ;;  %10411 = vst [vmem:[#allocation59_spill] sm:$0xff] %v8401_v56  ;;  %v8403_v4 = vrot.slane %v6412_v53, 1 }
 0x1aa   : > { %1607 = vrot.lane.b32.xlu0 %v6377_v57, %s7398_s15  ;;  %v3376_v58 = vshrl.u32 %v8361_v35, 16  ;;  %v815_v46 = vld [vmem:[#allocation2 + $0x78] sm:$0xe]  ;;  %v8406_v43 = vrot.slane %v6410_v5, 1  ;;  %v8408_v59 = vld [vmem:[#allocation2 + $0x28] sm:$0xf]  ;;  %v8425_v5 = vcombine.low %v8265_v62, %v8387_v0  ;;  %v8430_v28 = vcombine.low %v1055_v11, %v894_v21 }
 0x1ab   : > { %10412 = vst [vmem:[#allocation60_spill] sm:$0xff] %v8408_v59  ;;  %v6363_v27 = vcombine.low %v815_v46, %v831_v49  ;;  %v1351_v37 = vshll.u32 %v8344_v19, 16  ;;  %v1730_v57 = vshll.u32 %v8367_v9, 16  ;;  %v8412_v61 = vpop.permute.xlu1 %3245  ;;  %v10414_v26 = vshll.u32 %v8123_v8, 16  ;;  %10415 = vst [vmem:[#allocation62_spill] sm:$0xff] %v8419_v34 }
 0x1ac   : > { %10413 = vst [vmem:[#allocation61_spill] sm:$0xff] %v8412_v61  ;;  %v3032_v63 = vpop.permute.xlu0 %3031  ;;  %v8428_v49 = vcombine.low %v878_v50, %v8365_v23  ;;  %v3383_v61 = vshrl.u32 %v8394_v60, 16  ;;  %v3176_v8 = vshrl.u32 %v6537_v33, 16  ;;  %v3378_v12 = vrot.slane %v3376_v58, 7  ;;  %v8436_v6 = vld [vmem:[#allocation2 + $0x2c] sm:$0x1] }
 0x1ad   : > { %v8416_v38 = vor.u32 %v10414_v26, %v2929_v44  ;;  %1613 = vrot.lane.b32.xlu1 %v6380_v31, %s7398_s15  ;;  %v3379_v44 = vshll.u32 %v8361_v35, 16  ;;  %10416 = vst [vmem:[#allocation63_spill] sm:$0xff] %v8436_v6  ;;  %v3179_v53 = vshll.u32 %v6537_v33, 16  ;;  %v8440_v50 = vrot.slane %v6363_v27, 1  ;;  %v794_v35 = vld [vmem:[#allocation2 + $0x7c] sm:$0x1] }
 0x1ae   : > { %1867 = vrot.lane.b32.xlu0 %v1841_v20, %s7397_s14  ;;  %v1349_v21 = vshrl.u32 %v8344_v19, 16  ;;  %v1728_v11 = vshrl.u32 %v8367_v9, 16  ;;  %v1337_v62 = vshll.u32 %v8383_v54, 16  ;;  %v3803_v31 = vsel %vm437_vm2, %v2925_v39, %v3032_v63  ;;  %v8452_v19 = vld [vmem:[#allocation2 + $0x18] sm:$0xf] }
 0x1af   : > { %v8446_v20 = vpop.permute.xlu1 %2641  ;;  %v1353_v34 = vrot.slane %v1351_v37, 1  ;;  %v1732_v2 = vrot.slane %v1730_v57, 1  ;;  %v3386_v56 = vshll.u32 %v8394_v60, 16  ;;  %v3385_v27 = vrot.slane %v3383_v61, 7  ;;  %v798_v6 = vld [vmem:[#allocation2 + $0x8c] sm:$0x1] }
 0x1b0   : > { %10417 = vst [vmem:[#allocation64_spill] sm:$0xff] %v8446_v20  ;;  %v3240_v58 = vpop.permute.xlu0 %3239  ;;  %v8450_v26 = vrot.slane %v3176_v8, 1  ;;  %v1335_v9 = vshrl.u32 %v8383_v54, 16  ;;  %v8455_v59 = vld [vmem:[#allocation2 + $0x88] sm:$0xe]  ;;  %v10418_v60 = vshrl.u32 %v8222_v17, 16  ;;  %v8476_v17 = vcombine.low %v815_v46, %v794_v35 }
 0x1b1   : > { %v3850_v33 = vsel %vm3511_vm5, %v3803_v31, %v3240_v58  ;;  %1497 = vrot.lane.b32.xlu1 %v1472_v29, %s7396_s13  ;;  %v8466_v57 = vrot.slane %v3179_v53, 2  ;;  %v2112_v61 = vshll.u32 %v8390_v47, 16  ;;  %v1339_v8 = vrot.slane %v1337_v62, 1  ;;  %v8500_v35 = vld [vmem:[#allocation2 + $0x90] sm:$0xf]  ;;  %v10435_v53 = vld [vmem:[#allocation19_spill] sm:$0xff] }
 0x1b2   : > { %v3882_v39 = vsel %vm3544_vm6, %v3850_v33, %v8114_v41  ;;  %1979 = vrot.lane.b32.xlu0 %v6427_v10, %s7396_s13  ;;  %v8464_v37 = vor.u32 %v8277_v1, %v10418_v60  ;;  %v2110_v41 = vshrl.u32 %v8390_v47, 16  ;;  %v3381_v10 = vor.u32 %v3379_v44, %v3378_v12  ;;  %v8478_v1 = vld [vmem:[#allocation2 + $0x1c] sm:$0x1] }
 0x1b3   : > { %v6594_v54 = vcombine.low %v8302_v55, %v3882_v39  ;;  %v6597_v63 = vcombine.high %v8302_v55, %v3882_v39  ;;  %v8472_v31 = vpop.permute.xlu1 %2881  ;;  %v8482_v60 = vor.u32 %v1353_v34, %v1349_v21  ;;  %v10420_v47 = vcombine.low %v8363_v24, %v8365_v23 }
 0x1b4   : > { %10419 = vst [vmem:[#allocation65_spill] sm:$0xff] %v8472_v31  ;;  %v8474_v29 = vpop.permute.xlu0 %2635  ;;  %v2114_v62 = vrot.slane %v2112_v61, 1  ;;  %v1735_v55 = vshrl.u32 %v8428_v49, 16  ;;  %v1737_v46 = vshll.u32 %v8428_v49, 16  ;;  %v8493_v12 = vcombine.low %v8455_v59, %v798_v6  ;;  %v8708_v31 = vld [vmem:[#allocation2 + $0x9c] sm:$0x1] }
 0x1b5   : > { %v4603_v58 = vshrl.u32 %v6594_v54, 16  ;;  %v4606_v33 = vshll.u32 %v6594_v54, 16  ;;  %1609 = vrot.lane.b32.xlu1 %v10420_v47, %s7398_s15  ;;  %v10421_v34 = vcombine.low %v8306_v16, %v8340_v30  ;;  %v4612_v24 = vshll.u32 %v6597_v63, 16  ;;  %v8515_v16 = vld [vmem:[#allocation2 + $0x94] sm:$0x1] }
 0x1b6   : > { %1863 = vrot.lane.b32.xlu0 %v8392_v18, %s7397_s14  ;;  %v8505_v18 = vsel %vm3544_vm6, %v8241_v7, %v8052_v32  ;;  %v8509_v6 = vor.u32 %v1732_v2, %v1728_v11  ;;  %v8511_v54 = vor.u32 %v3386_v56, %v3385_v27  ;;  %v945_v30 = vld [vmem:[#allocation2 + $0x90] sm:$0xe]  ;;  %v8517_v63 = vld [vmem:[#allocation2 + $0x78] ss:$0 sps:$4 sm:$0xff]   ;;  %v2098_v32 = vshll.u32 %v8425_v5, 16 }
 0x1b7   : > { %v3468_v44 = vsel %vm437_vm2, %v10421_v34, %v8375_v22  ;;  %v4605_v21 = vrot.slane %v4603_v58, 4  ;;  %v4608_v23 = vrot.slane %v4606_v33, 5  ;;  %v3034_v39 = vpop.permute.xlu1 %3033  ;;  %v2096_v33 = vshrl.u32 %v8425_v5, 16 }
 0x1b8   : > { %v8507_v61 = vpop.permute.xlu0 %2875  ;;  %10422 = vst [vmem:[#allocation66_spill] sm:$0xff] %v8509_v6  ;;  %v3184_v7 = vshrl.u32 %v8430_v28, 16  ;;  %v3515_v2 = vsel %vm3511_vm5, %v3468_v44, %v8094_v3  ;;  %v10423_v56 = vcombine.low %v8371_v48, %v8387_v0  ;;  %v1739_v11 = vrot.slane %v1737_v46, 1 }
 0x1b9   : > { %v4609_v58 = vor.u32 %v4608_v23, %v4605_v21  ;;  %1869 = vrot.lane.b32.xlu1 %v8403_v4, %s7397_s14  ;;  %v1358_v27 = vshll.u32 %v8493_v12, 16  ;;  %v3187_v47 = vshll.u32 %v8430_v28, 16  ;;  %v3582_v5 = vsel %vm437_vm2, %v7783_v36, %v8165_v40  ;;  %v897_v21 = vld [vmem:[#allocation2 + $0x94] sm:$0x3] }
 0x1ba   : > { %1975 = vrot.lane.b32.xlu0 %v10423_v56, %s7396_s13  ;;  %v4614_v34 = vrot.slane %v4612_v24, 5  ;;  %v10424_v3 = vmov 0  ;;  %v1344_v48 = vshll.u32 %v8476_v17, 16  ;;  %v8546_v44 = vor.u32 %v1339_v8, %v1335_v9 }
 0x1bb   : > { %v10425_v3 = vsel %vm8537_vm9, 4294967295, %v10424_v3  ;;  %v4610_v4 = vrot.slane %v4609_v58, 4  ;;  %v8542_v0 = vpop.permute.xlu1 %1965  ;;  %v8548_v28 = vor.u32 %v2114_v62, %v2110_v41  ;;  %v8553_v40 = vcombine.low %v945_v30, %v8515_v16  ;;  %v1058_v41 = vld [vmem:[#allocation2 + $0x90] sm:$0xc] }
 0x1bc   : > { %10426 = vst [vmem:[#allocation67_spill] sm:$0xff] %v10425_v3  ;;  %v8544_v46 = vpop.permute.xlu0 %2155  ;;  %v8557_v23 = vsel %vm3544_vm6, %v3515_v2, %v8116_v42  ;;  %v1356_v9 = vshrl.u32 %v8493_v12, 16  ;;  %v2100_v8 = vrot.slane %v2098_v32, 1  ;;  %v3628_v62 = vsel %vm3511_vm5, %v3582_v5, %v8023_v13  ;;  %v8573_v2 = vld [vmem:[#allocation2 + $0x90] sm:$0xe] }
 0x1bd   : > { %v8561_v24 = vsel %vm8537_vm9, %v4610_v4, %v4614_v34  ;;  %1865 = vrot.lane.b32.xlu1 %v8406_v43, %s7397_s14  ;;  %v8569_v30 = vrot.slane %v3184_v7, 1  ;;  %v1342_v42 = vshrl.u32 %v8476_v17, 16  ;;  %v2373_v58 = vshrl.u32 %v8517_v63, 16 }
 0x1be   : > { %3447 = vrot.lane.b32.xlu0 %v3381_v10, %s7398_s15  ;;  %v3585_v12 = vsel %vm437_vm2, %v7684_v15, %v8065_v14  ;;  %v8580_v13 = vsel %vm3544_vm6, %v3628_v62, %v8185_v52  ;;  %v1360_v32 = vrot.slane %v1358_v27, 1  ;;  %v8582_v43 = vrot.slane %v3187_v47, 2  ;;  %v898_v10 = vld [vmem:[#allocation2 + $0x9c] sm:$0x3]  ;;  %v8591_v14 = vld [vmem:[#allocation2 + $0x98] sm:$0xe] }
 0x1bf   : > { %v6599_v7 = vcombine.low %v8557_v23, %v8580_v13  ;;  %v3806_v17 = vsel %vm437_vm2, %v8416_v38, %v3034_v39  ;;  %v3242_v56 = vpop.permute.xlu1 %3241  ;;  %v1346_v34 = vrot.slane %v1344_v48, 1  ;;  %v2376_v15 = vshll.u32 %v8517_v63, 16  ;;  %v8593_v52 = vld [vmem:[#allocation2 + $0x70] ss:$0 sps:$4 sm:$0xff]  }
 0x1c0   : > { %v8588_v5 = vpop.permute.xlu0 %1391  ;;  %v3852_v27 = vsel %vm3511_vm5, %v3806_v17, %v3242_v56  ;;  %v8598_v47 = vor.u32 %v1739_v11, %v1735_v55  ;;  %v8600_v4 = vor.u32 %v2100_v8, %v2096_v33  ;;  %v6413_v38 = vcombine.low %v8573_v2, %v897_v21  ;;  %v10429_v48 = vld [vmem:[#allocation37_spill] sm:$0xff]  ;;  %v10431_v33 = vld [vmem:[#allocation18_spill] sm:$0xff] }
 0x1c1   : > { %10427 = vst [vmem:[#allocation68_spill] sm:$0xff] %v8588_v5  ;;  %v3579_v39 = vsel %vm437_vm2, %v7736_v51, %v8078_v45  ;;  %v3884_v63 = vsel %vm3544_vm6, %v3852_v27, %v10429_v48  ;;  %2169 = vrot.lane.b32.xlu1 %v8464_v37, %s7398_s15  ;;  %v2375_v49 = vrot.slane %v2373_v58, 7  ;;  %v8612_v55 = vcombine.low %v1058_v41, %v897_v21  ;;  %v10432_v8 = vld [vmem:[#allocation49_spill] sm:$0xff]  ;;  %v1059_v45 = vld [vmem:[#allocation2 + $0x98] sm:$0xc] }
 0x1c2   : > { %10428 = vst [vmem:[#allocation69_spill] sm:$0xff] %v8598_v47  ;;  %1499 = vrot.lane.b32.xlu0 %v8440_v50, %s7396_s13  ;;  %v8616_v11 = vsel %vm3511_vm5, %v3585_v12, %v10431_v33  ;;  %v6600_v62 = vcombine.low %v10432_v8, %v3884_v63  ;;  %v6603_v51 = vcombine.high %v10432_v8, %v3884_v63  ;;  %v4631_v50 = vshrl.u32 %v6599_v7, 16  ;;  %v800_v8 = vld [vmem:[#allocation2 + $0x94] sm:$0x1]  ;;  %v802_v5 = vld [vmem:[#allocation2 + $0x9c] sm:$0x1] }
 0x1c3   : > { %10430 = vst [vmem:[#allocation37_spill] sm:$0xff] %v8612_v55  ;;  %v6414_v17 = vcombine.low %v8591_v14, %v898_v10  ;;  %v8621_v56 = vpop.permute.xlu1 %2637  ;;  %v8625_v27 = vor.u32 %v1360_v32, %v1356_v9  ;;  %v4634_v21 = vshll.u32 %v6599_v7, 16  ;;  %v8629_v48 = vor.u32 %v1346_v34, %v1342_v42 }
 0x1c4   : > { %v8623_v37 = vpop.permute.xlu0 %1603  ;;  %v4645_v58 = vshrl.u32 %v6600_v62, 16  ;;  %v4648_v12 = vshll.u32 %v6600_v62, 16  ;;  %v8631_v33 = vrot.slane %v6413_v38, 1  ;;  %v8637_v63 = vor.u32 %v2376_v15, %v2375_v49 }
 0x1c5   : > { %10433 = vst [vmem:[#allocation18_spill] sm:$0xff] %v8623_v37  ;;  %1405 = vrot.lane.b32.xlu1 %v8482_v60, %s7397_s14  ;;  %v8639_v9 = vcombine.low %v1059_v45, %v898_v10  ;;  %v2366_v32 = vshrl.u32 %v8593_v52, 16  ;;  %v2369_v7 = vshll.u32 %v8593_v52, 16  ;;  %v4654_v34 = vshll.u32 %v6603_v51, 16  ;;  %v8650_v45 = vld [vmem:[#allocation2 + $0x90] sm:$0xe] }
 0x1c6   : > { %3047 = vrot.lane.b32.xlu0 %v8509_v6, %s7397_s14  ;;  %v4647_v62 = vrot.slane %v4645_v58, 4  ;;  %v4650_v42 = vrot.slane %v4648_v12, 5  ;;  %v8643_v38 = vrot.slane %v6414_v17, 1  ;;  %v3626_v60 = vsel %vm3511_vm5, %v3579_v39, %v10435_v53 }
 0x1c7   : > { %10434 = vst [vmem:[#allocation49_spill] sm:$0xff] %v8639_v9  ;;  %v8647_v41 = vpop.permute.xlu1 %2877  ;;  %v4633_v15 = vrot.slane %v4631_v50, 4  ;;  %v4636_v49 = vrot.slane %v4634_v21, 5  ;;  %v2119_v10 = vshll.u32 %v8553_v40, 16  ;;  %v2117_v58 = vshrl.u32 %v8553_v40, 16 }
 0x1c8   : > { %v2152_v36 = vpop.permute.xlu0 %2151  ;;  %v4651_v22 = vor.u32 %v4650_v42, %v4647_v62  ;;  %v1744_v51 = vshll.u32 %v8378_v25, 16  ;;  %v10436_v39 = vor.u32 %v8466_v57, %v8450_v26  ;;  %v6602_v50 = vcombine.high %v8557_v23, %v8580_v13  ;;  %v8665_v21 = vld [vmem:[#allocation2 + $0x40] sm:$0xf]  ;;  %v833_v40 = vld [vmem:[#allocation2 + $0x8c] sm:$0x3] }
 0x1c9   : > { %v3658_v52 = vsel %vm3544_vm6, %v3626_v60, %v2152_v36  ;;  %3449 = vrot.lane.b32.xlu1 %v8511_v54, %s7398_s15  ;;  %v2368_v36 = vrot.slane %v2366_v32, 7  ;;  %10437 = vst [vmem:[#allocation19_spill] sm:$0xff] %v8665_v21  ;;  %v4656_v12 = vrot.slane %v4654_v34, 5  ;;  %v1742_v42 = vshrl.u32 %v8378_v25, 16  ;;  %v8836_v21 = vld [vmem:[#allocation2 + $0x98] sm:$0xf] }
 0x1ca   : > { %v6593_v17 = vcombine.low %v8505_v18, %v3658_v52  ;;  %v6596_v53 = vcombine.high %v8505_v18, %v3658_v52  ;;  %3255 = vrot.lane.b32.xlu0 %v10436_v39, %s7396_s13  ;;  %v4652_v62 = vrot.slane %v4651_v22, 4  ;;  %v8669_v18 = vcombine.low %v8650_v45, %v800_v8  ;;  %v10439_v22 = vld [vmem:[#allocation59_spill] sm:$0xff] }
 0x1cb   : > { %v8671_v52 = vpop.permute.xlu1 %1493  ;;  %v4637_v57 = vor.u32 %v4636_v49, %v4633_v15  ;;  %v2121_v39 = vrot.slane %v2119_v10, 1  ;;  %v1746_v13 = vrot.slane %v1744_v51, 1  ;;  %v6365_v32 = vcombine.low %v8455_v59, %v833_v40  ;;  %v956_v15 = vld [vmem:[#allocation2 + $0x4c] sm:$0x3]  ;;  %v8683_v49 = vld [vmem:[#allocation2 + $0x70] sm:$0x1e]  }
 0x1cc   : > { %v4589_v54 = vshrl.u32 %v6593_v17, 16  ;;  %v4592_v60 = vshll.u32 %v6593_v17, 16  ;;  %10438 = vst [vmem:[#allocation70_spill] sm:$0xff] %v8671_v52  ;;  %v8673_v26 = vpop.permute.xlu0 %1387  ;;  %v4657_v23 = vsel %vm8537_vm9, %v4652_v62, %v4656_v12  ;;  %v1751_v34 = vshll.u32 %v10439_v22, 16  ;;  %v8687_v59 = vld [vmem:[#allocation2 + $0x44] sm:$0x1] }
 0x1cd   : > { %v4598_v8 = vshll.u32 %v6596_v53, 16  ;;  %1401 = vrot.lane.b32.xlu1 %v8546_v44, %s7397_s14  ;;  %v4640_v17 = vshll.u32 %v6602_v50, 16  ;;  %v6692_v10 = vcombine.low %v8561_v24, %v4657_v23  ;;  %v6693_v51 = vcombine.high %v8561_v24, %v4657_v23  ;;  %10440 = vst [vmem:[#allocation59_spill] sm:$0xff] %v8687_v59  ;;  %v834_v24 = vld [vmem:[#allocation2 + $0x94] sm:$0x3] }
 0x1ce   : > { %v4591_v25 = vrot.slane %v4589_v54, 4  ;;  %v4594_v6 = vrot.slane %v4592_v60, 5  ;;  %2171 = vrot.lane.b32.xlu0 %v8548_v28, %s7398_s15  ;;  %v1365_v53 = vshll.u32 %v8669_v18, 16  ;;  %v4638_v50 = vrot.slane %v4637_v57, 4  ;;  %v8699_v60 = vld [vmem:[#allocation2 + $0x98] sm:$0xf] }
 0x1cf   : > { %v8692_v12 = vpop.permute.xlu1 %1605  ;;  %v8696_v62 = vor.u32 %v2369_v7, %v2368_v36  ;;  %v1749_v54 = vshrl.u32 %v10439_v22, 16  ;;  %5860 = vmatprep.mubr.bf16.mxu0 %v6693_v51  ;;  %v8701_v23 = vor.u32 %v2121_v39, %v2117_v58  ;;  %v8703_v9 = vor.u32 %v1746_v13, %v1742_v42  ;;  %v946_v42 = vld [vmem:[#allocation2 + $0x98] sm:$0xe] }
 0x1d0   : > { %10441 = vst [vmem:[#allocation71_spill] sm:$0xff] %v8692_v12  ;;  %v8694_v44 = vpop.permute.xlu0 %1599  ;;  %v4595_v28 = vor.u32 %v4594_v6, %v4591_v25  ;;  %v1363_v40 = vshrl.u32 %v8669_v18, 16  ;;  %v8706_v37 = vrot.slane %v6365_v32, 1  ;;  %v8710_v6 = vld [vmem:[#allocation2 + $0x78] sm:$0x1e]   ;;  %v4600_v7 = vrot.slane %v4598_v8, 5  ;;  %5861 = vmatmul.mubr.bf16.vlgmr.msra.gmra.mrb[16].mxu0 %v6692_v10 }
 0x1d1   : > { %10442 = vst [vmem:[#allocation72_spill] sm:$0xff] %v8694_v44  ;;  %10443 = vst [vmem:[#allocation73_spill] sm:$0xff] %v8703_v9  ;;  %3049 = vrot.lane.b32.xlu1 %v8598_v47, %s7397_s14  ;;  %v4642_v57 = vrot.slane %v4640_v17, 5  ;;  %v1753_v22 = vrot.slane %v1751_v34, 1  ;;  %v1367_v58 = vrot.slane %v1365_v53, 1  ;;  %v6366_v13 = vcombine.low %v8650_v45, %v834_v24  ;;  %v10446_v51 = vld [vmem:[#allocation58_spill] sm:$0xff] }
 0x1d2   : > { %v4596_v36 = vrot.slane %v4595_v28, 4  ;;  %1407 = vrot.lane.b32.xlu0 %v8625_v27, %s7397_s14  ;;  %v7349_v18 = vld [vmem:[#allocation2 + $0x48] sm:$0xe]  ;;  %v2592_v32 = vshll.u32 %v8683_v49, 16  ;;  %v8718_v25 = vld [vmem:[#allocation2 + $0x30] sm:$0xf] }
 0x1d3   : > { %v6455_v39 = vcombine.low %v7349_v18, %v956_v15  ;;  %v8720_v8 = vpop.permute.xlu1 %1489  ;;  %v4643_v27 = vsel %vm8537_vm9, %v4638_v50, %v4642_v57  ;;  %v8728_v17 = vld [vmem:[#allocation2 + $0xa0] sm:$0xf]  ;;  %v3192_v15 = vshrl.u32 %v10446_v51, 16  ;;  %v3195_v45 = vshll.u32 %v10446_v51, 16  ;;  %v10449_v51 = vld [vmem:[#allocation22_spill] sm:$0xff] }
 0x1d4   : > { %10444 = vst [vmem:[#allocation74_spill] sm:$0xff] %v8720_v8  ;;  %v8722_v10 = vpop.permute.xlu0 %1859  ;;  %v4601_v34 = vsel %vm8537_vm9, %v4596_v36, %v4600_v7  ;;  %v2599_v18 = vshll.u32 %v8710_v6, 16  ;;  %v10447_v7 = vcombine.low %v8500_v35, %v8515_v16  ;;  %v8739_v36 = vor.u32 %v1753_v22, %v1749_v54  ;;  %v947_v24 = vld [vmem:[#allocation2 + $0xa0] sm:$0xe]  ;;  %v8755_v54 = vld [vmem:[#allocation2 + $0x34] sm:$0x1] }
 0x1d5   : > { %10445 = vst [vmem:[#allocation75_spill] sm:$0xff] %v8722_v10  ;;  %v6690_v53 = vcombine.low %v4601_v34, %v4643_v27  ;;  %v6691_v28 = vcombine.high %v4601_v34, %v4643_v27  ;;  %v8742_v50 = vcombine.low %v946_v42, %v8708_v31  ;;  %v2590_v57 = vshrl.u32 %v8683_v49, 16  ;;  %v8747_v27 = vld [vmem:[#allocation2 + $0xa4] sm:$0x1] }
 0x1d6   : > { %1981 = vrot.lane.b32.xlu1 %v10447_v7, %s7396_s13  ;;  %10448 = vst [vmem:[#allocation58_spill] sm:$0xff] %v8739_v36  ;;  %v10450_v47 = vshrl.u32 %v10449_v51, 16  ;;  %2167 = vrot.lane.b32.xlu0 %v8600_v4, %s7398_s15  ;;  %v8751_v44 = vrot.slane %v6455_v39, 1  ;;  %v8753_v35 = vrot.slane %v6366_v13, 1  ;;  %v2594_v16 = vrot.slane %v2592_v32, 1 }
 0x1d7   : > { %5763 = vmatprep.mubr.bf16.mxu1 %v6691_v28  ;;  %v8759_v22 = vpop.permute.xlu1 %1601  ;;  %v8763_v42 = vor.u32 %v1367_v58, %v1363_v40  ;;  %v8767_v39 = vrot.slane %v3192_v15, 1  ;;  %v8769_v13 = vrot.slane %v3195_v45, 2  ;;  %v8771_v32 = vld [vmem:[#allocation2 + $0x94] sm:$0x1]  ;;  %v8774_v7 = vcombine.low %v947_v24, %v8747_v27  ;;  %v10455_v40 = vld [vmem:[#allocation24_spill] sm:$0xff]  ;;  %v10456_v58 = vld [vmem:[#allocation3_spill] sm:$0xff] }
 0x1d8   : > { %v2964_v34 = vrot.slane %v10450_v47, 7  ;;  %10451 = vst [vmem:[#allocation22_spill] sm:$0xff] %v8751_v44  ;;  %10452 = vst [vmem:[#allocation76_spill] sm:$0xff] %v8759_v22  ;;  %v8761_v47 = vpop.permute.xlu0 %1971  ;;  %5764 = vmatmul.mubr.bf16.vlgmr.msra.gmra.mrb[0].mxu1 %v6690_v53  ;;  %v7243_v28 = vld [vmem:[#allocation2 + $0x70] sm:$0x3c]   ;;  %v2597_v49 = vshrl.u32 %v8710_v6, 16  ;;  %v8781_v20 = vsel %vm437_vm2, %v10456_v58, %v10455_v40  ;;  %v10457_v15 = vor.u32 %v8582_v43, %v8569_v30 }
 0x1d9   : > { %10453 = vst [vmem:[#allocation77_spill] sm:$0xff] %v8761_v47  ;;  %v2601_v10 = vrot.slane %v2599_v18, 1  ;;  %v10454_v47 = vld [vmem:[#allocation62_spill] sm:$0xff]  ;;  %v10458_v45 = vshll.u32 %v10449_v51, 16  ;;  %v8791_v24 = vld [vmem:[#allocation2 + $0x90] sm:$0xf]  ;;  %v8797_v40 = vor.u32 %v2594_v16, %v2590_v57  ;;  %v8803_v30 = vcombine.low %v8573_v2, %v8771_v32 }
 0x1da   : > { %v3200_v53 = vshrl.u32 %v10454_v47, 16  ;;  %3257 = vrot.lane.b32.xlu1 %v10457_v15, %s7396_s13  ;;  %v3203_v6 = vshll.u32 %v10454_v47, 16  ;;  %v2126_v18 = vshll.u32 %v8742_v50, 16  ;;  %1403 = vrot.lane.b32.xlu0 %v8629_v48, %s7397_s14  ;;  %v10460_v43 = vld [vmem:[#allocation29_spill] sm:$0xff]  ;;  %v8807_v15 = vld [vmem:[#allocation2 + $0x9c] sm:$0x1] }
 0x1db   : > { %v8789_v4 = vor.u32 %v10458_v45, %v2964_v34  ;;  %v10461_v51 = vshrl.u32 %v10460_v43, 16  ;;  %10462 = vst [vmem:[#allocation24_spill] sm:$0xff] %v8807_v15  ;;  %v8809_v47 = vld [vmem:[#allocation2 + $0x90] ss:$0 sps:$4 sm:$0xff]   ;;  %v10463_v45 = vld [vmem:[#allocation27_spill] sm:$0xff]  ;;  %v8816_v57 = vpop.permute.xlu1 %1861  ;;  %v2824_v58 = vshrl.u32 %v7243_v28, 16  ;;  %v8824_v55 = vor.u32 %v2601_v10, %v2597_v49 }
 0x1dc   : > { %10465 = vst [vmem:[#allocation3_spill] sm:$0xff] %v8816_v57  ;;  %v8818_v16 = vpop.permute.xlu0 %1855  ;;  %v2827_v44 = vshll.u32 %v7243_v28, 16  ;;  %v8826_v12 = vrot.slane %v3200_v53, 1  ;;  %v2124_v52 = vshrl.u32 %v8742_v50, 16  ;;  %v2128_v2 = vrot.slane %v2126_v18, 1  ;;  %v10467_v22 = vld [vmem:[#allocation28_spill] sm:$0xff] }
 0x1dd   : > { %10459 = vst [vmem:[#allocation62_spill] sm:$0xff] %v8789_v4  ;;  %v2950_v34 = vrot.slane %v10461_v51, 7  ;;  %v10464_v4 = vld [vmem:[#allocation43_spill] sm:$0xff]  ;;  %10466 = vst [vmem:[#allocation29_spill] sm:$0xff] %v8818_v16  ;;  %v8822_v51 = vld [vmem:[#allocation2 + $0x98] sm:$0xe]  ;;  %v8849_v53 = vcombine.low %v8591_v14, %v8807_v15 }
 0x1de   : > { %v8814_v48 = vsel %vm437_vm2, %v10464_v4, %v10463_v45  ;;  %v2133_v4 = vshll.u32 %v8774_v7, 16  ;;  %v7245_v45 = vld [vmem:[#allocation2 + $0x78] sm:$0x3c]   ;;  %2429 = vrot.lane.b32.xlu1 %v8637_v63, %s7397_s14  ;;  %v8832_v16 = vrot.slane %v3203_v6, 2  ;;  %v10468_v28 = vshrl.u32 %v10467_v22, 16  ;;  %10469 = vst [vmem:[#allocation27_spill] sm:$0xff] %v8836_v21  ;;  %1871 = vrot.lane.b32.xlu0 %v8631_v33, %s7397_s14 }
 0x1df   : > { %v2131_v10 = vshrl.u32 %v8774_v7, 16  ;;  %v10470_v50 = vshll.u32 %v10460_v43, 16  ;;  %v8852_v6 = vcombine.low %v8822_v51, %v802_v5  ;;  %v8854_v18 = vld [vmem:[#allocation2 + $0x98] ss:$0 sps:$4 sm:$0xff]   ;;  %v804_v7 = vld [vmem:[#allocation2 + $0xa4] sm:$0x1]  ;;  %v10473_v33 = vcombine.low %v8452_v19, %v8478_v1 }
 0x1e0   : > { %v2971_v59 = vrot.slane %v10468_v28, 7  ;;  %v8856_v28 = vld [vmem:[#allocation2 + $0xa0] sm:$0xe]  ;;  %v8867_v14 = vrot.slane %v2824_v58, 1  ;;  %v8869_v63 = vrot.slane %v2827_v44, 2  ;;  %v3390_v5 = vshrl.u32 %v8809_v47, 16 }
 0x1e1   : > { %v8843_v49 = vor.u32 %v10470_v50, %v2950_v34  ;;  %10472 = vst [vmem:[#allocation28_spill] sm:$0xff] %v8856_v28  ;;  %v3471_v43 = vsel %vm437_vm2, %v10473_v33, %v8673_v26  ;;  %v8863_v34 = vpop.permute.xlu1 %1857  ;;  %v8865_v50 = vpop.permute.xlu0 %1967  ;;  %v10477_v15 = vld [vmem:[#allocation34_spill] sm:$0xff]  ;;  %v10478_v21 = vld [vmem:[#allocation45_spill] sm:$0xff]  ;;  %v2135_v8 = vrot.slane %v2133_v4, 1  ;;  %v2832_v19 = vshrl.u32 %v7245_v45, 16 }
 0x1e2   : > { %10474 = vst [vmem:[#allocation78_spill] sm:$0xff] %v8865_v50  ;;  %10475 = vst [vmem:[#allocation79_spill] sm:$0xff] %v8867_v14  ;;  %v2835_v1 = vshll.u32 %v7245_v45, 16  ;;  %v8877_v26 = vld [vmem:[#allocation2 + $0x80] ss:$0 sps:$4 sm:$0xff]   ;;  %1873 = vrot.lane.b32.xlu1 %v8643_v38, %s7397_s14  ;;  %v8883_v58 = vor.u32 %v2128_v2, %v2124_v52  ;;  %v10481_v33 = vshll.u32 %v10467_v22, 16  ;;  %2427 = vrot.lane.b32.xlu0 %v8696_v62, %s7397_s14 }
 0x1e3   : > { %10471 = vst [vmem:[#allocation43_spill] sm:$0xff] %v8843_v49  ;;  %10476 = vst [vmem:[#allocation80_spill] sm:$0xff] %v8869_v63  ;;  %v10479_v49 = vld [vmem:[#allocation51_spill] sm:$0xff]  ;;  %v3393_v38 = vshll.u32 %v8809_v47, 16  ;;  %v1372_v4 = vshll.u32 %v8852_v6, 16  ;;  %v3397_v52 = vshrl.u32 %v8854_v18, 16 }
 0x1e4   : > { %v10480_v57 = vcombine.low %v10478_v21, %v10479_v49  ;;  %v8887_v50 = vor.u32 %v10481_v33, %v2971_v59  ;;  %v8890_v21 = vcombine.low %v8856_v28, %v804_v7  ;;  %v8899_v2 = vld [vmem:[#allocation2 + $0xa4] sm:$0x3]  ;;  %v10485_v22 = vld [vmem:[#allocation33_spill] sm:$0xff]  ;;  %v10486_v59 = vld [vmem:[#allocation44_spill] sm:$0xff]  ;;  %v3392_v47 = vrot.slane %v3390_v5, 7 }
 0x1e5   : > { %10484 = vst [vmem:[#allocation45_spill] sm:$0xff] %v8899_v2  ;;  %v8904_v45 = vsel %vm437_vm2, %v10486_v59, %v10485_v22  ;;  %v10487_v49 = vld [vmem:[#allocation16_spill] sm:$0xff]  ;;  %v8910_v33 = vpop.permute.xlu0 %3439  ;;  %v8916_v44 = vrot.slane %v2832_v19, 1  ;;  %v8920_v28 = vld [vmem:[#allocation2 + $0xa0] sm:$0xe]  ;;  %v2380_v22 = vshrl.u32 %v8877_v26, 16 }
 0x1e6   : > { %v3474_v3 = vsel %vm437_vm2, %v10480_v57, %v10477_v15  ;;  %10482 = vst [vmem:[#allocation34_spill] sm:$0xff] %v8887_v50  ;;  %v10483_v15 = vld [vmem:[#allocation30_spill] sm:$0xff]  ;;  %10488 = vst [vmem:[#allocation51_spill] sm:$0xff] %v8910_v33  ;;  %v8918_v50 = vrot.slane %v2835_v1, 2  ;;  %v10491_v59 = vld [vmem:[#allocation15_spill] sm:$0xff]  ;;  %2173 = vrot.lane.b32.xlu1 %v8701_v23, %s7398_s15  ;;  %3051 = vrot.lane.b32.xlu0 %v8703_v9, %s7397_s14  ;;  %v1370_v19 = vshrl.u32 %v8852_v6, 16 }
 0x1e7   : > { %v3517_v57 = vsel %vm3511_vm5, %v3471_v43, %v10483_v15  ;;  %v3519_v7 = vsel %vm3511_vm5, %v3474_v3, %v10487_v49  ;;  %v8908_v43 = vpop.permute.xlu1 %2161  ;;  %v8914_v15 = vor.u32 %v2135_v8, %v2131_v10  ;;  %10490 = vst [vmem:[#allocation33_spill] sm:$0xff] %v8920_v28  ;;  %v10492_v49 = vld [vmem:[#allocation31_spill] sm:$0xff]  ;;  %v6415_v8 = vcombine.low %v8920_v28, %v8899_v2  ;;  %v10494_v23 = vld [vmem:[#allocation36_spill] sm:$0xff]  ;;  %v10496_v63 = vld [vmem:[#allocation17_spill] sm:$0xff] }
 0x1e8   : > { %v8925_v3 = vsel %vm3544_vm6, %v3517_v57, %v10491_v59  ;;  %v10493_v62 = vshrl.u32 %v10492_v49, 16  ;;  %v1379_v10 = vshll.u32 %v8890_v21, 16  ;;  %v1374_v1 = vrot.slane %v1372_v4, 1  ;;  %v8938_v59 = vld [vmem:[#allocation2 + $0x88] ss:$0 sps:$4 sm:$0xff]  }
 0x1e9   : > { %10489 = vst [vmem:[#allocation30_spill] sm:$0xff] %v8914_v15  ;;  %v3399_v15 = vrot.slane %v3397_v52, 7  ;;  %v3400_v57 = vshll.u32 %v8854_v18, 16  ;;  %v10495_v14 = vld [vmem:[#allocation52_spill] sm:$0xff]  ;;  %v8946_v2 = vsel %vm3544_vm6, %v8616_v11, %v8544_v46  ;;  %v3436_v9 = vpop.permute.xlu0 %3435  ;;  %v8952_v6 = vsel %vm3544_vm6, %v3519_v7, %v10496_v63  ;;  %v8956_v18 = vld [vmem:[#allocation2 + $0x38] sm:$0xf] }
 0x1ea   : > { %v2957_v5 = vrot.slane %v10493_v62, 7  ;;  %v3809_v62 = vsel %vm437_vm2, %v10495_v14, %v10494_v23  ;;  %v8954_v4 = vor.u32 %v3393_v38, %v3392_v47  ;;  %10498 = vst [vmem:[#allocation16_spill] sm:$0xff] %v8956_v18  ;;  %v8958_v52 = vld [vmem:[#allocation2 + $0x80] sm:$0x1e]   ;;  %v6605_v14 = vcombine.low %v8925_v3, %v8946_v2  ;;  %1409 = vrot.lane.b32.xlu1 %v8763_v42, %s7397_s14  ;;  %v8982_v46 = vld [vmem:[#allocation2 + $0x3c] sm:$0x1] }
 0x1eb   : > { %v8948_v28 = vpop.permute.xlu1 %1397  ;;  %v2382_v11 = vrot.slane %v2380_v22, 7  ;;  %v2383_v23 = vshll.u32 %v8877_v26, 16  ;;  %v10499_v63 = vshll.u32 %v10492_v49, 16  ;;  %v8971_v7 = vrot.slane %v6415_v8, 1  ;;  %1503 = vrot.lane.b32.xlu0 %v8706_v37, %s7396_s13  ;;  %v8980_v26 = vld [vmem:[#allocation2 + $0xac] sm:$0x3] }
 0x1ec   : > { %10497 = vst [vmem:[#allocation44_spill] sm:$0xff] %v8954_v4  ;;  %v1377_v47 = vshrl.u32 %v8890_v21, 16  ;;  %v1381_v4 = vrot.slane %v1379_v10, 1  ;;  %v8976_v33 = vor.u32 %v1374_v1, %v1370_v19  ;;  %v8978_v22 = vor.u32 %v3400_v57, %v3399_v15  ;;  %10500 = vst [vmem:[#allocation15_spill] sm:$0xff] %v8980_v26  ;;  %v10503_v8 = vld [vmem:[#allocation40_spill] sm:$0xff]  ;;  %v10504_v10 = vld [vmem:[#allocation46_spill] sm:$0xff] }
 0x1ed   : > { %v8969_v38 = vor.u32 %v10499_v63, %v2957_v5  ;;  %10501 = vst [vmem:[#allocation31_spill] sm:$0xff] %v8982_v46  ;;  %v2387_v49 = vshrl.u32 %v8938_v59, 16  ;;  %v10502_v5 = vld [vmem:[#allocation39_spill] sm:$0xff]  ;;  %v8992_v37 = vsel %vm437_vm2, %v10504_v10, %v10503_v8  ;;  %v8996_v15 = vpop.permute.xlu0 %1491  ;;  %v2390_v1 = vshll.u32 %v8938_v59, 16  ;;  %v9002_v18 = vld [vmem:[#allocation2 + $0xa8] sm:$0xe] }
 0x1ee   : > { %v3854_v21 = vsel %vm3511_vm5, %v3809_v62, %v10502_v5  ;;  %10505 = vst [vmem:[#allocation36_spill] sm:$0xff] %v8996_v15  ;;  %v2606_v57 = vshll.u32 %v8958_v52, 16  ;;  %v4673_v63 = vshrl.u32 %v6605_v14, 16  ;;  %v4676_v42 = vshll.u32 %v6605_v14, 16  ;;  %10506 = vst [vmem:[#allocation52_spill] sm:$0xff] %v9002_v18  ;;  %3053 = vrot.lane.b32.xlu1 %v8739_v36, %s7397_s14  ;;  %v10507_v14 = vld [vmem:[#allocation47_spill] sm:$0xff] }
 0x1ef   : > { %v8994_v19 = vpop.permute.xlu1 %3441  ;;  %v9000_v46 = vor.u32 %v2383_v23, %v2382_v11  ;;  %v2604_v62 = vshrl.u32 %v8958_v52, 16  ;;  %v9006_v5 = vsel %vm3544_vm6, %v3854_v21, %v3436_v9  ;;  %v9010_v8 = vor.u32 %v1381_v4, %v1377_v47  ;;  %v9026_v47 = vld [vmem:[#allocation2 + $0x88] sm:$0x1e]   ;;  %v10511_v36 = vld [vmem:[#allocation53_spill] sm:$0xff] }
 0x1f0   : > { %v6416_v59 = vcombine.low %v9002_v18, %v8980_v26  ;;  %v1756_v10 = vshrl.u32 %v8803_v30, 16  ;;  %v3746_v11 = vsel %vm3511_vm5, %v8814_v48, %v10507_v14  ;;  %v3742_v52 = vsel %vm3511_vm5, %v8904_v45, %v8474_v29  ;;  %10509 = vst [vmem:[#allocation17_spill] sm:$0xff] %v9026_v47  ;;  %v10510_v21 = vld [vmem:[#allocation48_spill] sm:$0xff]  ;;  %v10514_v47 = vld [vmem:[#allocation55_spill] sm:$0xff] }
 0x1f1   : > { %v10508_v9 = vcombine.low %v8699_v60, %v8708_v31  ;;  %v1758_v4 = vshll.u32 %v8803_v30, 16  ;;  %v2389_v23 = vrot.slane %v2387_v49, 7  ;;  %v3700_v18 = vsel %vm437_vm2, %v10511_v36, %v10510_v21  ;;  %v9038_v31 = vpop.permute.xlu0 %2419  ;;  %v10513_v21 = vld [vmem:[#allocation54_spill] sm:$0xff]  ;;  %v10515_v15 = vld [vmem:[#allocation56_spill] sm:$0xff] }
 0x1f2   : > { %v9033_v48 = vsel %vm3544_vm6, %v3742_v52, %v8507_v61  ;;  %v3632_v29 = vsel %vm3511_vm5, %v8781_v20, %v8542_v0  ;;  %v2608_v60 = vrot.slane %v2606_v57, 1  ;;  %v4675_v30 = vrot.slane %v4673_v63, 4  ;;  %1505 = vrot.lane.b32.xlu1 %v8753_v35, %s7396_s13  ;;  %v835_v20 = vld [vmem:[#allocation2 + $0x9c] sm:$0x3] }
 0x1f3   : > { %1983 = vrot.lane.b32.xlu0 %v10508_v9, %s7396_s13  ;;  %v2158_v45 = vpop.permute.xlu1 %2157  ;;  %v4678_v49 = vrot.slane %v4676_v42, 5  ;;  %v6606_v14 = vcombine.low %v9033_v48, %v9006_v5  ;;  %v9047_v52 = vrot.slane %v6416_v59, 1  ;;  %v6608_v42 = vcombine.high %v8925_v3, %v8946_v2 }
 0x1f4   : > { %v3664_v9 = vsel %vm3544_vm6, %v3632_v29, %v2158_v45  ;;  %v1760_v57 = vrot.slane %v1758_v4, 1  ;;  %v9054_v63 = vor.u32 %v2390_v1, %v2389_v23  ;;  %v6367_v2 = vcombine.low %v8822_v51, %v835_v20 }
 0x1f5   : > { %v6611_v36 = vcombine.low %v8952_v6, %v3664_v9  ;;  %v6614_v61 = vcombine.high %v8952_v6, %v3664_v9  ;;  %v9057_v35 = vpop.permute.xlu0 %3043  ;;  %v1765_v9 = vshll.u32 %v8849_v53, 16  ;;  %v4687_v0 = vshrl.u32 %v6606_v14, 16 }
 0x1f6   : > { %v4679_v26 = vor.u32 %v4678_v49, %v4675_v30  ;;  %v9062_v3 = vor.u32 %v2608_v60, %v2604_v62  ;;  %v9070_v59 = vsel %vm3544_vm6, %v3746_v11, %v10513_v21  ;;  %v3812_v30 = vsel %vm437_vm2, %v10515_v15, %v10514_v47  ;;  %v10517_v49 = vld [vmem:[#allocation61_spill] sm:$0xff] }
 0x1f7   : > { %2651 = vrot.lane.b32.xlu0 %v8797_v40, %s7396_s13  ;;  %v4715_v6 = vshrl.u32 %v6611_v36, 16  ;;  %v4718_v29 = vshll.u32 %v6611_v36, 16  ;;  %v1394_v45 = vpop.permute.xlu1 %1393  ;;  %v4690_v40 = vshll.u32 %v6606_v14, 16  ;;  %v4724_v23 = vshll.u32 %v6614_v61, 16 }
 0x1f8   : > { %v10512_v36 = vcombine.low %v8728_v17, %v8747_v27  ;;  %v4682_v51 = vshll.u32 %v6608_v42, 16  ;;  %v10516_v62 = vor.u32 %v8769_v13, %v8767_v39  ;;  %v9079_v60 = vor.u32 %v1760_v57, %v1756_v10  ;;  %v9096_v42 = vld [vmem:[#allocation2 + $0xa8] sm:$0xf] }
 0x1f9   : > { %v4717_v1 = vrot.slane %v4715_v6, 4  ;;  %v4720_v4 = vrot.slane %v4718_v29, 5  ;;  %v3856_v17 = vsel %vm3511_vm5, %v3812_v30, %v10517_v49  ;;  %v3744_v27 = vsel %vm3511_vm5, %v3700_v18, %v8621_v56  ;;  %v9085_v61 = vpop.permute.xlu0 %3251  ;;  %v10524_v30 = vld [vmem:[#allocation26_spill] sm:$0xff] }
 0x1fa   : > { %1985 = vrot.lane.b32.xlu1 %v10512_v36, %s7396_s13  ;;  %v9087_v20 = vrot.slane %v1765_v9, 1  ;;  %v3776_v15 = vsel %vm3544_vm6, %v3744_v27, %v8647_v41  ;;  %v10518_v39 = vcombine.low %v8718_v25, %v8755_v54  ;;  %v4680_v47 = vrot.slane %v4679_v26, 4  ;;  %v9106_v26 = vld [vmem:[#allocation2 + $0xac] sm:$0x1] }
 0x1fb   : > { %3259 = vrot.lane.b32.xlu0 %v10516_v62, %s7396_s13  ;;  %v4721_v11 = vor.u32 %v4720_v4, %v4717_v1  ;;  %v3438_v14 = vpop.permute.xlu1 %3437  ;;  %v4689_v56 = vrot.slane %v4687_v0, 4  ;;  %v4692_v18 = vrot.slane %v4690_v40, 5  ;;  %v4726_v21 = vrot.slane %v4724_v23, 5 }
 0x1fc   : > { %v3480_v13 = vsel %vm437_vm2, %v10518_v39, %v1394_v45  ;;  %v3888_v10 = vsel %vm3544_vm6, %v3856_v17, %v3438_v14  ;;  %v4684_v6 = vrot.slane %v4682_v51, 5  ;;  %v10519_v25 = vcombine.low %v8791_v24, %v8771_v32  ;;  %v10520_v45 = vld [vmem:[#allocation74_spill] sm:$0xff]  ;;  %v10529_v39 = vld [vmem:[#allocation76_spill] sm:$0xff] }
 0x1fd   : > { %v4722_v57 = vrot.slane %v4721_v11, 4  ;;  %v6612_v29 = vcombine.low %v3776_v15, %v3888_v10  ;;  %v6615_v41 = vcombine.high %v3776_v15, %v3888_v10  ;;  %v9104_v54 = vrot.slane %v6367_v2, 1  ;;  %v10522_v24 = vld [vmem:[#allocation38_spill] sm:$0xff]  ;;  %v10526_v11 = vld [vmem:[#allocation19_spill] sm:$0xff] }
 0x1fe   : > { %2653 = vrot.lane.b32.xlu1 %v8824_v55, %s7396_s13  ;;  %v6609_v0 = vcombine.high %v9033_v48, %v9006_v5  ;;  %v3523_v9 = vsel %vm3511_vm5, %v3480_v13, %v10520_v45  ;;  %v3040_v55 = vpop.permute.xlu0 %3039  ;;  %v6431_v32 = vcombine.low %v9096_v42, %v9106_v26  ;;  %v3594_v2 = vsel %vm437_vm2, %v10522_v24, %v8863_v34  ;;  %v10523_v48 = vld [vmem:[#allocation3_spill] sm:$0xff] }
 0x1ff   : > { %1615 = vrot.lane.b32.xlu0 %v10519_v25, %s7398_s15  ;;  %v9112_v40 = vpop.permute.xlu1 %2421  ;;  %v4727_v4 = vsel %vm8537_vm9, %v4722_v57, %v4726_v21  ;;  %v4729_v23 = vshrl.u32 %v6612_v29, 16  ;;  %v4732_v36 = vshll.u32 %v6612_v29, 16  ;;  %v4685_v5 = vsel %vm8537_vm9, %v4680_v47, %v4684_v6  ;;  %v10527_v34 = vld [vmem:[#allocation59_spill] sm:$0xff]  ;;  %v948_v29 = vld [vmem:[#allocation2 + $0xa8] sm:$0xe] }
 0x200   : > { %v3600_v51 = vsel %vm437_vm2, %v10524_v30, %v10523_v48  ;;  %v4693_v62 = vor.u32 %v4692_v18, %v4689_v56  ;;  %v10525_v49 = vor.u32 %v8832_v16, %v8826_v12  ;;  %v6696_v17 = vcombine.high %v4685_v5, %v4727_v4  ;;  %v10530_v56 = vld [vmem:[#allocation57_spill] sm:$0xff]  ;;  %v10531_v57 = vld [vmem:[#allocation43_spill] sm:$0xff]  ;;  %v10532_v25 = vld [vmem:[#allocation4_spill] sm:$0xff] }
 0x201   : > { %v6695_v27 = vcombine.low %v4685_v5, %v4727_v4  ;;  %v10528_v14 = vcombine.low %v10526_v11, %v10527_v34  ;;  %v9137_v13 = vsel %vm3544_vm6, %v3523_v9, %v10529_v39  ;;  %v4731_v10 = vrot.slane %v4729_v23, 4  ;;  %v10534_v23 = vld [vmem:[#allocation51_spill] sm:$0xff]  ;;  %v10536_v48 = vld [vmem:[#allocation24_spill] sm:$0xff] }
 0x202   : > { %3261 = vrot.lane.b32.xlu1 %v10525_v49, %s7396_s13  ;;  %v4734_v47 = vrot.slane %v4732_v36, 5  ;;  %v3636_v12 = vsel %vm3511_vm5, %v3594_v2, %v10530_v56  ;;  %v4696_v16 = vshll.u32 %v6609_v0, 16  ;;  %v4738_v18 = vshll.u32 %v6615_v41, 16  ;;  %5771 = vmatprep.mubr.bf16.mxu1 %v6696_v17  ;;  %v836_v41 = vld [vmem:[#allocation2 + $0xa4] sm:$0x3]  ;;  %v10533_v0 = vld [vmem:[#allocation70_spill] sm:$0xff] }
 0x203   : > { %v3486_v15 = vsel %vm437_vm2, %v10528_v14, %v8948_v28  ;;  %2175 = vrot.lane.b32.xlu0 %v8883_v58, %s7398_s15  ;;  %v3815_v21 = vsel %vm437_vm2, %v10531_v57, %v3040_v55  ;;  %v9145_v6 = vpop.permute.xlu1 %3045  ;;  %v3248_v28 = vpop.permute.xlu0 %3247  ;;  %v3640_v45 = vsel %vm3511_vm5, %v3600_v51, %v10532_v25  ;;  %v9151_v9 = vsel %vm3544_vm6, %v3636_v12, %v8908_v43  ;;  %v10535_v5 = vld [vmem:[#allocation27_spill] sm:$0xff]  ;;  %v10538_v17 = vld [vmem:[#allocation80_spill] sm:$0xff]  ;;  %v9191_v25 = vld [vmem:[#allocation2 + $0xb4] sm:$0x1] }
 0x204   : > { %v4735_v58 = vor.u32 %v4734_v47, %v4731_v10  ;;  %v3858_v4 = vsel %vm3511_vm5, %v3815_v21, %v3248_v28  ;;  %5772 = vmatmul.mubr.bf16.gmra.mrb[4].mxu1 %v6695_v27  ;;  %v3527_v55 = vsel %vm3511_vm5, %v3486_v15, %v10533_v0  ;;  %v4694_v24 = vrot.slane %v4693_v62, 4  ;;  %v10539_v27 = vld [vmem:[#allocation79_spill] sm:$0xff]  ;;  %v10542_v56 = vld [vmem:[#allocation28_spill] sm:$0xff] }
 0x205   : > { %v6623_v2 = vcombine.low %v9137_v13, %v9151_v9  ;;  %v3890_v36 = vsel %vm3544_vm6, %v3858_v4, %v10534_v23  ;;  %v10537_v43 = vcombine.low %v10535_v5, %v10536_v48  ;;  %v10540_v62 = vor.u32 %v10538_v17, %v10539_v27  ;;  %v10543_v12 = vld [vmem:[#allocation7_spill] sm:$0xff]  ;;  %v10546_v23 = vld [vmem:[#allocation44_spill] sm:$0xff] }
 0x206   : > { %v4736_v30 = vrot.slane %v4735_v58, 4  ;;  %v6618_v51 = vcombine.low %v9070_v59, %v3890_v36  ;;  %v6621_v49 = vcombine.high %v9070_v59, %v3890_v36  ;;  %v9171_v11 = vcombine.low %v948_v29, %v9106_v26  ;;  %v10544_v21 = vld [vmem:[#allocation71_spill] sm:$0xff]  ;;  %v9189_v29 = vld [vmem:[#allocation2 + $0xb0] sm:$0xf]  ;;  %v10548_v27 = vld [vmem:[#allocation68_spill] sm:$0xff] }
 0x207   : > { %1617 = vrot.lane.b32.xlu1 %v10537_v43, %s7398_s15  ;;  %2891 = vrot.lane.b32.xlu0 %v10540_v62, %s7398_s15  ;;  %v4698_v34 = vrot.slane %v4696_v16, 5  ;;  %v4740_v14 = vrot.slane %v4738_v18, 5  ;;  %v9173_v15 = vpop.permute.xlu1 %1977  ;;  %v2644_v39 = vpop.permute.xlu0 %2643  ;;  %v10541_v10 = vshrl.u32 %v8849_v53, 16  ;;  %v6368_v59 = vcombine.low %v10542_v56, %v836_v41  ;;  %v10550_v62 = vld [vmem:[#allocation63_spill] sm:$0xff] }
 0x208   : > { %v9183_v57 = vsel %vm3544_vm6, %v3640_v45, %v10543_v12  ;;  %v9187_v28 = vsel %vm3544_vm6, %v3527_v55, %v10544_v21  ;;  %v4771_v16 = vshrl.u32 %v6618_v51, 16  ;;  %v4774_v18 = vshll.u32 %v6618_v51, 16  ;;  %v10552_v12 = vld [vmem:[#allocation22_spill] sm:$0xff] }
 0x209   : > { %v9178_v47 = vor.u32 %v9087_v20, %v10541_v10  ;;  %v4799_v53 = vshrl.u32 %v6623_v2, 16  ;;  %v4802_v58 = vshll.u32 %v6623_v2, 16  ;;  %v10545_v20 = vld [vmem:[#allocation30_spill] sm:$0xff]  ;;  %v4699_v4 = vsel %vm8537_vm9, %v4694_v24, %v4698_v34  ;;  %v10547_v24 = vld [vmem:[#allocation37_spill] sm:$0xff] }
 0x20a   : > { %v4741_v45 = vsel %vm8537_vm9, %v4736_v30, %v4740_v14  ;;  %v4773_v41 = vrot.slane %v4771_v16, 4  ;;  %v4776_v0 = vrot.slane %v4774_v18, 5  ;;  %v4780_v55 = vshll.u32 %v6621_v49, 16  ;;  %v10549_v30 = vld [vmem:[#allocation60_spill] sm:$0xff] }
 0x20b   : > { %2177 = vrot.lane.b32.xlu1 %v10545_v20, %s7398_s15  ;;  %3451 = vrot.lane.b32.xlu0 %v10546_v23, %s7398_s15  ;;  %v6698_v36 = vcombine.high %v4699_v4, %v4741_v45  ;;  %v6635_v5 = vcombine.low %v9187_v28, %v9183_v57  ;;  %v3254_v2 = vpop.permute.xlu1 %3253  ;;  %v6697_v48 = vcombine.low %v4699_v4, %v4741_v45  ;;  %v2884_v43 = vpop.permute.xlu0 %2883  ;;  %v3208_v17 = vshrl.u32 %v10547_v24, 16  ;;  %v10553_v20 = vld [vmem:[#allocation62_spill] sm:$0xff] }
 0x20c   : > { %v6432_v51 = vcombine.low %v9189_v29, %v9191_v25  ;;  %v10551_v34 = vcombine.low %v10549_v30, %v10550_v62  ;;  %v4777_v14 = vor.u32 %v4776_v0, %v4773_v41  ;;  %v9211_v10 = vrot.slane %v6368_v59, 1  ;;  %v10560_v30 = vld [vmem:[#allocation20_spill] sm:$0xff]  ;;  %v10561_v62 = vld [vmem:[#allocation29_spill] sm:$0xff] }
 0x20d   : > { %5868 = vmatprep.mubr.bf16.mxu0 %v6698_v36  ;;  %v3211_v56 = vshll.u32 %v10547_v24, 16  ;;  %v3709_v21 = vsel %vm437_vm2, %v10552_v12, %v9038_v31  ;;  %v4801_v16 = vrot.slane %v4799_v53, 4  ;;  %v4804_v18 = vrot.slane %v4802_v58, 5 }
 0x20e   : > { %v3477_v49 = vsel %vm437_vm2, %v10551_v34, %v10548_v27  ;;  %v3821_v4 = vsel %vm437_vm2, %v10553_v20, %v9057_v35  ;;  %5869 = vmatmul.mubr.bf16.gmra.mrb[20].mxu0 %v6697_v48  ;;  %v10554_v45 = vor.u32 %v8918_v50, %v8916_v44  ;;  %v4782_v41 = vrot.slane %v4780_v55, 5  ;;  %v10555_v44 = vld [vmem:[#allocation64_spill] sm:$0xff]  ;;  %v10559_v27 = vld [vmem:[#allocation75_spill] sm:$0xff]  ;;  %v10562_v34 = vld [vmem:[#allocation25_spill] sm:$0xff] }
 0x20f   : > { %v3862_v59 = vsel %vm3511_vm5, %v3821_v4, %v9085_v61  ;;  %v3750_v0 = vsel %vm3511_vm5, %v3709_v21, %v2644_v39  ;;  %1411 = vrot.lane.b32.xlu0 %v8976_v33, %s7397_s14  ;;  %v4778_v31 = vrot.slane %v4777_v14, 4  ;;  %v4883_v53 = vshrl.u32 %v6635_v5, 16  ;;  %v3042_v36 = vpop.permute.xlu1 %3041  ;;  %v9232_v50 = vpop.permute.xlu0 %2163  ;;  %v10563_v4 = vld [vmem:[#allocation72_spill] sm:$0xff] }
 0x210   : > { %2893 = vrot.lane.b32.xlu1 %v10554_v45, %s7398_s15  ;;  %v4886_v58 = vshll.u32 %v6635_v5, 16  ;;  %v6626_v35 = vcombine.high %v9137_v13, %v9151_v9  ;;  %v3782_v23 = vsel %vm3544_vm6, %v3750_v0, %v2884_v43  ;;  %v3748_v61 = vsel %vm3511_vm5, %v8992_v37, %v10555_v44  ;;  %v10556_v5 = vld [vmem:[#allocation65_spill] sm:$0xff]  ;;  %v10557_v9 = vld [vmem:[#allocation23_spill] sm:$0xff]  ;;  %v10558_v43 = vld [vmem:[#allocation8_spill] sm:$0xff] }
 0x211   : > { %v9239_v39 = vsel %vm8537_vm9, %v4778_v31, %v4782_v41  ;;  %v9241_v33 = vrot.slane %v3208_v17, 1  ;;  %v9243_v55 = vrot.slane %v3211_v56, 2  ;;  %v3780_v13 = vsel %vm3544_vm6, %v3748_v61, %v10556_v5  ;;  %v10566_v0 = vld [vmem:[#allocation34_spill] sm:$0xff] }
 0x212   : > { %v3521_v48 = vsel %vm3511_vm5, %v3477_v49, %v10557_v9  ;;  %v3894_v24 = vsel %vm3544_vm6, %v3862_v59, %v10558_v43  ;;  %v4805_v37 = vor.u32 %v4804_v18, %v4801_v16  ;;  %v3597_v17 = vsel %vm437_vm2, %v10560_v30, %v10559_v27  ;;  %v10564_v59 = vld [vmem:[#allocation77_spill] sm:$0xff] }
 0x213   : > { %v3591_v14 = vsel %vm437_vm2, %v10562_v34, %v10561_v62  ;;  %v6638_v56 = vcombine.high %v9187_v28, %v9183_v57  ;;  %v6630_v12 = vcombine.low %v3782_v23, %v3894_v24  ;;  %1875 = vrot.lane.b32.xlu0 %v8971_v7, %s7397_s14  ;;  %v9263_v49 = vrot.slane %v4883_v53, 4  ;;  %v3250_v18 = vpop.permute.xlu1 %3249  ;;  %v9269_v20 = vpop.permute.xlu0 %1611  ;;  %v10565_v28 = vld [vmem:[#allocation78_spill] sm:$0xff]  ;;  %v10568_v27 = vld [vmem:[#allocation9_spill] sm:$0xff] }
 0x214   : > { %3453 = vrot.lane.b32.xlu1 %v8978_v22, %s7398_s15  ;;  %v9265_v21 = vrot.slane %v4886_v58, 5  ;;  %v4808_v22 = vshll.u32 %v6626_v35, 16  ;;  %v3818_v16 = vsel %vm437_vm2, %v8969_v38, %v3042_v36  ;;  %v3554_v45 = vsel %vm3544_vm6, %v3521_v48, %v10563_v4 }
 0x215   : > { %v3638_v57 = vsel %vm3511_vm5, %v3597_v17, %v10564_v59  ;;  %v3634_v7 = vsel %vm3511_vm5, %v3591_v14, %v10565_v28  ;;  %v3860_v41 = vsel %vm3511_vm5, %v3818_v16, %v3250_v18  ;;  %v3824_v31 = vsel %vm437_vm2, %v10566_v0, %v9145_v6 }
 0x216   : > { %v6633_v53 = vcombine.high %v3782_v23, %v3894_v24  ;;  %v3892_v38 = vsel %vm3544_vm6, %v3860_v41, %v8994_v19  ;;  %v4806_v58 = vrot.slane %v4805_v37, 4  ;;  %v3864_v35 = vsel %vm3511_vm5, %v3824_v31, %v3254_v2 }
 0x217   : > { %v4855_v36 = vshrl.u32 %v6630_v12, 16  ;;  %v6624_v44 = vcombine.low %v3780_v13, %v3892_v38  ;;  %v6627_v61 = vcombine.high %v3780_v13, %v3892_v38  ;;  %2431 = vrot.lane.b32.xlu0 %v9000_v46, %s7397_s14  ;;  %v9288_v5 = vshll.u32 %v6638_v56, 16  ;;  %v2646_v23 = vpop.permute.xlu1 %2645  ;;  %v2160_v48 = vpop.permute.xlu0 %2159  ;;  %v10570_v38 = vld [vmem:[#allocation31_spill] sm:$0xff] }
 0x218   : > { %1413 = vrot.lane.b32.xlu1 %v9010_v8, %s7397_s14  ;;  %v4810_v9 = vrot.slane %v4808_v22, 5  ;;  %v4858_v6 = vshll.u32 %v6630_v12, 16  ;;  %v4889_v19 = vor.u32 %v9265_v21, %v9263_v49  ;;  %v10567_v8 = vld [vmem:[#allocation21_spill] sm:$0xff]  ;;  %v9295_v13 = vshll.u32 %v6633_v53, 16  ;;  %v10569_v53 = vld [vmem:[#allocation16_spill] sm:$0xff] }
 0x219   : > { %v3712_v43 = vsel %vm437_vm2, %v10567_v8, %v9112_v40  ;;  %v4813_v2 = vshrl.u32 %v6624_v44, 16  ;;  %v4816_v24 = vshll.u32 %v6624_v44, 16  ;;  %v4822_v37 = vshll.u32 %v6627_v61, 16  ;;  %v10572_v44 = vld [vmem:[#allocation36_spill] sm:$0xff]  ;;  %v10577_v21 = vld [vmem:[#allocation41_spill] sm:$0xff] }
 0x21a   : > { %v3666_v46 = vsel %vm3544_vm6, %v3634_v7, %v2160_v48  ;;  %v3896_v30 = vsel %vm3544_vm6, %v3864_v35, %v10568_v27  ;;  %v9304_v17 = vsel %vm8537_vm9, %v4806_v58, %v4810_v9  ;;  %v4857_v62 = vrot.slane %v4855_v36, 4 }
 0x21b   : > { %v4815_v34 = vrot.slane %v4813_v2, 4  ;;  %v4818_v40 = vrot.slane %v4816_v24, 5  ;;  %v6617_v14 = vcombine.low %v3554_v45, %v3666_v46  ;;  %3055 = vrot.lane.b32.xlu0 %v9079_v60, %s7397_s14  ;;  %v4860_v56 = vrot.slane %v4858_v6, 5  ;;  %v1396_v18 = vpop.permute.xlu0 %1395 }
 0x21c   : > { %1877 = vrot.lane.b32.xlu1 %v9047_v52, %s7397_s14  ;;  %v4824_v12 = vrot.slane %v4822_v37, 5  ;;  %v3752_v22 = vsel %vm3511_vm5, %v3712_v43, %v2646_v23  ;;  %v6620_v16 = vcombine.high %v3554_v45, %v3666_v46  ;;  %v2886_v52 = vpop.permute.xlu1 %2885  ;;  %v10571_v58 = vcombine.low %v10569_v53, %v10570_v38  ;;  %v10573_v37 = vld [vmem:[#allocation18_spill] sm:$0xff] }
 0x21d   : > { %v4819_v4 = vor.u32 %v4818_v40, %v4815_v34  ;;  %v4757_v59 = vshrl.u32 %v6617_v14, 16  ;;  %v4760_v28 = vshll.u32 %v6617_v14, 16  ;;  %v3784_v7 = vsel %vm3544_vm6, %v3752_v22, %v2886_v52 }
 0x21e   : > { %v4766_v41 = vshll.u32 %v6620_v16, 16  ;;  %v6636_v0 = vcombine.low %v3784_v7, %v3896_v30  ;;  %v6639_v31 = vcombine.high %v3784_v7, %v3896_v30  ;;  %v3483_v35 = vsel %vm437_vm2, %v10571_v58, %v1396_v18  ;;  %v10576_v58 = vld [vmem:[#allocation49_spill] sm:$0xff] }
 0x21f   : > { %v4759_v36 = vrot.slane %v4757_v59, 4  ;;  %v4762_v45 = vrot.slane %v4760_v28, 5  ;;  %v3525_v61 = vsel %vm3511_vm5, %v3483_v35, %v10572_v44  ;;  %1507 = vrot.lane.b32.xlu0 %v9104_v54, %s7396_s13  ;;  %v4820_v9 = vrot.slane %v4819_v4, 4  ;;  %v9324_v2 = vpop.permute.xlu0 %1607 }
 0x220   : > { %2433 = vrot.lane.b32.xlu1 %v9054_v63, %s7397_s14  ;;  %v4861_v6 = vor.u32 %v4860_v56, %v4857_v62  ;;  %v3670_v23 = vsel %vm3544_vm6, %v3638_v57, %v9232_v50  ;;  %v4897_v48 = vshrl.u32 %v6636_v0, 16  ;;  %v4900_v8 = vshll.u32 %v6636_v0, 16  ;;  %v9322_v43 = vpop.permute.xlu1 %1501  ;;  %v949_v0 = vld [vmem:[#allocation2 + $0xb0] sm:$0xe] }
 0x221   : > { %v4763_v63 = vor.u32 %v4762_v45, %v4759_v36  ;;  %v4906_v24 = vshll.u32 %v6639_v31, 16  ;;  %v3558_v46 = vsel %vm3544_vm6, %v3525_v61, %v10573_v37  ;;  %v4825_v27 = vsel %vm8537_vm9, %v4820_v9, %v4824_v12  ;;  %v10574_v31 = vld [vmem:[#allocation17_spill] sm:$0xff] }
 0x222   : > { %v4768_v54 = vrot.slane %v4766_v41, 5  ;;  %v4899_v30 = vrot.slane %v4897_v48, 4  ;;  %v4902_v62 = vrot.slane %v4900_v8, 5  ;;  %v6629_v34 = vcombine.low %v3558_v46, %v3670_v23  ;;  %v7269_v41 = vld [vmem:[#allocation2 + $0x80] sm:$0x3c]  }
 0x223   : > { %v4764_v50 = vrot.slane %v4763_v63, 4  ;;  %v6632_v57 = vcombine.high %v3558_v46, %v3670_v23  ;;  %1987 = vrot.lane.b32.xlu0 %v6431_v32, %s7396_s13  ;;  %v6703_v40 = vcombine.high %v9239_v39, %v4825_v27  ;;  %v6702_v14 = vcombine.low %v9239_v39, %v4825_v27  ;;  %v9340_v18 = vpop.permute.xlu0 %1867 }
 0x224   : > { %3057 = vrot.lane.b32.xlu1 %v9178_v47, %s7397_s14  ;;  %v4862_v56 = vrot.slane %v4861_v6, 4  ;;  %v4903_v12 = vor.u32 %v4902_v62, %v4899_v30  ;;  %v4841_v22 = vshrl.u32 %v6629_v34, 16  ;;  %v4844_v16 = vshll.u32 %v6629_v34, 16  ;;  %v9338_v52 = vpop.permute.xlu1 %1613  ;;  %v866_v62 = vld [vmem:[#allocation2 + $0xa4] sm:$0x1] }
 0x225   : > { %v4866_v4 = vrot.slane %v9295_v13, 5  ;;  %v4908_v59 = vrot.slane %v4906_v24, 5  ;;  %v4850_v28 = vshll.u32 %v6632_v57, 16  ;;  %5876 = vmatprep.mubr.bf16.mxu0 %v6703_v40  ;;  %v4769_v42 = vsel %vm8537_vm9, %v4764_v50, %v4768_v54 }
 0x226   : > { %v4904_v26 = vrot.slane %v4903_v12, 4  ;;  %v4843_v32 = vrot.slane %v4841_v22, 4  ;;  %v4846_v7 = vrot.slane %v4844_v16, 5  ;;  %5877 = vmatmul.mubr.bf16.gmra.mrb[24].mxu0 %v6702_v14  ;;  %v6701_v39 = vcombine.high %v4769_v42, %v9304_v17  ;;  %v9395_v12 = vld [vmem:[#allocation2 + $0xa0] ss:$0 sps:$4 sm:$0xff]  }
 0x227   : > { %2655 = vrot.lane.b32.xlu0 %v9062_v3, %s7396_s13  ;;  %v6700_v13 = vcombine.low %v4769_v42, %v9304_v17  ;;  %v10575_v53 = vshll.u32 %v10574_v31, 16  ;;  %v3216_v35 = vshrl.u32 %v10576_v58, 16  ;;  %v3219_v36 = vshll.u32 %v10576_v58, 16  ;;  %v7352_v22 = vld [vmem:[#allocation2 + $0x70] sm:$0xf] }
 0x228   : > { %1509 = vrot.lane.b32.xlu1 %v9211_v10, %s7396_s13  ;;  %5779 = vmatprep.mubr.bf16.mxu1 %v6701_v39  ;;  %v9355_v45 = vpop.permute.xlu1 %1497  ;;  %v9357_v10 = vpop.permute.xlu0 %1979  ;;  %v4867_v44 = vsel %vm8537_vm9, %v4862_v56, %v4866_v4  ;;  %v4909_v3 = vsel %vm8537_vm9, %v4904_v26, %v4908_v59  ;;  %v4847_v17 = vor.u32 %v4846_v7, %v4843_v32  ;;  %v4890_v61 = vrot.slane %v4889_v19, 4  ;;  %v10578_v19 = vld [vmem:[#allocation42_spill] sm:$0xff]  ;;  %v7271_v26 = vld [vmem:[#allocation2 + $0x88] sm:$0x3c]   ;;  %v10585_v7 = vld [vmem:[#allocation35_spill] sm:$0xff] }
 0x229   : > { %v2615_v38 = vrot.slane %v10575_v53, 1  ;;  %5780 = vmatmul.mubr.bf16.gmra.mrb[8].mxu1 %v6700_v13  ;;  %v3214_v9 = vor.u32 %v9243_v55, %v9241_v33  ;;  %v6708_v6 = vcombine.high %v4867_v44, %v4909_v3  ;;  %v6707_v23 = vcombine.low %v4867_v44, %v4909_v3  ;;  %v10582_v59 = vld [vmem:[#allocation10_spill] sm:$0xff]  ;;  %v10584_v32 = vld [vmem:[#allocation32_spill] sm:$0xff] }
 0x22a   : > { %v2140_v48 = vshll.u32 %v9171_v11, 16  ;;  %v4894_v8 = vrot.slane %v9288_v5, 5  ;;  %v4852_v63 = vrot.slane %v4850_v28, 5  ;;  %v9371_v24 = vcombine.low %v949_v0, %v9191_v25  ;;  %v10587_v13 = vld [vmem:[#allocation12_spill] sm:$0xff]  ;;  %v10588_v0 = vld [vmem:[#allocation50_spill] sm:$0xff] }
 0x22b   : > { %v4848_v49 = vrot.slane %v4847_v17, 4  ;;  %v10579_v37 = vcombine.low %v10577_v21, %v10578_v19  ;;  %3263 = vrot.lane.b32.xlu0 %v3214_v9, %s7396_s13  ;;  %5884 = vmatprep.mubr.bf16.mxu0 %v6708_v6  ;;  %v10580_v55 = vshrl.u32 %v10574_v31, 16  ;;  %v2840_v46 = vshrl.u32 %v7269_v41, 16  ;;  %v9420_v6 = vld [vmem:[#allocation2 + $0xa8] sm:$0xf] }
 0x22c   : > { %1989 = vrot.lane.b32.xlu1 %v6432_v51, %s7396_s13  ;;  %v2843_v27 = vshll.u32 %v7269_v41, 16  ;;  %v9383_v54 = vpop.permute.xlu1 %1609  ;;  %v9385_v30 = vpop.permute.xlu0 %1863  ;;  %v4895_v25 = vsel %vm8537_vm9, %v4890_v61, %v4894_v8  ;;  %v9391_v51 = vld [vmem:[#allocation2 + $0xa0] sm:$0xf]  ;;  %v3218_v34 = vrot.slane %v3216_v35, 1  ;;  %v3221_v50 = vrot.slane %v3219_v36, 2  ;;  %10590 = vst [vmem:[#allocation40_spill] sm:$0xff] %v9420_v6 }
 0x22d   : > { %v2239_v33 = vrot.slane %v10579_v37, 1  ;;  %v2616_v5 = vor.u32 %v2615_v38, %v10580_v55  ;;  %v4853_v29 = vsel %vm8537_vm9, %v4848_v49, %v4852_v63  ;;  %10581 = vst [vmem:[#allocation39_spill] sm:$0xff] %v9391_v51  ;;  %v6383_v40 = vcombine.low %v9391_v51, %v866_v62  ;;  %v1060_v35 = vld [vmem:[#allocation2 + $0xa0] sm:$0xc]  ;;  %v7353_v63 = vld [vmem:[#allocation2 + $0x78] sm:$0xf] }
 0x22e   : > { %v6706_v57 = vcombine.high %v4853_v29, %v4895_v25  ;;  %v2138_v14 = vshrl.u32 %v9171_v11, 16  ;;  %v2142_v56 = vrot.slane %v2140_v48, 1  ;;  %v9397_v16 = vcombine.low %v7352_v22, %v7352_v22  ;;  %5885 = vmatmul.mubr.bf16.gmra.mrb[28].mxu0 %v6707_v23  ;;  %v10583_v11 = vld [vmem:[#allocation5_spill] sm:$0xff]  ;;  %v10589_v61 = vld [vmem:[#allocation11_spill] sm:$0xff]  ;;  %v868_v21 = vld [vmem:[#allocation2 + $0xac] sm:$0x1] }
 0x22f   : > { %v2147_v4 = vshll.u32 %v9371_v24, 16  ;;  %v3715_v28 = vsel %vm437_vm2, %v2239_v33, %v10582_v59  ;;  %1619 = vrot.lane.b32.xlu0 %v6383_v40, %s7398_s15  ;;  %v6705_v42 = vcombine.low %v4853_v29, %v4895_v25  ;;  %v10586_v39 = vcombine.low %v10584_v32, %v10585_v7  ;;  %v9427_v33 = vld [vmem:[#allocation2 + $0xa8] ss:$0 sps:$4 sm:$0xff]   ;;  %v10591_v55 = vld [vmem:[#allocation6_spill] sm:$0xff]  ;;  %v10593_v29 = vld [vmem:[#allocation33_spill] sm:$0xff] }
 0x230   : > { %2657 = vrot.lane.b32.xlu1 %v2616_v5, %s7396_s13  ;;  %5787 = vmatprep.mubr.bf16.mxu1 %v6706_v57  ;;  %v3756_v31 = vsel %vm3511_vm5, %v10588_v0, %v10587_v13  ;;  %v9412_v53 = vpop.permute.xlu1 %1869  ;;  %v9414_v38 = vpop.permute.xlu0 %1975  ;;  %v3222_v58 = vor.u32 %v3221_v50, %v3218_v34  ;;  %v2143_v36 = vor.u32 %v2142_v56, %v2138_v14  ;;  %v2842_v44 = vrot.slane %v2840_v46, 1  ;;  %v10592_v46 = vld [vmem:[#allocation14_spill] sm:$0xff]  ;;  %v9445_v40 = vld [vmem:[#allocation2 + $0x80] sm:$0xf]  ;;  %v9447_v14 = vld [vmem:[#allocation2 + $0x90] ss:$0 sps:$4 sm:$0xff]  }
 0x231   : > { %v3489_v41 = vsel %vm437_vm2, %v10586_v39, %v10583_v11  ;;  %5788 = vmatmul.mubr.bf16.gmra.mrb[12].mxu1 %v6705_v42  ;;  %v2845_v3 = vrot.slane %v2843_v27, 2  ;;  %v3404_v17 = vshrl.u32 %v9395_v12, 16  ;;  %v3754_v9 = vsel %vm3511_vm5, %v3715_v28, %v10589_v61  ;;  %v1061_v27 = vld [vmem:[#allocation2 + $0xa8] sm:$0xc]  ;;  %v10594_v56 = vld [vmem:[#allocation13_spill] sm:$0xff] }
 0x232   : > { %v2145_v23 = vshrl.u32 %v9371_v24, 16  ;;  %v2149_v48 = vrot.slane %v2147_v4, 1  ;;  %v2976_v8 = vshrl.u32 %v9397_v16, 16  ;;  %v9424_v49 = vcombine.low %v7353_v63, %v7353_v63  ;;  %v9454_v42 = vld [vmem:[#allocation2 + $0x98] ss:$0 sps:$4 sm:$0xff]  }
 0x233   : > { %2179 = vrot.lane.b32.xlu0 %v2143_v36, %s7398_s15  ;;  %v2848_v19 = vshrl.u32 %v7271_v26, 16  ;;  %v2851_v37 = vshll.u32 %v7271_v26, 16  ;;  %v9431_v5 = vsel %vm3511_vm5, %v3489_v41, %v10591_v55  ;;  %v9435_v24 = vsel %vm3544_vm6, %v3756_v31, %v10592_v46  ;;  %v10595_v26 = vld [vmem:[#allocation45_spill] sm:$0xff]  ;;  %v10596_v36 = vld [vmem:[#allocation15_spill] sm:$0xff]  ;;  %v9491_v55 = vld [vmem:[#allocation2 + $0x48] sm:$0x3c]  }
 0x234   : > { %3265 = vrot.lane.b32.xlu1 %v3222_v58, %s7396_s13  ;;  %v9438_v25 = vcombine.low %v10593_v29, %v866_v62  ;;  %v9440_v34 = vpop.permute.xlu1 %1865  ;;  %v9442_v50 = vpop.permute.xlu0 %3447  ;;  %v6384_v57 = vcombine.low %v9420_v6, %v868_v21  ;;  %v9451_v22 = vsel %vm3544_vm6, %v3754_v9, %v10594_v56  ;;  %v2846_v4 = vor.u32 %v2845_v3, %v2842_v44  ;;  %v7272_v62 = vld [vmem:[#allocation2 + $0x40] sm:$0x3c]   ;;  %v9461_v41 = vld [vmem:[#allocation2 + $0x70] sm:$0xf]  ;;  %v9497_v56 = vld [vmem:[#allocation2 + $0x78] sm:$0xf] }
 0x235   : > { %v3406_v59 = vrot.slane %v3404_v17, 7  ;;  %v3407_v28 = vshll.u32 %v9395_v12, 16  ;;  %v9457_v11 = vcombine.low %v1060_v35, %v10595_v26  ;;  %v2150_v32 = vor.u32 %v2149_v48, %v2145_v23  ;;  %v9463_v13 = vld [vmem:[#allocation2 + $0x90] sm:$0x1e]   ;;  %v7305_v35 = vld [vmem:[%s10293_s3 + $0x100] sm:$0xff]   ;;  %v10597_v48 = vld [vmem:[#allocation52_spill] sm:$0xff] }
 0x236   : > { %v2978_v7 = vrot.slane %v2976_v8, 7  ;;  %v2979_v39 = vshll.u32 %v9397_v16, 16  ;;  %v2850_v0 = vrot.slane %v2848_v19, 1  ;;  %v2853_v12 = vrot.slane %v2851_v37, 2  ;;  %v9478_v17 = vld [vmem:[#allocation2 + $0x84] sm:$0x1]  ;;  %6990 = vmatprep.subr.bf16.mxu1 %v7305_v35  ;;  %6966 = vmatprep.subr.bf16.mxu0 %v7305_v35 }
 0x237   : > { %2895 = vrot.lane.b32.xlu0 %v2846_v4, %s7398_s15  ;;  %v3411_v31 = vshrl.u32 %v9427_v33, 16  ;;  %v2983_v58 = vshrl.u32 %v9424_v49, 16  ;;  %v9472_v44 = vcombine.low %v1061_v27, %v10596_v36  ;;  %v2394_v9 = vshrl.u32 %v9447_v14, 16  ;;  %v9487_v19 = vld [vmem:[#allocation2 + $0x74] sm:$0x1]  ;;  %6994 = vmatpush3.bf16.msra.mxu1 %v7305_v35 }
 0x238   : > { %1621 = vrot.lane.b32.xlu1 %v6384_v57, %s7398_s15  ;;  %v9474_v16 = vpop.permute.xlu1 %2169  ;;  %v9476_v3 = vpop.permute.xlu0 %1499  ;;  %v1772_v23 = vshll.u32 %v9438_v25, 16  ;;  %v9485_v8 = vcombine.low %v10597_v48, %v868_v21  ;;  %v3409_v63 = vor.u32 %v3407_v28, %v3406_v59  ;;  %v2401_v46 = vshrl.u32 %v9454_v42, 16  ;;  %v7274_v26 = vld [vmem:[#allocation2 + $0x50] sm:$0x3c]   ;;  %6967 = vmatpush3.bf16.msra.mxu0 %v7305_v35  ;;  %v9512_v35 = vld [vmem:[#allocation2 + $0x7c] sm:$0x1] }
 0x239   : > { %v2981_v27 = vor.u32 %v2979_v39, %v2978_v7  ;;  %v4077_v29 = vrot.slane %v7272_v62, 1  ;;  %v2986_v57 = vshll.u32 %v9424_v49, 16  ;;  %v2620_v21 = vshll.u32 %v9463_v13, 16  ;;  %v9504_v7 = vld [vmem:[#allocation2 + $0x58] sm:$0x3c]  }
 0x23a   : > { %v2854_v4 = vor.u32 %v2853_v12, %v2850_v0  ;;  %v3413_v59 = vrot.slane %v3411_v31, 7  ;;  %v3414_v28 = vshll.u32 %v9427_v33, 16  ;;  %v2985_v36 = vrot.slane %v2983_v58, 7  ;;  %v7284_v51 = vld [vmem:[#allocation2 + $0x90] sm:$0x3c]  }
 0x23b   : > { %3455 = vrot.lane.b32.xlu0 %v3409_v63, %s7398_s15  ;;  %v2396_v62 = vrot.slane %v2394_v9, 7  ;;  %v2397_v49 = vshll.u32 %v9447_v14, 16  ;;  %v1770_v39 = vshrl.u32 %v9438_v25, 16  ;;  %v1774_v61 = vrot.slane %v1772_v23, 1 }
 0x23c   : > { %2181 = vrot.lane.b32.xlu1 %v2150_v32, %s7398_s15  ;;  %v9501_v48 = vpop.permute.xlu1 %1405  ;;  %v3048_v32 = vpop.permute.xlu0 %3047  ;;  %v4078_v63 = vrot.slane %v9491_v55, 1  ;;  %v2403_v0 = vrot.slane %v2401_v46, 7  ;;  %v2404_v12 = vshll.u32 %v9454_v42, 16  ;;  %v1779_v33 = vshll.u32 %v9485_v8, 16  ;;  %v9521_v46 = vld [vmem:[#allocation2 + $0x98] sm:$0x1e]  }
 0x23d   : > { %v2618_v31 = vshrl.u32 %v9463_v13, 16  ;;  %v2622_v58 = vrot.slane %v2620_v21, 1  ;;  %v3224_v25 = vshrl.u32 %v9457_v11, 16  ;;  %v3416_v9 = vor.u32 %v3414_v28, %v3413_v59  ;;  %v10598_v28 = vld [vmem:[#allocation69_spill] sm:$0xff] }
 0x23e   : > { %v4079_v23 = vrot.slane %v7274_v26, 1  ;;  %v9518_v55 = vor.u32 %v2986_v57, %v2985_v36  ;;  %v3227_v42 = vshll.u32 %v9457_v11, 16  ;;  %v3827_v13 = vsel %vm437_vm2, %v2981_v27, %v3048_v32  ;;  %v9543_v32 = vld [vmem:[#allocation2 + $0xb0] ss:$0 sps:$4 sm:$0xff]  }
 0x23f   : > { %4097 = vrot.lane.b32.xlu0 %v4077_v29, %s7397_s14  ;;  %v2399_v37 = vor.u32 %v2397_v49, %v2396_v62  ;;  %v4080_v14 = vrot.slane %v9504_v7, 1  ;;  %v9527_v6 = vor.u32 %v1774_v61, %v1770_v39  ;;  %v9530_v59 = vor.u32 %v2404_v12, %v2403_v0 }
 0x240   : > { %2897 = vrot.lane.b32.xlu1 %v2854_v4, %s7398_s15  ;;  %v9524_v21 = vpop.permute.xlu1 %3449  ;;  %v3256_v4 = vpop.permute.xlu0 %3255  ;;  %v1777_v57 = vshrl.u32 %v9485_v8, 16  ;;  %v1781_v11 = vrot.slane %v1779_v33, 1  ;;  %v3606_v27 = vsel %vm437_vm2, %v10598_v28, %v9440_v34  ;;  %v9539_v36 = vor.u32 %v2622_v58, %v2618_v31 }
 0x241   : > { %v3866_v29 = vsel %vm3511_vm5, %v3827_v13, %v3256_v4  ;;  %v9541_v61 = vrot.slane %v3224_v25, 1  ;;  %v9548_v49 = vrot.slane %v3227_v42, 2  ;;  %v2627_v34 = vshll.u32 %v9521_v46, 16 }
 0x242   : > { %v3898_v26 = vsel %vm3544_vm6, %v3866_v29, %v9442_v50  ;;  %v2856_v39 = vshrl.u32 %v7284_v51, 16  ;;  %v2859_v0 = vshll.u32 %v7284_v51, 16  ;;  %v3232_v12 = vshrl.u32 %v9472_v44, 16 }
 0x243   : > { %v6642_v62 = vcombine.low %v9451_v22, %v3898_v26  ;;  %v6645_v8 = vcombine.high %v9451_v22, %v3898_v26  ;;  %4101 = vrot.lane.b32.xlu0 %v4079_v23, %s7397_s14  ;;  %v3235_v33 = vshll.u32 %v9472_v44, 16  ;;  %v3644_v31 = vsel %vm3511_vm5, %v3606_v27, %v9173_v15  ;;  %v7286_v23 = vld [vmem:[#allocation2 + $0x98] sm:$0x3c]  }
 0x244   : > { %3457 = vrot.lane.b32.xlu1 %v3416_v9, %s7398_s15  ;;  %v1402_v7 = vpop.permute.xlu1 %1401  ;;  %v9551_v50 = vpop.permute.xlu0 %2171  ;;  %v10599_v25 = vcombine.low %v9461_v41, %v9487_v19  ;;  %v9563_v42 = vsel %vm3544_vm6, %v3644_v31, %v9474_v16  ;;  %v2625_v44 = vshrl.u32 %v9521_v46, 16  ;;  %v3418_v15 = vshrl.u32 %v9543_v32, 16 }
 0x245   : > { %v4939_v58 = vshrl.u32 %v6642_v62, 16  ;;  %v4942_v22 = vshll.u32 %v6642_v62, 16  ;;  %v4948_v29 = vshll.u32 %v6645_v8, 16  ;;  %v9577_v28 = vrot.slane %v2856_v39, 1 }
 0x246   : > { %v3492_v9 = vsel %vm437_vm2, %v10599_v25, %v1402_v7  ;;  %v9583_v26 = vrot.slane %v3232_v12, 1  ;;  %v9585_v62 = vrot.slane %v3235_v33, 2  ;;  %v2867_v31 = vshll.u32 %v7286_v23, 16  ;;  %v10600_v12 = vld [vmem:[#allocation66_spill] sm:$0xff] }
 0x247   : > { %v3531_v51 = vsel %vm3511_vm5, %v3492_v9, %v9355_v45  ;;  %v4941_v13 = vrot.slane %v4939_v58, 4  ;;  %v4944_v4 = vrot.slane %v4942_v22, 5  ;;  %2435 = vrot.lane.b32.xlu0 %v2399_v37, %s7397_s14  ;;  %v2629_v45 = vrot.slane %v2627_v34, 1 }
 0x248   : > { %4099 = vrot.lane.b32.xlu1 %v4078_v63, %s7397_s14  ;;  %v9572_v41 = vsel %vm3544_vm6, %v3531_v51, %v9383_v54  ;;  %v3050_v19 = vpop.permute.xlu1 %3049  ;;  %v9579_v63 = vrot.slane %v2859_v0, 2  ;;  %v9581_v27 = vpop.permute.xlu0 %1407  ;;  %v2864_v54 = vshrl.u32 %v7286_v23, 16  ;;  %v9588_v37 = vor.u32 %v1781_v11, %v1777_v57 }
 0x249   : > { %v6647_v16 = vcombine.low %v9572_v41, %v9563_v42  ;;  %v4945_v46 = vor.u32 %v4944_v4, %v4941_v13  ;;  %v3421_v34 = vshll.u32 %v9543_v32, 16  ;;  %v4950_v39 = vrot.slane %v4948_v29, 5  ;;  %v9602_v32 = vld [vmem:[#allocation2 + $0xb8] ss:$0 sps:$4 sm:$0xff]  }
 0x24a   : > { %v3420_v0 = vrot.slane %v3418_v15, 7  ;;  %v3603_v33 = vsel %vm437_vm2, %v10600_v12, %v9385_v30  ;;  %v2630_v57 = vor.u32 %v2629_v45, %v2625_v44  ;;  %v2862_v11 = vor.u32 %v9579_v63, %v9577_v28  ;;  %v10601_v28 = vld [vmem:[#allocation73_spill] sm:$0xff] }
 0x24b   : > { %v4967_v8 = vshrl.u32 %v6647_v16, 16  ;;  %v4970_v7 = vshll.u32 %v6647_v16, 16  ;;  %3059 = vrot.lane.b32.xlu0 %v9527_v6, %s7397_s14  ;;  %v4946_v58 = vrot.slane %v4945_v46, 4  ;;  %v3642_v25 = vsel %vm3511_vm5, %v3603_v33, %v9414_v38  ;;  %v7313_v12 = vld [vmem:[%s10293_s3 + $0x110] sm:$0xff]  }
 0x24c   : > { %4103 = vrot.lane.b32.xlu1 %v4080_v14, %s7397_s14  ;;  %v9596_v22 = vpop.permute.xlu1 %1981  ;;  %v3230_v14 = vor.u32 %v9548_v49, %v9541_v61  ;;  %v2168_v9 = vpop.permute.xlu0 %2167  ;;  %v3238_v23 = vor.u32 %v9585_v62, %v9583_v26  ;;  %v9608_v51 = vrot.slane %v2864_v54, 1  ;;  %v3562_v61 = vsel %vm3544_vm6, %v9431_v5, %v9324_v2 }
 0x24d   : > { %v9612_v30 = vsel %vm8537_vm9, %v4946_v58, %v4950_v39  ;;  %v4969_v49 = vrot.slane %v4967_v8, 4  ;;  %v4972_v44 = vrot.slane %v4970_v7, 5  ;;  %v3674_v15 = vsel %vm3544_vm6, %v3642_v25, %v2168_v9 }
 0x24e   : > { %v6641_v38 = vcombine.low %v3562_v61, %v3674_v15  ;;  %v6644_v13 = vcombine.high %v3562_v61, %v3674_v15  ;;  %v9622_v4 = vor.u32 %v3421_v34, %v3420_v0  ;;  %v9624_v29 = vrot.slane %v2867_v31, 2 }
 0x24f   : > { %2659 = vrot.lane.b32.xlu0 %v9539_v36, %s7396_s13  ;;  %v6650_v16 = vcombine.high %v9572_v41, %v9563_v42  ;;  %v3830_v2 = vsel %vm437_vm2, %v9518_v55, %v3050_v19  ;;  %v3425_v45 = vshrl.u32 %v9602_v32, 16  ;;  %v3609_v63 = vsel %vm437_vm2, %v10601_v28, %v9340_v18 }
 0x250   : > { %2437 = vrot.lane.b32.xlu1 %v9530_v59, %s7397_s14  ;;  %v3258_v5 = vpop.permute.xlu1 %3257  ;;  %v3428_v59 = vshll.u32 %v9602_v32, 16  ;;  %v4925_v36 = vshrl.u32 %v6641_v38, 16  ;;  %v4928_v46 = vshll.u32 %v6641_v38, 16  ;;  %v1404_v8 = vpop.permute.xlu0 %1403  ;;  %v4934_v7 = vshll.u32 %v6644_v13, 16 }
 0x251   : > { %v3868_v54 = vsel %vm3511_vm5, %v3830_v2, %v3258_v5  ;;  %v10602_v55 = vcombine.low %v9497_v56, %v9512_v35  ;;  %v4973_v19 = vor.u32 %v4972_v44, %v4969_v49  ;;  %v3646_v18 = vsel %vm3511_vm5, %v3609_v63, %v9357_v10 }
 0x252   : > { %v3900_v42 = vsel %vm3544_vm6, %v3868_v54, %v9524_v21  ;;  %v4927_v34 = vrot.slane %v4925_v36, 4  ;;  %v4930_v39 = vrot.slane %v4928_v46, 5  ;;  %v7312_v21 = vld [vmem:[%s10293_s3 + $0x108] sm:$0xff]   ;;  %v4976_v56 = vshll.u32 %v6650_v16, 16  ;;  %v7287_v36 = vld [vmem:[#allocation2 + $0x20] sm:$0x3c]  }
 0x253   : > { %v3495_v41 = vsel %vm437_vm2, %v10602_v55, %v1404_v8  ;;  %v6648_v0 = vcombine.low %v9435_v24, %v3900_v42  ;;  %3267 = vrot.lane.b32.xlu0 %v3230_v14, %s7396_s13  ;;  %v9653_v35 = vsel %vm3544_vm6, %v3646_v18, %v9551_v50  ;;  %v6651_v31 = vcombine.high %v9435_v24, %v3900_v42  ;;  %v10604_v46 = vld [vmem:[#allocation58_spill] sm:$0xff] }
 0x254   : > { %3061 = vrot.lane.b32.xlu1 %v9588_v37, %s7397_s14  ;;  %v3533_v10 = vsel %vm3511_vm5, %v3495_v41, %v9476_v3  ;;  %v9658_v58 = vpop.permute.xlu1 %2429  ;;  %v4931_v33 = vor.u32 %v4930_v39, %v4927_v34  ;;  %v9667_v50 = vpop.permute.xlu0 %1871  ;;  %6991 = vmatprep.subr.bf16.mxu1 %v7312_v21  ;;  %v10603_v24 = vcombine.low %v9445_v40, %v9478_v17  ;;  %v4936_v61 = vrot.slane %v4934_v7, 5  ;;  %v7314_v40 = vld [vmem:[%s10293_s3 + $0x118] sm:$0xff]  }
 0x255   : > { %v4981_v14 = vshrl.u32 %v6648_v0, 16  ;;  %v4984_v25 = vshll.u32 %v6648_v0, 16  ;;  %v9665_v9 = vsel %vm3544_vm6, %v3533_v10, %v9269_v20  ;;  %6968 = vmatprep.subr.bf16.mxu0 %v7312_v21  ;;  %v4974_v44 = vrot.slane %v4973_v19, 4  ;;  %6995 = vmatpush3.bf16.msra.mxu1 %v7312_v21 }
 0x256   : > { %v3498_v3 = vsel %vm437_vm2, %v10603_v24, %v9501_v48  ;;  %v6653_v49 = vcombine.low %v9665_v9, %v9653_v35  ;;  %v4932_v20 = vrot.slane %v4931_v33, 4  ;;  %v4990_v13 = vshll.u32 %v6651_v31, 16  ;;  %6969 = vmatpush3.bf16.msra.mxu0 %v7312_v21  ;;  %6992 = vmatprep.subr.bf16.mxu1 %v7313_v12  ;;  %v7291_v31 = vld [vmem:[#allocation2 + $0x28] sm:$0x3c]   ;;  %v7292_v33 = vld [vmem:[#allocation2 + $0x30] sm:$0x3c]  }
 0x257   : > { %v4983_v15 = vrot.slane %v4981_v14, 4  ;;  %v4986_v38 = vrot.slane %v4984_v25, 5  ;;  %2899 = vrot.lane.b32.xlu0 %v2862_v11, %s7398_s15  ;;  %v4978_v17 = vrot.slane %v4976_v56, 5  ;;  %v3427_v5 = vrot.slane %v3425_v45, 7  ;;  %6970 = vmatprep.subr.bf16.mxu0 %v7313_v12 }
 0x258   : > { %2661 = vrot.lane.b32.xlu1 %v2630_v57, %s7396_s13  ;;  %v5009_v48 = vshrl.u32 %v6653_v49, 16  ;;  %v5012_v16 = vshll.u32 %v6653_v49, 16  ;;  %v9681_v2 = vpop.permute.xlu1 %1873  ;;  %v9683_v28 = vpop.permute.xlu0 %2427  ;;  %v4937_v63 = vsel %vm8537_vm9, %v4932_v20, %v4936_v61  ;;  %v2870_v11 = vor.u32 %v9624_v29, %v9608_v51  ;;  %v7293_v49 = vld [vmem:[#allocation2 + $0x88] sm:$0x3c]  }
 0x259   : > { %v4987_v57 = vor.u32 %v4986_v38, %v4983_v15  ;;  %v3612_v54 = vsel %vm437_vm2, %v10604_v46, %v9412_v53  ;;  %v3535_v8 = vsel %vm3511_vm5, %v3498_v3, %v9322_v43  ;;  %v4979_v45 = vsel %vm8537_vm9, %v4974_v44, %v4978_v17  ;;  %6996 = vmatpush3.bf16.msra.mxu1 %v7313_v12  ;;  %v7294_v38 = vld [vmem:[#allocation2 + $0x90] sm:$0x3c]  }
 0x25a   : > { %v4992_v7 = vrot.slane %v4990_v13, 5  ;;  %v6711_v51 = vcombine.high %v4937_v63, %v4979_v45  ;;  %v6710_v29 = vcombine.low %v4937_v63, %v4979_v45  ;;  %6993 = vmatprep.subr.bf16.mxu1 %v7314_v40  ;;  %v3648_v43 = vsel %vm3511_vm5, %v3612_v54, %v9596_v22  ;;  %6971 = vmatpush3.bf16.msra.mxu0 %v7313_v12  ;;  %v7290_v22 = vld [vmem:[#allocation2 + $0x80] sm:$0x3c]   ;;  %v7295_v63 = vld [vmem:[#allocation2 + $0x38] sm:$0x3c]  }
 0x25b   : > { %3459 = vrot.lane.b32.xlu0 %v9622_v4, %s7398_s15  ;;  %v4988_v42 = vrot.slane %v4987_v57, 4  ;;  %v5011_v53 = vrot.slane %v5009_v48, 4  ;;  %v5014_v55 = vrot.slane %v5012_v16, 5  ;;  %v3430_v26 = vor.u32 %v3428_v59, %v3427_v5  ;;  %6972 = vmatprep.subr.bf16.mxu0 %v7314_v40  ;;  %v7298_v45 = vld [vmem:[#allocation2 + $0xb0] sm:$0x3c]  }
 0x25c   : > { %3269 = vrot.lane.b32.xlu1 %v3238_v23, %s7396_s13  ;;  %v2174_v41 = vpop.permute.xlu1 %2173  ;;  %5795 = vmatprep.mubr.bf16.mxu1 %v6711_v51  ;;  %v3568_v62 = vsel %vm3544_vm6, %v3535_v8, %v9338_v52  ;;  %v9709_v4 = vpop.permute.xlu0 %3051  ;;  %v4073_v19 = vrot.slane %v7287_v36, 1  ;;  %v6656_v34 = vcombine.high %v9665_v9, %v9653_v35  ;;  %v4081_v12 = vrot.slane %v7290_v22, 1  ;;  %v7296_v8 = vld [vmem:[#allocation2 + $0xa0] sm:$0x3c]  }
 0x25d   : > { %v3680_v23 = vsel %vm3544_vm6, %v3648_v43, %v2174_v41  ;;  %v4993_v18 = vsel %vm8537_vm9, %v4988_v42, %v4992_v7  ;;  %5796 = vmatmul.mubr.bf16.gmra.mrb[16].mxu1 %v6710_v29  ;;  %v5015_v10 = vor.u32 %v5014_v55, %v5011_v53  ;;  %v4074_v61 = vrot.slane %v7291_v31, 1  ;;  %v7297_v29 = vld [vmem:[#allocation2 + $0x98] sm:$0x3c]   ;;  %v7357_v42 = vld [vmem:[#allocation2 + $0x80] sm:$0xf] }
 0x25e   : > { %v6659_v32 = vcombine.low %v3568_v62, %v3680_v23  ;;  %v6662_v59 = vcombine.high %v3568_v62, %v3680_v23  ;;  %v6713_v52 = vcombine.high %v9612_v30, %v4993_v18  ;;  %v6712_v39 = vcombine.low %v9612_v30, %v4993_v18  ;;  %6997 = vmatpush3.bf16.msra.mxu1 %v7314_v40  ;;  %v797_v41 = vld [vmem:[#allocation2 + $0x88] sm:$0xf]  ;;  %v960_v18 = vld [vmem:[#allocation2 + $0x8c] sm:$0x3] }
 0x25f   : > { %4089 = vrot.lane.b32.xlu0 %v4073_v19, %s7397_s14  ;;  %6973 = vmatpush3.bf16.msra.mxu0 %v7314_v40  ;;  %v5018_v14 = vshll.u32 %v6656_v34, 16  ;;  %v5016_v44 = vrot.slane %v5015_v10, 4  ;;  %v4075_v15 = vrot.slane %v7292_v33, 1  ;;  %v4082_v16 = vrot.slane %v7293_v49, 1  ;;  %v7299_v19 = vld [vmem:[#allocation2 + $0xa8] sm:$0x3c]  }
 0x260   : > { %2901 = vrot.lane.b32.xlu1 %v2870_v11, %s7398_s15  ;;  %v5051_v0 = vshrl.u32 %v6659_v32, 16  ;;  %v5054_v21 = vshll.u32 %v6659_v32, 16  ;;  %v9719_v56 = vpop.permute.xlu1 %1409  ;;  %5892 = vmatprep.mubr.bf16.mxu0 %v6713_v52  ;;  %v9721_v35 = vpop.permute.xlu0 %1503  ;;  %v5060_v24 = vshll.u32 %v6662_v59, 16  ;;  %v4083_v36 = vrot.slane %v7294_v38, 1  ;;  %v7358_v32 = vld [vmem:[#allocation2 + $0x88] sm:$0xf] }
 0x261   : > { %5893 = vmatmul.mubr.bf16.gmra.mrb[32].mxu0 %v6712_v39  ;;  %v5020_v13 = vrot.slane %v5018_v14, 5  ;;  %v4076_v51 = vrot.slane %v7295_v63, 1  ;;  %v6523_v43 = vcombine.low %v7357_v42, %v7357_v42  ;;  %v4085_v55 = vrot.slane %v7296_v8, 1  ;;  %v7359_v52 = vld [vmem:[#allocation2 + $0x8c] sm:$0x1] }
 0x262   : > { %v5053_v25 = vrot.slane %v5051_v0, 4  ;;  %v5056_v9 = vrot.slane %v5054_v21, 5  ;;  %v5062_v17 = vrot.slane %v5060_v24, 5  ;;  %v4084_v23 = vrot.slane %v7297_v29, 1  ;;  %v7300_v0 = vld [vmem:[#allocation2 + $0xb8] sm:$0x3c]  }
 0x263   : > { %4105 = vrot.lane.b32.xlu0 %v4081_v12, %s7397_s14  ;;  %v5021_v5 = vsel %vm8537_vm9, %v5016_v44, %v5020_v13  ;;  %v2990_v22 = vshrl.u32 %v6523_v43, 16  ;;  %v9745_v59 = vcombine.low %v7358_v32, %v7358_v32  ;;  %v6333_v39 = vcombine.low %v797_v41, %v7359_v52  ;;  %v7360_v10 = vld [vmem:[#allocation2 + $0x88] sm:$0xe]  ;;  %v799_v49 = vld [vmem:[#allocation2 + $0x90] sm:$0xf] }
 0x264   : > { %3461 = vrot.lane.b32.xlu1 %v3430_v26, %s7398_s15  ;;  %v5057_v30 = vor.u32 %v5056_v9, %v5053_v25  ;;  %v9725_v3 = vpop.permute.xlu1 %3053  ;;  %v4087_v26 = vrot.slane %v7298_v45, 1  ;;  %v3615_v31 = vsel %vm437_vm2, %v9079_v60, %v9667_v50  ;;  %v6459_v12 = vcombine.low %v7360_v10, %v960_v18  ;;  %v7362_v63 = vld [vmem:[#allocation2 + $0x90] sm:$0xe]  ;;  %s6282_s15 = sshll.u32 %s10612_s24, 1 }
 0x265   : > { %v1984_v20 = vpop.permute.xlu0 %1983  ;;  %v3501_v21 = vsel %vm437_vm2, %v6333_v39, %v9581_v27  ;;  %v4086_v14 = vrot.slane %v7299_v19, 1  ;;  %v2992_v25 = vrot.slane %v2990_v22, 7  ;;  %v2993_v9 = vshll.u32 %v6523_v43, 16  ;;  %s341_s19 = scalar_lea.vmem %s10295_s5, %s6282_s15  ;;  %s345_s22 = scalar_lea.vmem %s10296_s6, %s6282_s15 }
 0x266   : > { %v5058_v40 = vrot.slane %v5057_v30, 4  ;;  %v3537_v24 = vsel %vm3511_vm5, %v3501_v21, %v9721_v35  ;;  %v3650_v30 = vsel %vm3511_vm5, %v3615_v31, %v1984_v20  ;;  %v2997_v27 = vshrl.u32 %v9745_v59, 16 }
 0x267   : > { %4093 = vrot.lane.b32.xlu0 %v4075_v15, %s7397_s14  ;;  %v4088_v50 = vrot.slane %v7300_v0, 1  ;;  %v961_v15 = vld [vmem:[#allocation2 + $0x94] sm:$0x3]  ;;  %v2241_v13 = vrot.slane %v6459_v12, 1  ;;  %v3000_v8 = vshll.u32 %v9745_v59, 16 }
 0x268   : > { %4091 = vrot.lane.b32.xlu1 %v4074_v61, %s7397_s14  ;;  %v9729_v48 = vpop.permute.xlu1 %1505  ;;  %v5063_v57 = vsel %vm8537_vm9, %v5058_v40, %v5062_v17  ;;  %v2995_v17 = vor.u32 %v2993_v9, %v2992_v25 }
 0x269   : > { %v9735_v11 = vpop.permute.xlu0 %2651  ;;  %v6716_v46 = vcombine.high %v5021_v5, %v5063_v57  ;;  %v6715_v54 = vcombine.low %v5021_v5, %v5063_v57  ;;  %v3721_v45 = vsel %vm437_vm2, %v2241_v13, %v9683_v28 }
 0x26a   : > { %v3833_v43 = vsel %vm437_vm2, %v2995_v17, %v9709_v4 }
 0x26b   : > { %4109 = vrot.lane.b32.xlu0 %v4083_v36, %s7397_s14  ;;  %5803 = vmatprep.mubr.bf16.mxu1 %v6716_v46  ;;  %v6460_v36 = vcombine.low %v7362_v63, %v961_v15  ;;  %v3618_v46 = vsel %vm437_vm2, %v9178_v47, %v9681_v2  ;;  %v3758_v47 = vsel %vm3511_vm5, %v3721_v45, %v9735_v11 }
 0x26c   : > { %4107 = vrot.lane.b32.xlu1 %v4082_v16, %s7397_s14  ;;  %v9739_v7 = vpop.permute.xlu1 %1985  ;;  %5804 = vmatmul.mubr.bf16.gmra.mrb[20].mxu1 %v6715_v54  ;;  %v7361_v16 = vld [vmem:[#allocation2 + $0x94] sm:$0x1]  ;;  %v2999_v54 = vrot.slane %v2997_v27, 7 }
 0x26d   : > { %v3260_v53 = vpop.permute.xlu0 %3259  ;;  %v6334_v35 = vcombine.low %v799_v49, %v7361_v16  ;;  %v3652_v2 = vsel %vm3511_vm5, %v3618_v46, %v9739_v7  ;;  %v2242_v32 = vrot.slane %v6460_v36, 1 }
 0x26e   : > { %v3870_v28 = vsel %vm3511_vm5, %v3833_v43, %v3260_v53  ;;  %v3002_v39 = vor.u32 %v3000_v8, %v2999_v54 }
 0x26f   : > { %4113 = vrot.lane.b32.xlu0 %v4085_v55, %s7397_s14  ;;  %v3724_v10 = vsel %vm437_vm2, %v2242_v32, %v9658_v58 }
 0x270   : > { %4095 = vrot.lane.b32.xlu1 %v4076_v51, %s7397_s14  ;;  %v9743_v62 = vpop.permute.xlu1 %2653  ;;  %v3504_v51 = vsel %vm437_vm2, %v6334_v35, %v9719_v56  ;;  %v3836_v9 = vsel %vm437_vm2, %v3002_v39, %v9725_v3  ;;  %v962_v39 = vld [vmem:[#allocation2 + $0x9c] sm:$0x3] }
 0x271   : > { %v1616_v34 = vpop.permute.xlu0 %1615  ;;  %v3539_v55 = vsel %vm3511_vm5, %v3504_v51, %v9729_v48 }
 0x272   : > { %v3570_v44 = vsel %vm3544_vm6, %v3537_v24, %v1616_v34  ;;  %v3760_v24 = vsel %vm3511_vm5, %v3724_v10, %v9743_v62 }
 0x273   : > { %4117 = vrot.lane.b32.xlu0 %v4087_v26, %s7397_s14 }
 0x274   : > { %4111 = vrot.lane.b32.xlu1 %v4084_v23, %s7397_s14  ;;  %v9754_v33 = vpop.permute.xlu1 %3261 }
 0x275   : > { %v2176_v61 = vpop.permute.xlu0 %2175 }
 0x276   : > { %v3682_v60 = vsel %vm3544_vm6, %v3650_v30, %v2176_v61  ;;  %v3872_v61 = vsel %vm3511_vm5, %v3836_v9, %v9754_v33  ;;  %v7366_v9 = vld [vmem:[#allocation2 + $0x98] sm:$0xe] }
 0x277   : > { %v6665_v38 = vcombine.low %v3570_v44, %v3682_v60  ;;  %v6668_v26 = vcombine.high %v3570_v44, %v3682_v60 }
 0x278   : > { %4115 = vrot.lane.b32.xlu1 %v4086_v14, %s7397_s14 }
 0x279   : > { %v1618_v40 = vpop.permute.xlu1 %1617  ;;  %v5093_v5 = vshrl.u32 %v6665_v38, 16  ;;  %v5096_v20 = vshll.u32 %v6665_v38, 16  ;;  %v2892_v57 = vpop.permute.xlu0 %2891  ;;  %v5102_v53 = vshll.u32 %v6668_v26, 16 }
 0x27a   : > { %v3572_v56 = vsel %vm3544_vm6, %v3539_v55, %v1618_v40  ;;  %v3790_v4 = vsel %vm3544_vm6, %v3758_v47, %v2892_v57 }
 0x27b   : > { %v5095_v29 = vrot.slane %v5093_v5, 4  ;;  %v5098_v42 = vrot.slane %v5096_v20, 5 }
 0x27c   : > { %4119 = vrot.lane.b32.xlu1 %v4088_v50, %s7397_s14  ;;  %v5104_v50 = vrot.slane %v5102_v53, 5 }
 0x27d   : > { %v2178_v41 = vpop.permute.xlu1 %2177  ;;  %v3452_v19 = vpop.permute.xlu0 %3451  ;;  %v5099_v34 = vor.u32 %v5098_v42, %v5095_v29 }
 0x27e   : > { %v3684_v23 = vsel %vm3544_vm6, %v3652_v2, %v2178_v41  ;;  %v3902_v48 = vsel %vm3544_vm6, %v3870_v28, %v3452_v19 }
 0x27f   : > { %v6671_v18 = vcombine.low %v3572_v56, %v3684_v23  ;;  %v6674_v22 = vcombine.high %v3572_v56, %v3684_v23  ;;  %v6654_v11 = vcombine.low %v3790_v4, %v3902_v48  ;;  %v5100_v30 = vrot.slane %v5099_v34, 4 }
 0x280   : > { %v6657_v15 = vcombine.high %v3790_v4, %v3902_v48 }
 0x281   : > { %v5135_v59 = vshrl.u32 %v6671_v18, 16  ;;  %v5138_v7 = vshll.u32 %v6671_v18, 16  ;;  %v5023_v0 = vshrl.u32 %v6654_v11, 16  ;;  %v5026_v21 = vshll.u32 %v6654_v11, 16  ;;  %v9785_v31 = vpop.permute.xlu0 %1411  ;;  %v7363_v11 = vld [vmem:[#allocation2 + $0x90] sm:$0xf] }
 0x282   : > { %v2894_v52 = vpop.permute.xlu1 %2893  ;;  %v5144_v25 = vshll.u32 %v6674_v22, 16  ;;  %v5105_v62 = vsel %vm8537_vm9, %v5100_v30, %v5104_v50  ;;  %v5032_v54 = vshll.u32 %v6657_v15, 16  ;;  %v6525_v32 = vcombine.low %v7363_v11, %v7363_v11  ;;  %v963_v50 = vld [vmem:[#allocation2 + $0xa4] sm:$0x3] }
 0x283   : > { %v5137_v12 = vrot.slane %v5135_v59, 4  ;;  %v5140_v14 = vrot.slane %v5138_v7, 5  ;;  %v5025_v27 = vrot.slane %v5023_v0, 4  ;;  %v5028_v44 = vrot.slane %v5026_v21, 5  ;;  %v7364_v21 = vld [vmem:[#allocation2 + $0x98] sm:$0xf] }
 0x284   : > { %v3792_v58 = vsel %vm3544_vm6, %v3760_v24, %v2894_v52  ;;  %v5146_v3 = vrot.slane %v5144_v25, 5  ;;  %v5034_v47 = vrot.slane %v5032_v54, 5  ;;  %v801_v52 = vld [vmem:[#allocation2 + $0x98] sm:$0xf]  ;;  %v3004_v53 = vshrl.u32 %v6525_v32, 16 }
 0x285   : > { %v5141_v49 = vor.u32 %v5140_v14, %v5137_v12  ;;  %v1876_v13 = vpop.permute.xlu0 %1875  ;;  %v5029_v35 = vor.u32 %v5028_v44, %v5025_v27  ;;  %v9819_v10 = vcombine.low %v7364_v21, %v7364_v21  ;;  %v7365_v14 = vld [vmem:[#allocation2 + $0x9c] sm:$0x1]  ;;  %v6461_v24 = vcombine.low %v7366_v9, %v962_v39  ;;  %v10606_v21 = vld [vmem:[#allocation40_spill] sm:$0xff] }
 0x286   : > { %v3454_v60 = vpop.permute.xlu1 %3453  ;;  %v6335_v25 = vcombine.low %v801_v52, %v7365_v14  ;;  %v3007_v27 = vshll.u32 %v6525_v32, 16  ;;  %v9854_v52 = vld [vmem:[#allocation2 + $0xac] sm:$0x3] }
 0x287   : > { %v3904_v38 = vsel %vm3544_vm6, %v3872_v61, %v3454_v60  ;;  %v5142_v40 = vrot.slane %v5141_v49, 4  ;;  %v5030_v29 = vrot.slane %v5029_v35, 4  ;;  %v3621_v61 = vsel %vm437_vm2, %v9527_v6, %v1876_v13  ;;  %v803_v60 = vld [vmem:[#allocation2 + $0xa0] sm:$0xf] }
 0x288   : > { %v6660_v17 = vcombine.low %v3792_v58, %v3904_v38  ;;  %v6663_v16 = vcombine.high %v3792_v58, %v3904_v38  ;;  %v3507_v30 = vsel %vm437_vm2, %v6335_v25, %v9785_v31  ;;  %v3006_v49 = vrot.slane %v3004_v53, 7 }
 0x289   : > { %v5147_v57 = vsel %vm8537_vm9, %v5142_v40, %v5146_v3  ;;  %v9803_v63 = vpop.permute.xlu0 %2431  ;;  %v5035_v26 = vsel %vm8537_vm9, %v5030_v29, %v5034_v47  ;;  %v3011_v58 = vshrl.u32 %v9819_v10, 16  ;;  %v10605_v3 = vld [vmem:[#allocation39_spill] sm:$0xff]  ;;  %v2243_v35 = vrot.slane %v6461_v24, 1 }
 0x28a   : > { %v5065_v33 = vshrl.u32 %v6660_v17, 16  ;;  %v5068_v5 = vshll.u32 %v6660_v17, 16  ;;  %v9799_v20 = vpop.permute.xlu1 %1413  ;;  %v6721_v36 = vcombine.high %v5105_v62, %v5147_v57  ;;  %v6720_v46 = vcombine.low %v5105_v62, %v5147_v57 }
 0x28b   : > { %v5074_v51 = vshll.u32 %v6663_v16, 16  ;;  %v9832_v17 = vcombine.low %v10605_v3, %v10605_v3  ;;  %v7367_v16 = vld [vmem:[#allocation2 + $0xa4] sm:$0x1]  ;;  %v3014_v54 = vshll.u32 %v9819_v10, 16  ;;  %v3727_v47 = vsel %vm437_vm2, %v2243_v35, %v9803_v63 }
 0x28c   : > { %v5067_v8 = vrot.slane %v5065_v33, 4  ;;  %v5070_v45 = vrot.slane %v5068_v5, 5  ;;  %5811 = vmatprep.mubr.bf16.mxu1 %v6721_v36  ;;  %v6336_v62 = vcombine.low %v803_v60, %v7367_v16  ;;  %v3009_v33 = vor.u32 %v3007_v27, %v3006_v49  ;;  %v7368_v5 = vld [vmem:[#allocation2 + $0xa0] sm:$0xe] }
 0x28d   : > { %5812 = vmatmul.mubr.bf16.gmra.mrb[24].mxu1 %v6720_v46  ;;  %v9807_v55 = vpop.permute.xlu0 %3055  ;;  %v5076_v41 = vrot.slane %v5074_v51, 5  ;;  %v6462_v57 = vcombine.low %v7368_v5, %v963_v50  ;;  %v3013_v46 = vrot.slane %v3011_v58, 7  ;;  %v9861_v10 = vcombine.low %v10606_v21, %v10606_v21 }
 0x28e   : > { %v5071_v42 = vor.u32 %v5070_v45, %v5067_v8  ;;  %v9805_v43 = vpop.permute.xlu1 %1877  ;;  %v3021_v16 = vshll.u32 %v9832_v17, 16 }
 0x28f   : > { %v2244_v14 = vrot.slane %v6462_v57, 1  ;;  %v3016_v49 = vor.u32 %v3014_v54, %v3013_v46 }
 0x290   : > { %v5072_v2 = vrot.slane %v5071_v42, 4  ;;  %v3510_v42 = vsel %vm437_vm2, %v6336_v62, %v9799_v20 }
 0x291   : > { %v1508_v23 = vpop.permute.xlu0 %1507 }
 0x292   : > { %v9809_v28 = vpop.permute.xlu1 %2433  ;;  %v5077_v56 = vsel %vm8537_vm9, %v5072_v2, %v5076_v41  ;;  %v3541_v15 = vsel %vm3511_vm5, %v3507_v30, %v1508_v23  ;;  %v3624_v2 = vsel %vm437_vm2, %v9588_v37, %v9805_v43  ;;  %v9871_v30 = vld [vmem:[#allocation2 + $0xa8] sm:$0xe] }
 0x293   : > { %v6718_v19 = vcombine.high %v5035_v26, %v5077_v56  ;;  %v6717_v4 = vcombine.low %v5035_v26, %v5077_v56  ;;  %v3018_v26 = vshrl.u32 %v9832_v17, 16  ;;  %v3839_v56 = vsel %vm437_vm2, %v3009_v33, %v9807_v55 }
 0x295   : > { %5900 = vmatprep.mubr.bf16.mxu0 %v6718_v19  ;;  %v1988_v22 = vpop.permute.xlu0 %1987 }
 0x296   : > { %v9815_v18 = vpop.permute.xlu1 %3057  ;;  %5901 = vmatmul.mubr.bf16.gmra.mrb[36].mxu0 %v6717_v4  ;;  %v3654_v38 = vsel %vm3511_vm5, %v3621_v61, %v1988_v22  ;;  %v6463_v61 = vcombine.low %v9871_v30, %v9854_v52 }
 0x297   : > { %v3842_v62 = vsel %vm437_vm2, %v3016_v49, %v9815_v18 }
 0x299   : > { %v2656_v34 = vpop.permute.xlu0 %2655 }
 0x29a   : > { %v1510_v48 = vpop.permute.xlu1 %1509  ;;  %v3762_v19 = vsel %vm3511_vm5, %v3727_v47, %v2656_v34 }
 0x29b   : > { %v3543_v23 = vsel %vm3511_vm5, %v3510_v42, %v1510_v48 }
 0x29d   : > { %v3264_v7 = vpop.permute.xlu0 %3263 }
 0x29e   : > { %v1990_v59 = vpop.permute.xlu1 %1989  ;;  %v3874_v63 = vsel %vm3511_vm5, %v3839_v56, %v3264_v7 }
 0x29f   : > { %v3656_v22 = vsel %vm3511_vm5, %v3624_v2, %v1990_v59 }
 0x2a1   : > { %v1620_v12 = vpop.permute.xlu0 %1619 }
 0x2a2   : > { %v9817_v0 = vpop.permute.xlu1 %2657  ;;  %v3574_v31 = vsel %vm3544_vm6, %v3541_v15, %v1620_v12  ;;  %v7306_v15 = vld [vmem:[#allocation2 + $0x40] sm:$0x1e]  }
 0x2a3   : > { %v6886_v51 = vpop.f32.mrb[16].mxu0 }
 0x2a4   : > { %v6887_v41 = vpop.f32.mrb[17].mxu0 }
 0x2a5   : > { %v2180_v40 = vpop.permute.xlu0 %2179  ;;  %v9849_v4 = vadd.f32 %v6887_v41, %v6886_v51  ;;  %v6889_v20 = vpop.f32.mrb[18].mxu0 }
 0x2a6   : > { %v9825_v44 = vpop.permute.xlu1 %3265  ;;  %v3686_v6 = vsel %vm3544_vm6, %v3654_v38, %v2180_v40  ;;  %v6890_v43 = vpop.f32.mrb[19].mxu0  ;;  %v9875_v38 = vrot.slane %v3018_v26, 7  ;;  %v3730_v40 = vsel %vm437_vm2, %v2244_v14, %v9809_v28 }
 0x2a7   : > { %v6677_v13 = vcombine.low %v3574_v31, %v3686_v6  ;;  %v6680_v11 = vcombine.high %v3574_v31, %v3686_v6  ;;  %v9856_v53 = vadd.f32 %v6890_v43, %v6889_v20  ;;  %v3876_v28 = vsel %vm3511_vm5, %v3842_v62, %v9825_v44 }
 0x2a9   : > { %v5177_v8 = vshrl.u32 %v6677_v13, 16  ;;  %v5180_v45 = vshll.u32 %v6677_v13, 16  ;;  %v2896_v29 = vpop.permute.xlu0 %2895  ;;  %v5186_v31 = vshll.u32 %v6680_v11, 16 }
 0x2aa   : > { %v1622_v36 = vpop.permute.xlu1 %1621  ;;  %v9864_v59 = vsel %vm3544_vm6, %v3762_v19, %v2896_v29 }
 0x2ab   : > { %v3576_v37 = vsel %vm3544_vm6, %v3543_v23, %v1622_v36  ;;  %v5179_v39 = vrot.slane %v5177_v8, 4  ;;  %v5182_v55 = vrot.slane %v5180_v45, 5  ;;  %v6822_v24 = vpop.f32.mrb[0].mxu1  ;;  %v3764_v36 = vsel %vm3511_vm5, %v3730_v40, %v9817_v0  ;;  %v7307_v8 = vld [vmem:[#allocation2 + $0x50] sm:$0x1e]  }
 0x2ac   : > { %v6823_v58 = vpop.f32.mrb[1].mxu1  ;;  %v5188_v2 = vrot.slane %v5186_v31, 5 }
 0x2ad   : > { %v3456_v34 = vpop.permute.xlu0 %3455  ;;  %v5183_v3 = vor.u32 %v5182_v55, %v5179_v39  ;;  %v6825_v13 = vpop.f32.mrb[2].mxu1  ;;  %v9887_v29 = vadd.f32 %v6823_v58, %v6822_v24 }
 0x2ae   : > { %v2182_v32 = vpop.permute.xlu1 %2181  ;;  %v9867_v12 = vsel %vm3544_vm6, %v3874_v63, %v3456_v34  ;;  %v6826_v57 = vpop.f32.mrb[3].mxu1 }
 0x2af   : > { %v3688_v48 = vsel %vm3544_vm6, %v3656_v22, %v2182_v32  ;;  %v6666_v9 = vcombine.low %v9864_v59, %v9867_v12  ;;  %v9889_v42 = vadd.f32 %v6826_v57, %v6825_v13  ;;  %v5184_v47 = vrot.slane %v5183_v3, 4 }
 0x2b0   : > { %v6683_v7 = vcombine.low %v3576_v37, %v3688_v48  ;;  %v6686_v25 = vcombine.high %v3576_v37, %v3688_v48  ;;  %v6669_v22 = vcombine.high %v9864_v59, %v9867_v12  ;;  %v7308_v37 = vld [vmem:[#allocation2 + $0x48] sm:$0x1e]  }
 0x2b1   : > { %v4098_v6 = vpop.permute.xlu0 %4097  ;;  %v5107_v54 = vshrl.u32 %v6666_v9, 16  ;;  %v5110_v41 = vshll.u32 %v6666_v9, 16  ;;  %v5189_v31 = vsel %vm8537_vm9, %v5184_v47, %v5188_v2  ;;  %v2245_v47 = vrot.slane %v6463_v61, 1 }
 0x2b2   : > { %v5219_v27 = vshrl.u32 %v6683_v7, 16  ;;  %v5222_v60 = vshll.u32 %v6683_v7, 16  ;;  %v2898_v50 = vpop.permute.xlu1 %2897  ;;  %v4135_v5 = vsel %vm437_vm2, %v7306_v15, %v4098_v6  ;;  %v5228_v46 = vshll.u32 %v6686_v25, 16  ;;  %v7310_v15 = vld [vmem:[#allocation2 + $0x58] sm:$0x1e]  }
 0x2b3   : > { %v4195_v51 = vshll.u32 %v4135_v5, 16  ;;  %v3796_v23 = vsel %vm3544_vm6, %v3764_v36, %v2898_v50  ;;  %v4193_v44 = vshrl.u32 %v4135_v5, 16  ;;  %v5109_v43 = vrot.slane %v5107_v54, 4 }
 0x2b4   : > { %v5221_v35 = vrot.slane %v5219_v27, 4  ;;  %v5224_v33 = vrot.slane %v5222_v60, 5  ;;  %v5230_v20 = vrot.slane %v5228_v46, 5  ;;  %v5112_v34 = vrot.slane %v5110_v41, 5 }
 0x2b5   : > { %v4102_v56 = vpop.permute.xlu0 %4101  ;;  %v4197_v19 = vrot.slane %v4195_v51, 1  ;;  %v5116_v12 = vshll.u32 %v6669_v22, 16  ;;  %v3023_v2 = vor.u32 %v3021_v16, %v9875_v38 }
 0x2b6   : > { %v5225_v45 = vor.u32 %v5224_v33, %v5221_v35  ;;  %v3458_v18 = vpop.permute.xlu1 %3457  ;;  %v4141_v11 = vsel %vm437_vm2, %v7307_v8, %v4102_v56  ;;  %v5113_v13 = vor.u32 %v5112_v34, %v5109_v43 }
 0x2b7   : > { %v3908_v26 = vsel %vm3544_vm6, %v3876_v28, %v3458_v18  ;;  %v4198_v32 = vor.u32 %v4197_v19, %v4193_v44  ;;  %v4205_v39 = vshrl.u32 %v4141_v11, 16  ;;  %v4207_v55 = vshll.u32 %v4141_v11, 16 }
 0x2b8   : > { %v5226_v0 = vrot.slane %v5225_v45, 4  ;;  %v6672_v63 = vcombine.low %v3796_v23, %v3908_v26  ;;  %v6675_v24 = vcombine.high %v3796_v23, %v3908_v26  ;;  %v5118_v18 = vrot.slane %v5116_v12, 5 }
 0x2b9   : > { %v9897_v25 = vpop.permute.xlu0 %2435  ;;  %v6619_v9 = vcombine.low %v4198_v32, %v4198_v32  ;;  %v4209_v49 = vrot.slane %v4207_v55, 1  ;;  %v6622_v57 = vcombine.high %v4198_v32, %v4198_v32  ;;  %v3025_v26 = vshrl.u32 %v9861_v10, 16 }
 0x2ba   : > { %v4100_v48 = vpop.permute.xlu1 %4099  ;;  %v5149_v21 = vshrl.u32 %v6672_v63, 16  ;;  %v5152_v7 = vshll.u32 %v6672_v63, 16  ;;  %v5231_v59 = vsel %vm8537_vm9, %v5226_v0, %v5230_v20  ;;  %v5158_v28 = vshll.u32 %v6675_v24, 16 }
 0x2bb   : > { %v4138_v14 = vsel %vm437_vm2, %v7308_v37, %v4100_v48  ;;  %v4785_v58 = vshrl.u32 %v6619_v9, 16  ;;  %v4788_v40 = vshll.u32 %v6619_v9, 16  ;;  %v4210_v3 = vor.u32 %v4209_v49, %v4205_v39 }
 0x2bc   : > { %v5151_v27 = vrot.slane %v5149_v21, 4  ;;  %v5154_v60 = vrot.slane %v5152_v7, 5  ;;  %v4201_v50 = vshll.u32 %v4138_v14, 16  ;;  %v4199_v62 = vshrl.u32 %v4138_v14, 16  ;;  %v965_v21 = vld [vmem:[#allocation2 + $0xb4] sm:$0x3] }
 0x2bd   : > { %v6726_v33 = vcombine.high %v5189_v31, %v5231_v59  ;;  %v9903_v5 = vpop.permute.xlu0 %3059  ;;  %v6631_v46 = vcombine.low %v4210_v3, %v4210_v3  ;;  %v4787_v54 = vrot.slane %v4785_v58, 4  ;;  %v4790_v8 = vrot.slane %v4788_v40, 5  ;;  %v7370_v58 = vld [vmem:[#allocation2 + $0xb0] sm:$0xe] }
 0x2be   : > { %v4104_v6 = vpop.permute.xlu1 %4103  ;;  %v4203_v35 = vrot.slane %v4201_v50, 1  ;;  %v5155_v36 = vor.u32 %v5154_v60, %v5151_v27  ;;  %v5114_v20 = vrot.slane %v5113_v13, 4  ;;  %v5160_v63 = vrot.slane %v5158_v28, 5 }
 0x2bf   : > { %5819 = vmatprep.mubr.bf16.mxu1 %v6726_v33  ;;  %v4144_v51 = vsel %vm437_vm2, %v7310_v15, %v4104_v6  ;;  %v4869_v56 = vshrl.u32 %v6631_v46, 16  ;;  %v4872_v11 = vshll.u32 %v6631_v46, 16  ;;  %v4791_v37 = vor.u32 %v4790_v8, %v4787_v54 }
 0x2c0   : > { %v4204_v45 = vor.u32 %v4203_v35, %v4199_v62  ;;  %v4213_v44 = vshll.u32 %v4144_v51, 16  ;;  %v5156_v22 = vrot.slane %v5155_v36, 4  ;;  %v4794_v52 = vshll.u32 %v6622_v57, 16 }
 0x2c1   : > { %v2660_v19 = vpop.permute.xlu0 %2659  ;;  %v6634_v43 = vcombine.high %v4210_v3, %v4210_v3  ;;  %v4211_v17 = vshrl.u32 %v4144_v51, 16  ;;  %v6725_v16 = vcombine.low %v5189_v31, %v5231_v59  ;;  %v4871_v39 = vrot.slane %v4869_v56, 4 }
 0x2c2   : > { %v9912_v41 = vpop.permute.xlu1 %2437  ;;  %v6625_v0 = vcombine.low %v4204_v45, %v4204_v45  ;;  %v6628_v23 = vcombine.high %v4204_v45, %v4204_v45  ;;  %v4215_v38 = vrot.slane %v4213_v44, 1  ;;  %v4874_v14 = vrot.slane %v4872_v11, 5 }
 0x2c3   : > { %5820 = vmatmul.mubr.bf16.gmra.mrb[28].mxu1 %v6725_v16  ;;  %v5119_v24 = vsel %vm8537_vm9, %v5114_v20, %v5118_v18  ;;  %v5161_v49 = vsel %vm8537_vm9, %v5156_v22, %v5160_v63  ;;  %v4792_v12 = vrot.slane %v4791_v37, 4  ;;  %v6464_v40 = vcombine.low %v7370_v58, %v965_v21 }
 0x2c4   : > { %v4827_v30 = vshrl.u32 %v6625_v0, 16  ;;  %v4830_v61 = vshll.u32 %v6625_v0, 16  ;;  %v4836_v34 = vshll.u32 %v6628_v23, 16  ;;  %v4216_v9 = vor.u32 %v4215_v38, %v4211_v17 }
 0x2c5   : > { %v3268_v7 = vpop.permute.xlu0 %3267  ;;  %v6723_v59 = vcombine.high %v5119_v24, %v5161_v49  ;;  %v6722_v60 = vcombine.low %v5119_v24, %v5161_v49  ;;  %v3027_v3 = vrot.slane %v3025_v26, 7  ;;  %v4796_v6 = vrot.slane %v4794_v52, 5 }
 0x2c6   : > { %v9915_v32 = vpop.permute.xlu1 %3061  ;;  %v4829_v55 = vrot.slane %v4827_v30, 4  ;;  %v4832_v48 = vrot.slane %v4830_v61, 5  ;;  %v6637_v50 = vcombine.low %v4216_v9, %v4216_v9  ;;  %v6640_v15 = vcombine.high %v4216_v9, %v4216_v9 }
 0x2c7   : > { %v4878_v13 = vshll.u32 %v6634_v43, 16  ;;  %v4838_v35 = vrot.slane %v4836_v34, 5  ;;  %5908 = vmatprep.mubr.bf16.mxu0 %v6723_v59  ;;  %v4875_v57 = vor.u32 %v4874_v14, %v4871_v39  ;;  %v3028_v46 = vshll.u32 %v9861_v10, 16  ;;  %v7315_v43 = vld [vmem:[#allocation2 + $0x20] sm:$0x1e]  }
 0x2c8   : > { %v4833_v27 = vor.u32 %v4832_v48, %v4829_v55  ;;  %v4911_v36 = vshrl.u32 %v6637_v50, 16  ;;  %v4914_v28 = vshll.u32 %v6637_v50, 16  ;;  %5909 = vmatmul.mubr.bf16.gmra.mrb[40].mxu0 %v6722_v60  ;;  %v3733_v54 = vsel %vm437_vm2, %v2245_v47, %v9897_v25  ;;  %v7316_v60 = vld [vmem:[#allocation2 + $0x80] sm:$0x1e]  }
 0x2c9   : > { %v2900_v33 = vpop.permute.xlu0 %2899  ;;  %v3845_v8 = vsel %vm437_vm2, %v3023_v2, %v9903_v5  ;;  %v4797_v45 = vsel %vm8537_vm9, %v4792_v12, %v4796_v6  ;;  %v4920_v56 = vshll.u32 %v6640_v15, 16  ;;  %v4880_v44 = vrot.slane %v4878_v13, 5 }
 0x2ca   : > { %v2662_v31 = vpop.permute.xlu1 %2661  ;;  %v4834_v62 = vrot.slane %v4833_v27, 4  ;;  %v4913_v18 = vrot.slane %v4911_v36, 4  ;;  %v4916_v26 = vrot.slane %v4914_v28, 5  ;;  %v2246_v10 = vrot.slane %v6464_v40, 1 }
 0x2cb   : > { %v3766_v20 = vsel %vm3511_vm5, %v3733_v54, %v2660_v19  ;;  %v3878_v25 = vsel %vm3511_vm5, %v3845_v8, %v3268_v7  ;;  %v4876_v22 = vrot.slane %v4875_v57, 4  ;;  %v4922_v52 = vrot.slane %v4920_v56, 5 }
 0x2cc   : > { %v4839_v51 = vsel %vm8537_vm9, %v4834_v62, %v4838_v35  ;;  %v4917_v5 = vor.u32 %v4916_v26, %v4913_v18  ;;  %v3798_v2 = vsel %vm3544_vm6, %v3766_v20, %v2900_v33  ;;  %v3030_v17 = vor.u32 %v3028_v46, %v3027_v3  ;;  %v7317_v35 = vld [vmem:[#allocation2 + $0x28] sm:$0x1e]  }
 0x2cd   : > { %v6704_v23 = vcombine.low %v4797_v45, %v4839_v51  ;;  %v3460_v47 = vpop.permute.xlu0 %3459  ;;  %v4881_v39 = vsel %vm8537_vm9, %v4876_v22, %v4880_v44  ;;  %v3736_v48 = vsel %vm437_vm2, %v2246_v10, %v9912_v41  ;;  %v9949_v41 = vld [vmem:[%s10294_s4] ss:$0 sm:$0xff] }
 0x2ce   : > { %v3270_v0 = vpop.permute.xlu1 %3269  ;;  %v3910_v63 = vsel %vm3544_vm6, %v3878_v25, %v3460_v47  ;;  %v4918_v37 = vrot.slane %v4917_v5, 4  ;;  %v3848_v7 = vsel %vm437_vm2, %v3030_v17, %v9915_v32  ;;  %v3768_v24 = vsel %vm3511_vm5, %v3736_v48, %v2662_v31  ;;  %v7318_v5 = vld [vmem:[#allocation2 + $0x30] sm:$0x1e]  }
 0x2cf   : > { %6978 = vmatprep.mubr.msk.bf16.mxu1 %vm3511_vm5, %v6704_v23  ;;  %v6678_v11 = vcombine.low %v3798_v2, %v3910_v63  ;;  %v6681_v30 = vcombine.high %v3798_v2, %v3910_v63  ;;  %v3880_v49 = vsel %vm3511_vm5, %v3848_v7, %v3270_v0  ;;  %v9957_v33 = vadd.f32 %v9887_v29, %v9949_v41 }
 0x2d0   : > { %v4923_v55 = vsel %vm8537_vm9, %v4918_v37, %v4922_v52 }
 0x2d1   : > { %v5191_v38 = vshrl.u32 %v6678_v11, 16  ;;  %v5194_v19 = vshll.u32 %v6678_v11, 16  ;;  %v4090_v16 = vpop.permute.xlu0 %4089  ;;  %v6709_v21 = vcombine.low %v4881_v39, %v4923_v55  ;;  %v5200_v12 = vshll.u32 %v6681_v30, 16 }
 0x2d2   : > { %v2902_v61 = vpop.permute.xlu1 %2901  ;;  %v4123_v34 = vsel %vm437_vm2, %v7315_v43, %v4090_v16 }
 0x2d3   : > { %v5193_v14 = vrot.slane %v5191_v38, 4  ;;  %v5196_v9 = vrot.slane %v5194_v19, 5  ;;  %v4171_v27 = vshll.u32 %v4123_v34, 16  ;;  %v3800_v15 = vsel %vm3544_vm6, %v3768_v24, %v2902_v61  ;;  %6979 = vmatmul.mubr.msk.bf16.vlgmr.msra.gmra.mrb[32].mxu1 %vm3511_vm5, %v6709_v21 }
 0x2d4   : > { %v4169_v58 = vshrl.u32 %v4123_v34, 16  ;;  %v5202_v8 = vrot.slane %v5200_v12, 5  ;;  %v9967_v38 = vadd.f32 %v9889_v42, %v9949_v41 }
 0x2d5   : > { %v5197_v50 = vor.u32 %v5196_v9, %v5193_v14  ;;  %v4106_v40 = vpop.permute.xlu0 %4105  ;;  %v4173_v3 = vrot.slane %v4171_v27, 1 }
 0x2d6   : > { %v3462_v59 = vpop.permute.xlu1 %3461  ;;  %v4147_v13 = vsel %vm437_vm2, %v7316_v60, %v4106_v40  ;;  %v7319_v60 = vld [vmem:[#allocation2 + $0x88] sm:$0x1e]  }
 0x2d7   : > { %v3912_v32 = vsel %vm3544_vm6, %v3880_v49, %v3462_v59  ;;  %v4219_v62 = vshll.u32 %v4147_v13, 16  ;;  %v4174_v57 = vor.u32 %v4173_v3, %v4169_v58  ;;  %v6828_v46 = vpop.f32.mrb[4].mxu1  ;;  %v4217_v45 = vshrl.u32 %v4147_v13, 16 }
 0x2d8   : > { %v6684_v31 = vcombine.low %v3800_v15, %v3912_v32  ;;  %v6687_v6 = vcombine.high %v3800_v15, %v3912_v32  ;;  %v6829_v26 = vpop.f32.mrb[5].mxu1  ;;  %v5198_v56 = vrot.slane %v5197_v50, 4 }
 0x2d9   : > { %v4221_v51 = vrot.slane %v4219_v62, 1  ;;  %v6595_v0 = vcombine.low %v4174_v57, %v4174_v57  ;;  %v6598_v23 = vcombine.high %v4174_v57, %v4174_v57  ;;  %v4094_v10 = vpop.permute.xlu0 %4093  ;;  %v6831_v20 = vpop.f32.mrb[6].mxu1  ;;  %v9975_v49 = vadd.f32 %v6829_v26, %v6828_v46 }
 0x2da   : > { %v5233_v36 = vshrl.u32 %v6684_v31, 16  ;;  %v5236_v28 = vshll.u32 %v6684_v31, 16  ;;  %v4092_v54 = vpop.permute.xlu1 %4091  ;;  %v9960_v44 = vshll.u32 %v6687_v6, 16  ;;  %v6832_v2 = vpop.f32.mrb[7].mxu1  ;;  %v4129_v17 = vsel %vm437_vm2, %v7318_v5, %v4094_v10  ;;  %v7320_v31 = vld [vmem:[#allocation2 + $0x90] sm:$0x1e]  }
 0x2db   : > { %v4126_v18 = vsel %vm437_vm2, %v7317_v35, %v4092_v54  ;;  %v4222_v47 = vor.u32 %v4221_v51, %v4217_v45  ;;  %v4617_v63 = vshrl.u32 %v6595_v0, 16  ;;  %v4620_v11 = vshll.u32 %v6595_v0, 16 }
 0x2dc   : > { %v5235_v29 = vrot.slane %v5233_v36, 4  ;;  %v5238_v25 = vrot.slane %v5236_v28, 5  ;;  %v4177_v22 = vshll.u32 %v4126_v18, 16  ;;  %v9962_v37 = vshll.u32 %v6598_v23, 16 }
 0x2dd   : > { %v4175_v52 = vshrl.u32 %v4126_v18, 16  ;;  %v6643_v30 = vcombine.low %v4222_v47, %v4222_v47  ;;  %v6646_v61 = vcombine.high %v4222_v47, %v4222_v47  ;;  %v4619_v19 = vrot.slane %v4617_v63, 4  ;;  %v4110_v50 = vpop.permute.xlu0 %4109 }
 0x2de   : > { %v4179_v43 = vrot.slane %v4177_v22, 1  ;;  %v4622_v16 = vrot.slane %v4620_v11, 5  ;;  %v9971_v39 = vsel %vm8537_vm9, %v5198_v56, %v5202_v8  ;;  %v5244_v55 = vrot.slane %v9960_v44, 5  ;;  %v4108_v7 = vpop.permute.xlu1 %4107 }
 0x2df   : > { %v4953_v48 = vshrl.u32 %v6643_v30, 16  ;;  %v4956_v34 = vshll.u32 %v6643_v30, 16  ;;  %v4628_v14 = vrot.slane %v9962_v37, 5  ;;  %v5239_v9 = vor.u32 %v5238_v25, %v5235_v29  ;;  %v7321_v25 = vld [vmem:[#allocation2 + $0x38] sm:$0x1e]  }
 0x2e0   : > { %v4180_v21 = vor.u32 %v4179_v43, %v4175_v52  ;;  %v4183_v24 = vshll.u32 %v4129_v17, 16  ;;  %v9977_v27 = vshll.u32 %v6646_v61, 16  ;;  %v4623_v58 = vor.u32 %v4622_v16, %v4619_v19 }
 0x2e1   : > { %v4955_v42 = vrot.slane %v4953_v48, 4  ;;  %v4958_v12 = vrot.slane %v4956_v34, 5  ;;  %v6892_v15 = vpop.f32.mrb[20].mxu0  ;;  %v4181_v40 = vshrl.u32 %v4129_v17, 16  ;;  %v9979_v57 = vadd.f32 %v6832_v2, %v6831_v20  ;;  %v4114_v61 = vpop.permute.xlu0 %4113  ;;  %v7322_v48 = vld [vmem:[#allocation2 + $0xa0] sm:$0x1e]  }
 0x2e2   : > { %v6601_v59 = vcombine.low %v4180_v21, %v4180_v21  ;;  %v6604_v32 = vcombine.high %v4180_v21, %v4180_v21  ;;  %v4185_v3 = vrot.slane %v4183_v24, 1  ;;  %v6893_v6 = vpop.f32.mrb[21].mxu0  ;;  %v4150_v54 = vsel %vm437_vm2, %v7319_v60, %v4108_v7  ;;  %v4096_v0 = vpop.permute.xlu1 %4095 }
 0x2e3   : > { %v4959_v13 = vor.u32 %v4958_v12, %v4955_v42  ;;  %v6895_v36 = vpop.f32.mrb[22].mxu0  ;;  %v4153_v8 = vsel %vm437_vm2, %v7320_v31, %v4110_v50  ;;  %v9985_v51 = vrot.slane %v5239_v9, 4  ;;  %v4964_v18 = vrot.slane %v9977_v27, 5 }
 0x2e4   : > { %v4659_v62 = vshrl.u32 %v6601_v59, 16  ;;  %v4662_v35 = vshll.u32 %v6601_v59, 16  ;;  %v9981_v28 = vshll.u32 %v6604_v32, 16  ;;  %v4186_v46 = vor.u32 %v4185_v3, %v4181_v40  ;;  %v6896_v45 = vpop.f32.mrb[23].mxu0 }
 0x2e5   : > { %v9988_v23 = vrot.slane %v4623_v58, 4  ;;  %v9990_v10 = vrot.slane %v4959_v13, 4  ;;  %v4225_v5 = vshll.u32 %v4150_v54, 16  ;;  %v4231_v2 = vshll.u32 %v4153_v8, 16 }
 0x2e6   : > { %v4661_v26 = vrot.slane %v4659_v62, 4  ;;  %v4664_v56 = vrot.slane %v4662_v35, 5  ;;  %v6607_v20 = vcombine.low %v4186_v46, %v4186_v46  ;;  %v6610_v29 = vcombine.high %v4186_v46, %v4186_v46  ;;  %v4112_v40 = vpop.permute.xlu1 %4111 }
 0x2e7   : > { %v4670_v22 = vrot.slane %v9981_v28, 5  ;;  %v4223_v52 = vshrl.u32 %v4150_v54, 16  ;;  %v4132_v30 = vsel %vm437_vm2, %v7321_v25, %v4096_v0  ;;  %v4227_v17 = vrot.slane %v4225_v5, 1 }
 0x2e8   : > { %v4665_v47 = vor.u32 %v4664_v56, %v4661_v26  ;;  %v4701_v63 = vshrl.u32 %v6607_v20, 16  ;;  %v4704_v11 = vshll.u32 %v6607_v20, 16  ;;  %v4710_v43 = vshll.u32 %v6610_v29, 16 }
 0x2e9   : > { %v4229_v19 = vshrl.u32 %v4153_v8, 16  ;;  %v4233_v16 = vrot.slane %v4231_v2, 1  ;;  %v4189_v9 = vshll.u32 %v4132_v30, 16  ;;  %v4228_v24 = vor.u32 %v4227_v17, %v4223_v52 }
 0x2ea   : > { %v9994_v34 = vrot.slane %v4665_v47, 4  ;;  %v4703_v21 = vrot.slane %v4701_v63, 4  ;;  %v4706_v7 = vrot.slane %v4704_v11, 5  ;;  %v9996_v12 = vadd.f32 %v6893_v6, %v6892_v15 }
 0x2eb   : > { %v4234_v42 = vor.u32 %v4233_v16, %v4229_v19  ;;  %v4159_v59 = vsel %vm437_vm2, %v7322_v48, %v4114_v61  ;;  %v4187_v50 = vshrl.u32 %v4132_v30, 16  ;;  %v4191_v58 = vrot.slane %v4189_v9, 1  ;;  %v4116_v30 = vpop.permute.xlu1 %4115  ;;  %v7323_v9 = vld [vmem:[#allocation2 + $0x98] sm:$0x1e]  }
 0x2ec   : > { %v4707_v60 = vor.u32 %v4706_v7, %v4703_v21  ;;  %v4243_v32 = vshll.u32 %v4159_v59, 16  ;;  %v4712_v3 = vrot.slane %v4710_v43, 5  ;;  %v6649_v31 = vcombine.low %v4228_v24, %v4228_v24 }
 0x2ed   : > { %v6652_v13 = vcombine.high %v4228_v24, %v4228_v24  ;;  %v6655_v62 = vcombine.low %v4234_v42, %v4234_v42  ;;  %v6658_v46 = vcombine.high %v4234_v42, %v4234_v42  ;;  %v4192_v54 = vor.u32 %v4191_v58, %v4187_v50  ;;  %v7324_v24 = vld [vmem:[#allocation2 + $0xb0] sm:$0x1e]   ;;  %v4118_v58 = vpop.permute.xlu0 %4117 }
 0x2ee   : > { %v4708_v35 = vrot.slane %v4707_v60, 4  ;;  %v9999_v8 = vadd.f32 %v6896_v45, %v6895_v36  ;;  %v4995_v26 = vshrl.u32 %v6649_v31, 16  ;;  %v4998_v56 = vshll.u32 %v6649_v31, 16 }
 0x2ef   : > { %v5037_v15 = vshrl.u32 %v6655_v62, 16  ;;  %v4245_v6 = vrot.slane %v4243_v32, 1  ;;  %v10001_v0 = vshll.u32 %v6652_v13, 16  ;;  %v5040_v20 = vshll.u32 %v6655_v62, 16 }
 0x2f0   : > { %v6613_v29 = vcombine.low %v4192_v54, %v4192_v54  ;;  %v4241_v25 = vshrl.u32 %v4159_v59, 16  ;;  %v10005_v47 = vsel %vm8537_vm9, %v4708_v35, %v4712_v3  ;;  %v4997_v5 = vrot.slane %v4995_v26, 4  ;;  %v7325_v3 = vld [vmem:[#allocation2 + $0xa8] sm:$0x1e]  }
 0x2f1   : > { %v5000_v2 = vrot.slane %v4998_v56, 5  ;;  %v5039_v63 = vrot.slane %v5037_v15, 4  ;;  %v5042_v11 = vrot.slane %v5040_v20, 5  ;;  %v10007_v52 = vshll.u32 %v6658_v46, 16  ;;  %v7326_v46 = vld [vmem:[#allocation2 + $0xb8] sm:$0x1e]  }
 0x2f2   : > { %v6616_v36 = vcombine.high %v4192_v54, %v4192_v54  ;;  %v4743_v45 = vshrl.u32 %v6613_v29, 16  ;;  %v4746_v43 = vshll.u32 %v6613_v29, 16  ;;  %v4246_v17 = vor.u32 %v4245_v6, %v4241_v25  ;;  %v4120_v6 = vpop.permute.xlu1 %4119 }
 0x2f3   : > { %v5001_v61 = vor.u32 %v5000_v2, %v4997_v5  ;;  %v5245_v19 = vsel %vm8537_vm9, %v9985_v51, %v5244_v55  ;;  %v5006_v16 = vrot.slane %v10001_v0, 5  ;;  %v5043_v48 = vor.u32 %v5042_v11, %v5039_v63 }
 0x2f4   : > { %v4745_v21 = vrot.slane %v4743_v45, 4  ;;  %v6728_v7 = vcombine.high %v9971_v39, %v5245_v19  ;;  %v4748_v42 = vrot.slane %v4746_v43, 5  ;;  %v4752_v59 = vshll.u32 %v6616_v36, 16 }
 0x2f5   : > { %v6667_v60 = vcombine.low %v4246_v17, %v4246_v17  ;;  %v6670_v50 = vcombine.high %v4246_v17, %v4246_v17  ;;  %v10016_v32 = vrot.slane %v5001_v61, 4  ;;  %v5048_v44 = vrot.slane %v10007_v52, 5 }
 0x2f6   : > { %5916 = vmatprep.mubr.bf16.mxu0 %v6728_v7  ;;  %v4156_v55 = vsel %vm437_vm2, %v7323_v9, %v4112_v40  ;;  %v6727_v51 = vcombine.low %v9971_v39, %v5245_v19  ;;  %v4749_v31 = vor.u32 %v4748_v42, %v4745_v21  ;;  %v10023_v54 = vrot.slane %v5043_v48, 4 }
 0x2f7   : > { %v5121_v13 = vshrl.u32 %v6667_v60, 16  ;;  %v5124_v62 = vshll.u32 %v6667_v60, 16  ;;  %v10021_v35 = vshll.u32 %v6670_v50, 16  ;;  %v4237_v26 = vshll.u32 %v4156_v55, 16 }
 0x2f8   : > { %5917 = vmatmul.mubr.bf16.gmra.mrb[44].mxu0 %v6727_v51  ;;  %v4165_v56 = vsel %vm437_vm2, %v7324_v24, %v4118_v58  ;;  %v4162_v15 = vsel %vm437_vm2, %v7325_v3, %v4116_v30  ;;  %v4750_v20 = vrot.slane %v4749_v31, 4  ;;  %v4754_v40 = vrot.slane %v4752_v59, 5 }
 0x2f9   : > { %v5123_v29 = vrot.slane %v5121_v13, 4  ;;  %v5126_v39 = vrot.slane %v5124_v62, 5  ;;  %v10027_v25 = vpop.f32.mrb[24].mxu0  ;;  %v4235_v5 = vshrl.u32 %v4156_v55, 16  ;;  %v4239_v2 = vrot.slane %v4237_v26, 1 }
 0x2fa   : > { %v4253_v63 = vshrl.u32 %v4165_v56, 16  ;;  %v4255_v11 = vshll.u32 %v4165_v56, 16  ;;  %v10029_v36 = vpop.f32.mrb[25].mxu0  ;;  %v4755_v45 = vsel %vm8537_vm9, %v4750_v20, %v4754_v40  ;;  %v5132_v61 = vrot.slane %v10021_v35, 5 }
 0x2fb   : > { %v4249_v43 = vshll.u32 %v4162_v15, 16  ;;  %v4168_v30 = vsel %vm437_vm2, %v7326_v46, %v4120_v6  ;;  %v10035_v17 = vpop.f32.mrb[26].mxu0  ;;  %v5127_v19 = vor.u32 %v5126_v39, %v5123_v29  ;;  %v4240_v48 = vor.u32 %v4239_v2, %v4235_v5 }
 0x2fc   : > { %v4257_v21 = vrot.slane %v4255_v11, 1  ;;  %v4247_v7 = vshrl.u32 %v4162_v15, 16  ;;  %v10037_v9 = vpop.f32.mrb[8].mxu1  ;;  %v10039_v24 = vpop.f32.mrb[27].mxu0  ;;  %v6699_v42 = vcombine.low %v10005_v47, %v4755_v45  ;;  %v4261_v60 = vshll.u32 %v4168_v30, 16 }
 0x2fd   : > { %v4251_v59 = vrot.slane %v4249_v43, 1  ;;  %v4629_v50 = vsel %vm8537_vm9, %v9988_v23, %v4628_v14  ;;  %v10047_v58 = vpop.f32.mrb[9].mxu1  ;;  %v6661_v55 = vcombine.low %v4240_v48, %v4240_v48  ;;  %v6664_v51 = vcombine.high %v4240_v48, %v4240_v48 }
 0x2fe   : > { %v4258_v3 = vor.u32 %v4257_v21, %v4253_v63  ;;  %v4671_v31 = vsel %vm8537_vm9, %v9994_v34, %v4670_v22  ;;  %v10054_v47 = vpop.f32.mrb[10].mxu1  ;;  %v4259_v62 = vshrl.u32 %v4168_v30, 16  ;;  %v4263_v37 = vrot.slane %v4261_v60, 1 }
 0x2ff   : > { %v4252_v13 = vor.u32 %v4251_v59, %v4247_v7  ;;  %v6694_v46 = vcombine.low %v4629_v50, %v4671_v31  ;;  %v6838_v26 = vpop.f32.mrb[11].mxu1  ;;  %v5128_v56 = vrot.slane %v5127_v19, 4  ;;  %v5079_v14 = vshrl.u32 %v6661_v55, 16 }
 0x300   : > { %v5082_v23 = vshll.u32 %v6661_v55, 16  ;;  %v6679_v15 = vcombine.low %v4258_v3, %v4258_v3  ;;  %v6682_v6 = vcombine.high %v4258_v3, %v4258_v3  ;;  %v4264_v29 = vor.u32 %v4263_v37, %v4259_v62 }
 0x301   : > { %v6673_v20 = vcombine.low %v4252_v13, %v4252_v13  ;;  %v6676_v40 = vcombine.high %v4252_v13, %v4252_v13  ;;  %6974 = vmatprep.mubr.msk.bf16.mxu0 %vm3511_vm5, %v6694_v46  ;;  %v6904_v28 = vpop.f32.mrb[28].mxu0  ;;  %v5081_v39 = vrot.slane %v5079_v14, 4  ;;  %v5088_v34 = vshll.u32 %v6664_v51, 16 }
 0x302   : > { %v5084_v22 = vrot.slane %v5082_v23, 5  ;;  %v5205_v5 = vshrl.u32 %v6679_v15, 16  ;;  %6975 = vmatmul.mubr.msk.bf16.vlgmr.msra.gmra.mrb[48].mxu0 %vm3511_vm5, %v6699_v42  ;;  %v6905_v2 = vpop.f32.mrb[29].mxu0  ;;  %v5208_v63 = vshll.u32 %v6679_v15, 16  ;;  %v5214_v11 = vshll.u32 %v6682_v6, 16 }
 0x303   : > { %v5163_v45 = vshrl.u32 %v6673_v20, 16  ;;  %v5166_v43 = vshll.u32 %v6673_v20, 16  ;;  %v6907_v30 = vpop.f32.mrb[30].mxu0  ;;  %v6685_v21 = vcombine.low %v4264_v29, %v4264_v29  ;;  %v4965_v7 = vsel %vm8537_vm9, %v9990_v10, %v4964_v18 }
 0x304   : > { %v5085_v19 = vor.u32 %v5084_v22, %v5081_v39  ;;  %v5207_v48 = vrot.slane %v5205_v5, 4  ;;  %v6840_v59 = vpop.f32.mrb[12].mxu1  ;;  %v6908_v60 = vpop.f32.mrb[31].mxu0  ;;  %v5210_v50 = vrot.slane %v5208_v63, 5  ;;  %v5172_v51 = vshll.u32 %v6676_v40, 16 }
 0x305   : > { %v5165_v55 = vrot.slane %v5163_v45, 4  ;;  %v5168_v42 = vrot.slane %v5166_v43, 5  ;;  %v6841_v3 = vpop.f32.mrb[13].mxu1  ;;  %v5090_v13 = vrot.slane %v5088_v34, 5  ;;  %v6688_v62 = vcombine.high %v4264_v29, %v4264_v29 }
 0x306   : > { %v5086_v31 = vrot.slane %v5085_v19, 4  ;;  %v5247_v37 = vshrl.u32 %v6685_v21, 16  ;;  %v6843_v46 = vpop.f32.mrb[14].mxu1  ;;  %v5216_v14 = vrot.slane %v5214_v11, 5  ;;  %v5250_v15 = vshll.u32 %v6685_v21, 16 }
 0x307   : > { %v5169_v23 = vor.u32 %v5168_v42, %v5165_v55  ;;  %v5007_v27 = vsel %vm8537_vm9, %v10016_v32, %v5006_v16  ;;  %v6844_v18 = vpop.f32.mrb[15].mxu1  ;;  %v5211_v10 = vor.u32 %v5210_v50, %v5207_v48  ;;  %v6900_v40 = vadd.f32 %v10029_v36, %v10027_v25 }
 0x308   : > { %v5249_v6 = vrot.slane %v5247_v37, 4  ;;  %v6714_v20 = vcombine.low %v4965_v7, %v5007_v27  ;;  %v5174_v29 = vrot.slane %v5172_v51, 5  ;;  %v5252_v22 = vrot.slane %v5250_v15, 5 }
 0x309   : > { %v5170_v39 = vrot.slane %v5169_v23, 4  ;;  %v5256_v34 = vshll.u32 %v6688_v62, 16  ;;  %v5049_v0 = vsel %vm8537_vm9, %v10023_v54, %v5048_v44  ;;  %v5091_v16 = vsel %vm8537_vm9, %v5086_v31, %v5090_v13 }
 0x30a   : > { %6982 = vmatprep.mubr.msk.bf16.mxu1 %vm3511_vm5, %v6714_v20  ;;  %v6903_v32 = vadd.f32 %v10039_v24, %v10035_v17  ;;  %v6836_v25 = vadd.f32 %v10047_v58, %v10037_v9  ;;  %v5253_v36 = vor.u32 %v5252_v22, %v5249_v6  ;;  %v6719_v5 = vcombine.low %v5049_v0, %v5091_v16 }
 0x30b   : > { %v5133_v52 = vsel %vm8537_vm9, %v5128_v56, %v5132_v61  ;;  %v5175_v63 = vsel %vm8537_vm9, %v5170_v39, %v5174_v29  ;;  %v5212_v44 = vrot.slane %v5211_v10, 4  ;;  %v6839_v11 = vadd.f32 %v6838_v26, %v10054_v47 }
 0x30c   : > { %v6724_v54 = vcombine.low %v5133_v52, %v5175_v63  ;;  %v6906_v45 = vadd.f32 %v6905_v2, %v6904_v28  ;;  %v5254_v43 = vrot.slane %v5253_v36, 4  ;;  %v5258_v17 = vrot.slane %v5256_v34, 5  ;;  %6983 = vmatmul.mubr.msk.bf16.gmra.mrb[36].mxu1 %vm3511_vm5, %v6719_v5 }
 0x30d   : > { %v6909_v9 = vadd.f32 %v6908_v60, %v6907_v30  ;;  %v6842_v24 = vadd.f32 %v6841_v3, %v6840_v59  ;;  %v6845_v35 = vadd.f32 %v6844_v18, %v6843_v46  ;;  %v10093_v61 = vadd.f32 %v9849_v4, %v9957_v33 }
 0x30e   : > { %6986 = vmatprep.mubr.msk.bf16.mxu1 %vm3511_vm5, %v6724_v54  ;;  %v10097_v58 = vadd.f32 %v9856_v53, %v9967_v38  ;;  %v5259_v47 = vsel %vm8537_vm9, %v5254_v43, %v5258_v17  ;;  %v5217_v26 = vsel %vm8537_vm9, %v5212_v44, %v5216_v14  ;;  %v5782_v4 = vadd.f32 %v6836_v25, %v9949_v41 }
 0x30f   : > { %v6729_v56 = vcombine.low %v5217_v26, %v5259_v47  ;;  %v5790_v28 = vadd.f32 %v6842_v24, %v9949_v41  ;;  %v5793_v33 = vadd.f32 %v6845_v35, %v9949_v41  ;;  %v5785_v53 = vadd.f32 %v6839_v11, %v9949_v41 }
 0x310   : > { %v10110_v38 = vadd.f32 %v6900_v40, %v5782_v4  ;;  %v5774_v1 = vadd.f32 %v9975_v49, %v9949_v41  ;;  %v5777_v48 = vadd.f32 %v9979_v57, %v9949_v41 }
 0x311   : > { %v10105_v2 = vadd.f32 %v6906_v45, %v5790_v28  ;;  %v10112_v30 = vadd.f32 %v6909_v9, %v5793_v33  ;;  %v10116_v19 = vadd.f32 %v6903_v32, %v5785_v53 }
 0x312   : > { %v10121_v21 = vadd.f32 %v9996_v12, %v5774_v1  ;;  %v10124_v59 = vadd.f32 %v9999_v8, %v5777_v48 }
 0x314   : > { %6987 = vmatmul.mubr.msk.bf16.gmra.mrb[40].mxu1 %vm3511_vm5, %v6729_v56 }
 0x330   : > { %v6846_v7 = vpop.f32.mrb[16].mxu1 }
 0x331   : > { %v6847_v60 = vpop.f32.mrb[17].mxu1 }
 0x332   : > { %v6848_v50 = vadd.f32 %v6847_v60, %v6846_v7  ;;  %v6849_v55 = vpop.f32.mrb[18].mxu1 }
 0x333   : > { %v6850_v42 = vpop.f32.mrb[19].mxu1 }
 0x334   : > { %v6851_v51 = vadd.f32 %v6850_v42, %v6849_v55  ;;  %v6910_v3 = vpop.f32.mrb[32].mxu0  ;;  %v5798_v40 = vadd.f32 %v6848_v50, %v9949_v41 }
 0x335   : > { %v6911_v31 = vpop.f32.mrb[33].mxu0 }
 0x336   : > { %v6912_v49 = vadd.f32 %v6911_v31, %v6910_v3  ;;  %v6913_v13 = vpop.f32.mrb[34].mxu0  ;;  %v5801_v39 = vadd.f32 %v6851_v51, %v9949_v41 }
 0x337   : > { %v6914_v62 = vpop.f32.mrb[35].mxu0 }
 0x338   : > { %v6915_v37 = vadd.f32 %v6914_v62, %v6913_v13  ;;  %v10128_v29 = vadd.f32 %v6912_v49, %v5798_v40 }
 0x33a   : > { %v10130_v22 = vadd.f32 %v6915_v37, %v5801_v39 }
 0x33f   : > { %v6852_v46 = vpop.f32.mrb[20].mxu1 }
 0x340   : > { %v6853_v57 = vpop.f32.mrb[21].mxu1 }
 0x341   : > { %v6854_v14 = vadd.f32 %v6853_v57, %v6852_v46  ;;  %v6855_v12 = vpop.f32.mrb[22].mxu1 }
 0x342   : > { %v6856_v23 = vpop.f32.mrb[23].mxu1 }
 0x343   : > { %v6857_v15 = vadd.f32 %v6856_v23, %v6855_v12  ;;  %v5806_v16 = vadd.f32 %v6854_v14, %v9949_v41 }
 0x345   : > { %v5809_v5 = vadd.f32 %v6857_v15, %v9949_v41 }
 0x360   : > { %v6858_v27 = vpop.f32.mrb[24].mxu1 }
 0x361   : > { %v6859_v8 = vpop.f32.mrb[25].mxu1 }
 0x362   : > { %v6860_v18 = vadd.f32 %v6859_v8, %v6858_v27  ;;  %v6861_v10 = vpop.f32.mrb[26].mxu1 }
 0x363   : > { %v6862_v6 = vpop.f32.mrb[27].mxu1 }
 0x364   : > { %v6863_v20 = vadd.f32 %v6862_v6, %v6861_v10  ;;  %v5814_v47 = vadd.f32 %v6860_v18, %v9949_v41 }
 0x366   : > { %v5817_v4 = vadd.f32 %v6863_v20, %v9949_v41 }
 0x369   : > { %v6916_v34 = vpop.f32.mrb[36].mxu0 }
 0x36a   : > { %v6917_v0 = vpop.f32.mrb[37].mxu0 }
 0x36b   : > { %v6918_v32 = vadd.f32 %v6917_v0, %v6916_v34  ;;  %v6919_v25 = vpop.f32.mrb[38].mxu0 }
 0x36c   : > { %v6920_v36 = vpop.f32.mrb[39].mxu0 }
 0x36d   : > { %v6921_v52 = vadd.f32 %v6920_v36, %v6919_v25  ;;  %v5903_v63 = vadd.f32 %v6918_v32, %v5806_v16 }
 0x36f   : > { %v5906_v44 = vadd.f32 %v6921_v52, %v5809_v5 }
 0x396   : > { %v6864_v54 = vpop.f32.mrb[28].mxu1 }
 0x397   : > { %v6865_v11 = vpop.f32.mrb[29].mxu1 }
 0x398   : > { %v6866_v45 = vadd.f32 %v6865_v11, %v6864_v54  ;;  %v6867_v43 = vpop.f32.mrb[30].mxu1 }
 0x399   : > { %v6868_v17 = vpop.f32.mrb[31].mxu1 }
 0x39a   : > { %v6869_v9 = vadd.f32 %v6868_v17, %v6867_v43  ;;  %v5822_v13 = vadd.f32 %v6866_v45, %v9949_v41 }
 0x39b   : > { %v6922_v24 = vpop.f32.mrb[40].mxu0 }
 0x39c   : > { %v6923_v35 = vpop.f32.mrb[41].mxu0  ;;  %v5825_v46 = vadd.f32 %v6869_v9, %v9949_v41 }
 0x39d   : > { %v6924_v26 = vadd.f32 %v6923_v35, %v6922_v24  ;;  %v6925_v56 = vpop.f32.mrb[42].mxu0 }
 0x39e   : > { %v6926_v28 = vpop.f32.mrb[43].mxu0 }
 0x39f   : > { %v6927_v33 = vadd.f32 %v6926_v28, %v6925_v56  ;;  %v5911_v53 = vadd.f32 %v6924_v26, %v5814_v47 }
 0x3a1   : > { %v10136_v1 = vadd.f32 %v6927_v33, %v5817_v4 }
 0x3a6   : > { %v6980_v48 = vpop.f32.mrb[32].mxu1 }
 0x3a7   : > { %v10139_v7 = vadd.f32 %v6980_v48, %v10105_v2  ;;  %v5975_v60 = vpop.f32.mrb[33].mxu1 }
 0x3a8   : > { %v10142_v50 = vadd.f32 %v5975_v60, %v10110_v38  ;;  %v6981_v55 = vpop.f32.mrb[34].mxu1 }
 0x3a9   : > { %v10145_v42 = vadd.f32 %v6981_v55, %v10112_v30  ;;  %v5978_v51 = vpop.f32.mrb[35].mxu1 }
 0x3aa   : > { %v10148_v3 = vadd.f32 %v5978_v51, %v10116_v19 }
 0x3ab   : > { %v6035_v43 = vsel %vm437_vm2, %v10145_v42, 0.0 }
 0x3ac   : > { %v6031_v25 = vsel %vm437_vm2, %v10148_v3, 0.0 }
 0x3cb   : > { %v6928_v31 = vpop.f32.mrb[44].mxu0 }
 0x3cc   : > { %v6929_v49 = vpop.f32.mrb[45].mxu0 }
 0x3cd   : > { %v6930_v62 = vadd.f32 %v6929_v49, %v6928_v31  ;;  %v6931_v37 = vpop.f32.mrb[46].mxu0 }
 0x3ce   : > { %v6932_v2 = vpop.f32.mrb[47].mxu0 }
 0x3cf   : > { %v6933_v57 = vadd.f32 %v6932_v2, %v6931_v37  ;;  %v5919_v38 = vadd.f32 %v6930_v62, %v5822_v13 }
 0x3d1   : > { %v5922_v14 = vadd.f32 %v6933_v57, %v5825_v46 }
 0x3d5   : > { %v6976_v12 = vpop.f32.mrb[48].mxu0 }
 0x3d6   : > { %v10153_v30 = vadd.f32 %v6976_v12, %v10121_v21  ;;  %v5959_v23 = vpop.f32.mrb[49].mxu0 }
 0x3d7   : > { %v10156_v19 = vadd.f32 %v5959_v23, %v10093_v61  ;;  %v6977_v15 = vpop.f32.mrb[50].mxu0  ;;  %v6067_v23 = vld [vmem:[%s341_s19] sm:$0x3] }
 0x3d8   : > { %v10159_v27 = vadd.f32 %v6977_v15, %v10124_v59  ;;  %v5962_v8 = vpop.f32.mrb[51].mxu0  ;;  %v6025_v6 = vsel %vm437_vm2, %v10153_v30, 0.0 }
 0x3d9   : > { %v10162_v18 = vadd.f32 %v5962_v8, %v10097_v58  ;;  %v6022_v41 = vsel %vm437_vm2, %v10156_v19, 0.0  ;;  %v6029_v58 = vsel %vm437_vm2, %v10142_v50, 0.0 }
 0x3da   : > { %v6027_v20 = vsel %vm437_vm2, %v10159_v27, 0.0 }
 0x3db   : > { %v6023_v10 = vsel %vm437_vm2, %v10162_v18, 0.0 }
 0x3dc   : > { %v6024_v21 = vadd.f32 %v6023_v10, %v6022_v41 }
 0x3de   : > { %v6026_v61 = vadd.f32 %v6025_v6, %v6024_v21 }
 0x3df   : > { %v6984_v40 = vpop.f32.mrb[36].mxu1 }
 0x3e0   : > { %v6028_v59 = vadd.f32 %v6027_v20, %v6026_v61  ;;  %v10174_v39 = vadd.f32 %v6984_v40, %v5903_v63  ;;  %v5991_v34 = vpop.f32.mrb[37].mxu1  ;;  %v6033_v63 = vsel %vm437_vm2, %v10139_v7, 0.0 }
 0x3e1   : > { %v10177_v16 = vadd.f32 %v5991_v34, %v10128_v29  ;;  %v6985_v32 = vpop.f32.mrb[38].mxu1  ;;  %v6068_v34 = vld [vmem:[%s345_s22] sm:$0x3] }
 0x3e2   : > { %v6030_v0 = vadd.f32 %v6029_v58, %v6028_v59  ;;  %v10181_v36 = vadd.f32 %v6985_v32, %v5906_v44  ;;  %v5994_v5 = vpop.f32.mrb[39].mxu1  ;;  %v6046_v17 = vsel %vm437_vm2, %v10174_v39, 0.0 }
 0x3e3   : > { %v10184_v54 = vadd.f32 %v5994_v5, %v10130_v22  ;;  %v6043_v45 = vsel %vm437_vm2, %v10177_v16, 0.0 }
 0x3e4   : > { %v6032_v52 = vadd.f32 %v6031_v25, %v6030_v0  ;;  %v6048_v26 = vsel %vm437_vm2, %v10181_v36, 0.0 }
 0x3e5   : > { %v6044_v29 = vsel %vm437_vm2, %v10184_v54, 0.0 }
 0x3e6   : > { %v6034_v11 = vadd.f32 %v6033_v63, %v6032_v52  ;;  %v6045_v44 = vadd.f32 %v6044_v29, %v6043_v45 }
 0x3e7   : > { %v6988_v9 = vpop.f32.mrb[40].mxu1 }
 0x3e8   : > { %v6036_v22 = vadd.f32 %v6035_v43, %v6034_v11  ;;  %v6047_v24 = vadd.f32 %v6046_v17, %v6045_v44  ;;  %v10196_v35 = vadd.f32 %v6988_v9, %v5919_v38  ;;  %v6007_v47 = vpop.f32.mrb[41].mxu1 }
 0x3e9   : > { %v10200_v56 = vadd.f32 %v6007_v47, %v5911_v53  ;;  %v6989_v28 = vpop.f32.mrb[42].mxu1 }
 0x3ea   : > { %v6037_v4 = vrot.slane %v6036_v22, 4  ;;  %v6049_v33 = vadd.f32 %v6048_v26, %v6047_v24  ;;  %v10202_v48 = vadd.f32 %v6989_v28, %v5922_v14  ;;  %v6010_v60 = vpop.f32.mrb[43].mxu1  ;;  %v6054_v37 = vsel %vm437_vm2, %v10196_v35, 0.0 }
 0x3eb   : > { %v6050_v55 = vsel %vm437_vm2, %v10200_v56, 0.0  ;;  %v10207_v51 = vadd.f32 %v6010_v60, %v10136_v1 }
 0x3ec   : > { %v6038_v31 = vadd.f32 %v6037_v4, %v6036_v22  ;;  %v6051_v49 = vadd.f32 %v6050_v55, %v6049_v33  ;;  %v6056_v57 = vsel %vm437_vm2, %v10202_v48, 0.0 }
 0x3ed   : > { %v6052_v13 = vsel %vm437_vm2, %v10207_v51, 0.0 }
 0x3ee   : > { %v6039_v62 = vrot.slane %v6038_v31, 2  ;;  %v6053_v53 = vadd.f32 %v6052_v13, %v6051_v49 }
 0x3f0   : > { %v6040_v2 = vadd.f32 %v6039_v62, %v6038_v31  ;;  %v6055_v46 = vadd.f32 %v6054_v37, %v6053_v53 }
 0x3f2   : > { %v6041_v1 = vrot.slane %v6040_v2, 1  ;;  %v6057_v38 = vadd.f32 %v6056_v57, %v6055_v46 }
 0x3f4   : > { %v6042_v14 = vadd.f32 %v6041_v1, %v6040_v2  ;;  %v6058_v12 = vrot.slane %v6057_v38, 4 }
 0x3f6   : > { %v6065_v15 = vmul.f32 0.015625, %v6042_v14  ;;  %v6059_v8 = vadd.f32 %v6058_v12, %v6057_v38 }
 0x3f8   : > { %v6069_v41 = vmul.f32 %v6067_v23, %v6065_v15  ;;  %v6060_v10 = vrot.slane %v6059_v8, 2 }
 0x3fa   : > { %v6071_v21 = vsel %vm561_vm1, %v6069_v41, 0.0  ;;  %v6061_v6 = vadd.f32 %v6060_v10, %v6059_v8 }
 0x3fb   : > { %6072 = vadd.xlane.f32.xlu0 %v6071_v21 }
 0x3fc   : > { %v6062_v61 = vrot.slane %v6061_v6, 1 }
 0x3fe   : > { %v6063_v20 = vadd.f32 %v6062_v61, %v6061_v6 }
 0x400   : > { %v6066_v59 = vmul.f32 0.015625, %v6063_v20 }
 0x402   : > { %v6070_v40 = vmul.f32 %v6067_v23, %v6066_v59 }
 0x404   : > { %v6074_v58 = vsel %vm561_vm1, %v6070_v40, 0.0 }
 0x405   : > { %6075 = vadd.xlane.f32.xlu1 %v6074_v58 }
 0x488   : > { %v6073_v0 = vpop.xlane.xlu0 %6072 }
 0x489   : > { %v6077_v32 = vmax.f32 %v6073_v0, 0.0 }
 0x48b   : > { %v6079_v25 = vmul.f32 %v6077_v32, %v6068_v34 }
 0x48d   : > { %v6081_v5 = vsel %vm561_vm1, %v6079_v25, 0.0 }
 0x48e   : > { %v6082_v52 = vrot.slane %v6081_v5, 4 }
 0x490   : > { %v6083_v63 = vadd.f32 %v6082_v52, %v6081_v5 }
 0x492   : > { %v6084_v11 = vrot.slane %v6083_v63, 2  ;;  %v6076_v45 = vpop.xlane.xlu1 %6075 }
 0x493   : > { %v6078_v43 = vmax.f32 %v6076_v45, 0.0 }
 0x494   : > { %v6085_v29 = vadd.f32 %v6084_v11, %v6083_v63 }
 0x495   : > { %v6080_v17 = vmul.f32 %v6078_v43, %v6068_v34 }
 0x496   : > { %v6086_v44 = vrot.slane %v6085_v29, 1 }
 0x497   : > { %v6088_v22 = vsel %vm561_vm1, %v6080_v17, 0.0 }
 0x498   : > { %v6087_v9 = vadd.f32 %v6086_v44, %v6085_v29  ;;  %v6089_v24 = vrot.slane %v6088_v22, 4 }
 0x49a   : > { %v6774_v47 = vmul.f32 -1.442695, %v6087_v9  ;;  %v6090_v26 = vadd.f32 %v6089_v24, %v6088_v22 }
 0x49c   : > { %7327 = vpow2.f32 %v6774_v47  ;;  %v6091_v28 = vrot.slane %v6090_v26, 2 }
 0x49e   : > { %v6092_v4 = vadd.f32 %v6091_v28, %v6090_v26 }
 0x4a0   : > { %v6093_v33 = vrot.slane %v6092_v4, 1 }
 0x4a2   : > { %v6094_v60 = vadd.f32 %v6093_v33, %v6092_v4 }
 0x4a4   : > { %v6775_v55 = vmul.f32 -1.442695, %v6094_v60 }
 0x4a6   : > { %v7328_v31 = vpop.eup %7327  ;;  %7329 = vpow2.f32 %v6775_v55 }
 0x4a7   : > { %v6101_v49 = vadd.f32 1.0, %v7328_v31 }
 0x4a9   : > { %7331 = vrcp.f32 %v6101_v49 }
 0x4b0   : > { %v7330_v13 = vpop.eup %7329 }
 0x4b1   : > { %v6102_v53 = vadd.f32 1.0, %v7330_v13 }
 0x4b3   : > { %v7332_v62 = vpop.eup %7331  ;;  %7333 = vrcp.f32 %v6102_v53 }
 0x4b4   : > { %v6107_v37 = vmul.f32 %v7332_v62, %v10156_v19  ;;  %v6108_v2 = vmul.f32 %v7332_v62, %v10162_v18  ;;  %v6109_v46 = vmul.f32 %v7332_v62, %v10153_v30  ;;  %v6110_v57 = vmul.f32 %v7332_v62, %v10159_v27 }
 0x4b5   : > { %v6111_v1 = vmul.f32 %v7332_v62, %v10142_v50  ;;  %v6112_v19 = vmul.f32 %v7332_v62, %v10148_v3  ;;  %v6113_v18 = vmul.f32 %v7332_v62, %v10139_v7  ;;  %v6114_v30 = vmul.f32 %v7332_v62, %v10145_v42 }
 0x4b6   : > { %v6123_v27 = vpack.c.bf16 %v6107_v37, %v6107_v37  ;;  %v6124_v38 = vpack.c.bf16 %v6108_v2, %v6108_v2  ;;  %v6125_v14 = vpack.c.bf16 %v6109_v46, %v6109_v46  ;;  %v6126_v12 = vpack.c.bf16 %v6110_v57, %v6110_v57 }
 0x4b7   : > { %v6127_v23 = vpack.c.bf16 %v6111_v1, %v6111_v1  ;;  %v6128_v15 = vpack.c.bf16 %v6112_v19, %v6112_v19  ;;  %v6129_v8 = vpack.c.bf16 %v6113_v18, %v6113_v18  ;;  %v6130_v41 = vpack.c.bf16 %v6114_v30, %v6114_v30 }
 0x4b8   : > { %6139 = vst.msk [vmem:[%s10235_s29] sm:$0xf] %vm559_vm0, %v6123_v27  ;;  %6140 = vst.msk [vmem:[%s10235_s29 + $0x4] sm:$0xf] %vm559_vm0, %v6124_v38 }
 0x4b9   : > { %6141 = vst.msk [vmem:[%s10235_s29 + $0x8] sm:$0xf] %vm559_vm0, %v6125_v14  ;;  %6142 = vst.msk [vmem:[%s10235_s29 + $0xc] sm:$0xf] %vm559_vm0, %v6126_v12 }
 0x4ba   : > { %6143 = vst.msk [vmem:[%s10235_s29 + $0x10] sm:$0xf] %vm559_vm0, %v6127_v23  ;;  %6144 = vst.msk [vmem:[%s10235_s29 + $0x14] sm:$0xf] %vm559_vm0, %v6128_v15 }
 0x4bb   : > { %6145 = vst.msk [vmem:[%s10235_s29 + $0x18] sm:$0xf] %vm559_vm0, %v6129_v8  ;;  %6146 = vst.msk [vmem:[%s10235_s29 + $0x1c] sm:$0xf] %vm559_vm0, %v6130_v41 }
 0x4bd   : > { %v7334_v7 = vpop.eup %7333 }
 0x4be   : > { %v6115_v50 = vmul.f32 %v7334_v7, %v10177_v16  ;;  %v6116_v42 = vmul.f32 %v7334_v7, %v10184_v54  ;;  %v6117_v3 = vmul.f32 %v7334_v7, %v10174_v39  ;;  %v6118_v10 = vmul.f32 %v7334_v7, %v10181_v36 }
 0x4bf   : > { %v6119_v21 = vmul.f32 %v7334_v7, %v10200_v56  ;;  %v6120_v6 = vmul.f32 %v7334_v7, %v10207_v51  ;;  %v6121_v61 = vmul.f32 %v7334_v7, %v10196_v35  ;;  %v6122_v16 = vmul.f32 %v7334_v7, %v10202_v48 }
 0x4c0   : > { %v6131_v54 = vpack.c.bf16 %v6115_v50, %v6115_v50  ;;  %v6132_v20 = vpack.c.bf16 %v6116_v42, %v6116_v42  ;;  %v6133_v59 = vpack.c.bf16 %v6117_v3, %v6117_v3  ;;  %v6134_v39 = vpack.c.bf16 %v6118_v10, %v6118_v10 }
 0x4c1   : > { %v6135_v40 = vpack.c.bf16 %v6119_v21, %v6119_v21  ;;  %v6136_v58 = vpack.c.bf16 %v6120_v6, %v6120_v6  ;;  %v6137_v36 = vpack.c.bf16 %v6121_v61, %v6121_v61  ;;  %v6138_v34 = vpack.c.bf16 %v6122_v16, %v6122_v16 }
 0x4c2   : > { %6147 = vst.msk [vmem:[%s10235_s29 + $0x20] sm:$0xf] %vm559_vm0, %v6131_v54  ;;  %6148 = vst.msk [vmem:[%s10235_s29 + $0x24] sm:$0xf] %vm559_vm0, %v6132_v20 }
 0x4c3   : > { %6149 = vst.msk [vmem:[%s10235_s29 + $0x28] sm:$0xf] %vm559_vm0, %v6133_v59  ;;  %6150 = vst.msk [vmem:[%s10235_s29 + $0x2c] sm:$0xf] %vm559_vm0, %v6134_v39 }
 0x4c4   : > { %6151 = vst.msk [vmem:[%s10235_s29 + $0x30] sm:$0xf] %vm559_vm0, %v6135_v40  ;;  %6152 = vst.msk [vmem:[%s10235_s29 + $0x34] sm:$0xf] %vm559_vm0, %v6136_v58 }
 0x4c5   : > { %6153 = vst.msk [vmem:[%s10235_s29 + $0x38] sm:$0xf] %vm559_vm0, %v6137_v36  ;;  %6154 = vst.msk [vmem:[%s10235_s29 + $0x3c] sm:$0xf] %vm559_vm0, %v6138_v34 }
 0x4c6 PF: > { %s17_s26 = sadd.s32 1, %s7393_s26   ;;  %s10607_s24 = smov %s7389_s25 }
 0x4c7   : > { %p14_p5 = scmp.ge.s32.totalorder %s17_s26, 4   ;;  %s10608_s25 = smov %s10610_s27 }
 0x4c9   :  { %16 = sbr.rel (!%p14_p5) target bundleno = 2 (0x2), region = 88 }

</bundles_post_ra>
